<compile_context>
chip_gen: v5e
topology: v5e:2x2
jax: 0.10.0
libtpu: 0.0.40
codegen_flags: <defaults>
</compile_context>

<pallas_src>
import functools

import jax
import jax.numpy as jnp
from jax.experimental import pallas as pl
from jax.experimental.pallas import tpu as pltpu

_IN_PAD = 8              # input channels padded 3 -> 8
_OUT_PAD = 128           # classifier output padded num_classes -> 128 (lane-dense)
_COMPUTE_DTYPE = jnp.bfloat16
_TARGET_ROWS = 2048      # rows (bt*N) per grid step


def pointnet_seg_kernel(x_ref,
                        w1_ref, b1_ref, w2_ref, b2_ref, w3_ref, b3_ref,
                        w4a_ref, w4b_ref, b4_ref, w5_ref, b5_ref,
                        w6_ref, b6_ref, w7_ref, b7_ref,
                        o_ref, *, bt, n):
    f32 = jnp.float32
    cdt = x_ref.dtype  # MXU input dtype (bfloat16)

    def mm(a, w_ref):
        return jnp.dot(a, w_ref[...], preferred_element_type=f32)

    x = x_ref[...]                                                   # (bt*n, 8) bf16

    # Shared MLP 3 -> 64 -> 128 -> 1024 (conv + eval-BN folded), ReLU, f32 accum.
    feat1 = jnp.maximum(mm(x, w1_ref) + b1_ref[...], 0.0)            # (bt*n, 64)
    feat1_c = feat1.astype(cdt)
    feat2 = jnp.maximum(mm(feat1_c, w2_ref) + b2_ref[...], 0.0)      # (bt*n, 128)
    # feat3 is only consumed by the per-element max -> keep it bf16 (same
    # precision the bf16 w4b matmul would see anyway, half the VMEM).
    feat3 = jnp.maximum(mm(feat2.astype(cdt), w3_ref) + b3_ref[...], 0.0).astype(cdt)  # (bt*n, 1024)

    # Batched global feature: one max over points per fused element, one matmul.
    c3 = feat3.shape[-1]
    g = jnp.max(feat3.reshape(bt, n, c3), axis=1)                    # (bt, 1024) bf16
    gbias = mm(g, w4b_ref) + b4_ref[...]                             # (bt, 512)  f32

    # conv4 on concat([feat1, global]) == feat1 @ W4a + (global @ W4b + b4)
    h4_mm = mm(feat1_c, w4a_ref)                                     # (bt*n, 512)
    c4 = h4_mm.shape[-1]
    h4 = jnp.maximum(h4_mm.reshape(bt, n, c4) + gbias[:, None, :], 0.0)
    h4 = h4.reshape(bt * n, c4)                                      # (bt*n, 512)

    h5 = jnp.maximum(mm(h4.astype(cdt), w5_ref) + b5_ref[...], 0.0)  # (bt*n, 256)
    # TODO(synk): nn.Dropout reproduced with eval-mode semantics (identity).
    h6 = jnp.maximum(mm(h5.astype(cdt), w6_ref) + b6_ref[...], 0.0)  # (bt*n, 128)

    out = mm(h6.astype(cdt), w7_ref) + b7_ref[...]                   # (bt*n, 128) lane-dense
    o_ref[...] = out.astype(o_ref.dtype)


def _choose_bt(B, N):
    """Batch elements fused per grid step.

    Target ~2048 matmul rows per step (amortizes per-step overhead and the
    per-layer MXU weight pushes), while keeping >= 2 grid steps when B >= 2 so
    both v7x TensorCores get work (v5e/v6e have a single TC and are unaffected).
    """
    target = max(1, _TARGET_ROWS // max(N, 1))
    if B >= 2:
        target = min(target, max(1, B // 2))
    bt = 1
    for d in range(1, B + 1):
        if B % d == 0 and d <= target:
            bt = d
    return bt


def _vmem_limit_bytes():
    """Generation-dependent scoped-VMEM limit (v7x has only 64 MiB physical)."""
    try:
        cap = getattr(pltpu.get_tpu_info(), "vmem_capacity_bytes", 0)
    except Exception:  # interpret mode / non-TPU backends
        cap = 0
    if cap > (64 << 20):     # v5e / v6e class: 128 MiB physical
        return 100 << 20
    return 48 << 20          # v7x class (64 MiB physical) or unknown: stay safe


def prepare_params(params, compute_dtype=_COMPUTE_DTYPE):
    """One-time weight prep: BN is already folded; pad conv1 input channels
    3 -> 8, pad the classifier to 128 lane-dense output channels, cast the
    MXU-feeding weights to bf16.  Hoist this out of the per-call path."""
    (w1, b1, w2, b2, w3, b3, w4a, w4b, b4, w5, b5, w6, b6, w7, b7) = params
    num_classes = w7.shape[1]

    w1p = jnp.zeros((_IN_PAD, w1.shape[1]), w1.dtype).at[:w1.shape[0], :].set(w1)
    w7p = jnp.zeros((w7.shape[0], _OUT_PAD), w7.dtype).at[:, :num_classes].set(w7)
    b7p = jnp.zeros((1, _OUT_PAD), b7.dtype).at[:, :num_classes].set(b7)

    cast_w = lambda w: w.astype(compute_dtype)
    kparams = (cast_w(w1p), b1, cast_w(w2), b2, cast_w(w3), b3,
               cast_w(w4a), cast_w(w4b), b4, cast_w(w5), b5,
               cast_w(w6), b6, cast_w(w7p), b7p)
    return kparams, num_classes


@functools.partial(jax.jit, static_argnames=("num_classes",))
def pointnet_seg_prepared(x, kparams, *, num_classes):
    """x: (B, N, 3) float32, kparams from prepare_params -> (B, N, C) float32."""
    B, N, Cin = x.shape
    assert Cin == 3
    assert N % 8 == 0, "N must be a multiple of 8 (sublane tiling)"

    # Lane-friendly input: zero-pad channels 3 -> 8, flatten batch into rows,
    # cast MXU inputs to bf16 (accumulation stays f32 in the kernel).
    x_pad = jnp.concatenate([x, jnp.zeros((B, N, _IN_PAD - Cin), x.dtype)], axis=-1)
    x_flat = x_pad.reshape(B * N, _IN_PAD).astype(_COMPUTE_DTYPE)

    bt = _choose_bt(B, N)
    rows = bt * N
    grid = (B // bt,)

    x_spec = pl.BlockSpec((rows, _IN_PAD), lambda i: (i, 0))
    w_specs = [pl.BlockSpec(p.shape, lambda i: (0, 0)) for p in kparams]
    out_spec = pl.BlockSpec((rows, _OUT_PAD), lambda i: (i, 0))

    out_flat = pl.pallas_call(
        functools.partial(pointnet_seg_kernel, bt=bt, n=N),
        # bf16 padded slab: halves the padded-output HBM writeback; accuracy is
        # already bounded by the bf16 MXU inputs.
        out_shape=jax.ShapeDtypeStruct((B * N, _OUT_PAD), jnp.bfloat16),
        grid_spec=pltpu.PrefetchScalarGridSpec(
            num_scalar_prefetch=0,
            grid=grid,
            in_specs=[x_spec] + w_specs,
            out_specs=out_spec,
        ),
        compiler_params=pltpu.CompilerParams(
            dimension_semantics=("parallel",),
            vmem_limit_bytes=_vmem_limit_bytes(),
        ),
    )(x_flat, *kparams)

    out = out_flat.reshape(B, N, _OUT_PAD)[:, :, :num_classes]
    return out.astype(jnp.float32)


def pointnet_seg(x, params):
    """Convenience wrapper: folded-BN params -> prepared params -> kernel."""
    kparams, num_classes = prepare_params(params)
    return pointnet_seg_prepared(x, kparams, num_classes=num_classes)


# ---------------- parameter construction (deterministic, BN folded) ----------


def _conv_bn_folded(key, cin, cout, eps=1e-5):
    """1x1 Conv1d + eval-mode BatchNorm1d folded to (Cin,Cout) weight, (1,Cout) bias."""
    kw, kb, kg, kbeta, km, kv = jax.random.split(key, 6)
    W = jax.random.normal(kw, (cout, cin), jnp.float32) * 0.05
    b = jax.random.normal(kb, (cout,), jnp.float32) * 0.05
    gamma = 1.0 + 0.1 * jax.random.normal(kg, (cout,), jnp.float32)
    beta = 0.1 * jax.random.normal(kbeta, (cout,), jnp.float32)
    running_mean = 0.1 * jax.random.normal(km, (cout,), jnp.float32)
    running_var = jnp.abs(jax.random.normal(kv, (cout,), jnp.float32)) + 0.5
    scale = gamma / jnp.sqrt(running_var + eps)
    W_folded = (W * scale[:, None]).T          # (Cin, Cout)
    b_folded = ((b - running_mean) * scale + beta)[None, :]
    return W_folded, b_folded


def make_params(key, num_classes=2):
    keys = jax.random.split(key, 8)
    w1, b1 = _conv_bn_folded(keys[0], 3, 64)
    w2, b2 = _conv_bn_folded(keys[1], 64, 128)
    w3, b3 = _conv_bn_folded(keys[2], 128, 1024)
    w4, b4 = _conv_bn_folded(keys[3], 1088, 512)
    w4a, w4b = w4[:64, :], w4[64:, :]          # split concat: [feat1(64) | global(1024)]
    w5, b5 = _conv_bn_folded(keys[4], 512, 256)
    w6, b6 = _conv_bn_folded(keys[5], 256, 128)
    # conv7: plain conv, no BN
    kw, kb = jax.random.split(keys[6])
    w7 = (jax.random.normal(kw, (num_classes, 128), jnp.float32) * 0.05).T
    b7 = (jax.random.normal(kb, (num_classes,), jnp.float32) * 0.05)[None, :]
    return (w1, b1, w2, b2, w3, b3, w4a, w4b, b4, w5, b5, w6, b6, w7, b7)


def pointnet_seg_ref(x, params):
    """Pure-JAX f32 reference (same math) for a correctness check."""
    (w1, b1, w2, b2, w3, b3, w4a, w4b, b4, w5, b5, w6, b6, w7, b7) = params
    relu = lambda v: jnp.maximum(v, 0.0)
    f1 = relu(x @ w1 + b1)
    f2 = relu(f1 @ w2 + b2)
    f3 = relu(f2 @ w3 + b3)
    g = jnp.max(f3, axis=1, keepdims=True)                 # (B, 1, 1024)
    h4 = relu(f1 @ w4a + g @ w4b + b4)
    h5 = relu(h4 @ w5 + b5)
    h6 = relu(h5 @ w6 + b6)
    return h6 @ w7 + b7


if __name__ == "__main__":
    B, N, num_classes = 4, 128, 2
    key = jax.random.PRNGKey(0)
    kx, kp = jax.random.split(key)
    x = jax.random.normal(kx, (B, N, 3), jnp.float32)
    params = make_params(kp, num_classes=num_classes)

    # One-time weight prep hoisted out of the per-call path.
    kparams, nc = prepare_params(params)
    out = pointnet_seg_prepared(x, kparams, num_classes=nc)
    out = jax.block_until_ready(out)

    ref = pointnet_seg_ref(x, params)
    assert out.shape == (B, N, num_classes)
    assert out.dtype == jnp.float32
    # Tolerance loosened for bf16 MXU inputs / bf16 output slab (f32 accumulation).
    err = float(jnp.max(jnp.abs(out - ref)))
    assert jnp.allclose(out, ref, atol=1e-1, rtol=1e-1), err

    print("KERNEL_OK")
</pallas_src>

<mosaic_0001>
module attributes {stable_mosaic.version = 11 : i64} {
  func.func @pointnet_seg_kernel(%arg0: i32, %arg1: memref<256x8xbf16, #tpu.memory_space<vmem>>, %arg2: memref<8x64xbf16, #tpu.memory_space<vmem>>, %arg3: memref<1x64xf32, #tpu.memory_space<vmem>>, %arg4: memref<64x128xbf16, #tpu.memory_space<vmem>>, %arg5: memref<1x128xf32, #tpu.memory_space<vmem>>, %arg6: memref<128x1024xbf16, #tpu.memory_space<vmem>>, %arg7: memref<1x1024xf32, #tpu.memory_space<vmem>>, %arg8: memref<64x512xbf16, #tpu.memory_space<vmem>>, %arg9: memref<1024x512xbf16, #tpu.memory_space<vmem>>, %arg10: memref<1x512xf32, #tpu.memory_space<vmem>>, %arg11: memref<512x256xbf16, #tpu.memory_space<vmem>>, %arg12: memref<1x256xf32, #tpu.memory_space<vmem>>, %arg13: memref<256x128xbf16, #tpu.memory_space<vmem>>, %arg14: memref<1x128xf32, #tpu.memory_space<vmem>>, %arg15: memref<128x128xbf16, #tpu.memory_space<vmem>>, %arg16: memref<1x128xf32, #tpu.memory_space<vmem>>, %arg17: memref<256x128xbf16, #tpu.memory_space<vmem>>) attributes {dimension_semantics = [#tpu.dimension_semantics<parallel>], iteration_bounds = array<i64: 2>, scalar_prefetch = 0 : i64, scratch_operands = 0 : i64, tpu.core_type = #tpu.core_type<tc>, window_params = [{transform_indices = @transform_0, window_bounds = array<i64: 256, 8>}, {pipeline_mode = #tpu.pipeline_mode<synchronous>, transform_indices = @transform_1, window_bounds = array<i64: 8, 64>}, {pipeline_mode = #tpu.pipeline_mode<synchronous>, transform_indices = @transform_2, window_bounds = array<i64: 1, 64>}, {pipeline_mode = #tpu.pipeline_mode<synchronous>, transform_indices = @transform_3, window_bounds = array<i64: 64, 128>}, {pipeline_mode = #tpu.pipeline_mode<synchronous>, transform_indices = @transform_4, window_bounds = array<i64: 1, 128>}, {pipeline_mode = #tpu.pipeline_mode<synchronous>, transform_indices = @transform_5, window_bounds = array<i64: 128, 1024>}, {pipeline_mode = #tpu.pipeline_mode<synchronous>, transform_indices = @transform_6, window_bounds = array<i64: 1, 1024>}, {pipeline_mode = #tpu.pipeline_mode<synchronous>, transform_indices = @transform_7, window_bounds = array<i64: 64, 512>}, {pipeline_mode = #tpu.pipeline_mode<synchronous>, transform_indices = @transform_8, window_bounds = array<i64: 1024, 512>}, {pipeline_mode = #tpu.pipeline_mode<synchronous>, transform_indices = @transform_9, window_bounds = array<i64: 1, 512>}, {pipeline_mode = #tpu.pipeline_mode<synchronous>, transform_indices = @transform_10, window_bounds = array<i64: 512, 256>}, {pipeline_mode = #tpu.pipeline_mode<synchronous>, transform_indices = @transform_11, window_bounds = array<i64: 1, 256>}, {pipeline_mode = #tpu.pipeline_mode<synchronous>, transform_indices = @transform_12, window_bounds = array<i64: 256, 128>}, {pipeline_mode = #tpu.pipeline_mode<synchronous>, transform_indices = @transform_13, window_bounds = array<i64: 1, 128>}, {pipeline_mode = #tpu.pipeline_mode<synchronous>, transform_indices = @transform_14, window_bounds = array<i64: 128, 128>}, {pipeline_mode = #tpu.pipeline_mode<synchronous>, transform_indices = @transform_15, window_bounds = array<i64: 1, 128>}, {transform_indices = @transform_16, window_bounds = array<i64: 256, 128>}]} {
    %c0 = arith.constant 0 : index
    %c0_0 = arith.constant 0 : index
    %0 = vector.load %arg1[%c0, %c0_0] : memref<256x8xbf16, #tpu.memory_space<vmem>>, vector<256x8xbf16>
    %c0_1 = arith.constant 0 : index
    %c0_2 = arith.constant 0 : index
    %1 = vector.load %arg2[%c0_1, %c0_2] : memref<8x64xbf16, #tpu.memory_space<vmem>>, vector<8x64xbf16>
    %cst = arith.constant dense<0.000000e+00> : vector<256x64xf32>
    %2 = tpu.matmul %0, %1, %cst {dimension_numbers = #tpu.dot_dimension_numbers<[1], [0], [0], [1], [0, 0, 1, 1], [], []>} : vector<256x8xbf16>, vector<8x64xbf16>, vector<256x64xf32> -> vector<256x64xf32>
    %c0_3 = arith.constant 0 : index
    %c0_4 = arith.constant 0 : index
    %3 = vector.load %arg3[%c0_3, %c0_4] : memref<1x64xf32, #tpu.memory_space<vmem>>, vector<1x64xf32>
    %4 = vector.broadcast %3 : vector<1x64xf32> to vector<256x64xf32>
    %5 = arith.addf %2, %4 : vector<256x64xf32>
    %cst_5 = arith.constant 0.000000e+00 : f32
    %6 = vector.broadcast %cst_5 : f32 to vector<256x64xf32>
    %7 = arith.maximumf %5, %6 : vector<256x64xf32>
    %8 = arith.truncf %7 : vector<256x64xf32> to vector<256x64xbf16>
    %c0_6 = arith.constant 0 : index
    %c0_7 = arith.constant 0 : index
    %9 = vector.load %arg4[%c0_6, %c0_7] : memref<64x128xbf16, #tpu.memory_space<vmem>>, vector<64x128xbf16>
    %cst_8 = arith.constant dense<0.000000e+00> : vector<256x128xf32>
    %10 = tpu.matmul %8, %9, %cst_8 {dimension_numbers = #tpu.dot_dimension_numbers<[1], [0], [0], [1], [0, 0, 1, 1], [], []>} : vector<256x64xbf16>, vector<64x128xbf16>, vector<256x128xf32> -> vector<256x128xf32>
    %c0_9 = arith.constant 0 : index
    %c0_10 = arith.constant 0 : index
    %11 = vector.load %arg5[%c0_9, %c0_10] : memref<1x128xf32, #tpu.memory_space<vmem>>, vector<1x128xf32>
    %12 = vector.broadcast %11 : vector<1x128xf32> to vector<256x128xf32>
    %13 = arith.addf %10, %12 : vector<256x128xf32>
    %cst_11 = arith.constant 0.000000e+00 : f32
    %14 = vector.broadcast %cst_11 : f32 to vector<256x128xf32>
    %15 = arith.maximumf %13, %14 : vector<256x128xf32>
    %16 = arith.truncf %15 : vector<256x128xf32> to vector<256x128xbf16>
    %c0_12 = arith.constant 0 : index
    %c0_13 = arith.constant 0 : index
    %17 = vector.load %arg6[%c0_12, %c0_13] : memref<128x1024xbf16, #tpu.memory_space<vmem>>, vector<128x1024xbf16>
    %cst_14 = arith.constant dense<0.000000e+00> : vector<256x1024xf32>
    %18 = tpu.matmul %16, %17, %cst_14 {dimension_numbers = #tpu.dot_dimension_numbers<[1], [0], [0], [1], [0, 0, 1, 1], [], []>} : vector<256x128xbf16>, vector<128x1024xbf16>, vector<256x1024xf32> -> vector<256x1024xf32>
    %c0_15 = arith.constant 0 : index
    %c0_16 = arith.constant 0 : index
    %19 = vector.load %arg7[%c0_15, %c0_16] : memref<1x1024xf32, #tpu.memory_space<vmem>>, vector<1x1024xf32>
    %20 = vector.broadcast %19 : vector<1x1024xf32> to vector<256x1024xf32>
    %21 = arith.addf %18, %20 : vector<256x1024xf32>
    %cst_17 = arith.constant 0.000000e+00 : f32
    %22 = vector.broadcast %cst_17 : f32 to vector<256x1024xf32>
    %23 = arith.maximumf %21, %22 : vector<256x1024xf32>
    %24 = arith.truncf %23 : vector<256x1024xf32> to vector<256x1024xbf16>
    %25 = vector.shape_cast %24 : vector<256x1024xbf16> to vector<2x128x1024xbf16>
    %cst_18 = arith.constant dense<0xFF80> : vector<2x1024xbf16>
    %26 = vector.multi_reduction <maximumf>, %25, %cst_18 [1] : vector<2x128x1024xbf16> to vector<2x1024xbf16>
    %c0_19 = arith.constant 0 : index
    %c0_20 = arith.constant 0 : index
    %27 = vector.load %arg9[%c0_19, %c0_20] : memref<1024x512xbf16, #tpu.memory_space<vmem>>, vector<1024x512xbf16>
    %cst_21 = arith.constant dense<0.000000e+00> : vector<2x512xf32>
    %28 = tpu.matmul %26, %27, %cst_21 {dimension_numbers = #tpu.dot_dimension_numbers<[1], [0], [0], [1], [0, 0, 1, 1], [], []>} : vector<2x1024xbf16>, vector<1024x512xbf16>, vector<2x512xf32> -> vector<2x512xf32>
    %c0_22 = arith.constant 0 : index
    %c0_23 = arith.constant 0 : index
    %29 = vector.load %arg10[%c0_22, %c0_23] : memref<1x512xf32, #tpu.memory_space<vmem>>, vector<1x512xf32>
    %30 = vector.broadcast %29 : vector<1x512xf32> to vector<2x512xf32>
    %31 = arith.addf %28, %30 : vector<2x512xf32>
    %c0_24 = arith.constant 0 : index
    %c0_25 = arith.constant 0 : index
    %32 = vector.load %arg8[%c0_24, %c0_25] : memref<64x512xbf16, #tpu.memory_space<vmem>>, vector<64x512xbf16>
    %cst_26 = arith.constant dense<0.000000e+00> : vector<256x512xf32>
    %33 = tpu.matmul %8, %32, %cst_26 {dimension_numbers = #tpu.dot_dimension_numbers<[1], [0], [0], [1], [0, 0, 1, 1], [], []>} : vector<256x64xbf16>, vector<64x512xbf16>, vector<256x512xf32> -> vector<256x512xf32>
    %34 = vector.shape_cast %33 : vector<256x512xf32> to vector<2x128x512xf32>
    %35 = vector.shape_cast %31 : vector<2x512xf32> to vector<2x1x512xf32>
    %36 = vector.broadcast %35 : vector<2x1x512xf32> to vector<2x128x512xf32>
    %37 = arith.addf %34, %36 : vector<2x128x512xf32>
    %cst_27 = arith.constant 0.000000e+00 : f32
    %38 = vector.broadcast %cst_27 : f32 to vector<2x128x512xf32>
    %39 = arith.maximumf %37, %38 : vector<2x128x512xf32>
    %40 = vector.shape_cast %39 : vector<2x128x512xf32> to vector<256x512xf32>
    %41 = arith.truncf %40 : vector<256x512xf32> to vector<256x512xbf16>
    %c0_28 = arith.constant 0 : index
    %c0_29 = arith.constant 0 : index
    %42 = vector.load %arg11[%c0_28, %c0_29] : memref<512x256xbf16, #tpu.memory_space<vmem>>, vector<512x256xbf16>
    %cst_30 = arith.constant dense<0.000000e+00> : vector<256x256xf32>
    %43 = tpu.matmul %41, %42, %cst_30 {dimension_numbers = #tpu.dot_dimension_numbers<[1], [0], [0], [1], [0, 0, 1, 1], [], []>} : vector<256x512xbf16>, vector<512x256xbf16>, vector<256x256xf32> -> vector<256x256xf32>
    %c0_31 = arith.constant 0 : index
    %c0_32 = arith.constant 0 : index
    %44 = vector.load %arg12[%c0_31, %c0_32] : memref<1x256xf32, #tpu.memory_space<vmem>>, vector<1x256xf32>
    %45 = vector.broadcast %44 : vector<1x256xf32> to vector<256x256xf32>
    %46 = arith.addf %43, %45 : vector<256x256xf32>
    %cst_33 = arith.constant 0.000000e+00 : f32
    %47 = vector.broadcast %cst_33 : f32 to vector<256x256xf32>
    %48 = arith.maximumf %46, %47 : vector<256x256xf32>
    %49 = arith.truncf %48 : vector<256x256xf32> to vector<256x256xbf16>
    %c0_34 = arith.constant 0 : index
    %c0_35 = arith.constant 0 : index
    %50 = vector.load %arg13[%c0_34, %c0_35] : memref<256x128xbf16, #tpu.memory_space<vmem>>, vector<256x128xbf16>
    %cst_36 = arith.constant dense<0.000000e+00> : vector<256x128xf32>
    %51 = tpu.matmul %49, %50, %cst_36 {dimension_numbers = #tpu.dot_dimension_numbers<[1], [0], [0], [1], [0, 0, 1, 1], [], []>} : vector<256x256xbf16>, vector<256x128xbf16>, vector<256x128xf32> -> vector<256x128xf32>
    %c0_37 = arith.constant 0 : index
    %c0_38 = arith.constant 0 : index
    %52 = vector.load %arg14[%c0_37, %c0_38] : memref<1x128xf32, #tpu.memory_space<vmem>>, vector<1x128xf32>
    %53 = vector.broadcast %52 : vector<1x128xf32> to vector<256x128xf32>
    %54 = arith.addf %51, %53 : vector<256x128xf32>
    %cst_39 = arith.constant 0.000000e+00 : f32
    %55 = vector.broadcast %cst_39 : f32 to vector<256x128xf32>
    %56 = arith.maximumf %54, %55 : vector<256x128xf32>
    %57 = arith.truncf %56 : vector<256x128xf32> to vector<256x128xbf16>
    %c0_40 = arith.constant 0 : index
    %c0_41 = arith.constant 0 : index
    %58 = vector.load %arg15[%c0_40, %c0_41] : memref<128x128xbf16, #tpu.memory_space<vmem>>, vector<128x128xbf16>
    %cst_42 = arith.constant dense<0.000000e+00> : vector<256x128xf32>
    %59 = tpu.matmul %57, %58, %cst_42 {dimension_numbers = #tpu.dot_dimension_numbers<[1], [0], [0], [1], [0, 0, 1, 1], [], []>} : vector<256x128xbf16>, vector<128x128xbf16>, vector<256x128xf32> -> vector<256x128xf32>
    %c0_43 = arith.constant 0 : index
    %c0_44 = arith.constant 0 : index
    %60 = vector.load %arg16[%c0_43, %c0_44] : memref<1x128xf32, #tpu.memory_space<vmem>>, vector<1x128xf32>
    %61 = vector.broadcast %60 : vector<1x128xf32> to vector<256x128xf32>
    %62 = arith.addf %59, %61 : vector<256x128xf32>
    %63 = arith.truncf %62 : vector<256x128xf32> to vector<256x128xbf16>
    %c0_45 = arith.constant 0 : index
    %c0_46 = arith.constant 0 : index
    %64 = vector.load %arg17[%c0_45, %c0_46] : memref<256x128xbf16, #tpu.memory_space<vmem>>, vector<256x128xbf16>
    tpu.vector_store %arg17[%c0_45, %c0_46], %63 {strides = array<i32>} : memref<256x128xbf16, #tpu.memory_space<vmem>>, vector<256x128xbf16>,
    return
  }
  func.func @transform_0(%arg0: i32) -> (i32, i32) {
    %c0_i32 = arith.constant 0 : i32
    %c0_i32_0 = arith.constant 0 : i32
    return %arg0, %c0_i32 : i32, i32
  }
  func.func @transform_1(%arg0: i32) -> (i32, i32) {
    %c0_i32 = arith.constant 0 : i32
    %c0_i32_0 = arith.constant 0 : i32
    %c0_i32_1 = arith.constant 0 : i32
    return %c0_i32, %c0_i32_0 : i32, i32
  }
  func.func @transform_2(%arg0: i32) -> (i32, i32) {
    %c0_i32 = arith.constant 0 : i32
    %c0_i32_0 = arith.constant 0 : i32
    %c0_i32_1 = arith.constant 0 : i32
    return %c0_i32, %c0_i32_0 : i32, i32
  }
  func.func @transform_3(%arg0: i32) -> (i32, i32) {
    %c0_i32 = arith.constant 0 : i32
    %c0_i32_0 = arith.constant 0 : i32
    %c0_i32_1 = arith.constant 0 : i32
    return %c0_i32, %c0_i32_0 : i32, i32
  }
  func.func @transform_4(%arg0: i32) -> (i32, i32) {
    %c0_i32 = arith.constant 0 : i32
    %c0_i32_0 = arith.constant 0 : i32
    %c0_i32_1 = arith.constant 0 : i32
    return %c0_i32, %c0_i32_0 : i32, i32
  }
  func.func @transform_5(%arg0: i32) -> (i32, i32) {
    %c0_i32 = arith.constant 0 : i32
    %c0_i32_0 = arith.constant 0 : i32
    %c0_i32_1 = arith.constant 0 : i32
    return %c0_i32, %c0_i32_0 : i32, i32
  }
  func.func @transform_6(%arg0: i32) -> (i32, i32) {
    %c0_i32 = arith.constant 0 : i32
    %c0_i32_0 = arith.constant 0 : i32
    %c0_i32_1 = arith.constant 0 : i32
    return %c0_i32, %c0_i32_0 : i32, i32
  }
  func.func @transform_7(%arg0: i32) -> (i32, i32) {
    %c0_i32 = arith.constant 0 : i32
    %c0_i32_0 = arith.constant 0 : i32
    %c0_i32_1 = arith.constant 0 : i32
    return %c0_i32, %c0_i32_0 : i32, i32
  }
  func.func @transform_8(%arg0: i32) -> (i32, i32) {
    %c0_i32 = arith.constant 0 : i32
    %c0_i32_0 = arith.constant 0 : i32
    %c0_i32_1 = arith.constant 0 : i32
    return %c0_i32, %c0_i32_0 : i32, i32
  }
  func.func @transform_9(%arg0: i32) -> (i32, i32) {
    %c0_i32 = arith.constant 0 : i32
    %c0_i32_0 = arith.constant 0 : i32
    %c0_i32_1 = arith.constant 0 : i32
    return %c0_i32, %c0_i32_0 : i32, i32
  }
  func.func @transform_10(%arg0: i32) -> (i32, i32) {
    %c0_i32 = arith.constant 0 : i32
    %c0_i32_0 = arith.constant 0 : i32
    %c0_i32_1 = arith.constant 0 : i32
    return %c0_i32, %c0_i32_0 : i32, i32
  }
  func.func @transform_11(%arg0: i32) -> (i32, i32) {
    %c0_i32 = arith.constant 0 : i32
    %c0_i32_0 = arith.constant 0 : i32
    %c0_i32_1 = arith.constant 0 : i32
    return %c0_i32, %c0_i32_0 : i32, i32
  }
  func.func @transform_12(%arg0: i32) -> (i32, i32) {
    %c0_i32 = arith.constant 0 : i32
    %c0_i32_0 = arith.constant 0 : i32
    %c0_i32_1 = arith.constant 0 : i32
    return %c0_i32, %c0_i32_0 : i32, i32
  }
  func.func @transform_13(%arg0: i32) -> (i32, i32) {
    %c0_i32 = arith.constant 0 : i32
    %c0_i32_0 = arith.constant 0 : i32
    %c0_i32_1 = arith.constant 0 : i32
    return %c0_i32, %c0_i32_0 : i32, i32
  }
  func.func @transform_14(%arg0: i32) -> (i32, i32) {
    %c0_i32 = arith.constant 0 : i32
    %c0_i32_0 = arith.constant 0 : i32
    %c0_i32_1 = arith.constant 0 : i32
    return %c0_i32, %c0_i32_0 : i32, i32
  }
  func.func @transform_15(%arg0: i32) -> (i32, i32) {
    %c0_i32 = arith.constant 0 : i32
    %c0_i32_0 = arith.constant 0 : i32
    %c0_i32_1 = arith.constant 0 : i32
    return %c0_i32, %c0_i32_0 : i32, i32
  }
  func.func @transform_16(%arg0: i32) -> (i32, i32) {
    %c0_i32 = arith.constant 0 : i32
    %c0_i32_0 = arith.constant 0 : i32
    return %arg0, %c0_i32 : i32, i32
  }
}

</mosaic_0001>

<bundles_post_ra>
// kernel: pointnet_seg_prepared.1
= control target key start
LH: loop header
LB: loop body
LE: loop exit
PB: predicated region body
PF: predicated region fallthrough
CT: control target
= control target key end

     0   :  { %s13661_s0 = inlined_call_operand.vmem [shape: bf16[512,8], index: 0, kind: input, shape index: {}]   ;;  %s13662_s1 = inlined_call_operand.vmem [shape: bf16[8,64], index: 1, kind: input, shape index: {}]   ;;  %s13663_s2 = inlined_call_operand.vmem [shape: f32[1,64], index: 2, kind: input, shape index: {}]   ;;  %s13664_s3 = inlined_call_operand.hbm [shape: bf16[64,128], index: 3, kind: input, shape index: {}]   ;;  %s13665_s4 = inlined_call_operand.vmem [shape: f32[1,128], index: 4, kind: input, shape index: {}]   ;;  %s13666_s5 = inlined_call_operand.vmem [shape: bf16[128,1024], index: 5, kind: input, shape index: {}]   ;;  %s13667_s6 = inlined_call_operand.vmem [shape: f32[1,1024], index: 6, kind: input, shape index: {}]   ;;  %s13668_s7 = inlined_call_operand.vmem [shape: bf16[64,512], index: 7, kind: input, shape index: {}]   ;;  %s13669_s8 = inlined_call_operand.hbm [shape: bf16[1024,512], index: 8, kind: input, shape index: {}]   ;;  %s13670_s9 = inlined_call_operand.vmem [shape: f32[1,512], index: 9, kind: input, shape index: {}]   ;;  %s13671_s10 = inlined_call_operand.hbm [shape: bf16[512,256], index: 10, kind: input, shape index: {}]   ;;  %s13672_s11 = inlined_call_operand.vmem [shape: f32[1,256], index: 11, kind: input, shape index: {}]   ;;  %s13673_s12 = inlined_call_operand.vmem [shape: bf16[256,128], index: 12, kind: input, shape index: {}]   ;;  %s13674_s13 = inlined_call_operand.vmem [shape: f32[1,128], index: 13, kind: input, shape index: {}]   ;;  %s13675_s14 = inlined_call_operand.hbm [shape: bf16[128,128], index: 14, kind: input, shape index: {}]   ;;  %s13676_s15 = inlined_call_operand.vmem [shape: f32[1,128], index: 15, kind: input, shape index: {}]   ;;  %s13677_s16 = inlined_call_operand.vmem [shape: bf16[512,128], index: 16, kind: output, shape index: {}]  }
   0x1   :  { %13755 = sst [smem:[#allocation57_spill]] %s13661_s0 }
   0x2   :  { %13756 = sst [smem:[#allocation58_spill]] %s13664_s3 }
   0x3   :  { %13757 = sst [smem:[#allocation59_spill]] %s13669_s8 }
   0x4   :  { %13758 = sst [smem:[#allocation60_spill]] %s13673_s12 }
   0x5   :  { %13759 = sst [smem:[#allocation61_spill]] %s13674_s13 }
   0x6   :  { %13760 = sst [smem:[#allocation62_spill]] %s13676_s15 }
   0x7   :  { %13761 = sst [smem:[#allocation63_spill]] %s13677_s16 }
   0x8   :  { %21 = vsyncpa [#allocation3], 0 }
   0x9   :  { %22 = vsyncpa [#allocation5], 0 }
   0xa   :  { %23 = vsyncpa [#allocation8], 0  ;;  %s10677_s21 = smov 0  }
   0xb LB: > { %s13762_s8 = sld [smem:[#allocation59_spill]]  ;;  %s13678_s25 = sadd.s32 4294967295, %s10580_s21   ;;  %s10580_s21 = sphi %s10677_s21, %s29_s21  }
   0xc   : > { %p7930_p0 = scmp.ge.s32.totalorder %s10580_s21, 1  ;;  %p401_p1 = scmp.lt.s32.totalorder %s10580_s21, 3 }
   0xd   : > { %p10690_p2 = scmp.eq.s32.totalorder %s13678_s25, 0  ;;  %s10582_s28 = smov [#allocation4]  }
   0xe   : > { %p10694_p3 = pnand %p7930_p0, %p401_p1  ;;  %s446_s29 = sshll.u32 %s10582_s28, 4  ;;  %s447_s29 = int_to_ptr.vmem [resolvable:$true] %s446_s29 }
   0xf   : > { %s13765_s3 = sld [smem:[#allocation58_spill]]  ;;  %s10583_s19 = smov [#allocation2]  }
  0x10   : > { %p10395_p4 = pneg %p10694_p3  ;;  %s420_s20 = sshll.u32 %s10583_s19, 4  ;;  %s421_s20 = int_to_ptr.vmem [resolvable:$true] %s420_s20 }
  0x11   : > { %s444_s24 = sshll.u32 %s13762_s8, 4  ;;  %s10584_s22 = smov 256   ;;  %s445_s24 = int_to_ptr.hbm [resolvable:$true] %s444_s24 }
  0x12   : > { %p10705_p5 = pnand %p10690_p2, %p10395_p4  ;;  %s10585_s23 = smov 16  }
  0x13   : > { %s461_s30 = sshll.u32 %s13671_s10, 4  ;;  %s10586_s0 = smov 64   ;;  %s462_s30 = int_to_ptr.hbm [resolvable:$true] %s461_s30 }
  0x14   : > { %10401 = dma.hbm_to_vmem [thread:$0]  (!%p10705_p5), %s445_s24, 32768, %s447_s29, [#allocation5], %s10584_s22, %s10584_s22, %s10585_s23  }
  0x15   : > { %s418_s17 = sshll.u32 %s13765_s3, 4  ;;  %s10587_s3 = smov 4   ;;  %s419_s17 = int_to_ptr.hbm [resolvable:$true] %s418_s17 }
  0x16   : > { %10398 = dma.hbm_to_vmem [thread:$0]  (!%p10705_p5), %s419_s17, 512, %s421_s20, [#allocation3], %s10586_s0, %s10586_s0, %s10587_s3  }
  0x17   : > { %s10588_s8 = smov [#allocation6]   ;;  %s10589_s15 = smov 128  }
  0x18   : > { %s463_s16 = sshll.u32 %s10588_s8, 4  ;;  %s10590_s19 = smov 8   ;;  %s464_s16 = int_to_ptr.vmem [resolvable:$true] %s463_s16 }
  0x19   : > { %10404 = dma.hbm_to_vmem [thread:$0]  (!%p10705_p5), %s462_s30, 8192, %s464_s16, [#allocation5], %s10589_s15, %s10589_s15, %s10590_s19  }
  0x1a   : > { %s484_s24 = sshll.u32 %s13675_s14, 4  ;;  %s10591_s25 = smov [#allocation7]   ;;  %s485_s24 = int_to_ptr.hbm [resolvable:$true] %s484_s24 }
  0x1b   : > { %s486_s29 = sshll.u32 %s10591_s25, 4  ;;  %514 = sbr.rel (%p10694_p3) target bundleno = 2733 (0xaad), region = 84  ;;  %s487_s29 = int_to_ptr.vmem [resolvable:$true] %s486_s29 }
  0x1c   : > { %10407 = dma.hbm_to_vmem [thread:$0]  (!%p10705_p5), %s485_s24, 1024, %s487_s29, [#allocation8], %s10586_s0, %s10586_s0, %s10587_s3  }
  0x20   : > { %10567 = dma.done.wait (%p10690_p2), [#allocation3], 512  }
  0x21   : > { %10569 = vsyncadd (%p10690_p2), [#allocation3], 4294966784 }
  0x22   : > { %10571 = dma.done.wait (%p10690_p2), [#allocation5], 40960  }
  0x23   : > { %10573 = vsyncadd (%p10690_p2), [#allocation5], 4294926336 }
  0x24   : > { %10575 = dma.done.wait (%p10690_p2), [#allocation8], 1024  }
  0x25   : > { %10577 = vsyncadd (%p10690_p2), [#allocation8], 4294966272  ;;  %s13767_s3 = sadd.s32 4294967295, %s10580_s21   ;;  %vm759_vm0 = vcmask 1043456   ;;  %s13768_s16 = sld [smem:[#allocation57_spill]]  ;;  %vm710_vm1 = vcmask 64512  }
  0x26   : > { %s7941_s8 = sshll.u32 %s13767_s3, 5  ;;  %v625_v0 = vld [vmem:[%s13662_s1] sm:$0xf]  ;;  %v9838_v8 = vld [vmem:[#allocation2 + $0x18] sm:$0xff]  ;;  %v9837_v10 = vld [vmem:[#allocation2 + $0x10] sm:$0xff]  ;;  %vm936_vm2 = vcmask 523264  }
  0x27   : > { %p581_p6 = scmp.lt.s32.totalorder %s7941_s8, 63  ;;  %v761_v1 = vsel %vm759_vm0, %v625_v0, 0  ;;  %989 = vmatpush.bf16.msra.mxu1 %v9838_v8  ;;  %v9836_v11 = vld [vmem:[#allocation2 + $0x8] sm:$0xff]  ;;  %v9835_v12 = vld [vmem:[#allocation2] sm:$0xff]  ;;  %vm3526_vm3 = vcmask 1041409   ;;  %vm5706_vm4 = vcmask 1040384  }
  0x28   : > { %770 = vmatpush.bf16.msra.mxu0 %v761_v1  ;;  %10358 = vmatpush.bf16.msra.mxu3 %v761_v1  ;;  %v10772_v16 = vld [vmem:[%s13663_s2] ss:$0 sm:$0xff]  ;;  %v8291_v0 = vld [vmem:[%s13666_s5 + $0x1c8] sm:$0xf]  ;;  %vm5708_vm5 = vcmask 1042434   ;;  %vm5713_vm6 = vcmask 1043459  }
  0x29   : > { %s14006_s8 = smov (!%p581_p6, %s7941_s8), 63  ;;  %v8283_v62 = vld [vmem:[%s13666_s5 + $0x1c0] sm:$0xf]  ;;  %vm5710_vm7 = vcmask 1041408   ;;  %vm5715_vm8 = vcmask 1042433   ;;  %s14003_s26 = sld [smem:[#allocation62_spill]] }
  0x2a   : > { %s7942_s12 = sshll.u32 %s14006_s8, 2  ;;  %v9899_v63 = vld [vmem:[%s13666_s5 + $0x1dc] sm:$0xf0]  ;;  %s14004_s23 = sld [smem:[#allocation63_spill]] }
  0x2b   : > { %s10747_s27 = scalar_lea.vmem %s13768_s16, %s7942_s12  ;;  %990 = vmatpush.bf16.msra.mxu1 %v9837_v10  ;;  %v8284_v1 = vor.u32 %v9899_v63, %v8283_v62  ;;  %s13949_s16 = sld [smem:[#allocation60_spill]] }
  0x2c   : > { %v9819_v2 = vld [vmem:[%s10747_s27] sm:$0xff]  ;;  %v9820_v3 = vld [vmem:[%s10747_s27 + $0x8] sm:$0xff]  ;;  %v9821_v4 = vld [vmem:[%s10747_s27 + $0x10] sm:$0xff]  ;;  %10359 = vmatpush.bf16.msrb.mxu3 %v9838_v8 }
  0x2d   : > { %8009 = vmatmul.msk.bf16.vlgmr.msra.gmra.mxu0 %vm710_vm1, %v9819_v2  ;;  %v9822_v5 = vld [vmem:[%s10747_s27 + $0x18] sm:$0xff]  ;;  %v9823_v6 = vld [vmem:[%s10747_s27 + $0x20] sm:$0xff]  ;;  %v9824_v7 = vld [vmem:[%s10747_s27 + $0x28] sm:$0xff]  ;;  %1524 = vmatpush.bf16.msra.mxu2 %v8284_v1 }
  0x2e   : > { %v9825_v9 = vld [vmem:[%s10747_s27 + $0x30] sm:$0xff]  ;;  %v9826_v13 = vld [vmem:[%s10747_s27 + $0x38] sm:$0xff]  ;;  %v9827_v14 = vld [vmem:[%s10747_s27 + $0x40] sm:$0xff] }
  0x2f   : > { %991 = vmatpush.bf16.msra.mxu1 %v9836_v11  ;;  %v9828_v23 = vld [vmem:[%s10747_s27 + $0x48] sm:$0xff]  ;;  %v9829_v32 = vld [vmem:[%s10747_s27 + $0x50] sm:$0xff]  ;;  %v9830_v41 = vld [vmem:[%s10747_s27 + $0x58] sm:$0xff] }
  0x30   : > { %10360 = vmatpush.bf16.msrb.mxu3 %v9837_v10  ;;  %v9832_v25 = vld [vmem:[%s10747_s27 + $0x68] sm:$0xff]  ;;  %v9833_v34 = vld [vmem:[%s10747_s27 + $0x70] sm:$0xff]  ;;  %v9834_v43 = vld [vmem:[%s10747_s27 + $0x78] sm:$0xff]  ;;  %s13600_s28 = scalar_lea.vmem %s14004_s23, %s7942_s12 }
  0x31   : > { %8022 = vmatmul.msk.bf16.vlgmr.msra.gmra.mxu3 %vm710_vm1, %v9832_v25  ;;  %v9831_v50 = vld [vmem:[%s10747_s27 + $0x60] sm:$0xff]  ;;  %v9900_v2 = vld [vmem:[%s13666_s5 + $0x1e4] sm:$0xf0]  ;;  %s13996_s27 = sld [smem:[#allocation61_spill]] }
  0x32   : > { %v9891_v8 = vld [vmem:[%s13666_s5 + $0x19c] sm:$0xf0] }
  0x33   : > { %992 = vmatpush.bf16.msra.mxu1 %v9835_v12 }
  0x34   : > { %10361 = vmatpush.bf16.msrb.mxu3 %v9836_v11  ;;  %v9892_v11 = vld [vmem:[%s13666_s5 + $0x1a4] sm:$0xf0] }
  0x38   : > { %10362 = vmatpush.bf16.msrb.mxu3 %v9835_v12 }
  0x3c   : > { %10363 = vmatpush.bf16.msra.mxu3 %v8284_v1 }
  0x3d   : > { %8010 = vmatmul.msk.bf16.gmra.mxu0 %vm710_vm1, %v9820_v3 }
  0x41   : > { %8023 = vmatmul.msk.bf16.gmra.mxu3 %vm710_vm1, %v9833_v34  ;;  %v8163_v34 = vld [vmem:[%s13666_s5 + $0xc8] sm:$0xf] }
  0x4d   : > { %8011 = vmatmul.msk.bf16.gmra.mxu0 %vm710_vm1, %v9821_v4 }
  0x51   : > { %8024 = vmatmul.msk.bf16.gmra.mxu3 %vm710_vm1, %v9834_v43  ;;  %v9859_v43 = vld [vmem:[%s13666_s5 + $0x9c] sm:$0xf0] }
  0x5d   : > { %8012 = vmatmul.msk.bf16.gmra.mxu0 %vm710_vm1, %v9822_v5  ;;  %v8292_v5 = vor.u32 %v9900_v2, %v8291_v0 }
  0x5f   : > { %1702 = vmatpush.bf16.msrb.mxu0 %v8292_v5 }
  0x6d   : > { %8013 = vmatmul.msk.bf16.gmra.mxu0 %vm710_vm1, %v9823_v6 }
  0x7d   : > { %8014 = vmatmul.msk.bf16.gmra.mxu0 %vm710_vm1, %v9824_v7  ;;  %v8251_v7 = vld [vmem:[%s13666_s5 + $0x180] sm:$0xf] }
  0x7e   : > { %v8252_v10 = vor.u32 %v9891_v8, %v8251_v7 }
  0x80   : > { %1525 = vmatpush.bf16.msra.mxu2 %v8252_v10  ;;  %10364 = vmatpush.bf16.msra.mxu3 %v8252_v10 }
  0x8d   : > { %8015 = vmatmul.msk.bf16.gmra.mxu0 %vm710_vm1, %v9825_v9  ;;  %v8259_v9 = vld [vmem:[%s13666_s5 + $0x188] sm:$0xf] }
  0x8e   : > { %v8260_v12 = vor.u32 %v9892_v11, %v8259_v9 }
  0x90   : > { %1703 = vmatpush.bf16.msrb.mxu0 %v8260_v12 }
  0x9d   : > { %8016 = vmatmul.msk.bf16.gmra.mxu0 %vm710_vm1, %v9826_v13 }
  0xaa   : > { %v772_v15 = vpop.f32.mrf.mxu0 }
  0xab   : > { %v773_v17 = vadd.f32 %v10772_v16, %v772_v15  ;;  %v9883_v15 = vld [vmem:[%s13666_s5 + $0x15c] sm:$0xf0] }
  0xad   : > { %8017 = vmatmul.msk.bf16.gmra.mxu0 %vm710_vm1, %v9827_v14  ;;  %v852_v20 = vmax.f32 %v773_v17, 0.0  ;;  %v8219_v14 = vld [vmem:[%s13666_s5 + $0x140] sm:$0xf]  ;;  %v8227_v17 = vld [vmem:[%s13666_s5 + $0x148] sm:$0xf] }
  0xb2   : > { %v774_v18 = vpop.f32.mrf.mxu0 }
  0xb3   : > { %v775_v19 = vadd.f32 %v10772_v16, %v774_v18  ;;  %v8220_v18 = vor.u32 %v9883_v15, %v8219_v14  ;;  %v10940_v14 = vld [vmem:[%s13665_s4] ss:$0 sm:$0xff] }
  0xb5   : > { %v853_v21 = vmax.f32 %v775_v19, 0.0  ;;  %v9884_v19 = vld [vmem:[%s13666_s5 + $0x164] sm:$0xf0]  ;;  %1526 = vmatpush.bf16.msra.mxu2 %v8220_v18  ;;  %10365 = vmatpush.bf16.msra.mxu3 %v8220_v18 }
  0xb7   : > { %v10777_v22 = vpack.c.bf16 %v853_v21, %v852_v20  ;;  %v8228_v20 = vor.u32 %v9884_v19, %v8227_v17  ;;  %v8187_v21 = vld [vmem:[%s13666_s5 + $0x100] sm:$0xf] }
  0xb9   : > { %13769 = vst [vmem:[#allocation12_spill] sm:$0xff] %v10777_v22  ;;  %8041 = vmatmul.msk.bf16.vlgmr.msra.gmra.mxu1 %vm936_vm2, %v10777_v22  ;;  %1704 = vmatpush.bf16.msrb.mxu0 %v8228_v20 }
  0xba   : > { %v777_v24 = vpop.f32.mrf.mxu0 }
  0xbb   : > { %v778_v26 = vadd.f32 %v10772_v16, %v777_v24  ;;  %v8195_v24 = vld [vmem:[%s13666_s5 + $0x108] sm:$0xf] }
  0xbd   : > { %8018 = vmatmul.msk.bf16.gmra.mxu0 %vm710_vm1, %v9828_v23  ;;  %v854_v29 = vmax.f32 %v778_v26, 0.0  ;;  %v9875_v23 = vld [vmem:[%s13666_s5 + $0x11c] sm:$0xf0]  ;;  %v9876_v26 = vld [vmem:[%s13666_s5 + $0x124] sm:$0xf0] }
  0xbe   : > { %v8188_v25 = vor.u32 %v9875_v23, %v8187_v21 }
  0xc0   : > { %1527 = vmatpush.bf16.msra.mxu2 %v8188_v25  ;;  %10366 = vmatpush.bf16.msra.mxu3 %v8188_v25 }
  0xc2   : > { %v779_v27 = vpop.f32.mrf.mxu0 }
  0xc3   : > { %v780_v28 = vadd.f32 %v10772_v16, %v779_v27 }
  0xc5   : > { %v855_v30 = vmax.f32 %v780_v28, 0.0  ;;  %v8196_v28 = vor.u32 %v9876_v26, %v8195_v24 }
  0xc7   : > { %v10787_v31 = vpack.c.bf16 %v855_v30, %v854_v29  ;;  %1705 = vmatpush.bf16.msrb.mxu0 %v8196_v28 }
  0xc9   : > { %13770 = vst [vmem:[#allocation13_spill] sm:$0xff] %v10787_v31  ;;  %8042 = vmatmul.msk.bf16.gmra.mxu1 %vm936_vm2, %v10787_v31 }
  0xca   : > { %v782_v33 = vpop.f32.mrf.mxu0 }
  0xcb   : > { %v783_v35 = vadd.f32 %v10772_v16, %v782_v33  ;;  %v9867_v33 = vld [vmem:[%s13666_s5 + $0xdc] sm:$0xf0] }
  0xcd   : > { %8019 = vmatmul.msk.bf16.gmra.mxu0 %vm710_vm1, %v9829_v32  ;;  %v856_v38 = vmax.f32 %v783_v35, 0.0  ;;  %v8155_v32 = vld [vmem:[%s13666_s5 + $0xc0] sm:$0xf] }
  0xce   : > { %v8156_v35 = vor.u32 %v9867_v33, %v8155_v32  ;;  %v9896_v33 = vld [vmem:[%s13666_s5 + $0x1cc] sm:$0xf] }
  0xd0   : > { %1528 = vmatpush.bf16.msra.mxu2 %v8156_v35  ;;  %10367 = vmatpush.bf16.msra.mxu3 %v8156_v35 }
  0xd2   : > { %v784_v36 = vpop.f32.mrf.mxu0 }
  0xd3   : > { %v785_v37 = vadd.f32 %v10772_v16, %v784_v36  ;;  %v9868_v36 = vld [vmem:[%s13666_s5 + $0xe4] sm:$0xf0] }
  0xd5   : > { %v857_v39 = vmax.f32 %v785_v37, 0.0 }
  0xd7   : > { %v10797_v40 = vpack.c.bf16 %v857_v39, %v856_v38  ;;  %v8164_v39 = vor.u32 %v9868_v36, %v8163_v34  ;;  %v8293_v34 = vld [vmem:[%s13666_s5 + $0x1e8] sm:$0xf0] }
  0xd8   : > { %v8296_v35 = vor.u32 %v9896_v33, %v8293_v34 }
  0xd9   : > { %13771 = vst [vmem:[#allocation14_spill] sm:$0xff] %v10797_v40  ;;  %8043 = vmatmul.msk.bf16.gmra.mxu1 %vm936_vm2, %v10797_v40  ;;  %1706 = vmatpush.bf16.msrb.mxu0 %v8164_v39  ;;  %v8261_v39 = vld [vmem:[%s13666_s5 + $0x1a8] sm:$0xf0] }
  0xda   : > { %v787_v42 = vpop.f32.mrf.mxu0  ;;  %1791 = vmatpush.bf16.msrb.mxu1 %v8296_v35 }
  0xdb   : > { %v788_v44 = vadd.f32 %v10772_v16, %v787_v42  ;;  %v8123_v42 = vld [vmem:[%s13666_s5 + $0x80] sm:$0xf] }
  0xdd   : > { %8020 = vmatmul.msk.bf16.gmra.mxu0 %vm710_vm1, %v9830_v41  ;;  %v858_v47 = vmax.f32 %v788_v44, 0.0  ;;  %v8131_v44 = vld [vmem:[%s13666_s5 + $0x88] sm:$0xf] }
  0xe2   : > { %v789_v45 = vpop.f32.mrf.mxu0 }
  0xe3   : > { %v790_v46 = vadd.f32 %v10772_v16, %v789_v45  ;;  %v8124_v45 = vor.u32 %v9859_v43, %v8123_v42 }
  0xe5   : > { %v859_v48 = vmax.f32 %v790_v46, 0.0  ;;  %v9860_v46 = vld [vmem:[%s13666_s5 + $0xa4] sm:$0xf0]  ;;  %1529 = vmatpush.bf16.msra.mxu2 %v8124_v45  ;;  %10368 = vmatpush.bf16.msra.mxu3 %v8124_v45 }
  0xe7   : > { %v10807_v49 = vpack.c.bf16 %v859_v48, %v858_v47  ;;  %v8132_v47 = vor.u32 %v9860_v46, %v8131_v44 }
  0xe9   : > { %13772 = vst [vmem:[#allocation15_spill] sm:$0xff] %v10807_v49  ;;  %8044 = vmatmul.msk.bf16.gmra.mxu1 %vm936_vm2, %v10807_v49  ;;  %1707 = vmatpush.bf16.msrb.mxu0 %v8132_v47 }
  0xea   : > { %v792_v51 = vpop.f32.mrf.mxu0 }
  0xeb   : > { %v793_v52 = vadd.f32 %v10772_v16, %v792_v51  ;;  %v9851_v51 = vld [vmem:[%s13666_s5 + $0x5c] sm:$0xf0] }
  0xed   : > { %8021 = vmatmul.msk.bf16.gmra.mxu0 %vm710_vm1, %v9831_v50  ;;  %v860_v55 = vmax.f32 %v793_v52, 0.0  ;;  %v8091_v50 = vld [vmem:[%s13666_s5 + $0x40] sm:$0xf]  ;;  %v8099_v52 = vld [vmem:[%s13666_s5 + $0x48] sm:$0xf] }
  0xf2   : > { %v794_v53 = vpop.f32.mrf.mxu0 }
  0xf3   : > { %v795_v54 = vadd.f32 %v10772_v16, %v794_v53  ;;  %v8092_v53 = vor.u32 %v9851_v51, %v8091_v50  ;;  %v9880_v51 = vld [vmem:[%s13666_s5 + $0x14c] sm:$0xf] }
  0xf5   : > { %v861_v56 = vmax.f32 %v795_v54, 0.0  ;;  %v9852_v54 = vld [vmem:[%s13666_s5 + $0x64] sm:$0xf0]  ;;  %1530 = vmatpush.bf16.msra.mxu2 %v8092_v53  ;;  %10369 = vmatpush.bf16.msra.mxu3 %v8092_v53 }
  0xf7   : > { %v10815_v57 = vpack.c.bf16 %v861_v56, %v860_v55  ;;  %v8100_v55 = vor.u32 %v9852_v54, %v8099_v52  ;;  %v8059_v56 = vld [vmem:[%s13666_s5] sm:$0xf]  ;;  %v8229_v52 = vld [vmem:[%s13666_s5 + $0x168] sm:$0xf0] }
  0xf8   : > { %v8232_v53 = vor.u32 %v9880_v51, %v8229_v52 }
  0xf9   : > { %13773 = vst [vmem:[#allocation16_spill] sm:$0xff] %v10815_v57  ;;  %8045 = vmatmul.msk.bf16.gmra.mxu1 %vm936_vm2, %v10815_v57  ;;  %1708 = vmatpush.bf16.msrb.mxu0 %v8100_v55 }
  0xfa   : > { %v797_v58 = vpop.f32.mrf.mxu0 }
  0xfb   : > { %v798_v59 = vadd.f32 %v10772_v16, %v797_v58  ;;  %v9843_v58 = vld [vmem:[%s13666_s5 + $0x1c] sm:$0xf0] }
  0xfd   : > { %v862_v3 = vmax.f32 %v798_v59, 0.0  ;;  %v8067_v59 = vld [vmem:[%s13666_s5 + $0x8] sm:$0xf] }
 0x102   : > { %v799_v60 = vpop.f32.mrf.mxu0 }
 0x103   : > { %v800_v61 = vadd.f32 %v10772_v16, %v799_v60  ;;  %v8060_v60 = vor.u32 %v9843_v58, %v8059_v56 }
 0x105   : > { %v863_v4 = vmax.f32 %v800_v61, 0.0  ;;  %v9844_v61 = vld [vmem:[%s13666_s5 + $0x24] sm:$0xf0]  ;;  %1531 = vmatpush.bf16.msra.mxu2 %v8060_v60  ;;  %10370 = vmatpush.bf16.msra.mxu3 %v8060_v60 }
 0x106   : > { %v8068_v63 = vor.u32 %v9844_v61, %v8067_v59 }
 0x107   : > { %v10833_v6 = vpack.c.bf16 %v863_v4, %v862_v3 }
 0x108   : > { %1709 = vmatpush.bf16.msrb.mxu0 %v8068_v63  ;;  %v8197_v63 = vld [vmem:[%s13666_s5 + $0x128] sm:$0xf0] }
 0x109   : > { %13774 = vst [vmem:[#allocation17_spill] sm:$0xff] %v10833_v6  ;;  %8046 = vmatmul.msk.bf16.gmra.mxu1 %vm936_vm2, %v10833_v6 }
 0x10a   : > { %v802_v13 = vpop.f32.mrf.mxu0 }
 0x10b   : > { %v803_v27 = vadd.f32 %v10772_v16, %v802_v13 }
 0x10d   : > { %v864_v37 = vmax.f32 %v803_v27, 0.0  ;;  %v837_v27 = vpop.f32.mrf.mxu3 }
 0x10e   : > { %v838_v36 = vadd.f32 %v10772_v16, %v837_v27 }
 0x110   : > { %v878_v45 = vmax.f32 %v838_v36, 0.0 }
 0x112   : > { %v804_v29 = vpop.f32.mrf.mxu0 }
 0x113   : > { %v805_v30 = vadd.f32 %v10772_v16, %v804_v29 }
 0x115   : > { %v865_v38 = vmax.f32 %v805_v30, 0.0  ;;  %v839_v42 = vpop.f32.mrf.mxu3 }
 0x116   : > { %v840_v46 = vadd.f32 %v10772_v16, %v839_v42  ;;  %v9840_v42 = vld [vmem:[%s13666_s5 + $0xc] sm:$0xf] }
 0x117   : > { %v10887_v41 = vpack.c.bf16 %v865_v38, %v864_v37  ;;  %v9888_v38 = vld [vmem:[%s13666_s5 + $0x18c] sm:$0xf] }
 0x118   : > { %v8264_v43 = vor.u32 %v9888_v38, %v8261_v39  ;;  %v879_v50 = vmax.f32 %v840_v46, 0.0 }
 0x119   : > { %13775 = vst [vmem:[#allocation18_spill] sm:$0xff] %v10887_v41  ;;  %8047 = vmatmul.msk.bf16.gmra.mxu1 %vm936_vm2, %v10887_v41 }
 0x11a   : > { %v807_v48 = vpop.f32.mrf.mxu0  ;;  %1792 = vmatpush.bf16.msrb.mxu1 %v8264_v43  ;;  %v10979_v58 = vpack.c.bf16 %v879_v50, %v878_v45  ;;  %v8069_v43 = vld [vmem:[%s13666_s5 + $0x28] sm:$0xf0] }
 0x11b   : > { %v808_v62 = vadd.f32 %v10772_v16, %v807_v48  ;;  %v8072_v45 = vor.u32 %v9840_v42, %v8069_v43 }
 0x11c   : > { %13780 = vst [vmem:[#allocation23_spill] sm:$0xff] %v10979_v58  ;;  %8054 = vmatmul.msk.bf16.vlgmr.msrb.gmra.mxu3 %vm936_vm2, %v10979_v58  ;;  %v9871_v58 = vld [vmem:[%s13666_s5 + $0x104] sm:$0xf] }
 0x11d   : > { %v866_v2 = vmax.f32 %v808_v62, 0.0  ;;  %v9872_v62 = vld [vmem:[%s13666_s5 + $0x10c] sm:$0xf] }
 0x11e   : > { %1793 = vmatpush.bf16.msrb.mxu1 %v8232_v53 }
 0x122   : > { %v809_v0 = vpop.f32.mrf.mxu0 }
 0x123   : > { %v810_v1 = vadd.f32 %v10772_v16, %v809_v0  ;;  %v842_v0 = vpop.f32.mrf.mxu3 }
 0x125   : > { %v867_v3 = vmax.f32 %v810_v1, 0.0  ;;  %v8200_v1 = vor.u32 %v9872_v62, %v8197_v63 }
 0x127   : > { %v10929_v4 = vpack.c.bf16 %v867_v3, %v866_v2  ;;  %1794 = vmatpush.bf16.msrb.mxu1 %v8200_v1 }
 0x129   : > { %13776 = vst [vmem:[#allocation19_spill] sm:$0xff] %v10929_v4  ;;  %8048 = vmatmul.msk.bf16.gmra.mxu1 %vm936_vm2, %v10929_v4 }
 0x12a   : > { %v812_v5 = vpop.f32.mrf.mxu0 }
 0x12b   : > { %v813_v7 = vadd.f32 %v10772_v16, %v812_v5 }
 0x12d   : > { %v868_v10 = vmax.f32 %v813_v7, 0.0 }
 0x132   : > { %v814_v8 = vpop.f32.mrf.mxu0 }
 0x133   : > { %v815_v9 = vadd.f32 %v10772_v16, %v814_v8  ;;  %v9864_v8 = vld [vmem:[%s13666_s5 + $0xcc] sm:$0xf] }
 0x135   : > { %v869_v11 = vmax.f32 %v815_v9, 0.0  ;;  %v8165_v9 = vld [vmem:[%s13666_s5 + $0xe8] sm:$0xf0] }
 0x136   : > { %v994_v12 = vpop.f32.mrf.mxu1 }
 0x137   : > { %v10935_v13 = vpack.c.bf16 %v869_v11, %v868_v10  ;;  %v995_v17 = vadd.f32 %v10940_v14, %v994_v12  ;;  %v8168_v10 = vor.u32 %v9864_v8, %v8165_v9  ;;  %v843_v11 = vadd.f32 %v10772_v16, %v842_v0 }
 0x139   : > { %13777 = vst [vmem:[#allocation20_spill] sm:$0xff] %v10935_v13  ;;  %8049 = vmatmul.msk.bf16.gmra.mxu1 %vm936_vm2, %v10935_v13  ;;  %v1074_v20 = vmax.f32 %v995_v17, 0.0  ;;  %v8133_v17 = vld [vmem:[%s13666_s5 + $0xa8] sm:$0xf0] }
 0x13a   : > { %v817_v15 = vpop.f32.mrf.mxu0  ;;  %1795 = vmatpush.bf16.msrb.mxu1 %v8168_v10 }
 0x13b   : > { %v818_v21 = vadd.f32 %v10772_v16, %v817_v15  ;;  %v9856_v15 = vld [vmem:[%s13666_s5 + $0x8c] sm:$0xf] }
 0x13d   : > { %v870_v28 = vmax.f32 %v818_v21, 0.0  ;;  %v880_v21 = vmax.f32 %v843_v11, 0.0 }
 0x13e   : > { %v996_v18 = vpop.f32.mrf.mxu1 }
 0x13f   : > { %v997_v19 = vadd.f32 %v10940_v14, %v996_v18  ;;  %v844_v18 = vpop.f32.mrf.mxu3 }
 0x141   : > { %v1075_v23 = vmax.f32 %v997_v19, 0.0  ;;  %v8136_v19 = vor.u32 %v9856_v15, %v8133_v17 }
 0x142   : > { %v819_v24 = vpop.f32.mrf.mxu0 }
 0x143   : > { %v10947_v25 = vpack.c.bf16 %v1075_v23, %v1074_v20  ;;  %v820_v26 = vadd.f32 %v10772_v16, %v819_v24  ;;  %v845_v23 = vadd.f32 %v10772_v16, %v844_v18  ;;  %1796 = vmatpush.bf16.msrb.mxu1 %v8136_v19 }
 0x145   : > { %13778 = vst [vmem:[#allocation21_spill] sm:$0xff] %v10947_v25  ;;  %v871_v29 = vmax.f32 %v820_v26, 0.0  ;;  %1532 = vmatmul.bf16.vlgmr.msra.gmra.mxu2 %v10947_v25  ;;  %1710 = vmatmul.bf16.vlgmr.msrb.gmra.mxu0 %v10947_v25  ;;  %v881_v27 = vmax.f32 %v845_v23, 0.0 }
 0x146   : > { %v999_v30 = vpop.f32.mrf.mxu1 }
 0x147   : > { %v10952_v32 = vpack.c.bf16 %v871_v29, %v870_v28  ;;  %v1000_v44 = vadd.f32 %v10940_v14, %v999_v30  ;;  %v9848_v28 = vld [vmem:[%s13666_s5 + $0x4c] sm:$0xf]  ;;  %v11021_v36 = vpack.c.bf16 %v881_v27, %v880_v21 }
 0x148   : > { %v8101_v29 = vld [vmem:[%s13666_s5 + $0x68] sm:$0xf0] }
 0x149   : > { %13779 = vst [vmem:[#allocation22_spill] sm:$0xff] %v10952_v32  ;;  %8050 = vmatmul.msk.bf16.gmra.mxu1 %vm936_vm2, %v10952_v32  ;;  %v1076_v54 = vmax.f32 %v1000_v44, 0.0  ;;  %v8104_v30 = vor.u32 %v9848_v28, %v8101_v29  ;;  %8055 = vmatmul.msk.bf16.gmra.mxu3 %vm936_vm2, %v11021_v36  ;;  %v847_v44 = vpop.f32.mrf.mxu3 }
 0x14a   : > { %v822_v37 = vpop.f32.mrf.mxu0  ;;  %13783 = vst [vmem:[#allocation26_spill] sm:$0xff] %v11021_v36  ;;  %v848_v51 = vadd.f32 %v10772_v16, %v847_v44 }
 0x14b   : > { %v823_v55 = vadd.f32 %v10772_v16, %v822_v37  ;;  %1797 = vmatpush.bf16.msrb.mxu1 %v8104_v30 }
 0x14d   : > { %v872_v2 = vmax.f32 %v823_v55, 0.0  ;;  %v882_v55 = vmax.f32 %v848_v51, 0.0 }
 0x14e   : > { %v1001_v47 = vpop.f32.mrf.mxu1 }
 0x14f   : > { %v1002_v48 = vadd.f32 %v10940_v14, %v1001_v47  ;;  %1798 = vmatpush.bf16.msrb.mxu1 %v8072_v45 }
 0x151   : > { %v1077_v56 = vmax.f32 %v1002_v48, 0.0  ;;  %v849_v53 = vpop.f32.mrf.mxu3 }
 0x152   : > { %v824_v59 = vpop.f32.mrf.mxu0 }
 0x153   : > { %v10981_v60 = vpack.c.bf16 %v1077_v56, %v1076_v54  ;;  %v825_v61 = vadd.f32 %v10772_v16, %v824_v59  ;;  %v850_v56 = vadd.f32 %v10772_v16, %v849_v53 }
 0x155   : > { %13781 = vst [vmem:[#allocation24_spill] sm:$0xff] %v10981_v60  ;;  %v873_v3 = vmax.f32 %v825_v61, 0.0  ;;  %1537 = vmatmul.bf16.gmra.mxu2 %v10981_v60  ;;  %1715 = vmatmul.bf16.gmra.mxu0 %v10981_v60  ;;  %v883_v62 = vmax.f32 %v850_v56, 0.0 }
 0x156   : > { %v1004_v5 = vpop.f32.mrf.mxu1 }
 0x157   : > { %v10994_v7 = vpack.c.bf16 %v873_v3, %v872_v2  ;;  %v1005_v20 = vadd.f32 %v10940_v14, %v1004_v5  ;;  %v11045_v2 = vpack.c.bf16 %v883_v62, %v882_v55 }
 0x159   : > { %13782 = vst [vmem:[#allocation25_spill] sm:$0xff] %v10994_v7  ;;  %8051 = vmatmul.msk.bf16.gmra.mxu1 %vm936_vm2, %v10994_v7  ;;  %v1078_v33 = vmax.f32 %v1005_v20, 0.0  ;;  %8056 = vmatmul.msk.bf16.gmra.mxu3 %vm936_vm2, %v11045_v2 }
 0x15a   : > { %v827_v12 = vpop.f32.mrf.mxu0  ;;  %13786 = vst [vmem:[#allocation29_spill] sm:$0xff] %v11045_v2 }
 0x15b   : > { %v828_v34 = vadd.f32 %v10772_v16, %v827_v12 }
 0x15d   : > { %v874_v46 = vmax.f32 %v828_v34, 0.0 }
 0x15e   : > { %v1006_v24 = vpop.f32.mrf.mxu1 }
 0x15f   : > { %v1007_v26 = vadd.f32 %v10940_v14, %v1006_v24 }
 0x161   : > { %v1079_v35 = vmax.f32 %v1007_v26, 0.0 }
 0x162   : > { %v829_v37 = vpop.f32.mrf.mxu0 }
 0x163   : > { %v11023_v38 = vpack.c.bf16 %v1079_v35, %v1078_v33  ;;  %v830_v39 = vadd.f32 %v10772_v16, %v829_v37 }
 0x165   : > { %13784 = vst [vmem:[#allocation27_spill] sm:$0xff] %v11023_v38  ;;  %v875_v47 = vmax.f32 %v830_v39, 0.0  ;;  %1542 = vmatmul.bf16.gmra.mxu2 %v11023_v38  ;;  %1720 = vmatmul.bf16.gmra.mxu0 %v11023_v38 }
 0x166   : > { %v1009_v48 = vpop.f32.mrf.mxu1 }
 0x167   : > { %v11036_v50 = vpack.c.bf16 %v875_v47, %v874_v46  ;;  %v1010_v54 = vadd.f32 %v10940_v14, %v1009_v48 }
 0x169   : > { %13785 = vst [vmem:[#allocation28_spill] sm:$0xff] %v11036_v50  ;;  %8052 = vmatmul.msk.bf16.gmra.mxu1 %vm936_vm2, %v11036_v50  ;;  %v1080_v63 = vmax.f32 %v1010_v54, 0.0 }
 0x16a   : > { %v832_v52 = vpop.f32.mrf.mxu0 }
 0x16b   : > { %v833_v0 = vadd.f32 %v10772_v16, %v832_v52 }
 0x16d   : > { %v876_v9 = vmax.f32 %v833_v0, 0.0  ;;  %v9901_v0 = vld [vmem:[%s13666_s5 + $0x1ec] sm:$0xf0] }
 0x16e   : > { %v1011_v59 = vpop.f32.mrf.mxu1 }
 0x16f   : > { %v1012_v61 = vadd.f32 %v10940_v14, %v1011_v59 }
 0x171   : > { %v1081_v1 = vmax.f32 %v1012_v61, 0.0 }
 0x172   : > { %v834_v3 = vpop.f32.mrf.mxu0 }
 0x173   : > { %v11047_v5 = vpack.c.bf16 %v1081_v1, %v1080_v63  ;;  %v835_v8 = vadd.f32 %v10772_v16, %v834_v3  ;;  %v8299_v63 = vld [vmem:[%s13666_s5 + $0x1d0] sm:$0xf] }
 0x174   : > { %v8300_v1 = vor.u32 %v9901_v0, %v8299_v63  ;;  %v8075_v0 = vld [vmem:[%s13666_s5 + $0x10] sm:$0xf] }
 0x175   : > { %13787 = vst [vmem:[#allocation30_spill] sm:$0xff] %v11047_v5  ;;  %v877_v10 = vmax.f32 %v835_v8, 0.0  ;;  %1547 = vmatmul.bf16.gmra.mxu2 %v11047_v5  ;;  %1725 = vmatmul.bf16.gmra.mxu0 %v11047_v5  ;;  %v8267_v8 = vld [vmem:[%s13666_s5 + $0x190] sm:$0xf] }
 0x176   : > { %v1014_v11 = vpop.f32.mrf.mxu1  ;;  %1880 = vmatpush.bf16.msrb.mxu2 %v8300_v1  ;;  %v9845_v1 = vld [vmem:[%s13666_s5 + $0x2c] sm:$0xf0] }
 0x177   : > { %v11054_v12 = vpack.c.bf16 %v877_v10, %v876_v9  ;;  %v1015_v15 = vadd.f32 %v10940_v14, %v1014_v11  ;;  %v9893_v9 = vld [vmem:[%s13666_s5 + $0x1ac] sm:$0xf0] }
 0x178   : > { %v8268_v11 = vor.u32 %v9893_v9, %v8267_v8  ;;  %v8076_v8 = vor.u32 %v9845_v1, %v8075_v0 }
 0x179   : > { %13788 = vst [vmem:[#allocation31_spill] sm:$0xff] %v11054_v12  ;;  %8053 = vmatmul.msk.bf16.gmra.mxu1 %vm936_vm2, %v11054_v12  ;;  %v1082_v18 = vmax.f32 %v1015_v15, 0.0 }
 0x17a   : > { %1881 = vmatpush.bf16.msrb.mxu2 %v8268_v11 }
 0x17e   : > { %v1016_v17 = vpop.f32.mrf.mxu1 }
 0x17f   : > { %v1017_v16 = vadd.f32 %v10940_v14, %v1016_v17  ;;  %v8235_v17 = vld [vmem:[%s13666_s5 + $0x150] sm:$0xf] }
 0x181   : > { %v1083_v19 = vmax.f32 %v1017_v16, 0.0  ;;  %v9885_v16 = vld [vmem:[%s13666_s5 + $0x16c] sm:$0xf0] }
 0x183   : > { %v11060_v20 = vpack.c.bf16 %v1083_v19, %v1082_v18  ;;  %v8236_v18 = vor.u32 %v9885_v16, %v8235_v17 }
 0x185   : > { %13789 = vst [vmem:[#allocation32_spill] sm:$0xff] %v11060_v20  ;;  %1552 = vmatmul.bf16.gmra.mxu2 %v11060_v20  ;;  %1730 = vmatmul.bf16.gmra.mxu0 %v11060_v20 }
 0x186   : > { %v1019_v21 = vpop.f32.mrf.mxu1  ;;  %1882 = vmatpush.bf16.msrb.mxu2 %v8236_v18 }
 0x187   : > { %v1020_v23 = vadd.f32 %v10940_v14, %v1019_v21 }
 0x189   : > { %1799 = vmatmul.bf16.vlgmr.msrb.gmra.mxu1 %v10947_v25  ;;  %v1084_v27 = vmax.f32 %v1020_v23, 0.0 }
 0x18e   : > { %v1021_v24 = vpop.f32.mrf.mxu1 }
 0x18f   : > { %v1022_v26 = vadd.f32 %v10940_v14, %v1021_v24  ;;  %v8203_v24 = vld [vmem:[%s13666_s5 + $0x110] sm:$0xf] }
 0x191   : > { %v1085_v28 = vmax.f32 %v1022_v26, 0.0  ;;  %v9877_v26 = vld [vmem:[%s13666_s5 + $0x12c] sm:$0xf0] }
 0x193   : > { %v11067_v29 = vpack.c.bf16 %v1085_v28, %v1084_v27  ;;  %v8204_v28 = vor.u32 %v9877_v26, %v8203_v24 }
 0x195   : > { %1557 = vmatmul.bf16.gmra.mxu2 %v11067_v29  ;;  %1735 = vmatmul.bf16.gmra.mxu0 %v11067_v29 }
 0x196   : > { %v1024_v30 = vpop.f32.mrf.mxu1  ;;  %1883 = vmatpush.bf16.msrb.mxu2 %v8204_v28 }
 0x197   : > { %v1025_v33 = vadd.f32 %v10940_v14, %v1024_v30 }
 0x199   : > { %1804 = vmatmul.bf16.gmra.mxu1 %v10981_v60  ;;  %v1086_v37 = vmax.f32 %v1025_v33, 0.0 }
 0x19e   : > { %v1026_v34 = vpop.f32.mrf.mxu1 }
 0x19f   : > { %v1027_v35 = vadd.f32 %v10940_v14, %v1026_v34 }
 0x1a1   : > { %v1087_v39 = vmax.f32 %v1027_v35, 0.0 }
 0x1a3   : > { %v11074_v42 = vpack.c.bf16 %v1087_v39, %v1086_v37  ;;  %v8171_v37 = vld [vmem:[%s13666_s5 + $0xd0] sm:$0xf] }
 0x1a4   : > { %v9869_v39 = vld [vmem:[%s13666_s5 + $0xec] sm:$0xf0] }
 0x1a5   : > { %1562 = vmatmul.bf16.gmra.mxu2 %v11074_v42  ;;  %1740 = vmatmul.bf16.gmra.mxu0 %v11074_v42 }
 0x1a6   : > { %v1029_v43 = vpop.f32.mrf.mxu1 }
 0x1a7   : > { %v1030_v44 = vadd.f32 %v10940_v14, %v1029_v43  ;;  %v8172_v43 = vor.u32 %v9869_v39, %v8171_v37 }
 0x1a9   : > { %1809 = vmatmul.bf16.gmra.mxu1 %v11023_v38  ;;  %v1088_v47 = vmax.f32 %v1030_v44, 0.0  ;;  %1884 = vmatpush.bf16.msrb.mxu2 %v8172_v43 }
 0x1ae   : > { %v1031_v45 = vpop.f32.mrf.mxu1 }
 0x1af   : > { %v1032_v46 = vadd.f32 %v10940_v14, %v1031_v45  ;;  %v8139_v45 = vld [vmem:[%s13666_s5 + $0x90] sm:$0xf] }
 0x1b1   : > { %v1089_v48 = vmax.f32 %v1032_v46, 0.0  ;;  %v9861_v46 = vld [vmem:[%s13666_s5 + $0xac] sm:$0xf0] }
 0x1b3   : > { %v11081_v51 = vpack.c.bf16 %v1089_v48, %v1088_v47  ;;  %v8140_v48 = vor.u32 %v9861_v46, %v8139_v45 }
 0x1b5   : > { %1567 = vmatmul.bf16.gmra.mxu2 %v11081_v51  ;;  %1745 = vmatmul.bf16.gmra.mxu0 %v11081_v51 }
 0x1b6   : > { %v1034_v52 = vpop.f32.mrf.mxu1  ;;  %1885 = vmatpush.bf16.msrb.mxu2 %v8140_v48 }
 0x1b7   : > { %v1035_v53 = vadd.f32 %v10940_v14, %v1034_v52 }
 0x1b9   : > { %1814 = vmatmul.bf16.gmra.mxu1 %v11047_v5  ;;  %v1090_v56 = vmax.f32 %v1035_v53, 0.0  ;;  %v8107_v53 = vld [vmem:[%s13666_s5 + $0x50] sm:$0xf] }
 0x1be   : > { %v1036_v54 = vpop.f32.mrf.mxu1 }
 0x1bf   : > { %v1037_v55 = vadd.f32 %v10940_v14, %v1036_v54  ;;  %v9853_v54 = vld [vmem:[%s13666_s5 + $0x6c] sm:$0xf0] }
 0x1c1   : > { %v1091_v59 = vmax.f32 %v1037_v55, 0.0  ;;  %v8108_v55 = vor.u32 %v9853_v54, %v8107_v53  ;;  %v11196_v53 = vld [vmem:[%s13667_s6] sm:$0xff] }
 0x1c2   : > { %v11088_v61 = vpop.f32.mrf.mxu0 }
 0x1c3   : > { %v11090_v62 = vpack.c.bf16 %v1091_v59, %v1090_v56  ;;  %1886 = vmatpush.bf16.msrb.mxu2 %v8108_v55 }
 0x1c5   : > { %1572 = vmatmul.bf16.gmra.mxu2 %v11090_v62  ;;  %1750 = vmatmul.bf16.gmra.mxu0 %v11090_v62 }
 0x1c6   : > { %v1039_v3 = vpop.f32.mrf.mxu1 }
 0x1c7   : > { %v1040_v19 = vadd.f32 %v10940_v14, %v1039_v3  ;;  %1887 = vmatpush.bf16.msrb.mxu2 %v8076_v8 }
 0x1c8   : > { %v11106_v10 = vpop.f32.mrf.mxu2 }
 0x1c9   : > { %1819 = vmatmul.bf16.gmra.mxu1 %v11060_v20  ;;  %v1092_v30 = vmax.f32 %v1040_v19, 0.0 }
 0x1ca   : > { %v11109_v15 = vpop.f32.mrf.mxu0 }
 0x1ce   : > { %v1041_v21 = vpop.f32.mrf.mxu1 }
 0x1cf   : > { %v1042_v23 = vadd.f32 %v10940_v14, %v1041_v21 }
 0x1d0   : > { %v11125_v27 = vpop.f32.mrf.mxu2 }
 0x1d1   : > { %v1093_v33 = vmax.f32 %v1042_v23, 0.0 }
 0x1d2   : > { %v11127_v34 = vpop.f32.mrf.mxu0 }
 0x1d3   : > { %v11129_v35 = vpack.c.bf16 %v1093_v33, %v1092_v30 }
 0x1d5   : > { %1577 = vmatmul.bf16.gmra.mxu2 %v11129_v35  ;;  %1755 = vmatmul.bf16.gmra.mxu0 %v11129_v35 }
 0x1d6   : > { %v1044_v44 = vpop.f32.mrf.mxu1 }
 0x1d7   : > { %v1045_v56 = vadd.f32 %v10940_v14, %v1044_v44  ;;  %v1059_v44 = vpop.f32.mrf.mxu3 }
 0x1d8   : > { %v11145_v47 = vpop.f32.mrf.mxu2 }
 0x1d9   : > { %1824 = vmatmul.bf16.gmra.mxu1 %v11067_v29  ;;  %v1094_v9 = vmax.f32 %v1045_v56, 0.0 }
 0x1da   : > { %v11148_v52 = vpop.f32.mrf.mxu0 }
 0x1de   : > { %v1046_v59 = vpop.f32.mrf.mxu1 }
 0x1df   : > { %v1047_v63 = vadd.f32 %v10940_v14, %v1046_v59  ;;  %v1061_v56 = vpop.f32.mrf.mxu3  ;;  %v11200_v59 = vperm.slane %v11196_v53, 2 }
 0x1e0   : > { %v11164_v3 = vpop.f32.mrf.mxu2  ;;  %v1062_v2 = vadd.f32 %v10940_v14, %v1061_v56  ;;  %v9886_v56 = vld [vmem:[%s13666_s5 + $0x174] sm:$0xf0] }
 0x1e1   : > { %v1095_v11 = vmax.f32 %v1047_v63, 0.0  ;;  %v1717_v12 = vadd.f32 %v11127_v34, %v11200_v59 }
 0x1e2   : > { %v11166_v17 = vpop.f32.mrf.mxu0 }
 0x1e3   : > { %v11168_v16 = vpack.c.bf16 %v1095_v11, %v1094_v9  ;;  %v11207_v9 = vperm.slane %v11196_v53, 3  ;;  %v9895_v11 = vld [vmem:[%s13666_s5 + $0x1c4] sm:$0xf] }
 0x1e5   : > { %1582 = vmatmul.bf16.gmra.mxu2 %v11168_v16  ;;  %1760 = vmatmul.bf16.gmra.mxu0 %v11168_v16 }
 0x1e6   : > { %v1049_v18 = vpop.f32.mrf.mxu1 }
 0x1e7   : > { %v1050_v23 = vadd.f32 %v10940_v14, %v1049_v18  ;;  %v8285_v18 = vld [vmem:[%s13666_s5 + $0x1e0] sm:$0xf0] }
 0x1e8   : > { %v11172_v19 = vpop.f32.mrf.mxu2 }
 0x1e9   : > { %1829 = vmatmul.bf16.gmra.mxu1 %v11074_v42  ;;  %v1096_v28 = vmax.f32 %v1050_v23, 0.0  ;;  %v8307_v23 = vld [vmem:[%s13666_s5 + $0x1d8] sm:$0xf] }
 0x1ea   : > { %v11175_v21 = vpop.f32.mrf.mxu0 }
 0x1ee   : > { %v1051_v24 = vpop.f32.mrf.mxu1 }
 0x1ef   : > { %v1052_v26 = vadd.f32 %v10940_v14, %v1051_v24  ;;  %v1712_v24 = vadd.f32 %v11088_v61, %v11200_v59  ;;  %v9887_v61 = vld [vmem:[%s13666_s5 + $0x184] sm:$0xf] }
 0x1f0   : > { %v11179_v33 = vpop.f32.mrf.mxu2 }
 0x1f1   : > { %v1097_v30 = vmax.f32 %v1052_v26, 0.0  ;;  %v8288_v26 = vor.u32 %v9895_v11, %v8285_v18 }
 0x1f2   : > { %v11181_v37 = vpop.f32.mrf.mxu0 }
 0x1f3   : > { %v11183_v39 = vpack.c.bf16 %v1097_v30, %v1096_v28  ;;  %v9902_v28 = vld [vmem:[%s13666_s5 + $0x1f4] sm:$0xf0]  ;;  %1613 = vmatpush.bf16.msrb.mxu3 %v8288_v26  ;;  %v11242_v26 = vpop.f32.mrf.mxu3 }
 0x1f5   : > { %1587 = vmatmul.bf16.gmra.mxu2 %v11183_v39  ;;  %1765 = vmatmul.bf16.gmra.mxu0 %v11183_v39 }
 0x1f6   : > { %v1054_v43 = vpop.f32.mrf.mxu1 }
 0x1f7   : > { %v1055_v48 = vadd.f32 %v10940_v14, %v1054_v43 }
 0x1f8   : > { %v11190_v46 = vpop.f32.mrf.mxu2 }
 0x1f9   : > { %1834 = vmatmul.bf16.gmra.mxu1 %v11081_v51  ;;  %v1098_v63 = vmax.f32 %v1055_v48, 0.0  ;;  %v8308_v48 = vor.u32 %v9902_v28, %v8307_v23  ;;  %v9894_v23 = vld [vmem:[%s13666_s5 + $0x1b4] sm:$0xf0] }
 0x1fa   : > { %v11188_v45 = vpop.f32.mrf.mxu0 }
 0x1fb   : > { %2058 = vmatpush.bf16.msra.mxu0 %v8308_v48  ;;  %v1060_v48 = vadd.f32 %v10940_v14, %v1059_v44  ;;  %v1714_v44 = vadd.f32 %v11109_v15, %v11200_v59  ;;  %v8189_v15 = vld [vmem:[%s13666_s5 + $0x120] sm:$0xf0]  ;;  %v1066_v7 = vpop.f32.mrf.mxu3 }
 0x1fe   : > { %v1056_v54 = vpop.f32.mrf.mxu1 }
 0x1ff   : > { %v1057_v55 = vadd.f32 %v10940_v14, %v1056_v54 }
 0x200   : > { %v11225_v30 = vpop.f32.mrf.mxu2 }
 0x201   : > { %v1099_v0 = vmax.f32 %v1057_v55, 0.0  ;;  %v8253_v55 = vld [vmem:[%s13666_s5 + $0x1a0] sm:$0xf0] }
 0x202   : > { %v11202_v1 = vpop.f32.mrf.mxu0  ;;  %v8256_v18 = vor.u32 %v9887_v61, %v8253_v55  ;;  %v8243_v61 = vld [vmem:[%s13666_s5 + $0x158] sm:$0xf] }
 0x203   : > { %v11204_v8 = vpack.c.bf16 %v1099_v0, %v1098_v63  ;;  %v8275_v63 = vld [vmem:[%s13666_s5 + $0x198] sm:$0xf]  ;;  %v2238_v0 = vmax.f32 %v1712_v24, 0.0  ;;  %v9879_v24 = vld [vmem:[%s13666_s5 + $0x144] sm:$0xf] }
 0x204   : > { %1614 = vmatpush.bf16.msrb.mxu3 %v8256_v18  ;;  %v1101_v18 = vmax.f32 %v1062_v2, 0.0 }
 0x205   : > { %1592 = vmatmul.bf16.vlgmr.msra.gmra.mxu3 %v11204_v8  ;;  %1770 = vmatmul.bf16.gmra.mxu0 %v11204_v8 }
 0x206   : > { %1888 = vmatmul.bf16.vlgmr.msrb.gmra.mxu2 %v10947_v25  ;;  %v1800_v43 = vpop.f32.mrf.mxu1 }
 0x207   : > { %v1801_v54 = vadd.f32 %v1800_v43, %v11207_v9  ;;  %v8276_v43 = vor.u32 %v9894_v23, %v8275_v63 }
 0x209   : > { %v2239_v11 = vmax.f32 %v1801_v54, 0.0  ;;  %1839 = vmatmul.bf16.gmra.mxu1 %v11090_v62  ;;  %2059 = vmatpush.bf16.msra.mxu0 %v8276_v43  ;;  %v8221_v54 = vld [vmem:[%s13666_s5 + $0x160] sm:$0xf0]  ;;  %v11263_v43 = vpop.f32.mrf.mxu2 }
 0x20a   : > { %v11244_v28 = vpop.f32.mrf.mxu0  ;;  %v8224_v55 = vor.u32 %v9879_v24, %v8221_v54  ;;  %v8211_v24 = vld [vmem:[%s13666_s5 + $0x118] sm:$0xf]  ;;  %v8192_v54 = vor.u32 %v9871_v58, %v8189_v15  ;;  %v9863_v58 = vld [vmem:[%s13666_s5 + $0xc4] sm:$0xf] }
 0x20b   : > { %v2493_v36 = vpack.c.bf16 %v2239_v11, %v2238_v0  ;;  %v8244_v0 = vor.u32 %v9886_v56, %v8243_v61  ;;  %v1100_v11 = vmax.f32 %v1060_v48, 0.0  ;;  %v2246_v48 = vmax.f32 %v1714_v44, 0.0  ;;  %v9878_v61 = vld [vmem:[%s13666_s5 + $0x134] sm:$0xf0]  ;;  %v8157_v44 = vld [vmem:[%s13666_s5 + $0xe0] sm:$0xf0] }
 0x20c   : > { %1615 = vmatpush.bf16.msrb.mxu3 %v8224_v55  ;;  %v8212_v56 = vor.u32 %v9878_v61, %v8211_v24  ;;  %v8160_v34 = vor.u32 %v9863_v58, %v8157_v44  ;;  %v9870_v24 = vld [vmem:[%s13666_s5 + $0xf4] sm:$0xf0]  ;;  %v2254_v44 = vmax.f32 %v1717_v12, 0.0  ;;  %v9847_v12 = vld [vmem:[%s13666_s5 + $0x44] sm:$0xf] }
 0x20d   : > { %2060 = vmatpush.bf16.msra.mxu0 %v8244_v0  ;;  %v2622_v50 = vunpack.c.l.bf16 %v2493_v36  ;;  %v8147_v58 = vld [vmem:[%s13666_s5 + $0x98] sm:$0xf] }
 0x20e   : > { %v1802_v63 = vpop.f32.mrf.mxu1 }
 0x20f   : > { %v1803_v23 = vadd.f32 %v1802_v63, %v11207_v9  ;;  %v11279_v63 = vpack.c.bf16 %v1101_v18, %v1100_v11  ;;  %v8179_v11 = vld [vmem:[%s13666_s5 + $0xd8] sm:$0xf]  ;;  %v2623_v18 = vunpack.c.h.bf16 %v2493_v36  ;;  %v9855_v36 = vld [vmem:[%s13666_s5 + $0x84] sm:$0xf] }
 0x210   : > { %1616 = vmatpush.bf16.msrb.mxu3 %v8192_v54 }
 0x211   : > { %v2247_v2 = vmax.f32 %v1803_v23, 0.0  ;;  %2061 = vmatpush.bf16.msra.mxu0 %v8212_v56 }
 0x212   : > { %v11277_v55 = vpop.f32.mrf.mxu0 }
 0x213   : > { %v2497_v0 = vpack.c.bf16 %v2247_v2, %v2246_v48  ;;  %v8180_v2 = vor.u32 %v9870_v24, %v8179_v11 }
 0x214   : > { %1617 = vmatpush.bf16.msrb.mxu3 %v8160_v34 }
 0x215   : > { %v2630_v23 = vunpack.c.l.bf16 %v2497_v0  ;;  %v2631_v15 = vunpack.c.h.bf16 %v2497_v0  ;;  %1597 = vmatmul.bf16.gmra.mxu3 %v11279_v63  ;;  %1775 = vmatmul.bf16.gmra.mxu0 %v11279_v63  ;;  %v8125_v0 = vld [vmem:[%s13666_s5 + $0xa0] sm:$0xf0] }
 0x216   : > { %1893 = vmatmul.bf16.gmra.mxu2 %v10981_v60  ;;  %v1805_v48 = vpop.f32.mrf.mxu1  ;;  %2062 = vmatpush.bf16.msra.mxu0 %v8180_v2 }
 0x217   : > { %v2918_v54 = vmax.f32 %v2622_v50, %v2630_v23  ;;  %v2939_v61 = vmax.f32 %v2623_v18, %v2631_v15  ;;  %v1806_v56 = vadd.f32 %v1805_v48, %v11207_v9  ;;  %v8128_v50 = vor.u32 %v9855_v36, %v8125_v0  ;;  %v9862_v18 = vld [vmem:[%s13666_s5 + $0xb4] sm:$0xf0]  ;;  %v11314_v15 = vpop.f32.mrf.mxu2 }
 0x218   : > { %v1065_v23 = vadd.f32 %v10940_v14, %v11242_v26  ;;  %v8148_v24 = vor.u32 %v9862_v18, %v8147_v58  ;;  %v1067_v48 = vadd.f32 %v10940_v14, %v1066_v7  ;;  %v8115_v26 = vld [vmem:[%s13666_s5 + $0x58] sm:$0xf]  ;;  %v1719_v36 = vadd.f32 %v11148_v52, %v11200_v59  ;;  %v9839_v52 = vld [vmem:[%s13666_s5 + $0x4] sm:$0xf] }
 0x219   : > { %v2255_v11 = vmax.f32 %v1806_v56, 0.0  ;;  %1844 = vmatmul.bf16.gmra.mxu1 %v11129_v35  ;;  %1618 = vmatpush.bf16.msrb.mxu3 %v8128_v50  ;;  %v8093_v56 = vld [vmem:[%s13666_s5 + $0x60] sm:$0xf0]  ;;  %v1069_v50 = vpop.f32.mrf.mxu3 }
 0x21a   : > { %v11316_v34 = vpop.f32.mrf.mxu0  ;;  %2063 = vmatpush.bf16.msra.mxu0 %v8148_v24  ;;  %v8096_v58 = vor.u32 %v9847_v12, %v8093_v56  ;;  %v1103_v32 = vmax.f32 %v1067_v48, 0.0  ;;  %v2262_v12 = vmax.f32 %v1719_v36, 0.0 }
 0x21b   : > { %v2501_v2 = vpack.c.bf16 %v2255_v11, %v2254_v44  ;;  %v9854_v44 = vld [vmem:[%s13666_s5 + $0x74] sm:$0xf0]  ;;  %v1102_v11 = vmax.f32 %v1065_v23, 0.0 }
 0x21c   : > { %v8116_v24 = vor.u32 %v9854_v44, %v8115_v26  ;;  %v8083_v23 = vld [vmem:[%s13666_s5 + $0x18] sm:$0xf]  ;;  %v1722_v44 = vadd.f32 %v11166_v17, %v11200_v59  ;;  %v1070_v17 = vadd.f32 %v10940_v14, %v1069_v50 }
 0x21d   : > { %v2638_v0 = vunpack.c.l.bf16 %v2501_v2  ;;  %v2639_v7 = vunpack.c.h.bf16 %v2501_v2  ;;  %1619 = vmatpush.bf16.msrb.mxu3 %v8096_v58  ;;  %v8061_v2 = vld [vmem:[%s13666_s5 + $0x20] sm:$0xf0] }
 0x21e   : > { %v1807_v18 = vpop.f32.mrf.mxu1  ;;  %2064 = vmatpush.bf16.msra.mxu0 %v8116_v24 }
 0x21f   : > { %v2919_v13 = vmax.f32 %v2918_v54, %v2638_v0  ;;  %v2940_v4 = vmax.f32 %v2939_v61, %v2639_v7  ;;  %v1808_v41 = vadd.f32 %v1807_v18, %v11207_v9  ;;  %v8064_v54 = vor.u32 %v9839_v52, %v8061_v2  ;;  %v9846_v61 = vld [vmem:[%s13666_s5 + $0x34] sm:$0xf0]  ;;  %v11350_v58 = vpop.f32.mrf.mxu2 }
 0x220   : > { %v8084_v26 = vor.u32 %v9846_v61, %v8083_v23  ;;  %v11348_v0 = vpack.c.bf16 %v1103_v32, %v1102_v11  ;;  %v2270_v2 = vmax.f32 %v1722_v44, 0.0  ;;  %v1724_v61 = vadd.f32 %v11175_v21, %v11200_v59 }
 0x221   : > { %v2263_v48 = vmax.f32 %v1808_v41, 0.0  ;;  %1620 = vmatpush.bf16.msrb.mxu3 %v8064_v54  ;;  %v1071_v52 = vpop.f32.mrf.mxu3  ;;  %v1727_v21 = vadd.f32 %v11181_v37, %v11200_v59 }
 0x222   : > { %v11346_v56 = vpop.f32.mrf.mxu0  ;;  %2065 = vmatpush.bf16.msra.mxu0 %v8084_v26  ;;  %v2278_v50 = vmax.f32 %v1724_v61, 0.0 }
 0x223   : > { %v2505_v7 = vpack.c.bf16 %v2263_v48, %v2262_v12  ;;  %v1072_v48 = vadd.f32 %v10940_v14, %v1071_v52  ;;  %v2286_v61 = vmax.f32 %v1727_v21, 0.0 }
 0x225   : > { %v2646_v36 = vunpack.c.l.bf16 %v2505_v7  ;;  %v2647_v41 = vunpack.c.h.bf16 %v2505_v7  ;;  %1602 = vmatmul.bf16.gmra.mxu3 %v11348_v0  ;;  %1780 = vmatmul.bf16.gmra.mxu0 %v11348_v0  ;;  %v1105_v44 = vmax.f32 %v1072_v48, 0.0 }
 0x226   : > { %1898 = vmatmul.bf16.gmra.mxu2 %v11023_v38  ;;  %v1810_v18 = vpop.f32.mrf.mxu1 }
 0x227   : > { %v2920_v24 = vmax.f32 %v2919_v13, %v2646_v36  ;;  %v2941_v32 = vmax.f32 %v2940_v4, %v2647_v41  ;;  %v1811_v11 = vadd.f32 %v1810_v18, %v11207_v9  ;;  %v1104_v4 = vmax.f32 %v1070_v17, 0.0  ;;  %v11365_v7 = vpop.f32.mrf.mxu2 }
 0x229   : > { %v2271_v23 = vmax.f32 %v1811_v11, 0.0  ;;  %1849 = vmatmul.bf16.gmra.mxu1 %v11168_v16  ;;  %v11370_v14 = vpack.c.bf16 %v1105_v44, %v1104_v4 }
 0x22a   : > { %v11360_v12 = vpop.f32.mrf.mxu0 }
 0x22b   : > { %v2509_v54 = vpack.c.bf16 %v2271_v23, %v2270_v2 }
 0x22d   : > { %v2654_v26 = vunpack.c.l.bf16 %v2509_v54  ;;  %v2655_v13 = vunpack.c.h.bf16 %v2509_v54 }
 0x22e   : > { %v1812_v36 = vpop.f32.mrf.mxu1 }
 0x22f   : > { %v2921_v41 = vmax.f32 %v2920_v24, %v2654_v26  ;;  %v2942_v18 = vmax.f32 %v2941_v32, %v2655_v13  ;;  %v1813_v11 = vadd.f32 %v1812_v36, %v11207_v9  ;;  %v11378_v54 = vpop.f32.mrf.mxu2  ;;  %v1729_v13 = vadd.f32 %v11188_v45, %v11200_v59 }
 0x231   : > { %v2279_v6 = vmax.f32 %v1813_v11, 0.0 }
 0x232   : > { %v11368_v57 = vpop.f32.mrf.mxu0 }
 0x233   : > { %v2513_v52 = vpack.c.bf16 %v2279_v6, %v2278_v50  ;;  %v2294_v50 = vmax.f32 %v1729_v13, 0.0 }
 0x235   : > { %v2662_v2 = vunpack.c.l.bf16 %v2513_v52  ;;  %v2663_v23 = vunpack.c.h.bf16 %v2513_v52  ;;  %1607 = vmatmul.bf16.gmra.mxu3 %v11370_v14  ;;  %1785 = vmatmul.bf16.gmra.mxu0 %v11370_v14 }
 0x236   : > { %1903 = vmatmul.bf16.gmra.mxu2 %v11047_v5  ;;  %v1815_v24 = vpop.f32.mrf.mxu1 }
 0x237   : > { %v2922_v32 = vmax.f32 %v2921_v41, %v2662_v2  ;;  %v2943_v17 = vmax.f32 %v2942_v18, %v2663_v23  ;;  %v1816_v48 = vadd.f32 %v1815_v24, %v11207_v9  ;;  %v11386_v2 = vpop.f32.mrf.mxu2  ;;  %v1732_v24 = vadd.f32 %v11202_v1, %v11200_v59  ;;  %v8309_v1 = vld [vmem:[%s13666_s5 + $0x1f8] sm:$0xf0] }
 0x239   : > { %v2287_v6 = vmax.f32 %v1816_v48, 0.0  ;;  %1854 = vmatmul.bf16.gmra.mxu1 %v11183_v39  ;;  %v2302_v13 = vmax.f32 %v1732_v24, 0.0 }
 0x23a   : > { %v11381_v37 = vpop.f32.mrf.mxu0 }
 0x23b   : > { %v2517_v26 = vpack.c.bf16 %v2287_v6, %v2286_v61 }
 0x23d   : > { %v2670_v4 = vunpack.c.l.bf16 %v2517_v26  ;;  %v2671_v36 = vunpack.c.h.bf16 %v2517_v26  ;;  %v9898_v26 = vld [vmem:[%s13666_s5 + $0x1dc] sm:$0xf] }
 0x23e   : > { %v1817_v44 = vpop.f32.mrf.mxu1 }
 0x23f   : > { %v2923_v11 = vmax.f32 %v2922_v32, %v2670_v4  ;;  %v2944_v41 = vmax.f32 %v2943_v17, %v2671_v36  ;;  %v1818_v18 = vadd.f32 %v1817_v44, %v11207_v9  ;;  %v8312_v36 = vor.u32 %v9898_v26, %v8309_v1  ;;  %v9882_v1 = vld [vmem:[%s13666_s5 + $0x15c] sm:$0xf] }
 0x241   : > { %v2295_v52 = vmax.f32 %v1818_v18, 0.0  ;;  %2147 = vmatpush.bf16.msra.mxu1 %v8312_v36 }
 0x242   : > { %v11388_v21 = vpop.f32.mrf.mxu0 }
 0x243   : > { %v2521_v23 = vpack.c.bf16 %v2295_v52, %v2294_v50  ;;  %v8277_v50 = vld [vmem:[%s13666_s5 + $0x1b8] sm:$0xf0]  ;;  %v1734_v52 = vadd.f32 %v11244_v28, %v11200_v59 }
 0x245   : > { %v2678_v48 = vunpack.c.l.bf16 %v2521_v23  ;;  %v2679_v61 = vunpack.c.h.bf16 %v2521_v23  ;;  %1621 = vmatmul.bf16.vlgmr.msrb.gmra.mxu3 %v10947_v25  ;;  %2066 = vmatmul.bf16.vlgmr.msra.gmra.mxu0 %v10947_v25 }
 0x246   : > { %1908 = vmatmul.bf16.gmra.mxu2 %v11060_v20  ;;  %v1820_v45 = vpop.f32.mrf.mxu1 }
 0x247   : > { %v2924_v32 = vmax.f32 %v2923_v11, %v2678_v48  ;;  %v2945_v17 = vmax.f32 %v2944_v41, %v2679_v61  ;;  %v1821_v6 = vadd.f32 %v1820_v45, %v11207_v9  ;;  %v11405_v11 = vpop.f32.mrf.mxu2  ;;  %v9890_v41 = vld [vmem:[%s13666_s5 + $0x19c] sm:$0xf] }
 0x248   : > { %v8280_v48 = vor.u32 %v9890_v41, %v8277_v50  ;;  %v1737_v41 = vadd.f32 %v11277_v55, %v11200_v59  ;;  %v9866_v55 = vld [vmem:[%s13666_s5 + $0xdc] sm:$0xf] }
 0x249   : > { %v2303_v4 = vmax.f32 %v1821_v6, 0.0  ;;  %1859 = vmatmul.bf16.gmra.mxu1 %v11204_v8 }
 0x24a   : > { %v11403_v44 = vpop.f32.mrf.mxu0  ;;  %2148 = vmatpush.bf16.msra.mxu1 %v8280_v48 }
 0x24b   : > { %v2525_v18 = vpack.c.bf16 %v2303_v4, %v2302_v13  ;;  %v8245_v13 = vld [vmem:[%s13666_s5 + $0x178] sm:$0xf0]  ;;  %v2310_v4 = vmax.f32 %v1734_v52, 0.0 }
 0x24c   : > { %v8248_v28 = vor.u32 %v9882_v1, %v8245_v13  ;;  %v8181_v13 = vld [vmem:[%s13666_s5 + $0xf8] sm:$0xf0] }
 0x24d   : > { %v2686_v23 = vunpack.c.l.bf16 %v2525_v18  ;;  %v2687_v24 = vunpack.c.h.bf16 %v2525_v18 }
 0x24e   : > { %v1822_v61 = vpop.f32.mrf.mxu1  ;;  %2149 = vmatpush.bf16.msra.mxu1 %v8248_v28  ;;  %v8184_v28 = vor.u32 %v9866_v55, %v8181_v13 }
 0x24f   : > { %v2925_v45 = vmax.f32 %v2924_v32, %v2686_v23  ;;  %v2946_v6 = vmax.f32 %v2945_v17, %v2687_v24  ;;  %v1823_v26 = vadd.f32 %v1822_v61, %v11207_v9  ;;  %v9874_v32 = vld [vmem:[%s13666_s5 + $0x11c] sm:$0xf]  ;;  %v11434_v24 = vpop.f32.mrf.mxu2 }
 0x250   : > { %v8213_v17 = vld [vmem:[%s13666_s5 + $0x138] sm:$0xf0]  ;;  %13790 = vst [vmem:[#allocation33_spill] sm:$0xff] %v11434_v24 }
 0x251   : > { %v2311_v36 = vmax.f32 %v1823_v26, 0.0  ;;  %v8216_v52 = vor.u32 %v9874_v32, %v8213_v17  ;;  %v8149_v32 = vld [vmem:[%s13666_s5 + $0xb8] sm:$0xf0]  ;;  %v1739_v17 = vadd.f32 %v11316_v34, %v11200_v59 }
 0x252   : > { %v11422_v49 = vpop.f32.mrf.mxu0 }
 0x253   : > { %v2529_v18 = vpack.c.bf16 %v2311_v36, %v2310_v4  ;;  %2150 = vmatpush.bf16.msra.mxu1 %v8216_v52  ;;  %v2318_v4 = vmax.f32 %v1737_v41, 0.0  ;;  %v2326_v34 = vmax.f32 %v1739_v17, 0.0 }
 0x255   : > { %v2694_v50 = vunpack.c.l.bf16 %v2529_v18  ;;  %v2695_v23 = vunpack.c.h.bf16 %v2529_v18  ;;  %1626 = vmatmul.bf16.gmra.mxu3 %v10981_v60  ;;  %2071 = vmatmul.bf16.gmra.mxu0 %v10981_v60 }
 0x256   : > { %1913 = vmatmul.bf16.gmra.mxu2 %v11067_v29  ;;  %v1825_v48 = vpop.f32.mrf.mxu1 }
 0x257   : > { %v2926_v61 = vmax.f32 %v2925_v45, %v2694_v50  ;;  %v2947_v26 = vmax.f32 %v2946_v6, %v2695_v23  ;;  %v1826_v1 = vadd.f32 %v1825_v48, %v11207_v9  ;;  %2151 = vmatpush.bf16.msra.mxu1 %v8184_v28  ;;  %v9858_v6 = vld [vmem:[%s13666_s5 + $0x9c] sm:$0xf]  ;;  %v11456_v13 = vpop.f32.mrf.mxu2 }
 0x258   : > { %v8152_v23 = vor.u32 %v9858_v6, %v8149_v32  ;;  %13791 = vst [vmem:[#allocation34_spill] sm:$0xff] %v11456_v13  ;;  %v8085_v32 = vld [vmem:[%s13666_s5 + $0x38] sm:$0xf0] }
 0x259   : > { %v2319_v36 = vmax.f32 %v1826_v1, 0.0  ;;  %1864 = vmatmul.bf16.gmra.mxu1 %v11279_v63 }
 0x25a   : > { %v11445_v18 = vpop.f32.mrf.mxu0 }
 0x25b   : > { %v2533_v45 = vpack.c.bf16 %v2319_v36, %v2318_v4  ;;  %2152 = vmatpush.bf16.msra.mxu1 %v8152_v23  ;;  %v9850_v4 = vld [vmem:[%s13666_s5 + $0x5c] sm:$0xf] }
 0x25c   : > { %v8117_v36 = vld [vmem:[%s13666_s5 + $0x78] sm:$0xf0] }
 0x25d   : > { %v2702_v41 = vunpack.c.l.bf16 %v2533_v45  ;;  %v2703_v50 = vunpack.c.h.bf16 %v2533_v45  ;;  %v8120_v45 = vor.u32 %v9850_v4, %v8117_v36 }
 0x25e   : > { %v1827_v52 = vpop.f32.mrf.mxu1 }
 0x25f   : > { %v2927_v48 = vmax.f32 %v2926_v61, %v2702_v41  ;;  %v2948_v1 = vmax.f32 %v2947_v26, %v2703_v50  ;;  %v1828_v55 = vadd.f32 %v1827_v52, %v11207_v9  ;;  %2153 = vmatpush.bf16.msra.mxu1 %v8120_v45  ;;  %v9842_v26 = vld [vmem:[%s13666_s5 + $0x1c] sm:$0xf]  ;;  %v1742_v41 = vadd.f32 %v11346_v56, %v11200_v59  ;;  %v11479_v56 = vpop.f32.mrf.mxu2 }
 0x260   : > { %v8088_v17 = vor.u32 %v9842_v26, %v8085_v32  ;;  %13792 = vst [vmem:[#allocation35_spill] sm:$0xff] %v11479_v56  ;;  %v1744_v26 = vadd.f32 %v11360_v12, %v11200_v59 }
 0x261   : > { %v2327_v28 = vmax.f32 %v1828_v55, 0.0 }
 0x262   : > { %v11464_v6 = vpop.f32.mrf.mxu0 }
 0x263   : > { %v2537_v61 = vpack.c.bf16 %v2327_v28, %v2326_v34  ;;  %2154 = vmatpush.bf16.msra.mxu1 %v8088_v17  ;;  %v2334_v34 = vmax.f32 %v1742_v41, 0.0 }
 0x265   : > { %v2710_v50 = vunpack.c.l.bf16 %v2537_v61  ;;  %v2711_v23 = vunpack.c.h.bf16 %v2537_v61  ;;  %1631 = vmatmul.bf16.gmra.mxu3 %v11023_v38  ;;  %2076 = vmatmul.bf16.gmra.mxu0 %v11023_v38 }
 0x266   : > { %1918 = vmatmul.bf16.gmra.mxu2 %v11074_v42  ;;  %v1830_v52 = vpop.f32.mrf.mxu1 }
 0x267   : > { %v2928_v55 = vmax.f32 %v2927_v48, %v2710_v50  ;;  %v2949_v4 = vmax.f32 %v2948_v1, %v2711_v23  ;;  %v1831_v36 = vadd.f32 %v1830_v52, %v11207_v9  ;;  %v2342_v23 = vmax.f32 %v1744_v26, 0.0 }
 0x269   : > { %v2335_v28 = vmax.f32 %v1831_v36, 0.0  ;;  %1869 = vmatmul.bf16.gmra.mxu1 %v11348_v0  ;;  %v11488_v36 = vpop.f32.mrf.mxu2 }
 0x26a   : > { %v11481_v45 = vpop.f32.mrf.mxu0  ;;  %13793 = vst [vmem:[#allocation36_spill] sm:$0xff] %v11488_v36 }
 0x26b   : > { %v2541_v61 = vpack.c.bf16 %v2335_v28, %v2334_v34  ;;  %v1747_v34 = vadd.f32 %v11368_v57, %v11200_v59 }
 0x26d   : > { %v2718_v32 = vunpack.c.l.bf16 %v2541_v61  ;;  %v2719_v40 = vunpack.c.h.bf16 %v2541_v61 }
 0x26e   : > { %v1832_v31 = vpop.f32.mrf.mxu1 }
 0x26f   : > { %v2929_v48 = vmax.f32 %v2928_v55, %v2718_v32  ;;  %v2950_v1 = vmax.f32 %v2949_v4, %v2719_v40  ;;  %v1833_v50 = vadd.f32 %v1832_v31, %v11207_v9  ;;  %v2350_v4 = vmax.f32 %v1747_v34, 0.0 }
 0x270   : > { %v1749_v32 = vadd.f32 %v11381_v37, %v11200_v59 }
 0x271   : > { %v2343_v41 = vmax.f32 %v1833_v50, 0.0 }
 0x272   : > { %v11486_v17 = vpop.f32.mrf.mxu0 }
 0x273   : > { %v2545_v52 = vpack.c.bf16 %v2343_v41, %v2342_v23  ;;  %v11501_v41 = vpop.f32.mrf.mxu2 }
 0x274   : > { %13794 = vst [vmem:[#allocation37_spill] sm:$0xff] %v11501_v41 }
 0x275   : > { %v2726_v28 = vunpack.c.l.bf16 %v2545_v52  ;;  %v2727_v22 = vunpack.c.h.bf16 %v2545_v52  ;;  %1636 = vmatmul.bf16.gmra.mxu3 %v11047_v5  ;;  %2081 = vmatmul.bf16.gmra.mxu0 %v11047_v5 }
 0x276   : > { %1923 = vmatmul.bf16.gmra.mxu2 %v11081_v51  ;;  %v1835_v40 = vpop.f32.mrf.mxu1 }
 0x277   : > { %v2930_v31 = vmax.f32 %v2929_v48, %v2726_v28  ;;  %v2951_v12 = vmax.f32 %v2950_v1, %v2727_v22  ;;  %v1836_v55 = vadd.f32 %v1835_v40, %v11207_v9  ;;  %v2358_v1 = vmax.f32 %v1749_v32, 0.0 }
 0x279   : > { %v2351_v61 = vmax.f32 %v1836_v55, 0.0  ;;  %1874 = vmatmul.bf16.gmra.mxu1 %v11370_v14  ;;  %v1752_v55 = vadd.f32 %v11388_v21, %v11200_v59 }
 0x27a   : > { %v11497_v26 = vpop.f32.mrf.mxu0 }
 0x27b   : > { %v2549_v57 = vpack.c.bf16 %v2351_v61, %v2350_v4  ;;  %v11516_v32 = vpop.f32.mrf.mxu2  ;;  %v2366_v21 = vmax.f32 %v1752_v55, 0.0 }
 0x27c   : > { %13795 = vst [vmem:[#allocation38_spill] sm:$0xff] %v11516_v32 }
 0x27d   : > { %v2734_v50 = vunpack.c.l.bf16 %v2549_v57  ;;  %v2735_v23 = vunpack.c.h.bf16 %v2549_v57 }
 0x27e   : > { %v1837_v52 = vpop.f32.mrf.mxu1 }
 0x27f   : > { %v2931_v36 = vmax.f32 %v2930_v31, %v2734_v50  ;;  %v2952_v48 = vmax.f32 %v2951_v12, %v2735_v23  ;;  %v1838_v22 = vadd.f32 %v1837_v52, %v11207_v9 }
 0x281   : > { %v2359_v34 = vmax.f32 %v1838_v22, 0.0 }
 0x282   : > { %v11504_v28 = vpop.f32.mrf.mxu0 }
 0x283   : > { %v2553_v40 = vpack.c.bf16 %v2359_v34, %v2358_v1  ;;  %v1754_v1 = vadd.f32 %v11403_v44, %v11200_v59  ;;  %v9897_v34 = vld [vmem:[%s13666_s5 + $0x1d4] sm:$0xf] }
 0x285   : > { %v2742_v4 = vunpack.c.l.bf16 %v2553_v40  ;;  %v2743_v61 = vunpack.c.h.bf16 %v2553_v40  ;;  %1641 = vmatmul.bf16.gmra.mxu3 %v11060_v20  ;;  %2086 = vmatmul.bf16.gmra.mxu0 %v11060_v20  ;;  %v8301_v40 = vld [vmem:[%s13666_s5 + $0x1f0] sm:$0xf0] }
 0x286   : > { %1928 = vmatmul.bf16.gmra.mxu2 %v11090_v62  ;;  %v1840_v37 = vpop.f32.mrf.mxu1 }
 0x287   : > { %v11511_v31 = vmax.f32 %v2931_v36, %v2742_v4  ;;  %v11513_v12 = vmax.f32 %v2952_v48, %v2743_v61  ;;  %v1841_v57 = vadd.f32 %v1840_v37, %v11207_v9  ;;  %v8304_v4 = vor.u32 %v9897_v34, %v8301_v40 }
 0x288   : > { %v11518_v50 = vpop.f32.mrf.mxu3  ;;  %v2374_v61 = vmax.f32 %v1754_v1, 0.0 }
 0x289   : > { %13796 = vst [vmem:[#allocation39_spill] sm:$0xff] %v11518_v50  ;;  %v2367_v23 = vmax.f32 %v1841_v57, 0.0  ;;  %2155 = vmatmul.bf16.vlgmr.msra.gmra.mxu1 %v10947_v25  ;;  %v11534_v57 = vpop.f32.mrf.mxu2  ;;  %1969 = vmatpush.bf16.msra.mxu3 %v8304_v4 }
 0x28a   : > { %v11521_v52 = vpop.f32.mrf.mxu0  ;;  %13798 = vst [vmem:[#allocation41_spill] sm:$0xff] %v11534_v57 }
 0x28b   : > { %v2557_v22 = vpack.c.bf16 %v2367_v23, %v2366_v21 }
 0x28d   : > { %v2750_v23 = vunpack.c.l.bf16 %v2557_v22 }
 0x28e   : > { %v1842_v36 = vpop.f32.mrf.mxu1 }
 0x28f   : > { %v1843_v48 = vadd.f32 %v1842_v36, %v11207_v9  ;;  %v2751_v36 = vunpack.c.h.bf16 %v2557_v22 }
 0x290   : > { %v11532_v55 = vpop.f32.mrf.mxu3 }
 0x291   : > { %13797 = vst [vmem:[#allocation40_spill] sm:$0xff] %v11532_v55  ;;  %v2375_v37 = vmax.f32 %v1843_v48, 0.0  ;;  %v1757_v55 = vadd.f32 %v11422_v49, %v11200_v59  ;;  %v1759_v49 = vadd.f32 %v11445_v18, %v11200_v59 }
 0x292   : > { %v11536_v21 = vpop.f32.mrf.mxu0 }
 0x293   : > { %v2561_v44 = vpack.c.bf16 %v2375_v37, %v2374_v61  ;;  %v2382_v22 = vmax.f32 %v1757_v55, 0.0 }
 0x295   : > { %v2758_v50 = vunpack.c.l.bf16 %v2561_v44  ;;  %v2759_v32 = vunpack.c.h.bf16 %v2561_v44  ;;  %1646 = vmatmul.bf16.gmra.mxu3 %v11067_v29  ;;  %2091 = vmatmul.bf16.gmra.mxu0 %v11067_v29  ;;  %v11549_v44 = vpop.f32.mrf.mxu2 }
 0x296   : > { %1933 = vmatmul.bf16.gmra.mxu2 %v11129_v35  ;;  %v1845_v1 = vpop.f32.mrf.mxu1  ;;  %13800 = vst [vmem:[#allocation43_spill] sm:$0xff] %v11549_v44 }
 0x297   : > { %v3086_v48 = vmax.f32 %v2750_v23, %v2758_v50  ;;  %v3107_v34 = vmax.f32 %v2751_v36, %v2759_v32  ;;  %v1846_v40 = vadd.f32 %v1845_v1, %v11207_v9 }
 0x298   : > { %v11544_v4 = vpop.f32.mrf.mxu3 }
 0x299   : > { %13799 = vst [vmem:[#allocation42_spill] sm:$0xff] %v11544_v4  ;;  %2160 = vmatmul.bf16.gmra.mxu1 %v10981_v60  ;;  %v2383_v61 = vmax.f32 %v1846_v40, 0.0  ;;  %v2390_v4 = vmax.f32 %v1759_v49, 0.0 }
 0x29a   : > { %v11547_v37 = vpop.f32.mrf.mxu0 }
 0x29b   : > { %v2565_v57 = vpack.c.bf16 %v2383_v61, %v2382_v22  ;;  %v1762_v22 = vadd.f32 %v11464_v6, %v11200_v59 }
 0x29d   : > { %v2766_v41 = vunpack.c.l.bf16 %v2565_v57  ;;  %v2767_v56 = vunpack.c.h.bf16 %v2565_v57  ;;  %v11562_v18 = vpop.f32.mrf.mxu2 }
 0x29e   : > { %v1847_v50 = vpop.f32.mrf.mxu1  ;;  %13802 = vst [vmem:[#allocation45_spill] sm:$0xff] %v11562_v18 }
 0x29f   : > { %v1848_v32 = vadd.f32 %v1847_v50, %v11207_v9  ;;  %v3087_v23 = vmax.f32 %v3086_v48, %v2766_v41  ;;  %v3108_v36 = vmax.f32 %v3107_v34, %v2767_v56  ;;  %v1764_v50 = vadd.f32 %v11481_v45, %v11200_v59 }
 0x2a0   : > { %v11554_v1 = vpop.f32.mrf.mxu3 }
 0x2a1   : > { %13801 = vst [vmem:[#allocation44_spill] sm:$0xff] %v11554_v1  ;;  %v2391_v55 = vmax.f32 %v1848_v32, 0.0 }
 0x2a2   : > { %v11556_v40 = vpop.f32.mrf.mxu0 }
 0x2a3   : > { %v2569_v60 = vpack.c.bf16 %v2391_v55, %v2390_v4  ;;  %v2398_v4 = vmax.f32 %v1762_v22, 0.0  ;;  %v8269_v22 = vld [vmem:[%s13666_s5 + $0x1b0] sm:$0xf0] }
 0x2a5   : > { %v2774_v61 = vunpack.c.l.bf16 %v2569_v60  ;;  %v2775_v44 = vunpack.c.h.bf16 %v2569_v60  ;;  %1651 = vmatmul.bf16.gmra.mxu3 %v11074_v42  ;;  %2096 = vmatmul.bf16.gmra.mxu0 %v11074_v42 }
 0x2a6   : > { %1938 = vmatmul.bf16.gmra.mxu2 %v11168_v16  ;;  %v1850_v56 = vpop.f32.mrf.mxu1 }
 0x2a7   : > { %v3088_v41 = vmax.f32 %v3087_v23, %v2774_v61  ;;  %v3109_v57 = vmax.f32 %v3108_v36, %v2775_v44  ;;  %v1851_v48 = vadd.f32 %v1850_v56, %v11207_v9  ;;  %v9889_v36 = vld [vmem:[%s13666_s5 + $0x194] sm:$0xf]  ;;  %v11580_v61 = vpop.f32.mrf.mxu2 }
 0x2a8   : > { %v11566_v34 = vpop.f32.mrf.mxu3  ;;  %13804 = vst [vmem:[#allocation47_spill] sm:$0xff] %v11580_v61  ;;  %v8272_v45 = vor.u32 %v9889_v36, %v8269_v22 }
 0x2a9   : > { %13803 = vst [vmem:[#allocation46_spill] sm:$0xff] %v11566_v34  ;;  %v2399_v49 = vmax.f32 %v1851_v48, 0.0  ;;  %2165 = vmatmul.bf16.gmra.mxu1 %v11023_v38  ;;  %v2406_v48 = vmax.f32 %v1764_v50, 0.0 }
 0x2aa   : > { %v11569_v60 = vpop.f32.mrf.mxu0  ;;  %1970 = vmatpush.bf16.msra.mxu3 %v8272_v45 }
 0x2ab   : > { %v2573_v6 = vpack.c.bf16 %v2399_v49, %v2398_v4 }
 0x2ad   : > { %v2782_v32 = vunpack.c.l.bf16 %v2573_v6  ;;  %v2783_v55 = vunpack.c.h.bf16 %v2573_v6 }
 0x2ae   : > { %v1852_v1 = vpop.f32.mrf.mxu1 }
 0x2af   : > { %v3089_v18 = vmax.f32 %v3088_v41, %v2782_v32  ;;  %v3110_v23 = vmax.f32 %v3109_v57, %v2783_v55  ;;  %v1853_v44 = vadd.f32 %v1852_v1, %v11207_v9  ;;  %v1767_v1 = vadd.f32 %v11486_v17, %v11200_v59  ;;  %v11595_v17 = vpop.f32.mrf.mxu2 }
 0x2b0   : > { %v11582_v56 = vpop.f32.mrf.mxu3  ;;  %13807 = vst [vmem:[#allocation50_spill] sm:$0xff] %v11595_v17 }
 0x2b1   : > { %13805 = vst [vmem:[#allocation48_spill] sm:$0xff] %v11582_v56  ;;  %v2407_v4 = vmax.f32 %v1853_v44, 0.0  ;;  %v2414_v22 = vmax.f32 %v1767_v1, 0.0 }
 0x2b2   : > { %v11584_v49 = vpop.f32.mrf.mxu0 }
 0x2b3   : > { %v2577_v41 = vpack.c.bf16 %v2407_v4, %v2406_v48 }
 0x2b5   : > { %v2790_v57 = vunpack.c.l.bf16 %v2577_v41  ;;  %v2791_v6 = vunpack.c.h.bf16 %v2577_v41  ;;  %1656 = vmatmul.bf16.gmra.mxu3 %v11081_v51  ;;  %2101 = vmatmul.bf16.gmra.mxu0 %v11081_v51  ;;  %v1769_v41 = vadd.f32 %v11497_v26, %v11200_v59  ;;  %v1772_v26 = vadd.f32 %v11504_v28, %v11200_v59 }
 0x2b6   : > { %1943 = vmatmul.bf16.gmra.mxu2 %v11183_v39  ;;  %v1855_v32 = vpop.f32.mrf.mxu1 }
 0x2b7   : > { %v3090_v55 = vmax.f32 %v3089_v18, %v2790_v57  ;;  %v3111_v36 = vmax.f32 %v3110_v23, %v2791_v6  ;;  %v1856_v50 = vadd.f32 %v1855_v32, %v11207_v9  ;;  %v2422_v1 = vmax.f32 %v1769_v41, 0.0 }
 0x2b8   : > { %v11592_v44 = vpop.f32.mrf.mxu3 }
 0x2b9   : > { %13806 = vst [vmem:[#allocation49_spill] sm:$0xff] %v11592_v44  ;;  %v2415_v45 = vmax.f32 %v1856_v50, 0.0  ;;  %2170 = vmatmul.bf16.gmra.mxu1 %v11047_v5  ;;  %v11605_v44 = vperm.slane %v11196_v53, 0 }
 0x2ba   : > { %v11597_v48 = vpop.f32.mrf.mxu0 }
 0x2bb   : > { %v2581_v4 = vpack.c.bf16 %v2415_v45, %v2414_v22  ;;  %v11609_v22 = vpop.f32.mrf.mxu2 }
 0x2bc   : > { %13809 = vst [vmem:[#allocation52_spill] sm:$0xff] %v11609_v22 }
 0x2bd   : > { %v2798_v61 = vunpack.c.l.bf16 %v2581_v4  ;;  %v2799_v56 = vunpack.c.h.bf16 %v2581_v4 }
 0x2be   : > { %v1857_v18 = vpop.f32.mrf.mxu1 }
 0x2bf   : > { %v3091_v23 = vmax.f32 %v3090_v55, %v2798_v61  ;;  %v3112_v57 = vmax.f32 %v3111_v36, %v2799_v56  ;;  %v1858_v6 = vadd.f32 %v1857_v18, %v11207_v9  ;;  %v11616_v56 = vperm.slane %v11196_v53, 1 }
 0x2c0   : > { %v11602_v32 = vpop.f32.mrf.mxu3  ;;  %v1534_v36 = vadd.f32 %v11106_v10, %v11605_v44  ;;  %v1774_v10 = vadd.f32 %v11521_v52, %v11200_v59  ;;  %v8237_v52 = vld [vmem:[%s13666_s5 + $0x170] sm:$0xf0] }
 0x2c1   : > { %13808 = vst [vmem:[#allocation51_spill] sm:$0xff] %v11602_v32  ;;  %v2423_v50 = vmax.f32 %v1858_v6, 0.0  ;;  %v2430_v6 = vmax.f32 %v1772_v26, 0.0  ;;  %v1536_v26 = vadd.f32 %v11125_v27, %v11605_v44 }
 0x2c2   : > { %v11607_v34 = vpop.f32.mrf.mxu0 }
 0x2c3   : > { %v2585_v17 = vpack.c.bf16 %v2423_v50, %v2422_v1  ;;  %v2236_v50 = vmax.f32 %v1534_v36, 0.0 }
 0x2c5   : > { %v2806_v45 = vunpack.c.l.bf16 %v2585_v17  ;;  %v2807_v61 = vunpack.c.h.bf16 %v2585_v17  ;;  %1661 = vmatmul.bf16.gmra.mxu3 %v11090_v62  ;;  %2106 = vmatmul.bf16.gmra.mxu0 %v11090_v62 }
 0x2c6   : > { %1948 = vmatmul.bf16.gmra.mxu2 %v11204_v8  ;;  %v1860_v55 = vpop.f32.mrf.mxu1 }
 0x2c7   : > { %v3092_v4 = vmax.f32 %v3091_v23, %v2806_v45  ;;  %v3113_v41 = vmax.f32 %v3112_v57, %v2807_v61  ;;  %v1861_v18 = vadd.f32 %v1860_v55, %v11207_v9  ;;  %v11628_v23 = vpop.f32.mrf.mxu2 }
 0x2c8   : > { %v1622_v28 = vpop.f32.mrf.mxu3  ;;  %13810 = vst [vmem:[#allocation53_spill] sm:$0xff] %v11628_v23 }
 0x2c9   : > { %v2431_v17 = vmax.f32 %v1861_v18, 0.0  ;;  %v1623_v1 = vadd.f32 %v1622_v28, %v11616_v56  ;;  %2175 = vmatmul.bf16.gmra.mxu1 %v11060_v20  ;;  %v2438_v28 = vmax.f32 %v1774_v10, 0.0 }
 0x2ca   : > { %v11624_v13 = vpop.f32.mrf.mxu0 }
 0x2cb   : > { %v2589_v53 = vpack.c.bf16 %v2431_v17, %v2430_v6  ;;  %v2237_v22 = vmax.f32 %v1623_v1, 0.0  ;;  %v2244_v1 = vmax.f32 %v1536_v26, 0.0 }
 0x2cd   : > { %v2814_v32 = vunpack.c.l.bf16 %v2589_v53  ;;  %v2815_v5 = vunpack.c.h.bf16 %v2589_v53  ;;  %v2492_v38 = vpack.c.bf16 %v2237_v22, %v2236_v50  ;;  %v9881_v22 = vld [vmem:[%s13666_s5 + $0x154] sm:$0xf] }
 0x2ce   : > { %v1862_v57 = vpop.f32.mrf.mxu1  ;;  %v8240_v17 = vor.u32 %v9881_v22, %v8237_v52 }
 0x2cf   : > { %v3093_v45 = vmax.f32 %v3092_v4, %v2814_v32  ;;  %v3114_v61 = vmax.f32 %v3113_v41, %v2815_v5  ;;  %v1863_v55 = vadd.f32 %v1862_v57, %v11207_v9  ;;  %v1777_v5 = vadd.f32 %v11536_v21, %v11200_v59  ;;  %v11650_v52 = vpop.f32.mrf.mxu2 }
 0x2d0   : > { %v1624_v36 = vpop.f32.mrf.mxu3  ;;  %1971 = vmatpush.bf16.msra.mxu3 %v8240_v17  ;;  %v1539_v41 = vadd.f32 %v11145_v47, %v11605_v44  ;;  %v2620_v50 = vunpack.c.l.bf16 %v2492_v38  ;;  %v2621_v26 = vunpack.c.h.bf16 %v2492_v38 }
 0x2d1   : > { %v1625_v18 = vadd.f32 %v1624_v36, %v11616_v56  ;;  %v2439_v6 = vmax.f32 %v1863_v55, 0.0  ;;  %v2446_v22 = vmax.f32 %v1777_v5, 0.0  ;;  %v1541_v5 = vadd.f32 %v11164_v3, %v11605_v44 }
 0x2d2   : > { %v11647_v21 = vpop.f32.mrf.mxu0  ;;  %v2252_v38 = vmax.f32 %v1539_v41, 0.0 }
 0x2d3   : > { %v2245_v27 = vmax.f32 %v1625_v18, 0.0  ;;  %v2593_v32 = vpack.c.bf16 %v2439_v6, %v2438_v28 }
 0x2d5   : > { %v2496_v4 = vpack.c.bf16 %v2245_v27, %v2244_v1  ;;  %1666 = vmatmul.bf16.gmra.mxu3 %v11129_v35  ;;  %2111 = vmatmul.bf16.gmra.mxu0 %v11129_v35  ;;  %v2822_v53 = vunpack.c.l.bf16 %v2593_v32  ;;  %v2823_v10 = vunpack.c.h.bf16 %v2593_v32 }
 0x2d6   : > { %1953 = vmatmul.bf16.gmra.mxu2 %v11279_v63  ;;  %v1865_v57 = vpop.f32.mrf.mxu1 }
 0x2d7   : > { %v2628_v55 = vunpack.c.l.bf16 %v2496_v4  ;;  %v2629_v36 = vunpack.c.h.bf16 %v2496_v4  ;;  %v1866_v18 = vadd.f32 %v1865_v57, %v11207_v9  ;;  %v3094_v28 = vmax.f32 %v3093_v45, %v2822_v53 }
 0x2d8   : > { %v3115_v6 = vmax.f32 %v3114_v61, %v2823_v10  ;;  %v1627_v17 = vpop.f32.mrf.mxu3  ;;  %v1779_v45 = vadd.f32 %v11547_v37, %v11200_v59 }
 0x2d9   : > { %v2876_v47 = vmax.f32 %v2620_v50, %v2628_v55  ;;  %v2897_v1 = vmax.f32 %v2621_v26, %v2629_v36  ;;  %v2447_v27 = vmax.f32 %v1866_v18, 0.0  ;;  %v1628_v32 = vadd.f32 %v1627_v17, %v11616_v56  ;;  %2180 = vmatmul.bf16.gmra.mxu1 %v11067_v29  ;;  %v11662_v17 = vpop.f32.mrf.mxu2 }
 0x2da   : > { %v11659_v18 = vpop.f32.mrf.mxu0 }
 0x2db   : > { %v2597_v23 = vpack.c.bf16 %v2447_v27, %v2446_v22  ;;  %v2253_v4 = vmax.f32 %v1628_v32, 0.0  ;;  %v2454_v22 = vmax.f32 %v1779_v45, 0.0  ;;  %v2260_v27 = vmax.f32 %v1541_v5, 0.0 }
 0x2dd   : > { %v2830_v20 = vunpack.c.l.bf16 %v2597_v23  ;;  %v2831_v25 = vunpack.c.h.bf16 %v2597_v23  ;;  %v2500_v24 = vpack.c.bf16 %v2253_v4, %v2252_v38 }
 0x2de   : > { %v1867_v61 = vpop.f32.mrf.mxu1 }
 0x2df   : > { %v3095_v50 = vmax.f32 %v3094_v28, %v2830_v20  ;;  %v3116_v53 = vmax.f32 %v3115_v6, %v2831_v25  ;;  %v2636_v10 = vunpack.c.l.bf16 %v2500_v24  ;;  %v2637_v57 = vunpack.c.h.bf16 %v2500_v24 }
 0x2e0   : > { %v1868_v26 = vadd.f32 %v1867_v61, %v11207_v9  ;;  %v1629_v55 = vpop.f32.mrf.mxu3  ;;  %v1782_v25 = vadd.f32 %v11556_v40, %v11200_v59 }
 0x2e1   : > { %v2877_v41 = vmax.f32 %v2876_v47, %v2636_v10  ;;  %v2898_v36 = vmax.f32 %v2897_v1, %v2637_v57  ;;  %v1630_v23 = vadd.f32 %v1629_v55, %v11616_v56  ;;  %v1544_v1 = vadd.f32 %v11172_v19, %v11605_v44 }
 0x2e2   : > { %v2455_v3 = vmax.f32 %v1868_v26, 0.0  ;;  %v2462_v5 = vmax.f32 %v1782_v25, 0.0 }
 0x2e3   : > { %v2261_v37 = vmax.f32 %v1630_v23, 0.0  ;;  %v2268_v23 = vmax.f32 %v1544_v1, 0.0 }
 0x2e4   : > { %v2601_v20 = vpack.c.bf16 %v2455_v3, %v2454_v22  ;;  %v11674_v22 = vpop.f32.mrf.mxu0 }
 0x2e5   : > { %v2504_v24 = vpack.c.bf16 %v2261_v37, %v2260_v27  ;;  %1671 = vmatmul.bf16.gmra.mxu3 %v11168_v16  ;;  %2116 = vmatmul.bf16.gmra.mxu0 %v11168_v16  ;;  %v11676_v27 = vpop.f32.mrf.mxu2 }
 0x2e6   : > { %v2838_v28 = vunpack.c.l.bf16 %v2601_v20  ;;  %v2839_v6 = vunpack.c.h.bf16 %v2601_v20  ;;  %1958 = vmatmul.bf16.gmra.mxu2 %v11348_v0  ;;  %v1870_v47 = vpop.f32.mrf.mxu1 }
 0x2e7   : > { %v2644_v32 = vunpack.c.l.bf16 %v2504_v24  ;;  %v2645_v38 = vunpack.c.h.bf16 %v2504_v24  ;;  %v1871_v4 = vadd.f32 %v1870_v47, %v11207_v9 }
 0x2e8   : > { %v3096_v40 = vmax.f32 %v3095_v50, %v2838_v28  ;;  %v3117_v45 = vmax.f32 %v3116_v53, %v2839_v6  ;;  %v1632_v61 = vpop.f32.mrf.mxu3  ;;  %v1546_v50 = vadd.f32 %v11179_v33, %v11605_v44  ;;  %v1784_v53 = vadd.f32 %v11569_v60, %v11200_v59 }
 0x2e9   : > { %v2878_v10 = vmax.f32 %v2877_v41, %v2644_v32  ;;  %v2899_v57 = vmax.f32 %v2898_v36, %v2645_v38  ;;  %v2463_v26 = vmax.f32 %v1871_v4, 0.0  ;;  %v1633_v55 = vadd.f32 %v1632_v61, %v11616_v56  ;;  %2185 = vmatmul.bf16.gmra.mxu1 %v11074_v42 }
 0x2ea   : > { %v1787_v33 = vadd.f32 %v11584_v49, %v11200_v59 }
 0x2eb   : > { %v2605_v3 = vpack.c.bf16 %v2463_v26, %v2462_v5  ;;  %v2269_v19 = vmax.f32 %v1633_v55, 0.0  ;;  %v2470_v5 = vmax.f32 %v1784_v53, 0.0  ;;  %v2276_v26 = vmax.f32 %v1546_v50, 0.0 }
 0x2ec   : > { %v2478_v50 = vmax.f32 %v1787_v33, 0.0 }
 0x2ed   : > { %v2846_v37 = vunpack.c.l.bf16 %v2605_v3  ;;  %v2847_v20 = vunpack.c.h.bf16 %v2605_v3  ;;  %v2508_v25 = vpack.c.bf16 %v2269_v19, %v2268_v23  ;;  %v11686_v23 = vpop.f32.mrf.mxu0  ;;  %v1549_v19 = vadd.f32 %v11190_v46, %v11605_v44 }
 0x2ee   : > { %v1872_v41 = vpop.f32.mrf.mxu1 }
 0x2ef   : > { %v3097_v36 = vmax.f32 %v3096_v40, %v2846_v37  ;;  %v3118_v24 = vmax.f32 %v3117_v45, %v2847_v20  ;;  %v2652_v28 = vunpack.c.l.bf16 %v2508_v25  ;;  %v2653_v6 = vunpack.c.h.bf16 %v2508_v25  ;;  %v11690_v45 = vpop.f32.mrf.mxu2 }
 0x2f0   : > { %v1873_v47 = vadd.f32 %v1872_v41, %v11207_v9  ;;  %v1634_v1 = vpop.f32.mrf.mxu3  ;;  %v2933_v25 = vrot.slane %v11511_v31, 4 }
 0x2f1   : > { %v2879_v32 = vmax.f32 %v2878_v10, %v2652_v28  ;;  %v2900_v38 = vmax.f32 %v2899_v57, %v2653_v6  ;;  %v1635_v4 = vadd.f32 %v1634_v1, %v11616_v56  ;;  %v9873_v6 = vld [vmem:[%s13666_s5 + $0x114] sm:$0xf] }
 0x2f2   : > { %v2471_v61 = vmax.f32 %v1873_v47, 0.0  ;;  %v8205_v47 = vld [vmem:[%s13666_s5 + $0x130] sm:$0xf0]  ;;  %v2934_v33 = vmax.f32 %v11511_v31, %v2933_v25  ;;  %v10438_v25 = vld [vmem:[%s13667_s6] sm:$0xff] }
 0x2f3   : > { %v2277_v55 = vmax.f32 %v1635_v4, 0.0 }
 0x2f4   : > { %v2609_v60 = vpack.c.bf16 %v2471_v61, %v2470_v5  ;;  %v2954_v61 = vrot.slane %v11513_v12, 4  ;;  %v2935_v31 = vrot.slane %v2934_v33, 2 }
 0x2f5   : > { %v2512_v40 = vpack.c.bf16 %v2277_v55, %v2276_v26  ;;  %1676 = vmatmul.bf16.gmra.mxu3 %v11183_v39  ;;  %2121 = vmatmul.bf16.gmra.mxu0 %v11183_v39 }
 0x2f6   : > { %v2854_v10 = vunpack.c.l.bf16 %v2609_v60  ;;  %v2855_v57 = vunpack.c.h.bf16 %v2609_v60  ;;  %1963 = vmatmul.bf16.gmra.mxu2 %v11370_v14  ;;  %v1875_v3 = vpop.f32.mrf.mxu1 }
 0x2f7   : > { %v2660_v37 = vunpack.c.l.bf16 %v2512_v40  ;;  %v2661_v49 = vunpack.c.h.bf16 %v2512_v40  ;;  %v1876_v20 = vadd.f32 %v1875_v3, %v11207_v9 }
 0x2f8   : > { %v3098_v53 = vmax.f32 %v3097_v36, %v2854_v10  ;;  %v3119_v41 = vmax.f32 %v3118_v24, %v2855_v57  ;;  %v1637_v28 = vpop.f32.mrf.mxu3  ;;  %v8208_v36 = vor.u32 %v9873_v6, %v8205_v47  ;;  %v2284_v24 = vmax.f32 %v1549_v19, 0.0 }
 0x2f9   : > { %v2880_v1 = vmax.f32 %v2879_v32, %v2660_v37  ;;  %v2901_v46 = vmax.f32 %v2900_v38, %v2661_v49  ;;  %v2479_v4 = vmax.f32 %v1876_v20, 0.0  ;;  %v1638_v5 = vadd.f32 %v1637_v28, %v11616_v56  ;;  %2190 = vmatmul.bf16.gmra.mxu1 %v11081_v51  ;;  %v11712_v37 = vpop.f32.mrf.mxu0 }
 0x2fa   : > { %1972 = vmatpush.bf16.msra.mxu3 %v8208_v36  ;;  %v1551_v32 = vadd.f32 %v11225_v30, %v11605_v44  ;;  %v2955_v38 = vmax.f32 %v11513_v12, %v2954_v61  ;;  %v1789_v57 = vadd.f32 %v11597_v48, %v11200_v59  ;;  %v11717_v28 = vperm.slane %v10438_v25, 6 }
 0x2fb   : > { %v2613_v26 = vpack.c.bf16 %v2479_v4, %v2478_v50  ;;  %v2285_v55 = vmax.f32 %v1638_v5, 0.0  ;;  %v11721_v61 = vperm.slane %v10438_v25, 7  ;;  %v2936_v36 = vmax.f32 %v2934_v33, %v2935_v31 }
 0x2fc   : > { %v2486_v48 = vmax.f32 %v1789_v57, 0.0 }
 0x2fd   : > { %v2862_v60 = vunpack.c.l.bf16 %v2613_v26  ;;  %v2863_v40 = vunpack.c.h.bf16 %v2613_v26  ;;  %v2516_v10 = vpack.c.bf16 %v2285_v55, %v2284_v24  ;;  %v2068_v24 = vadd.f32 %v11607_v34, %v11717_v28 }
 0x2fe   : > { %v1877_v3 = vpop.f32.mrf.mxu1  ;;  %v2937_v57 = vrot.slane %v2936_v36, 1 }
 0x2ff   : > { %v3099_v19 = vmax.f32 %v3098_v53, %v2862_v60  ;;  %v3120_v49 = vmax.f32 %v3119_v41, %v2863_v40  ;;  %v2668_v20 = vunpack.c.l.bf16 %v2516_v10  ;;  %v2669_v50 = vunpack.c.h.bf16 %v2516_v10 }
 0x300   : > { %v1878_v30 = vadd.f32 %v1877_v3, %v11207_v9  ;;  %v1639_v12 = vpop.f32.mrf.mxu3  ;;  %v2292_v53 = vmax.f32 %v1551_v32, 0.0  ;;  %v2956_v41 = vrot.slane %v2955_v38, 2  ;;  %v1554_v9 = vadd.f32 %v11263_v43, %v11605_v44 }
 0x301   : > { %v2881_v6 = vmax.f32 %v2880_v1, %v2668_v20  ;;  %v2902_v47 = vmax.f32 %v2901_v46, %v2669_v50  ;;  %v1640_v59 = vadd.f32 %v1639_v12, %v11616_v56  ;;  %v2242_v3 = vmax.f32 %v2068_v24, 0.0  ;;  %v11730_v31 = vpop.f32.mrf.mxu0 }
 0x302   : > { %v2487_v4 = vmax.f32 %v1878_v30, 0.0  ;;  %v2957_v40 = vmax.f32 %v2955_v38, %v2956_v41 }
 0x303   : > { %v2293_v5 = vmax.f32 %v1640_v59, 0.0 }
 0x304   : > { %v2617_v26 = vpack.c.bf16 %v2487_v4, %v2486_v48  ;;  %v2300_v48 = vmax.f32 %v1554_v9, 0.0  ;;  %v2958_v4 = vrot.slane %v2957_v40, 1 }
 0x305   : > { %v2520_v55 = vpack.c.bf16 %v2293_v5, %v2292_v53  ;;  %1681 = vmatmul.bf16.gmra.mxu3 %v11204_v8  ;;  %2126 = vmatmul.bf16.gmra.mxu0 %v11204_v8  ;;  %v2938_v5 = vmax.f32 %v2936_v36, %v2937_v57 }
 0x306   : > { %v2870_v1 = vunpack.c.l.bf16 %v2617_v26  ;;  %v2871_v46 = vunpack.c.h.bf16 %v2617_v26  ;;  %v2156_v60 = vpop.f32.mrf.mxu1 }
 0x307   : > { %v2676_v10 = vunpack.c.l.bf16 %v2520_v55  ;;  %v2677_v32 = vunpack.c.h.bf16 %v2520_v55  ;;  %v2157_v33 = vadd.f32 %v2156_v60, %v11721_v61 }
 0x308   : > { %v3100_v34 = vmax.f32 %v3099_v19, %v2870_v1  ;;  %v3121_v20 = vmax.f32 %v3120_v49, %v2871_v46  ;;  %v1642_v50 = vpop.f32.mrf.mxu3  ;;  %v2070_v19 = vadd.f32 %v11624_v13, %v11717_v28  ;;  %v2959_v46 = vmax.f32 %v2957_v40, %v2958_v4  ;;  %v8173_v40 = vld [vmem:[%s13666_s5 + $0xf0] sm:$0xf0] }
 0x309   : > { %v2882_v25 = vmax.f32 %v2881_v6, %v2676_v10  ;;  %v2903_v30 = vmax.f32 %v2902_v47, %v2677_v32  ;;  %v2243_v12 = vmax.f32 %v2157_v33, 0.0  ;;  %v1643_v43 = vadd.f32 %v1642_v50, %v11616_v56  ;;  %2195 = vmatmul.bf16.gmra.mxu1 %v11090_v62 }
 0x30a   : > { %v3101_v59 = vrot.slane %v3100_v34, 4  ;;  %v3122_v38 = vrot.slane %v3121_v20, 4  ;;  %v1556_v6 = vadd.f32 %v11314_v15, %v11605_v44  ;;  %v3214_v32 = vpack.c.bf16 %v2938_v5, %v2938_v5  ;;  %v9865_v15 = vld [vmem:[%s13666_s5 + $0xd4] sm:$0xf] }
 0x30b   : > { %v2495_v53 = vpack.c.bf16 %v2243_v12, %v2242_v3  ;;  %v2301_v41 = vmax.f32 %v1643_v43, 0.0  ;;  %v2250_v33 = vmax.f32 %v2070_v19, 0.0 }
 0x30c   : > { %v3102_v49 = vmax.f32 %v3100_v34, %v3101_v59  ;;  %v3123_v24 = vmax.f32 %v3121_v20, %v3122_v38  ;;  %v2308_v12 = vmax.f32 %v1556_v6, 0.0  ;;  %v8176_v38 = vor.u32 %v9865_v15, %v8173_v40 }
 0x30d   : > { %v2524_v26 = vpack.c.bf16 %v2301_v41, %v2300_v48  ;;  %v1559_v48 = vadd.f32 %v11350_v58, %v11605_v44  ;;  %v3512_v5 = vunpack.c.l.b16 %v3214_v32  ;;  %v2073_v58 = vadd.f32 %v11647_v21, %v11717_v28  ;;  %v8141_v21 = vld [vmem:[%s13666_s5 + $0xb0] sm:$0xf0] }
 0x30e   : > { %v3103_v47 = vrot.slane %v3102_v49, 2  ;;  %v3124_v55 = vrot.slane %v3123_v24, 2  ;;  %v2158_v1 = vpop.f32.mrf.mxu1  ;;  %1973 = vmatpush.bf16.msra.mxu3 %v8176_v38 }
 0x30f   : > { %v2684_v60 = vunpack.c.l.bf16 %v2524_v26  ;;  %v2685_v10 = vunpack.c.h.bf16 %v2524_v26  ;;  %v2159_v9 = vadd.f32 %v2158_v1, %v11721_v61  ;;  %v2627_v26 = vunpack.c.h.bf16 %v2495_v53 }
 0x310   : > { %v3104_v36 = vmax.f32 %v3102_v49, %v3103_v47  ;;  %v3125_v57 = vmax.f32 %v3123_v24, %v3124_v55  ;;  %v1644_v3 = vpop.f32.mrf.mxu3  ;;  %v2626_v24 = vunpack.c.l.bf16 %v2495_v53 }
 0x311   : > { %v2883_v13 = vmax.f32 %v2882_v25, %v2684_v60  ;;  %v2904_v34 = vmax.f32 %v2903_v30, %v2685_v10  ;;  %v2251_v20 = vmax.f32 %v2159_v9, 0.0  ;;  %v1645_v50 = vadd.f32 %v1644_v3, %v11616_v56  ;;  %v11748_v30 = vpop.f32.mrf.mxu0 }
 0x312   : > { %v3105_v43 = vrot.slane %v3104_v36, 1  ;;  %v3126_v59 = vrot.slane %v3125_v57, 1  ;;  %v3215_v25 = vpack.c.bf16 %v2959_v46, %v2959_v46 }
 0x313   : > { %v2499_v4 = vpack.c.bf16 %v2251_v20, %v2250_v33  ;;  %v2309_v41 = vmax.f32 %v1645_v50, 0.0  ;;  %v9857_v50 = vld [vmem:[%s13666_s5 + $0x94] sm:$0xf] }
 0x314   : > { %v3106_v19 = vmax.f32 %v3104_v36, %v3105_v43  ;;  %v3127_v49 = vmax.f32 %v3125_v57, %v3126_v59  ;;  %v3513_v36 = vunpack.c.l.b16 %v3215_v25  ;;  %v8144_v43 = vor.u32 %v9857_v50, %v8141_v21 }
 0x315   : > { %v2634_v47 = vunpack.c.l.bf16 %v2499_v4  ;;  %v2635_v55 = vunpack.c.h.bf16 %v2499_v4  ;;  %v2528_v6 = vpack.c.bf16 %v2309_v41, %v2308_v12  ;;  %1686 = vmatmul.bf16.gmra.mxu3 %v11279_v63  ;;  %2131 = vmatmul.bf16.gmra.mxu0 %v11279_v63  ;;  %v2258_v59 = vmax.f32 %v2073_v58, 0.0 }
 0x316   : > { %v3222_v1 = vpack.c.bf16 %v3106_v19, %v3106_v19  ;;  %v3223_v46 = vpack.c.bf16 %v3127_v49, %v3127_v49  ;;  %v2161_v60 = vpop.f32.mrf.mxu1  ;;  %v2316_v41 = vmax.f32 %v1559_v48, 0.0  ;;  %1974 = vmatpush.bf16.msra.mxu3 %v8144_v43  ;;  %v9849_v49 = vld [vmem:[%s13666_s5 + $0x54] sm:$0xf]  ;;  %v1561_v58 = vadd.f32 %v11365_v7, %v11605_v44 }
 0x317   : > { %v3002_v10 = vmax.f32 %v2626_v24, %v2634_v47  ;;  %v3023_v9 = vmax.f32 %v2627_v26, %v2635_v55  ;;  %v2692_v32 = vunpack.c.l.bf16 %v2528_v6  ;;  %v2693_v33 = vunpack.c.h.bf16 %v2528_v6  ;;  %v8109_v24 = vld [vmem:[%s13666_s5 + $0x70] sm:$0xf0] }
 0x318   : > { %v3520_v53 = vunpack.c.l.b16 %v3222_v1  ;;  %v3521_v57 = vunpack.c.l.b16 %v3223_v46  ;;  %v2162_v3 = vadd.f32 %v2161_v60, %v11721_v61  ;;  %v1647_v20 = vpop.f32.mrf.mxu3  ;;  %v8112_v47 = vor.u32 %v9849_v49, %v8109_v24 }
 0x319   : > { %v2884_v15 = vmax.f32 %v2883_v13, %v2692_v32  ;;  %v2905_v40 = vmax.f32 %v2904_v34, %v2693_v33  ;;  %v1648_v12 = vadd.f32 %v1647_v20, %v11616_v56  ;;  %2200 = vmatmul.bf16.gmra.mxu1 %v11129_v35  ;;  %v2075_v13 = vadd.f32 %v11659_v18, %v11717_v28 }
 0x31a   : > { %v2259_v38 = vmax.f32 %v2162_v3, 0.0  ;;  %v11764_v25 = vsel %vm3526_vm3, %v3520_v53, %v3512_v5  ;;  %v11767_v4 = vsel %vm3526_vm3, %v3521_v57, %v3513_v36  ;;  %v11777_v5 = vpop.f32.mrf.mxu0  ;;  %1975 = vmatpush.bf16.msra.mxu3 %v8112_v47  ;;  %v9841_v53 = vld [vmem:[%s13666_s5 + $0x14] sm:$0xf] }
 0x31b   : > { %13811 = vst [vmem:[#allocation54_spill] sm:$0xff] %v11767_v4  ;;  %v2317_v19 = vmax.f32 %v1648_v12, 0.0  ;;  %v2266_v60 = vmax.f32 %v2075_v13, 0.0  ;;  %v8077_v57 = vld [vmem:[%s13666_s5 + $0x30] sm:$0xf0]  ;;  %v2324_v12 = vmax.f32 %v1561_v58, 0.0 }
 0x31c   : > { %v2503_v34 = vpack.c.bf16 %v2259_v38, %v2258_v59  ;;  %v8080_v21 = vor.u32 %v9841_v53, %v8077_v57  ;;  %v1566_v53 = vadd.f32 %v11386_v2, %v11605_v44 }
 0x31d   : > { %v2532_v26 = vpack.c.bf16 %v2317_v19, %v2316_v41  ;;  %v1564_v41 = vadd.f32 %v11378_v54, %v11605_v44 }
 0x31e   : > { %v2642_v55 = vunpack.c.l.bf16 %v2503_v34  ;;  %v2643_v48 = vunpack.c.h.bf16 %v2503_v34  ;;  %v2163_v6 = vpop.f32.mrf.mxu1  ;;  %1976 = vmatpush.bf16.msra.mxu3 %v8080_v21 }
 0x31f   : > { %v2700_v18 = vunpack.c.l.bf16 %v2532_v26  ;;  %v2701_v1 = vunpack.c.h.bf16 %v2532_v26  ;;  %v2164_v46 = vadd.f32 %v2163_v6, %v11721_v61 }
 0x320   : > { %v3003_v32 = vmax.f32 %v3002_v10, %v2642_v55  ;;  %v3024_v33 = vmax.f32 %v3023_v9, %v2643_v48  ;;  %v1649_v36 = vpop.f32.mrf.mxu3 }
 0x321   : > { %v2885_v3 = vmax.f32 %v2884_v15, %v2700_v18  ;;  %v2906_v20 = vmax.f32 %v2905_v40, %v2701_v1  ;;  %v2267_v7 = vmax.f32 %v2164_v46, 0.0  ;;  %v1650_v50 = vadd.f32 %v1649_v36, %v11616_v56 }
 0x322   : > { %v2078_v15 = vadd.f32 %v11674_v22, %v11717_v28  ;;  %v11795_v19 = vpop.f32.mrf.mxu0  ;;  %v2332_v18 = vmax.f32 %v1564_v41, 0.0  ;;  %v2080_v1 = vadd.f32 %v11686_v23, %v11717_v28 }
 0x323   : > { %v2507_v43 = vpack.c.bf16 %v2267_v7, %v2266_v60  ;;  %v2325_v59 = vmax.f32 %v1650_v50, 0.0 }
 0x324   : > { %v2274_v54 = vmax.f32 %v2078_v15, 0.0  ;;  %v2282_v7 = vmax.f32 %v2080_v1, 0.0 }
 0x325   : > { %v2650_v10 = vunpack.c.l.bf16 %v2507_v43  ;;  %v2651_v9 = vunpack.c.h.bf16 %v2507_v43  ;;  %v2536_v38 = vpack.c.bf16 %v2325_v59, %v2324_v12  ;;  %1691 = vmatmul.bf16.gmra.mxu3 %v11348_v0  ;;  %2136 = vmatmul.bf16.gmra.mxu0 %v11348_v0 }
 0x326   : > { %v2166_v40 = vpop.f32.mrf.mxu1 }
 0x327   : > { %v3004_v13 = vmax.f32 %v3003_v32, %v2650_v10  ;;  %v3025_v34 = vmax.f32 %v3024_v33, %v2651_v9  ;;  %v2708_v49 = vunpack.c.l.bf16 %v2536_v38  ;;  %v2709_v24 = vunpack.c.h.bf16 %v2536_v38 }
 0x328   : > { %v2167_v26 = vadd.f32 %v2166_v40, %v11721_v61  ;;  %v1652_v47 = vpop.f32.mrf.mxu3  ;;  %v2340_v38 = vmax.f32 %v1566_v53, 0.0 }
 0x329   : > { %v2886_v55 = vmax.f32 %v2885_v3, %v2708_v49  ;;  %v2907_v48 = vmax.f32 %v2906_v20, %v2709_v24  ;;  %v1653_v6 = vadd.f32 %v1652_v47, %v11616_v56  ;;  %2205 = vmatmul.bf16.gmra.mxu1 %v11168_v16 }
 0x32a   : > { %v2275_v58 = vmax.f32 %v2167_v26, 0.0  ;;  %v11805_v43 = vpop.f32.mrf.mxu0 }
 0x32b   : > { %v2333_v22 = vmax.f32 %v1653_v6, 0.0 }
 0x32c   : > { %v2511_v46 = vpack.c.bf16 %v2275_v58, %v2274_v54 }
 0x32d   : > { %v2540_v60 = vpack.c.bf16 %v2333_v22, %v2332_v18 }
 0x32e   : > { %v2658_v32 = vunpack.c.l.bf16 %v2511_v46  ;;  %v2659_v33 = vunpack.c.h.bf16 %v2511_v46  ;;  %v2168_v36 = vpop.f32.mrf.mxu1 }
 0x32f   : > { %v2716_v57 = vunpack.c.l.bf16 %v2540_v60  ;;  %v2717_v3 = vunpack.c.h.bf16 %v2540_v60  ;;  %v2169_v20 = vadd.f32 %v2168_v36, %v11721_v61 }
 0x330   : > { %v3005_v50 = vmax.f32 %v3004_v13, %v2658_v32  ;;  %v3026_v21 = vmax.f32 %v3025_v34, %v2659_v33  ;;  %v1654_v12 = vpop.f32.mrf.mxu3  ;;  %v1569_v13 = vadd.f32 %v11405_v11, %v11605_v44  ;;  %v2083_v34 = vadd.f32 %v11712_v37, %v11717_v28 }
 0x331   : > { %v2887_v59 = vmax.f32 %v2886_v55, %v2716_v57  ;;  %v2908_v23 = vmax.f32 %v2907_v48, %v2717_v3  ;;  %v2283_v10 = vmax.f32 %v2169_v20, 0.0  ;;  %v1655_v9 = vadd.f32 %v1654_v12, %v11616_v56  ;;  %v13812_v20 = vld [vmem:[#allocation33_spill] sm:$0xff] }
 0x332   : > { %v2290_v1 = vmax.f32 %v2083_v34, 0.0  ;;  %v2348_v11 = vmax.f32 %v1569_v13, 0.0  ;;  %v11817_v60 = vpop.f32.mrf.mxu0  ;;  %v2085_v32 = vadd.f32 %v11730_v31, %v11717_v28 }
 0x333   : > { %v2515_v41 = vpack.c.bf16 %v2283_v10, %v2282_v7  ;;  %v2341_v15 = vmax.f32 %v1655_v9, 0.0  ;;  %v1571_v7 = vadd.f32 %v13812_v20, %v11605_v44 }
 0x335   : > { %v2666_v40 = vunpack.c.l.bf16 %v2515_v41  ;;  %v2667_v2 = vunpack.c.h.bf16 %v2515_v41  ;;  %v2544_v49 = vpack.c.bf16 %v2341_v15, %v2340_v38  ;;  %1696 = vmatmul.bf16.gmra.mxu3 %v11370_v14  ;;  %2141 = vmatmul.bf16.gmra.mxu0 %v11370_v14 }
 0x336   : > { %v2171_v24 = vpop.f32.mrf.mxu1 }
 0x337   : > { %v3006_v26 = vmax.f32 %v3005_v50, %v2666_v40  ;;  %v3027_v47 = vmax.f32 %v3026_v21, %v2667_v2  ;;  %v2724_v55 = vunpack.c.l.bf16 %v2544_v49  ;;  %v2725_v48 = vunpack.c.h.bf16 %v2544_v49 }
 0x338   : > { %v2172_v6 = vadd.f32 %v2171_v24, %v11721_v61  ;;  %v1657_v54 = vpop.f32.mrf.mxu3  ;;  %v2356_v40 = vmax.f32 %v1571_v7, 0.0 }
 0x339   : > { %v2888_v58 = vmax.f32 %v2887_v59, %v2724_v55  ;;  %v2909_v18 = vmax.f32 %v2908_v23, %v2725_v48  ;;  %v1658_v22 = vadd.f32 %v1657_v54, %v11616_v56  ;;  %2210 = vmatmul.bf16.gmra.mxu1 %v11183_v39  ;;  %v2298_v59 = vmax.f32 %v2085_v32, 0.0  ;;  %v13813_v48 = vld [vmem:[#allocation21_spill] sm:$0xff] }
 0x33a   : > { %v2291_v46 = vmax.f32 %v2172_v6, 0.0  ;;  %v11825_v13 = vpop.f32.mrf.mxu0  ;;  %v13814_v6 = vld [vmem:[#allocation34_spill] sm:$0xff] }
 0x33b   : > { %v2349_v37 = vmax.f32 %v1658_v22, 0.0 }
 0x33c   : > { %v2519_v33 = vpack.c.bf16 %v2291_v46, %v2290_v1 }
 0x33d   : > { %v2548_v36 = vpack.c.bf16 %v2349_v37, %v2348_v11 }
 0x33e   : > { %v2674_v53 = vunpack.c.l.bf16 %v2519_v33  ;;  %v2675_v57 = vunpack.c.h.bf16 %v2519_v33  ;;  %v2173_v3 = vpop.f32.mrf.mxu1 }
 0x33f   : > { %v2732_v50 = vunpack.c.l.bf16 %v2548_v36  ;;  %v2733_v21 = vunpack.c.h.bf16 %v2548_v36  ;;  %v2174_v12 = vadd.f32 %v2173_v3, %v11721_v61 }
 0x340   : > { %v3007_v23 = vmax.f32 %v3006_v26, %v2674_v53  ;;  %v3028_v10 = vmax.f32 %v3027_v47, %v2675_v57  ;;  %v1659_v9 = vpop.f32.mrf.mxu3  ;;  %v1574_v26 = vadd.f32 %v13814_v6, %v11605_v44  ;;  %v2088_v47 = vadd.f32 %v11748_v30, %v11717_v28 }
 0x341   : > { %v2889_v38 = vmax.f32 %v2888_v58, %v2732_v50  ;;  %v2910_v41 = vmax.f32 %v2909_v18, %v2733_v21  ;;  %v2299_v15 = vmax.f32 %v2174_v12, 0.0  ;;  %v1660_v31 = vadd.f32 %v1659_v9, %v11616_v56  ;;  %v13815_v12 = vld [vmem:[#allocation35_spill] sm:$0xff] }
 0x342   : > { %v2306_v36 = vmax.f32 %v2088_v47, 0.0  ;;  %v2364_v57 = vmax.f32 %v1574_v26, 0.0 }
 0x343   : > { %v2523_v2 = vpack.c.bf16 %v2299_v15, %v2298_v59  ;;  %v2357_v49 = vmax.f32 %v1660_v31, 0.0  ;;  %v1576_v59 = vadd.f32 %v13815_v12, %v11605_v44 }
 0x345   : > { %v2682_v34 = vunpack.c.l.bf16 %v2523_v2  ;;  %v2683_v24 = vunpack.c.h.bf16 %v2523_v2  ;;  %v2552_v55 = vpack.c.bf16 %v2357_v49, %v2356_v40  ;;  %1977 = vmatmul.bf16.vlgmr.msra.gmra.mxu3 %v13813_v48  ;;  %v2372_v2 = vmax.f32 %v1576_v59, 0.0  ;;  %v13816_v48 = vld [vmem:[#allocation24_spill] sm:$0xff] }
 0x346   : > { %v2176_v54 = vpop.f32.mrf.mxu1 }
 0x347   : > { %v3008_v58 = vmax.f32 %v3007_v23, %v2682_v34  ;;  %v3029_v18 = vmax.f32 %v3028_v10, %v2683_v24  ;;  %v2740_v22 = vunpack.c.l.bf16 %v2552_v55  ;;  %v2741_v1 = vunpack.c.h.bf16 %v2552_v55  ;;  %v11843_v10 = vpop.f32.mrf.mxu0 }
 0x348   : > { %v2177_v46 = vadd.f32 %v2176_v54, %v11721_v61  ;;  %v1662_v11 = vpop.f32.mrf.mxu3  ;;  %v2090_v23 = vadd.f32 %v11777_v5, %v11717_v28  ;;  %v2093_v5 = vadd.f32 %v11795_v19, %v11717_v28 }
 0x349   : > { %v11833_v37 = vmax.f32 %v2889_v38, %v2740_v22  ;;  %v11835_v32 = vmax.f32 %v2910_v41, %v2741_v1  ;;  %v1663_v33 = vadd.f32 %v1662_v11, %v11616_v56  ;;  %2215 = vmatmul.bf16.gmra.mxu1 %v11204_v8 }
 0x34a   : > { %v2307_v53 = vmax.f32 %v2177_v46, 0.0  ;;  %v2314_v49 = vmax.f32 %v2090_v23, 0.0 }
 0x34b   : > { %v2365_v30 = vmax.f32 %v1663_v33, 0.0 }
 0x34c   : > { %v2527_v3 = vpack.c.bf16 %v2307_v53, %v2306_v36 }
 0x34d   : > { %v2556_v20 = vpack.c.bf16 %v2365_v30, %v2364_v57  ;;  %v2322_v57 = vmax.f32 %v2093_v5, 0.0 }
 0x34e   : > { %v2690_v7 = vunpack.c.l.bf16 %v2527_v3  ;;  %v2691_v50 = vunpack.c.h.bf16 %v2527_v3  ;;  %v2178_v21 = vpop.f32.mrf.mxu1 }
 0x34f   : > { %v2179_v41 = vadd.f32 %v2178_v21, %v11721_v61  ;;  %v2748_v26 = vunpack.c.l.bf16 %v2556_v20  ;;  %v2749_v47 = vunpack.c.h.bf16 %v2556_v20  ;;  %v11853_v11 = vpop.f32.mrf.mxu0 }
 0x350   : > { %v3009_v9 = vmax.f32 %v3008_v58, %v2690_v7  ;;  %v3030_v38 = vmax.f32 %v3029_v18, %v2691_v50  ;;  %v1664_v15 = vpop.f32.mrf.mxu3  ;;  %v13817_v18 = vld [vmem:[#allocation36_spill] sm:$0xff] }
 0x351   : > { %v1665_v31 = vadd.f32 %v1664_v15, %v11616_v56  ;;  %v2315_v40 = vmax.f32 %v2179_v41, 0.0  ;;  %v1579_v22 = vadd.f32 %v13817_v18, %v11605_v44 }
 0x353   : > { %v2373_v34 = vmax.f32 %v1665_v31, 0.0  ;;  %v2531_v24 = vpack.c.bf16 %v2315_v40, %v2314_v49  ;;  %v2380_v20 = vmax.f32 %v1579_v22, 0.0  ;;  %v13818_v31 = vld [vmem:[#allocation37_spill] sm:$0xff] }
 0x354   : > { %v1581_v40 = vadd.f32 %v13818_v31, %v11605_v44 }
 0x355   : > { %v2560_v55 = vpack.c.bf16 %v2373_v34, %v2372_v2  ;;  %1982 = vmatmul.bf16.gmra.mxu3 %v13816_v48  ;;  %v2698_v33 = vunpack.c.l.bf16 %v2531_v24  ;;  %v2699_v19 = vunpack.c.h.bf16 %v2531_v24  ;;  %v2095_v2 = vadd.f32 %v11805_v43, %v11717_v28 }
 0x356   : > { %v2181_v6 = vpop.f32.mrf.mxu1  ;;  %v2098_v43 = vadd.f32 %v11817_v60, %v11717_v28 }
 0x357   : > { %v2756_v54 = vunpack.c.l.bf16 %v2560_v55  ;;  %v2757_v58 = vunpack.c.h.bf16 %v2560_v55  ;;  %v2182_v1 = vadd.f32 %v2181_v6, %v11721_v61  ;;  %v3010_v21 = vmax.f32 %v3009_v9, %v2698_v33 }
 0x358   : > { %v1667_v46 = vpop.f32.mrf.mxu3  ;;  %v3031_v12 = vmax.f32 %v3030_v38, %v2699_v19  ;;  %v2330_v18 = vmax.f32 %v2095_v2, 0.0 }
 0x359   : > { %v3044_v36 = vmax.f32 %v2748_v26, %v2756_v54  ;;  %v3065_v53 = vmax.f32 %v2749_v47, %v2757_v58  ;;  %2220 = vmatmul.bf16.gmra.mxu1 %v11279_v63  ;;  %v2323_v30 = vmax.f32 %v2182_v1, 0.0  ;;  %v1668_v3 = vadd.f32 %v1667_v46, %v11616_v56  ;;  %v11863_v54 = vpop.f32.mrf.mxu0  ;;  %v13819_v1 = vld [vmem:[#allocation27_spill] sm:$0xff] }
 0x35a   : > { %v2388_v47 = vmax.f32 %v1581_v40, 0.0 }
 0x35b   : > { %v2535_v7 = vpack.c.bf16 %v2323_v30, %v2322_v57  ;;  %v2381_v50 = vmax.f32 %v1668_v3, 0.0  ;;  %v13820_v57 = vld [vmem:[#allocation38_spill] sm:$0xff] }
 0x35c   : > { %v1584_v19 = vadd.f32 %v13820_v57, %v11605_v44  ;;  %v11881_v57 = vpop.f32.mrf.mxu2 }
 0x35d   : > { %v2706_v59 = vunpack.c.l.bf16 %v2535_v7  ;;  %v2707_v23 = vunpack.c.h.bf16 %v2535_v7  ;;  %v2564_v41 = vpack.c.bf16 %v2381_v50, %v2380_v20 }
 0x35e   : > { %v2183_v15 = vpop.f32.mrf.mxu1 }
 0x35f   : > { %v2184_v49 = vadd.f32 %v2183_v15, %v11721_v61  ;;  %v3011_v34 = vmax.f32 %v3010_v21, %v2706_v59  ;;  %v3032_v24 = vmax.f32 %v3031_v12, %v2707_v23  ;;  %v2764_v55 = vunpack.c.l.bf16 %v2564_v41 }
 0x360   : > { %v2765_v48 = vunpack.c.h.bf16 %v2564_v41  ;;  %v1669_v5 = vpop.f32.mrf.mxu3  ;;  %v2338_v21 = vmax.f32 %v2098_v43, 0.0  ;;  %v2396_v23 = vmax.f32 %v1584_v19, 0.0 }
 0x361   : > { %v1670_v9 = vadd.f32 %v1669_v5, %v11616_v56  ;;  %v3045_v38 = vmax.f32 %v3044_v36, %v2764_v55  ;;  %v2331_v26 = vmax.f32 %v2184_v49, 0.0  ;;  %v11873_v31 = vpop.f32.mrf.mxu0 }
 0x362   : > { %v3066_v6 = vmax.f32 %v3065_v53, %v2765_v48 }
 0x363   : > { %v2389_v58 = vmax.f32 %v1670_v9, 0.0  ;;  %v2539_v46 = vpack.c.bf16 %v2331_v26, %v2330_v18  ;;  %v13821_v9 = vld [vmem:[#allocation41_spill] sm:$0xff] }
 0x365   : > { %v2568_v22 = vpack.c.bf16 %v2389_v58, %v2388_v47  ;;  %1987 = vmatmul.bf16.gmra.mxu3 %v13819_v1  ;;  %v2714_v12 = vunpack.c.l.bf16 %v2539_v46  ;;  %v2715_v59 = vunpack.c.h.bf16 %v2539_v46  ;;  %v2100_v58 = vadd.f32 %v11825_v13, %v11717_v28 }
 0x366   : > { %v2186_v33 = vpop.f32.mrf.mxu1 }
 0x367   : > { %v2772_v30 = vunpack.c.l.bf16 %v2568_v22  ;;  %v2773_v36 = vunpack.c.h.bf16 %v2568_v22  ;;  %v2187_v53 = vadd.f32 %v2186_v33, %v11721_v61  ;;  %v3012_v2 = vmax.f32 %v3011_v34, %v2714_v12 }
 0x368   : > { %v1672_v3 = vpop.f32.mrf.mxu3  ;;  %v3033_v49 = vmax.f32 %v3032_v24, %v2715_v59 }
 0x369   : > { %v3046_v20 = vmax.f32 %v3045_v38, %v2772_v30  ;;  %v3067_v7 = vmax.f32 %v3066_v6, %v2773_v36  ;;  %v1673_v50 = vadd.f32 %v1672_v3, %v11616_v56  ;;  %2225 = vmatmul.bf16.gmra.mxu1 %v11348_v0  ;;  %v2339_v60 = vmax.f32 %v2187_v53, 0.0  ;;  %v13822_v53 = vld [vmem:[#allocation30_spill] sm:$0xff] }
 0x36a   : > { %v1586_v38 = vadd.f32 %v13821_v9, %v11605_v44  ;;  %v2346_v30 = vmax.f32 %v2100_v58, 0.0  ;;  %v2103_v3 = vadd.f32 %v11843_v10, %v11717_v28 }
 0x36b   : > { %v2397_v41 = vmax.f32 %v1673_v50, 0.0  ;;  %v2543_v15 = vpack.c.bf16 %v2339_v60, %v2338_v21  ;;  %v13823_v21 = vld [vmem:[#allocation43_spill] sm:$0xff] }
 0x36c   : > { %v2404_v33 = vmax.f32 %v1586_v38, 0.0  ;;  %v11893_v38 = vpop.f32.mrf.mxu2 }
 0x36d   : > { %v2572_v40 = vpack.c.bf16 %v2397_v41, %v2396_v23  ;;  %v2722_v55 = vunpack.c.l.bf16 %v2543_v15  ;;  %v2723_v48 = vunpack.c.h.bf16 %v2543_v15 }
 0x36e   : > { %v2188_v5 = vpop.f32.mrf.mxu1 }
 0x36f   : > { %v2780_v6 = vunpack.c.l.bf16 %v2572_v40  ;;  %v2781_v26 = vunpack.c.h.bf16 %v2572_v40  ;;  %v2189_v47 = vadd.f32 %v2188_v5, %v11721_v61  ;;  %v3013_v18 = vmax.f32 %v3012_v2, %v2722_v55 }
 0x370   : > { %v3034_v22 = vmax.f32 %v3033_v49, %v2723_v48  ;;  %v1674_v1 = vpop.f32.mrf.mxu3  ;;  %v2354_v2 = vmax.f32 %v2103_v3, 0.0 }
 0x371   : > { %v3047_v43 = vmax.f32 %v3046_v20, %v2780_v6  ;;  %v3068_v46 = vmax.f32 %v3067_v7, %v2781_v26  ;;  %v1675_v34 = vadd.f32 %v1674_v1, %v11616_v56  ;;  %v2347_v24 = vmax.f32 %v2189_v47, 0.0  ;;  %v11888_v7 = vpop.f32.mrf.mxu0 }
 0x372   : > { %v1589_v20 = vadd.f32 %v13823_v21, %v11605_v44 }
 0x373   : > { %v2405_v19 = vmax.f32 %v1675_v34, 0.0  ;;  %v2547_v13 = vpack.c.bf16 %v2347_v24, %v2346_v30 }
 0x374   : > { %v2412_v48 = vmax.f32 %v1589_v20, 0.0  ;;  %v13825_v20 = vld [vmem:[#allocation32_spill] sm:$0xff] }
 0x375   : > { %v2576_v36 = vpack.c.bf16 %v2405_v19, %v2404_v33  ;;  %1992 = vmatmul.bf16.gmra.mxu3 %v13822_v53  ;;  %v2730_v10 = vunpack.c.l.bf16 %v2547_v13  ;;  %v2731_v49 = vunpack.c.h.bf16 %v2547_v13 }
 0x376   : > { %v2191_v50 = vpop.f32.mrf.mxu1 }
 0x377   : > { %v2788_v12 = vunpack.c.l.bf16 %v2576_v36  ;;  %v2789_v59 = vunpack.c.h.bf16 %v2576_v36  ;;  %v2192_v60 = vadd.f32 %v2191_v50, %v11721_v61  ;;  %v3014_v26 = vmax.f32 %v3013_v18, %v2730_v10 }
 0x378   : > { %v1677_v23 = vpop.f32.mrf.mxu3  ;;  %v3035_v47 = vmax.f32 %v3034_v22, %v2731_v49 }
 0x379   : > { %v3048_v41 = vmax.f32 %v3047_v43, %v2788_v12  ;;  %v3069_v15 = vmax.f32 %v3068_v46, %v2789_v59  ;;  %v1678_v40 = vadd.f32 %v1677_v23, %v11616_v56  ;;  %2230 = vmatmul.bf16.gmra.mxu1 %v11370_v14  ;;  %v2355_v55 = vmax.f32 %v2192_v60, 0.0  ;;  %v13824_v46 = vld [vmem:[#allocation45_spill] sm:$0xff]  ;;  %v11903_v53 = vpop.f32.mrf.mxu0  ;;  %v11909_v60 = vpop.f32.mrf.mxu2 }
 0x37a   : > { %v1591_v34 = vadd.f32 %v13824_v46, %v11605_v44  ;;  %v2108_v12 = vadd.f32 %v11863_v54, %v11717_v28  ;;  %v2110_v46 = vadd.f32 %v11873_v31, %v11717_v28 }
 0x37b   : > { %v2413_v5 = vmax.f32 %v1678_v40, 0.0  ;;  %v2551_v9 = vpack.c.bf16 %v2355_v55, %v2354_v2  ;;  %v13826_v2 = vld [vmem:[#allocation39_spill] sm:$0xff] }
 0x37c   : > { %v2420_v22 = vmax.f32 %v1591_v34, 0.0  ;;  %v1594_v10 = vadd.f32 %v13826_v2, %v11605_v44 }
 0x37d   : > { %v2580_v6 = vpack.c.bf16 %v2413_v5, %v2412_v48  ;;  %v2738_v58 = vunpack.c.l.bf16 %v2551_v9  ;;  %v2739_v1 = vunpack.c.h.bf16 %v2551_v9  ;;  %v2370_v48 = vmax.f32 %v2108_v12, 0.0 }
 0x37e   : > { %v11895_v43 = vpop.f32.mrf.mxu1  ;;  %v2428_v54 = vmax.f32 %v1594_v10, 0.0  ;;  %v8411_v10 = vld [vmem:[#allocation4 + $0xc0] sm:$0xf] }
 0x37f   : > { %v2796_v24 = vunpack.c.l.bf16 %v2580_v6  ;;  %v2797_v33 = vunpack.c.h.bf16 %v2580_v6  ;;  %v11899_v19 = vmax.f32 %v3014_v26, %v2738_v58  ;;  %v11901_v30 = vmax.f32 %v3035_v47, %v2739_v1 }
 0x380   : > { %v1679_v36 = vpop.f32.mrf.mxu3 }
 0x381   : > { %v3049_v3 = vmax.f32 %v3048_v41, %v2796_v24  ;;  %v3070_v13 = vmax.f32 %v3069_v15, %v2797_v33  ;;  %v1680_v18 = vadd.f32 %v1679_v36, %v11616_v56  ;;  %v11915_v6 = vpop.f32.mrf.mxu0  ;;  %v13827_v24 = vld [vmem:[#allocation40_spill] sm:$0xff] }
 0x382   : > { %v1596_v33 = vadd.f32 %v13827_v24, %v11605_v44  ;;  %v8395_v24 = vld [vmem:[#allocation4 + $0xa0] sm:$0xf] }
 0x383   : > { %v2421_v50 = vmax.f32 %v1680_v18, 0.0  ;;  %v8427_v18 = vld [vmem:[#allocation4 + $0xe0] sm:$0xf] }
 0x384   : > { %v2436_v2 = vmax.f32 %v1596_v33, 0.0  ;;  %v9925_v33 = vld [vmem:[#allocation4 + $0xac] sm:$0xf0] }
 0x385   : > { %v2584_v21 = vpack.c.bf16 %v2421_v50, %v2420_v22  ;;  %1997 = vmatmul.bf16.gmra.mxu3 %v13825_v20  ;;  %v9933_v22 = vld [vmem:[#allocation4 + $0xec] sm:$0xf0]  ;;  %v11924_v50 = vpop.f32.mrf.mxu2 }
 0x386   : > { %v2196_v59 = vpop.f32.mrf.mxu1 }
 0x387   : > { %v2804_v23 = vunpack.c.l.bf16 %v2584_v21  ;;  %v2805_v40 = vunpack.c.h.bf16 %v2584_v21  ;;  %v2197_v41 = vadd.f32 %v2196_v59, %v11721_v61 }
 0x388   : > { %v1682_v15 = vpop.f32.mrf.mxu3 }
 0x389   : > { %v3050_v49 = vmax.f32 %v3049_v3, %v2804_v23  ;;  %v3071_v55 = vmax.f32 %v3070_v13, %v2805_v40  ;;  %v2371_v5 = vmax.f32 %v2197_v41, 0.0  ;;  %v1683_v9 = vadd.f32 %v1682_v15, %v11616_v56  ;;  %v9929_v41 = vld [vmem:[#allocation4 + $0xcc] sm:$0xf0] }
 0x38a   : > { %v8428_v23 = vor.u32 %v9933_v22, %v8427_v18  ;;  %v2378_v40 = vmax.f32 %v2110_v46, 0.0  ;;  %v2113_v15 = vadd.f32 %v11888_v7, %v11717_v28 }
 0x38b   : > { %v11917_v26 = vpack.c.bf16 %v2371_v5, %v2370_v48  ;;  %v2429_v47 = vmax.f32 %v1683_v9, 0.0  ;;  %v11929_v48 = vpop.f32.mrf.mxu0 }
 0x38c   : > { %4831 = vmatpush.bf16.msra.mxu2 %v8428_v23  ;;  %v2386_v7 = vmax.f32 %v2113_v15, 0.0  ;;  %v9921_v15 = vld [vmem:[#allocation4 + $0x8c] sm:$0xf0] }
 0x38d   : > { %v2588_v58 = vpack.c.bf16 %v2429_v47, %v2428_v54  ;;  %v8412_v47 = vor.u32 %v9929_v41, %v8411_v10  ;;  %v11936_v23 = vpop.f32.mrf.mxu2  ;;  %v8379_v41 = vld [vmem:[#allocation4 + $0x80] sm:$0xf] }
 0x38e   : > { %v2198_v1 = vpop.f32.mrf.mxu1 }
 0x38f   : > { %v2199_v34 = vadd.f32 %v2198_v1, %v11721_v61  ;;  %v2812_v36 = vunpack.c.l.bf16 %v2588_v58  ;;  %v2813_v3 = vunpack.c.h.bf16 %v2588_v58 }
 0x390   : > { %v1684_v13 = vpop.f32.mrf.mxu3  ;;  %4832 = vmatpush.bf16.msra.mxu2 %v8412_v47  ;;  %v9934_v47 = vld [vmem:[#allocation4 + $0xf4] sm:$0xf0] }
 0x391   : > { %v2379_v21 = vmax.f32 %v2199_v34, 0.0  ;;  %v1685_v20 = vadd.f32 %v1684_v13, %v11616_v56  ;;  %v3051_v12 = vmax.f32 %v3050_v49, %v2812_v36  ;;  %v3072_v59 = vmax.f32 %v3071_v55, %v2813_v3  ;;  %v13828_v49 = vld [vmem:[#allocation42_spill] sm:$0xff] }
 0x392   : > { %v1599_v55 = vadd.f32 %v13828_v49, %v11605_v44  ;;  %v8396_v13 = vor.u32 %v9925_v33, %v8395_v24 }
 0x393   : > { %v2437_v31 = vmax.f32 %v1685_v20, 0.0  ;;  %v2563_v5 = vpack.c.bf16 %v2379_v21, %v2378_v40  ;;  %v2754_v40 = vunpack.c.l.bf16 %v11917_v26  ;;  %v11944_v24 = vpop.f32.mrf.mxu0 }
 0x394   : > { %v2444_v20 = vmax.f32 %v1599_v55, 0.0  ;;  %4833 = vmatpush.bf16.msra.mxu2 %v8396_v13 }
 0x395   : > { %2002 = vmatmul.bf16.gmra.mxu3 %v11067_v29  ;;  %v2592_v9 = vpack.c.bf16 %v2437_v31, %v2436_v2  ;;  %v2762_v36 = vunpack.c.l.bf16 %v2563_v5  ;;  %v2763_v29 = vunpack.c.h.bf16 %v2563_v5  ;;  %v2755_v2 = vunpack.c.h.bf16 %v11917_v26 }
 0x396   : > { %v2201_v54 = vpop.f32.mrf.mxu1 }
 0x397   : > { %v2820_v58 = vunpack.c.l.bf16 %v2592_v9  ;;  %v2821_v1 = vunpack.c.h.bf16 %v2592_v9  ;;  %v2202_v46 = vadd.f32 %v2201_v54, %v11721_v61  ;;  %v2115_v9 = vadd.f32 %v11903_v53, %v11717_v28 }
 0x398   : > { %v1687_v34 = vpop.f32.mrf.mxu3  ;;  %v3170_v54 = vmax.f32 %v2754_v40, %v2762_v36  ;;  %v3191_v49 = vmax.f32 %v2755_v2, %v2763_v29  ;;  %v8363_v29 = vld [vmem:[#allocation4 + $0x60] sm:$0xf] }
 0x399   : > { %v1688_v3 = vadd.f32 %v1687_v34, %v11616_v56  ;;  %v3052_v18 = vmax.f32 %v3051_v12, %v2820_v58  ;;  %v3073_v22 = vmax.f32 %v3072_v59, %v2821_v1  ;;  %v2387_v21 = vmax.f32 %v2202_v46, 0.0  ;;  %v8435_v59 = vld [vmem:[#allocation4 + $0xe8] sm:$0xf]  ;;  %v13829_v34 = vld [vmem:[#allocation44_spill] sm:$0xff] }
 0x39a   : > { %v8380_v12 = vor.u32 %v9921_v15, %v8379_v41  ;;  %v8436_v46 = vor.u32 %v9934_v47, %v8435_v59  ;;  %v1601_v26 = vadd.f32 %v13829_v34, %v11605_v44  ;;  %v9930_v41 = vld [vmem:[#allocation4 + $0xd4] sm:$0xf0]  ;;  %v2394_v15 = vmax.f32 %v2115_v9, 0.0 }
 0x39b   : > { %v2445_v31 = vmax.f32 %v1688_v3, 0.0  ;;  %v2567_v10 = vpack.c.bf16 %v2387_v21, %v2386_v7  ;;  %v9917_v21 = vld [vmem:[#allocation4 + $0x6c] sm:$0xf0] }
 0x39c   : > { %4834 = vmatpush.bf16.msra.mxu2 %v8380_v12  ;;  %5039 = vmatpush.bf16.msrb.mxu0 %v8436_v46  ;;  %v8364_v59 = vor.u32 %v9917_v21, %v8363_v29  ;;  %v2452_v47 = vmax.f32 %v1601_v26, 0.0  ;;  %v9913_v12 = vld [vmem:[#allocation4 + $0x4c] sm:$0xf0]  ;;  %v2118_v46 = vadd.f32 %v11915_v6, %v11717_v28 }
 0x39d   : > { %v2596_v5 = vpack.c.bf16 %v2445_v31, %v2444_v20  ;;  %v2770_v55 = vunpack.c.l.bf16 %v2567_v10  ;;  %v2771_v58 = vunpack.c.h.bf16 %v2567_v10  ;;  %v8419_v10 = vld [vmem:[#allocation4 + $0xc8] sm:$0xf]  ;;  %v13830_v26 = vld [vmem:[#allocation46_spill] sm:$0xff] }
 0x39e   : > { %v2203_v1 = vpop.f32.mrf.mxu1 }
 0x39f   : > { %v2828_v33 = vunpack.c.l.bf16 %v2596_v5  ;;  %v2829_v7 = vunpack.c.h.bf16 %v2596_v5  ;;  %v2204_v3 = vadd.f32 %v2203_v1, %v11721_v61  ;;  %v3171_v53 = vmax.f32 %v3170_v54, %v2770_v55  ;;  %v11950_v55 = vpop.f32.mrf.mxu2 }
 0x3a0   : > { %v11947_v36 = vmax.f32 %v3191_v49, %v2771_v58  ;;  %v1689_v13 = vpop.f32.mrf.mxu3  ;;  %v8420_v5 = vor.u32 %v9930_v41, %v8419_v10  ;;  %4835 = vmatpush.bf16.msra.mxu2 %v8364_v59  ;;  %v8347_v49 = vld [vmem:[#allocation4 + $0x40] sm:$0xf]  ;;  %v11958_v10 = vpop.f32.mrf.mxu0 }
 0x3a1   : > { %v3053_v20 = vmax.f32 %v3052_v18, %v2828_v33  ;;  %v3074_v40 = vmax.f32 %v3073_v22, %v2829_v7  ;;  %v2395_v31 = vmax.f32 %v2204_v3, 0.0  ;;  %v1690_v2 = vadd.f32 %v1689_v13, %v11616_v56  ;;  %v8403_v18 = vld [vmem:[#allocation4 + $0xa8] sm:$0xf]  ;;  %v9926_v22 = vld [vmem:[#allocation4 + $0xb4] sm:$0xf0] }
 0x3a2   : > { %5040 = vmatpush.bf16.msrb.mxu0 %v8420_v5  ;;  %v8348_v34 = vor.u32 %v9913_v12, %v8347_v49  ;;  %v8404_v33 = vor.u32 %v9926_v22, %v8403_v18  ;;  %v1604_v7 = vadd.f32 %v13830_v26, %v11605_v44  ;;  %v8387_v5 = vld [vmem:[#allocation4 + $0x88] sm:$0xf]  ;;  %v8315_v26 = vld [vmem:[#allocation4] sm:$0xf] }
 0x3a3   : > { %v2453_v1 = vmax.f32 %v1690_v2, 0.0  ;;  %v2571_v54 = vpack.c.bf16 %v2395_v31, %v2394_v15  ;;  %v9909_v2 = vld [vmem:[#allocation4 + $0x2c] sm:$0xf0] }
 0x3a4   : > { %4836 = vmatpush.bf16.msra.mxu2 %v8348_v34  ;;  %v2460_v18 = vmax.f32 %v1604_v7, 0.0 }
 0x3a5   : > { %v2600_v58 = vpack.c.bf16 %v2453_v1, %v2452_v47  ;;  %2007 = vmatmul.bf16.gmra.mxu3 %v11074_v42  ;;  %v2778_v29 = vunpack.c.l.bf16 %v2571_v54  ;;  %v8331_v42 = vld [vmem:[#allocation4 + $0x20] sm:$0xf]  ;;  %v9922_v47 = vld [vmem:[#allocation4 + $0x94] sm:$0xf0]  ;;  %v2402_v1 = vmax.f32 %v2118_v46, 0.0  ;;  %v2779_v49 = vunpack.c.h.bf16 %v2571_v54 }
 0x3a6   : > { %v2206_v9 = vpop.f32.mrf.mxu1  ;;  %5041 = vmatpush.bf16.msrb.mxu0 %v8404_v33  ;;  %v8332_v59 = vor.u32 %v9909_v2, %v8331_v42  ;;  %v8683_v46 = vld [vmem:[#allocation4 + $0x2e0] sm:$0xf]  ;;  %v9997_v54 = vld [vmem:[#allocation4 + $0x2ec] sm:$0xf0] }
 0x3a7   : > { %v2836_v3 = vunpack.c.l.bf16 %v2600_v58  ;;  %v2837_v13 = vunpack.c.h.bf16 %v2600_v58  ;;  %v2207_v21 = vadd.f32 %v2206_v9, %v11721_v61  ;;  %v8388_v58 = vor.u32 %v9922_v47, %v8387_v5  ;;  %v13831_v9 = vld [vmem:[#allocation48_spill] sm:$0xff]  ;;  %v8371_v5 = vld [vmem:[#allocation4 + $0x68] sm:$0xf]  ;;  %v9918_v47 = vld [vmem:[#allocation4 + $0x74] sm:$0xf0] }
 0x3a8   : > { %v1692_v31 = vpop.f32.mrf.mxu3  ;;  %v1606_v34 = vadd.f32 %v13831_v9, %v11605_v44  ;;  %4837 = vmatpush.bf16.msra.mxu2 %v8332_v59  ;;  %v11966_v59 = vpop.f32.mrf.mxu2 }
 0x3a9   : > { %v3054_v41 = vmax.f32 %v3053_v20, %v2836_v3  ;;  %v3075_v6 = vmax.f32 %v3074_v40, %v2837_v13  ;;  %v1693_v15 = vadd.f32 %v1692_v31, %v11616_v56  ;;  %v2403_v12 = vmax.f32 %v2207_v21, 0.0  ;;  %v9905_v20 = vld [vmem:[#allocation4 + $0xc] sm:$0xf0] }
 0x3aa   : > { %5042 = vmatpush.bf16.msrb.mxu0 %v8388_v58  ;;  %v2120_v40 = vadd.f32 %v11929_v48, %v11717_v28  ;;  %v3172_v3 = vmax.f32 %v3171_v53, %v2778_v29  ;;  %v8316_v31 = vor.u32 %v9905_v20, %v8315_v26  ;;  %v3193_v21 = vmax.f32 %v11947_v36, %v2779_v49  ;;  %v9993_v26 = vld [vmem:[#allocation4 + $0x2cc] sm:$0xf0] }
 0x3ab   : > { %v2461_v22 = vmax.f32 %v1693_v15, 0.0  ;;  %v2575_v33 = vpack.c.bf16 %v2403_v12, %v2402_v1  ;;  %v8684_v15 = vor.u32 %v9997_v54, %v8683_v46  ;;  %v8372_v48 = vor.u32 %v9918_v47, %v8371_v5  ;;  %v9914_v46 = vld [vmem:[#allocation4 + $0x54] sm:$0xf0] }
 0x3ac   : > { %4838 = vmatpush.bf16.msra.mxu2 %v8316_v31  ;;  %v2468_v54 = vmax.f32 %v1606_v34, 0.0  ;;  %v9910_v34 = vld [vmem:[#allocation4 + $0x34] sm:$0xf0] }
 0x3ad   : > { %v2604_v13 = vpack.c.bf16 %v2461_v22, %v2460_v18  ;;  %v2786_v7 = vunpack.c.l.bf16 %v2575_v33  ;;  %v2787_v42 = vunpack.c.h.bf16 %v2575_v33  ;;  %v8667_v33 = vld [vmem:[#allocation4 + $0x2c0] sm:$0xf] }
 0x3ae   : > { %v2208_v2 = vpop.f32.mrf.mxu1  ;;  %5043 = vmatpush.bf16.msrb.mxu0 %v8372_v48  ;;  %v8668_v20 = vor.u32 %v9993_v26, %v8667_v33 }
 0x3af   : > { %v2844_v1 = vunpack.c.l.bf16 %v2604_v13  ;;  %v2845_v12 = vunpack.c.h.bf16 %v2604_v13  ;;  %v2209_v58 = vadd.f32 %v2208_v2, %v11721_v61  ;;  %v11969_v53 = vmax.f32 %v3172_v3, %v2786_v7  ;;  %v8355_v13 = vld [vmem:[#allocation4 + $0x48] sm:$0xf]  ;;  %v11974_v3 = vpop.f32.mrf.mxu0 }
 0x3b0   : > { %v11971_v29 = vmax.f32 %v3193_v21, %v2787_v42  ;;  %v1694_v18 = vpop.f32.mrf.mxu3  ;;  %4857 = vmatpush.bf16.msrb.mxu2 %v8684_v15  ;;  %v2410_v2 = vmax.f32 %v2120_v40, 0.0  ;;  %v8356_v7 = vor.u32 %v9914_v46, %v8355_v13  ;;  %v2123_v15 = vadd.f32 %v11944_v24, %v11717_v28  ;;  %v13832_v40 = vld [vmem:[#allocation49_spill] sm:$0xff]  ;;  %v8635_v13 = vld [vmem:[#allocation4 + $0x280] sm:$0xf]  ;;  %v9985_v46 = vld [vmem:[#allocation4 + $0x28c] sm:$0xf0] }
 0x3b1   : > { %v3055_v36 = vmax.f32 %v3054_v41, %v2844_v1  ;;  %v3076_v49 = vmax.f32 %v3075_v6, %v2845_v12  ;;  %v2411_v22 = vmax.f32 %v2209_v58, 0.0  ;;  %v1695_v9 = vadd.f32 %v1694_v18, %v11616_v56  ;;  %v8651_v41 = vld [vmem:[#allocation4 + $0x2a0] sm:$0xf]  ;;  %v9989_v6 = vld [vmem:[#allocation4 + $0x2ac] sm:$0xf0] }
 0x3b2   : > { %5044 = vmatpush.bf16.msrb.mxu0 %v8356_v7  ;;  %v8652_v47 = vor.u32 %v9989_v6, %v8651_v41  ;;  %v8339_v1 = vld [vmem:[#allocation4 + $0x28] sm:$0xf]  ;;  %v1609_v12 = vadd.f32 %v13832_v40, %v11605_v44  ;;  %v9906_v41 = vld [vmem:[#allocation4 + $0x14] sm:$0xf0] }
 0x3b3   : > { %v2469_v21 = vmax.f32 %v1695_v9, 0.0  ;;  %v2579_v42 = vpack.c.bf16 %v2411_v22, %v2410_v2  ;;  %v11982_v9 = vpop.f32.mrf.mxu2  ;;  %v2418_v2 = vmax.f32 %v2123_v15, 0.0 }
 0x3b4   : > { %4858 = vmatpush.bf16.msrb.mxu2 %v8668_v20  ;;  %13833 = vst [vmem:[#allocation33_spill] sm:$0xff] %v11982_v9  ;;  %v2476_v6 = vmax.f32 %v1609_v12, 0.0 }
 0x3b5   : > { %v2608_v31 = vpack.c.bf16 %v2469_v21, %v2468_v54  ;;  %2012 = vmatmul.bf16.gmra.mxu3 %v11081_v51  ;;  %v8340_v51 = vor.u32 %v9910_v34, %v8339_v1  ;;  %v2794_v33 = vunpack.c.l.bf16 %v2579_v42  ;;  %v8323_v54 = vld [vmem:[#allocation4 + $0x8] sm:$0xf]  ;;  %v2795_v21 = vunpack.c.h.bf16 %v2579_v42  ;;  %v13834_v42 = vld [vmem:[#allocation51_spill] sm:$0xff] }
 0x3b6   : > { %v2211_v5 = vpop.f32.mrf.mxu1  ;;  %v8324_v34 = vor.u32 %v9906_v41, %v8323_v54  ;;  %v1611_v15 = vadd.f32 %v13834_v42, %v11605_v44 }
 0x3b7   : > { %v2852_v58 = vunpack.c.l.bf16 %v2608_v31  ;;  %v2853_v48 = vunpack.c.h.bf16 %v2608_v31  ;;  %v2212_v18 = vadd.f32 %v2211_v5, %v11721_v61  ;;  %5045 = vmatpush.bf16.msrb.mxu0 %v8340_v51  ;;  %v8636_v31 = vor.u32 %v9985_v46, %v8635_v13 }
 0x3b8   : > { %v1697_v22 = vpop.f32.mrf.mxu3  ;;  %4859 = vmatpush.bf16.msrb.mxu2 %v8652_v47  ;;  %v2891_v5 = vrot.slane %v11833_v37, 4  ;;  %v10439_v47 = vld [vmem:[%s13667_s6] sm:$0xff]  ;;  %v3174_v12 = vmax.f32 %v11969_v53, %v2794_v33  ;;  %v3195_v51 = vmax.f32 %v11971_v29, %v2795_v21  ;;  %v2125_v53 = vadd.f32 %v11958_v10, %v11717_v28 }
 0x3b9   : > { %v3056_v26 = vmax.f32 %v3055_v36, %v2852_v58  ;;  %v3077_v20 = vmax.f32 %v3076_v49, %v2853_v48  ;;  %v1698_v24 = vadd.f32 %v1697_v22, %v11616_v56  ;;  %v2419_v7 = vmax.f32 %v2212_v18, 0.0  ;;  %v11994_v58 = vpop.f32.mrf.mxu0  ;;  %v8619_v18 = vld [vmem:[#allocation4 + $0x260] sm:$0xf]  ;;  %v9981_v22 = vld [vmem:[#allocation4 + $0x26c] sm:$0xf0] }
 0x3ba   : > { %v2912_v36 = vrot.slane %v11835_v32, 4  ;;  %v11990_v40 = vperm.slane %v10439_v47, 4  ;;  %v8620_v54 = vor.u32 %v9981_v22, %v8619_v18 }
 0x3bb   : > { %v2477_v1 = vmax.f32 %v1698_v24, 0.0  ;;  %v2583_v49 = vpack.c.bf16 %v2419_v7, %v2418_v2  ;;  %5046 = vmatpush.bf16.msrb.mxu0 %v8324_v34  ;;  %v2892_v2 = vmax.f32 %v11833_v37, %v2891_v5  ;;  %v8603_v34 = vld [vmem:[#allocation4 + $0x240] sm:$0xf]  ;;  %v12004_v18 = vpop.f32.mrf.mxu2 }
 0x3bc   : > { %4860 = vmatpush.bf16.msrb.mxu2 %v8636_v31  ;;  %v2913_v42 = vmax.f32 %v11835_v32, %v2912_v36  ;;  %v13835_v36 = vld [vmem:[#allocation47_spill] sm:$0xff] }
 0x3bd   : > { %v2612_v48 = vpack.c.bf16 %v2477_v1, %v2476_v6  ;;  %v2802_v24 = vunpack.c.l.bf16 %v2583_v49  ;;  %v2803_v13 = vunpack.c.h.bf16 %v2583_v49  ;;  %v9977_v49 = vld [vmem:[#allocation4 + $0x24c] sm:$0xf0]  ;;  %v2893_v22 = vrot.slane %v2892_v2, 2 }
 0x3be   : > { %v2213_v46 = vpop.f32.mrf.mxu1  ;;  %v8604_v5 = vor.u32 %v9977_v49, %v8603_v34  ;;  %v1890_v10 = vadd.f32 %v13835_v36, %v11990_v40 }
 0x3bf   : > { %v2860_v7 = vunpack.c.l.bf16 %v2612_v48  ;;  %v2861_v41 = vunpack.c.h.bf16 %v2612_v48  ;;  %v2214_v44 = vadd.f32 %v2213_v46, %v11721_v61  ;;  %v3175_v33 = vmax.f32 %v3174_v12, %v2802_v24  ;;  %v8587_v24 = vld [vmem:[#allocation4 + $0x220] sm:$0xf] }
 0x3c0   : > { %v3196_v31 = vmax.f32 %v3195_v51, %v2803_v13  ;;  %v1699_v6 = vpop.f32.mrf.mxu3  ;;  %4861 = vmatpush.bf16.msrb.mxu2 %v8620_v54  ;;  %v2484_v48 = vmax.f32 %v1611_v15, 0.0  ;;  %v2914_v12 = vrot.slane %v2913_v42, 2  ;;  %v2426_v51 = vmax.f32 %v2125_v53, 0.0  ;;  %v9973_v15 = vld [vmem:[#allocation4 + $0x22c] sm:$0xf0] }
 0x3c1   : > { %v3057_v29 = vmax.f32 %v3056_v26, %v2860_v7  ;;  %v3078_v21 = vmax.f32 %v3077_v20, %v2861_v41  ;;  %v1700_v1 = vadd.f32 %v1699_v6, %v11616_v56  ;;  %v2427_v37 = vmax.f32 %v2214_v44, 0.0  ;;  %v2132_v41 = vpop.f32.mrf.mxu0 }
 0x3c2   : > { %v2128_v26 = vadd.f32 %v11974_v3, %v11717_v28  ;;  %v12011_v56 = vperm.slane %v10439_v47, 5  ;;  %v8588_v54 = vor.u32 %v9973_v15, %v8587_v24  ;;  %v2894_v7 = vmax.f32 %v2892_v2, %v2893_v22 }
 0x3c3   : > { %v2485_v32 = vmax.f32 %v1700_v1, 0.0  ;;  %v2587_v13 = vpack.c.bf16 %v2427_v37, %v2426_v51  ;;  %v2240_v1 = vmax.f32 %v1890_v10, 0.0  ;;  %v2915_v53 = vmax.f32 %v2913_v42, %v2914_v12  ;;  %v12015_v15 = vpop.f32.mrf.mxu2 }
 0x3c4   : > { %4862 = vmatpush.bf16.msrb.mxu2 %v8604_v5  ;;  %v2434_v49 = vmax.f32 %v2128_v26, 0.0  ;;  %v8571_v5 = vld [vmem:[#allocation4 + $0x200] sm:$0xf]  ;;  %v2895_v22 = vrot.slane %v2894_v7, 1 }
 0x3c5   : > { %v2616_v20 = vpack.c.bf16 %v2485_v32, %v2484_v48  ;;  %2017 = vmatmul.bf16.gmra.mxu3 %v11090_v62  ;;  %v9969_v32 = vld [vmem:[#allocation4 + $0x20c] sm:$0xf0]  ;;  %v2810_v37 = vunpack.c.l.bf16 %v2587_v13  ;;  %v2811_v36 = vunpack.c.h.bf16 %v2587_v13  ;;  %v2916_v42 = vrot.slane %v2915_v53, 1 }
 0x3c6   : > { %v2216_v46 = vpop.f32.mrf.mxu1  ;;  %v8572_v2 = vor.u32 %v9969_v32, %v8571_v5 }
 0x3c7   : > { %v2868_v44 = vunpack.c.l.bf16 %v2616_v20  ;;  %v2869_v6 = vunpack.c.h.bf16 %v2616_v20  ;;  %v2217_v34 = vadd.f32 %v2216_v46, %v11721_v61 }
 0x3c8   : > { %v1978_v3 = vpop.f32.mrf.mxu3  ;;  %4863 = vmatpush.bf16.msrb.mxu2 %v8588_v54  ;;  %v3176_v54 = vmax.f32 %v3175_v33, %v2810_v37 }
 0x3c9   : > { %v3058_v48 = vmax.f32 %v3057_v29, %v2868_v44  ;;  %v3079_v62 = vmax.f32 %v3078_v21, %v2869_v6  ;;  %v1979_v47 = vadd.f32 %v1978_v3, %v12011_v56  ;;  %v2435_v51 = vmax.f32 %v2217_v34, 0.0  ;;  %v13836_v3 = vld [vmem:[#allocation50_spill] sm:$0xff] }
 0x3ca   : > { %v2130_v29 = vadd.f32 %v11994_v58, %v11717_v28  ;;  %v3197_v44 = vmax.f32 %v3196_v31, %v2811_v36  ;;  %v1892_v5 = vadd.f32 %v13836_v3, %v11990_v40 }
 0x3cb   : > { %v3059_v24 = vrot.slane %v3058_v48, 4  ;;  %v3080_v20 = vrot.slane %v3079_v62, 4  ;;  %v2241_v10 = vmax.f32 %v1979_v47, 0.0  ;;  %v2591_v12 = vpack.c.bf16 %v2435_v51, %v2434_v49 }
 0x3cc   : > { %4864 = vmatpush.bf16.msrb.mxu2 %v8572_v2  ;;  %v2896_v47 = vmax.f32 %v2894_v7, %v2895_v22  ;;  %v2917_v51 = vmax.f32 %v2915_v53, %v2916_v42  ;;  %v2442_v31 = vmax.f32 %v2130_v29, 0.0  ;;  %v2248_v36 = vmax.f32 %v1892_v5, 0.0 }
 0x3cd   : > { %v3060_v21 = vmax.f32 %v3058_v48, %v3059_v24  ;;  %v3081_v26 = vmax.f32 %v3079_v62, %v3080_v20  ;;  %v2494_v46 = vpack.c.bf16 %v2241_v10, %v2240_v1  ;;  %v2818_v13 = vunpack.c.l.bf16 %v2591_v12  ;;  %v2134_v62 = vpop.f32.mrf.mxu0 }
 0x3ce   : > { %v2819_v6 = vunpack.c.h.bf16 %v2591_v12  ;;  %v2218_v34 = vpop.f32.mrf.mxu1  ;;  %v3212_v7 = vpack.c.bf16 %v2896_v47, %v2896_v47  ;;  %v3213_v22 = vpack.c.bf16 %v2917_v51, %v2917_v51 }
 0x3cf   : > { %v3061_v32 = vrot.slane %v3060_v21, 2  ;;  %v3082_v49 = vrot.slane %v3081_v26, 2  ;;  %v3177_v9 = vmax.f32 %v3176_v54, %v2818_v13  ;;  %v2219_v58 = vadd.f32 %v2218_v34, %v11721_v61  ;;  %v12027_v34 = vpop.f32.mrf.mxu2 }
 0x3d0   : > { %v3198_v4 = vmax.f32 %v3197_v44, %v2819_v6  ;;  %v1980_v48 = vpop.f32.mrf.mxu3  ;;  %v13837_v44 = vld [vmem:[#allocation52_spill] sm:$0xff]  ;;  %v2624_v13 = vunpack.c.l.bf16 %v2494_v46  ;;  %v2625_v29 = vunpack.c.h.bf16 %v2494_v46  ;;  %v3511_v51 = vunpack.c.l.b16 %v3213_v22 }
 0x3d1   : > { %v3062_v1 = vmax.f32 %v3060_v21, %v3061_v32  ;;  %v3083_v2 = vmax.f32 %v3081_v26, %v3082_v49  ;;  %v1981_v33 = vadd.f32 %v1980_v48, %v12011_v56  ;;  %v2443_v37 = vmax.f32 %v2219_v58, 0.0 }
 0x3d2   : > { %v1895_v21 = vadd.f32 %v13837_v44, %v11990_v40  ;;  %v2133_v26 = vadd.f32 %v2132_v41, %v11717_v28  ;;  %v3510_v49 = vunpack.c.l.b16 %v3212_v7 }
 0x3d3   : > { %v3063_v24 = vrot.slane %v3062_v1, 1  ;;  %v3084_v20 = vrot.slane %v3083_v2, 1  ;;  %v2249_v10 = vmax.f32 %v1981_v33, 0.0  ;;  %v2595_v12 = vpack.c.bf16 %v2443_v37, %v2442_v31 }
 0x3d4   : > { %v2450_v41 = vmax.f32 %v2133_v26, 0.0  ;;  %v2256_v7 = vmax.f32 %v1895_v21, 0.0 }
 0x3d5   : > { %v3064_v53 = vmax.f32 %v3062_v1, %v3063_v24  ;;  %v3085_v42 = vmax.f32 %v3083_v2, %v3084_v20  ;;  %v2498_v54 = vpack.c.bf16 %v2249_v10, %v2248_v36  ;;  %2022 = vmatmul.bf16.gmra.mxu3 %v11129_v35  ;;  %v2826_v58 = vunpack.c.l.bf16 %v2595_v12  ;;  %v2137_v24 = vpop.f32.mrf.mxu0 }
 0x3d6   : > { %v2221_v6 = vpop.f32.mrf.mxu1  ;;  %v2827_v37 = vunpack.c.h.bf16 %v2595_v12 }
 0x3d7   : > { %v3220_v3 = vpack.c.bf16 %v3064_v53, %v3064_v53  ;;  %v3221_v5 = vpack.c.bf16 %v3085_v42, %v3085_v42  ;;  %v2632_v47 = vunpack.c.l.bf16 %v2498_v54  ;;  %v2633_v32 = vunpack.c.h.bf16 %v2498_v54 }
 0x3d8   : > { %v2222_v48 = vadd.f32 %v2221_v6, %v11721_v61  ;;  %v1983_v35 = vpop.f32.mrf.mxu3  ;;  %v3178_v54 = vmax.f32 %v3177_v9, %v2826_v58  ;;  %v3199_v44 = vmax.f32 %v3198_v4, %v2827_v37  ;;  %v13838_v6 = vld [vmem:[#allocation53_spill] sm:$0xff] }
 0x3d9   : > { %v3518_v1 = vunpack.c.l.b16 %v3220_v3  ;;  %v3519_v2 = vunpack.c.l.b16 %v3221_v5  ;;  %v2960_v33 = vmax.f32 %v2624_v13, %v2632_v47  ;;  %v2981_v31 = vmax.f32 %v2625_v29, %v2633_v32 }
 0x3da   : > { %v2451_v46 = vmax.f32 %v2222_v48, 0.0  ;;  %v1984_v36 = vadd.f32 %v1983_v35, %v12011_v56  ;;  %v1897_v3 = vadd.f32 %v13838_v6, %v11990_v40  ;;  %v2135_v5 = vadd.f32 %v2134_v62, %v11717_v28 }
 0x3db   : > { %v3527_v20 = vsel %vm3526_vm3, %v3518_v1, %v3510_v49  ;;  %v12033_v10 = vsel %vm3526_vm3, %v3519_v2, %v3511_v51  ;;  %v12043_v51 = vpop.f32.mrf.mxu2  ;;  %v2194_v62 = vadd.f32 %v11895_v43, %v11721_v61 }
 0x3dc   : > { %v2599_v22 = vpack.c.bf16 %v2451_v46, %v2450_v41  ;;  %v2257_v53 = vmax.f32 %v1984_v36, 0.0  ;;  %v12035_v42 = vpack.c.b16 %v3527_v20, %v3527_v20  ;;  %v2264_v2 = vmax.f32 %v1897_v3, 0.0 }
 0x3dd   : > { %v2458_v37 = vmax.f32 %v2135_v5, 0.0  ;;  %v2139_v46 = vpop.f32.mrf.mxu0  ;;  %v2138_v20 = vadd.f32 %v2137_v24, %v11717_v28  ;;  %v2363_v43 = vmax.f32 %v2194_v62, 0.0 }
 0x3de   : > { %v2834_v13 = vunpack.c.l.bf16 %v2599_v22  ;;  %v2835_v29 = vunpack.c.h.bf16 %v2599_v22  ;;  %v2502_v26 = vpack.c.bf16 %v2257_v53, %v2256_v7  ;;  %v2223_v12 = vpop.f32.mrf.mxu1  ;;  %4839 = vmatmul.bf16.vlgmr.msra.gmra.mxu2 %v12035_v42  ;;  %5047 = vmatmul.bf16.vlgmr.msrb.gmra.mxu0 %v12035_v42  ;;  %v1900_v53 = vadd.f32 %v11650_v52, %v11990_v40 }
 0x3df   : > { %v2224_v21 = vadd.f32 %v2223_v12, %v11721_v61  ;;  %v2466_v12 = vmax.f32 %v2138_v20, 0.0 }
 0x3e0   : > { %v3179_v47 = vmax.f32 %v3178_v54, %v2834_v13  ;;  %v3200_v32 = vmax.f32 %v3199_v44, %v2835_v29  ;;  %v2640_v49 = vunpack.c.l.bf16 %v2502_v26  ;;  %v2641_v9 = vunpack.c.h.bf16 %v2502_v26  ;;  %v1985_v4 = vpop.f32.mrf.mxu3 }
 0x3e1   : > { %v1986_v58 = vadd.f32 %v1985_v4, %v12011_v56  ;;  %v2459_v1 = vmax.f32 %v2224_v21, 0.0  ;;  %v2272_v5 = vmax.f32 %v1900_v53, 0.0 }
 0x3e2   : > { %v2961_v48 = vmax.f32 %v2960_v33, %v2640_v49  ;;  %v2982_v35 = vmax.f32 %v2981_v31, %v2641_v9  ;;  %v2105_v33 = vadd.f32 %v11853_v11, %v11717_v28  ;;  %v12060_v9 = vpack.c.b16 %v11764_v25, %v11764_v25 }
 0x3e3   : > { %v2265_v41 = vmax.f32 %v1986_v58, 0.0  ;;  %v2603_v7 = vpack.c.bf16 %v2459_v1, %v2458_v37  ;;  %v12056_v21 = vpop.f32.mrf.mxu2  ;;  %v1902_v37 = vadd.f32 %v11662_v17, %v11990_v40  ;;  %v2140_v25 = vadd.f32 %v2139_v46, %v11717_v28 }
 0x3e4   : > { %v2362_v52 = vmax.f32 %v2105_v33, 0.0  ;;  %v1905_v17 = vadd.f32 %v11676_v27, %v11990_v40 }
 0x3e5   : > { %v2506_v36 = vpack.c.bf16 %v2265_v41, %v2264_v2  ;;  %2027 = vmatmul.bf16.gmra.mxu3 %v11168_v16  ;;  %v2842_v24 = vunpack.c.l.bf16 %v2603_v7  ;;  %v2843_v6 = vunpack.c.h.bf16 %v2603_v7  ;;  %v2142_v62 = vpop.f32.mrf.mxu0 }
 0x3e6   : > { %v2226_v22 = vpop.f32.mrf.mxu1  ;;  %v2555_v4 = vpack.c.bf16 %v2363_v43, %v2362_v52 }
 0x3e7   : > { %v2648_v31 = vunpack.c.l.bf16 %v2506_v36  ;;  %v2649_v54 = vunpack.c.h.bf16 %v2506_v36  ;;  %v2227_v44 = vadd.f32 %v2226_v22, %v11721_v61 }
 0x3e8   : > { %v1988_v13 = vpop.f32.mrf.mxu3  ;;  %v2747_v43 = vunpack.c.h.bf16 %v2555_v4 }
 0x3e9   : > { %v2962_v29 = vmax.f32 %v2961_v48, %v2648_v31  ;;  %v2983_v26 = vmax.f32 %v2982_v35, %v2649_v54  ;;  %v1989_v16 = vadd.f32 %v1988_v13, %v12011_v56  ;;  %v2467_v3 = vmax.f32 %v2227_v44, 0.0 }
 0x3ea   : > { %v3180_v48 = vmax.f32 %v3179_v47, %v2842_v24  ;;  %v3201_v35 = vmax.f32 %v3200_v32, %v2843_v6  ;;  %v2746_v47 = vunpack.c.l.bf16 %v2555_v4  ;;  %v2280_v13 = vmax.f32 %v1902_v37, 0.0  ;;  %v9965_v4 = vld [vmem:[#allocation4 + $0x1ec] sm:$0xf0] }
 0x3eb   : > { %v2273_v49 = vmax.f32 %v1989_v16, 0.0  ;;  %v2607_v11 = vpack.c.bf16 %v2467_v3, %v2466_v12  ;;  %v2474_v12 = vmax.f32 %v2140_v25, 0.0  ;;  %v12070_v24 = vpop.f32.mrf.mxu2  ;;  %v8539_v25 = vld [vmem:[#allocation4 + $0x1c0] sm:$0xf] }
 0x3ec   : > { %v3016_v46 = vmax.f32 %v11899_v19, %v2746_v47 }
 0x3ed   : > { %v2510_v58 = vpack.c.bf16 %v2273_v49, %v2272_v5  ;;  %v2850_v1 = vunpack.c.l.bf16 %v2607_v11  ;;  %v2851_v2 = vunpack.c.h.bf16 %v2607_v11  ;;  %v3037_v5 = vmax.f32 %v11901_v30, %v2747_v43  ;;  %v8555_v11 = vld [vmem:[#allocation4 + $0x1e0] sm:$0xf]  ;;  %v2144_v19 = vpop.f32.mrf.mxu0 }
 0x3ee   : > { %v2228_v41 = vpop.f32.mrf.mxu1  ;;  %4865 = vmatmul.bf16.vlgmr.msrb.gmra.mxu2 %v12060_v9  ;;  %v2145_v47 = vadd.f32 %v2144_v19, %v11717_v28 }
 0x3ef   : > { %v2656_v36 = vunpack.c.l.bf16 %v2510_v58  ;;  %v2657_v20 = vunpack.c.h.bf16 %v2510_v58  ;;  %v2229_v7 = vadd.f32 %v2228_v41, %v11721_v61  ;;  %v3181_v22 = vmax.f32 %v3180_v48, %v2850_v1 }
 0x3f0   : > { %v3202_v53 = vmax.f32 %v3201_v35, %v2851_v2  ;;  %v1990_v33 = vpop.f32.mrf.mxu3  ;;  %v2288_v58 = vmax.f32 %v1905_v17, 0.0  ;;  %v8556_v35 = vor.u32 %v9965_v4, %v8555_v11  ;;  %v3017_v1 = vrot.slane %v3016_v46, 4  ;;  %v9957_v11 = vld [vmem:[#allocation4 + $0x1ac] sm:$0xf0] }
 0x3f1   : > { %v2963_v32 = vmax.f32 %v2962_v29, %v2656_v36  ;;  %v2984_v31 = vmax.f32 %v2983_v26, %v2657_v20  ;;  %v1991_v54 = vadd.f32 %v1990_v33, %v12011_v56  ;;  %v2475_v44 = vmax.f32 %v2229_v7, 0.0  ;;  %v9961_v33 = vld [vmem:[#allocation4 + $0x1cc] sm:$0xf0] }
 0x3f2   : > { %v2143_v29 = vadd.f32 %v2142_v62, %v11717_v28  ;;  %4844 = vmatpush.bf16.msrb.mxu3 %v8556_v35  ;;  %v3038_v30 = vrot.slane %v3037_v5, 4  ;;  %v2490_v4 = vmax.f32 %v2145_v47, 0.0 }
 0x3f3   : > { %v2281_v16 = vmax.f32 %v1991_v54, 0.0  ;;  %v2611_v26 = vpack.c.bf16 %v2475_v44, %v2474_v12  ;;  %v8540_v44 = vor.u32 %v9961_v33, %v8539_v25 }
 0x3f4   : > { %v2482_v37 = vmax.f32 %v2143_v29, 0.0  ;;  %v12081_v29 = vpop.f32.mrf.mxu2 }
 0x3f5   : > { %v2514_v6 = vpack.c.bf16 %v2281_v16, %v2280_v13  ;;  %2032 = vmatmul.bf16.gmra.mxu3 %v11183_v39  ;;  %v2858_v62 = vunpack.c.l.bf16 %v2611_v26  ;;  %v2859_v36 = vunpack.c.h.bf16 %v2611_v26  ;;  %v1907_v13 = vadd.f32 %v11690_v45, %v11990_v40 }
 0x3f6   : > { %v2231_v3 = vpop.f32.mrf.mxu1  ;;  %4845 = vmatpush.bf16.msrb.mxu3 %v8540_v44  ;;  %v3039_v26 = vmax.f32 %v3037_v5, %v3038_v30  ;;  %v9949_v44 = vld [vmem:[#allocation4 + $0x16c] sm:$0xf0] }
 0x3f7   : > { %v2664_v52 = vunpack.c.l.bf16 %v2514_v6  ;;  %v2665_v49 = vunpack.c.h.bf16 %v2514_v6  ;;  %v2232_v27 = vadd.f32 %v2231_v3, %v11721_v61  ;;  %v3182_v43 = vmax.f32 %v3181_v22, %v2858_v62  ;;  %v9953_v62 = vld [vmem:[#allocation4 + $0x18c] sm:$0xf0] }
 0x3f8   : > { %v1993_v48 = vpop.f32.mrf.mxu3  ;;  %v3203_v16 = vmax.f32 %v3202_v53, %v2859_v36  ;;  %v2296_v19 = vmax.f32 %v1907_v13, 0.0  ;;  %v1910_v13 = vadd.f32 %v11881_v57, %v11990_v40 }
 0x3f9   : > { %v2964_v2 = vmax.f32 %v2963_v32, %v2664_v52  ;;  %v2985_v41 = vmax.f32 %v2984_v31, %v2665_v49  ;;  %v1994_v39 = vadd.f32 %v1993_v48, %v12011_v56  ;;  %v2483_v20 = vmax.f32 %v2232_v27, 0.0  ;;  %v8523_v49 = vld [vmem:[#allocation4 + $0x1a0] sm:$0xf] }
 0x3fa   : > { %v3018_v32 = vmax.f32 %v3016_v46, %v3017_v1 }
 0x3fb   : > { %v2289_v7 = vmax.f32 %v1994_v39, 0.0  ;;  %v2615_v54 = vpack.c.bf16 %v2483_v20, %v2482_v37  ;;  %v8507_v37 = vld [vmem:[#allocation4 + $0x180] sm:$0xf] }
 0x3fc   : > { %v3019_v1 = vrot.slane %v3018_v32, 2  ;;  %v8508_v36 = vor.u32 %v9953_v62, %v8507_v37 }
 0x3fd   : > { %v2518_v31 = vpack.c.bf16 %v2289_v7, %v2288_v58  ;;  %v2866_v17 = vunpack.c.l.bf16 %v2615_v54  ;;  %v2867_v12 = vunpack.c.h.bf16 %v2615_v54  ;;  %v8524_v58 = vor.u32 %v9957_v11, %v8523_v49  ;;  %v8491_v54 = vld [vmem:[#allocation4 + $0x160] sm:$0xf] }
 0x3fe   : > { %v2233_v6 = vpop.f32.mrf.mxu1  ;;  %v3020_v25 = vmax.f32 %v3018_v32, %v3019_v1  ;;  %v8475_v11 = vld [vmem:[#allocation4 + $0x140] sm:$0xf] }
 0x3ff   : > { %v2672_v3 = vunpack.c.l.bf16 %v2518_v31  ;;  %v2673_v52 = vunpack.c.h.bf16 %v2518_v31  ;;  %v2234_v28 = vadd.f32 %v2233_v6, %v11721_v61  ;;  %v3183_v27 = vmax.f32 %v3182_v43, %v2866_v17  ;;  %4846 = vmatpush.bf16.msrb.mxu3 %v8524_v58  ;;  %v12088_v17 = vpop.f32.mrf.mxu2 }
 0x400   : > { %v3204_v45 = vmax.f32 %v3203_v16, %v2867_v12  ;;  %v1995_v46 = vpop.f32.mrf.mxu3  ;;  %v3040_v61 = vrot.slane %v3039_v26, 2  ;;  %v8492_v16 = vor.u32 %v9949_v44, %v8491_v54  ;;  %v8443_v44 = vld [vmem:[#allocation4 + $0x100] sm:$0xf] }
 0x401   : > { %v2965_v22 = vmax.f32 %v2964_v2, %v2672_v3  ;;  %v2986_v53 = vmax.f32 %v2985_v41, %v2673_v52  ;;  %v2491_v48 = vmax.f32 %v2234_v28, 0.0  ;;  %v1996_v35 = vadd.f32 %v1995_v46, %v12011_v56 }
 0x402   : > { %v3041_v31 = vmax.f32 %v3039_v26, %v3040_v61  ;;  %v3021_v52 = vrot.slane %v3020_v25, 1 }
 0x403   : > { %v2619_v5 = vpack.c.bf16 %v2491_v48, %v2490_v4  ;;  %v2297_v39 = vmax.f32 %v1996_v35, 0.0  ;;  %4847 = vmatpush.bf16.msrb.mxu3 %v8508_v36  ;;  %v9945_v4 = vld [vmem:[#allocation4 + $0x14c] sm:$0xf0] }
 0x404   : > { %v8476_v26 = vor.u32 %v9945_v4, %v8475_v11 }
 0x405   : > { %v2874_v20 = vunpack.c.l.bf16 %v2619_v5  ;;  %v2875_v30 = vunpack.c.h.bf16 %v2619_v5  ;;  %v2522_v7 = vpack.c.bf16 %v2297_v39, %v2296_v19  ;;  %2037 = vmatmul.bf16.gmra.mxu3 %v11204_v8  ;;  %v8459_v19 = vld [vmem:[#allocation4 + $0x120] sm:$0xf]  ;;  %v9941_v5 = vld [vmem:[#allocation4 + $0x12c] sm:$0xf0] }
 0x406   : > { %v8460_v36 = vor.u32 %v9941_v5, %v8459_v19  ;;  %v8779_v5 = vld [vmem:[#allocation4 + $0x3a0] sm:$0xf] }
 0x407   : > { %v3184_v2 = vmax.f32 %v3183_v27, %v2874_v20  ;;  %v3205_v41 = vmax.f32 %v3204_v45, %v2875_v30  ;;  %v2680_v33 = vunpack.c.l.bf16 %v2522_v7  ;;  %v2681_v47 = vunpack.c.h.bf16 %v2522_v7  ;;  %4848 = vmatpush.bf16.msrb.mxu3 %v8492_v16 }
 0x408   : > { %v1998_v43 = vpop.f32.mrf.mxu3  ;;  %v2304_v27 = vmax.f32 %v1910_v13, 0.0  ;;  %v3042_v45 = vrot.slane %v3041_v31, 1  ;;  %v9937_v13 = vld [vmem:[#allocation4 + $0x10c] sm:$0xf0] }
 0x409   : > { %v3185_v12 = vrot.slane %v3184_v2, 4  ;;  %v3206_v6 = vrot.slane %v3205_v41, 4  ;;  %v2966_v3 = vmax.f32 %v2965_v22, %v2680_v33  ;;  %v2987_v8 = vmax.f32 %v2986_v53, %v2681_v47  ;;  %v12094_v47 = vpop.f32.mrf.mxu2 }
 0x40a   : > { %v1999_v32 = vadd.f32 %v1998_v43, %v12011_v56  ;;  %v1912_v22 = vadd.f32 %v11893_v38, %v11990_v40  ;;  %v3022_v53 = vmax.f32 %v3020_v25, %v3021_v52  ;;  %v3043_v39 = vmax.f32 %v3041_v31, %v3042_v45 }
 0x40b   : > { %v3186_v28 = vmax.f32 %v3184_v2, %v3185_v12  ;;  %v3207_v49 = vmax.f32 %v3205_v41, %v3206_v6  ;;  %4849 = vmatpush.bf16.msrb.mxu3 %v8476_v26  ;;  %v8444_v16 = vor.u32 %v9937_v13, %v8443_v44  ;;  %v8811_v12 = vld [vmem:[#allocation4 + $0x3e0] sm:$0xf]  ;;  %v10029_v6 = vld [vmem:[#allocation4 + $0x3ec] sm:$0xf0] }
 0x40c   : > { %v2305_v57 = vmax.f32 %v1999_v32, 0.0  ;;  %v2312_v33 = vmax.f32 %v1912_v22, 0.0  ;;  %v3218_v31 = vpack.c.bf16 %v3022_v53, %v3022_v53  ;;  %v3219_v43 = vpack.c.bf16 %v3043_v39, %v3043_v39  ;;  %v10021_v39 = vld [vmem:[#allocation4 + $0x3ac] sm:$0xf0] }
 0x40d   : > { %v3187_v46 = vrot.slane %v3186_v28, 2  ;;  %v3208_v58 = vrot.slane %v3207_v49, 2 }
 0x40e   : > { %v2526_v48 = vpack.c.bf16 %v2305_v57, %v2304_v27  ;;  %v3516_v45 = vunpack.c.l.b16 %v3218_v31  ;;  %v3517_v57 = vunpack.c.l.b16 %v3219_v43  ;;  %v8747_v31 = vld [vmem:[#allocation4 + $0x360] sm:$0xf]  ;;  %v10013_v43 = vld [vmem:[#allocation4 + $0x36c] sm:$0xf0] }
 0x40f   : > { %v3188_v35 = vmax.f32 %v3186_v28, %v3187_v46  ;;  %v3209_v1 = vmax.f32 %v3207_v49, %v3208_v58  ;;  %4850 = vmatpush.bf16.msrb.mxu3 %v8460_v36  ;;  %v8795_v46 = vld [vmem:[#allocation4 + $0x3c0] sm:$0xf]  ;;  %v10025_v58 = vld [vmem:[#allocation4 + $0x3cc] sm:$0xf0]  ;;  %v1917_v36 = vadd.f32 %v11924_v50, %v11990_v40  ;;  %v8748_v50 = vor.u32 %v10013_v43, %v8747_v31 }
 0x410   : > { %v2688_v37 = vunpack.c.l.bf16 %v2526_v48  ;;  %v2689_v62 = vunpack.c.h.bf16 %v2526_v48  ;;  %v2000_v61 = vpop.f32.mrf.mxu3 }
 0x411   : > { %v3189_v20 = vrot.slane %v3188_v35, 1  ;;  %v3210_v30 = vrot.slane %v3209_v1, 1  ;;  %v2001_v7 = vadd.f32 %v2000_v61, %v12011_v56  ;;  %v8780_v61 = vor.u32 %v10021_v39, %v8779_v5 }
 0x412   : > { %v2967_v2 = vmax.f32 %v2966_v3, %v2688_v37  ;;  %v2988_v41 = vmax.f32 %v2987_v8, %v2689_v62  ;;  %v8812_v3 = vor.u32 %v10029_v6, %v8811_v12  ;;  %v1915_v8 = vadd.f32 %v11909_v60, %v11990_v40  ;;  %v12106_v37 = vpop.f32.mrf.mxu2 }
 0x413   : > { %v3190_v38 = vmax.f32 %v3188_v35, %v3189_v20  ;;  %v3211_v25 = vmax.f32 %v3209_v1, %v3210_v30  ;;  %v2313_v54 = vmax.f32 %v2001_v7, 0.0  ;;  %4851 = vmatpush.bf16.msrb.mxu3 %v8444_v16  ;;  %v2328_v44 = vmax.f32 %v1917_v36, 0.0 }
 0x414   : > { %v2320_v1 = vmax.f32 %v1915_v8, 0.0  ;;  %v1920_v12 = vadd.f32 %v11936_v23, %v11990_v40  ;;  %v10009_v8 = vld [vmem:[#allocation4 + $0x34c] sm:$0xf0] }
 0x415   : > { %v3226_v32 = vpack.c.bf16 %v3190_v38, %v3190_v38  ;;  %v3227_v52 = vpack.c.bf16 %v3211_v25, %v3211_v25  ;;  %v2530_v28 = vpack.c.bf16 %v2313_v54, %v2312_v33  ;;  %2042 = vmatmul.bf16.gmra.mxu3 %v11279_v63  ;;  %v8796_v63 = vor.u32 %v10025_v58, %v8795_v46 }
 0x417   : > { %v3524_v49 = vunpack.c.l.b16 %v3226_v32  ;;  %v3525_v11 = vunpack.c.l.b16 %v3227_v52  ;;  %v2696_v4 = vunpack.c.l.bf16 %v2530_v28  ;;  %v2697_v27 = vunpack.c.h.bf16 %v2530_v28  ;;  %4870 = vmatpush.bf16.msra.mxu3 %v8812_v3  ;;  %v8731_v3 = vld [vmem:[#allocation4 + $0x340] sm:$0xf] }
 0x418   : > { %v2003_v26 = vpop.f32.mrf.mxu3 }
 0x419   : > { %v2968_v48 = vmax.f32 %v2967_v2, %v2696_v4  ;;  %v2989_v22 = vmax.f32 %v2988_v41, %v2697_v27  ;;  %v2004_v53 = vadd.f32 %v2003_v26, %v12011_v56  ;;  %v12101_v35 = vsel %vm3526_vm3, %v3524_v49, %v3516_v45  ;;  %v8763_v2 = vld [vmem:[#allocation4 + $0x380] sm:$0xf]  ;;  %v10017_v41 = vld [vmem:[#allocation4 + $0x38c] sm:$0xf0] }
 0x41a   : > { %v12104_v60 = vsel %vm3526_vm3, %v3525_v11, %v3517_v57  ;;  %v8764_v54 = vor.u32 %v10017_v41, %v8763_v2  ;;  %v12114_v6 = vpop.f32.mrf.mxu2  ;;  %v8732_v27 = vor.u32 %v10009_v8, %v8731_v3  ;;  %v2336_v45 = vmax.f32 %v1920_v12, 0.0  ;;  %v10005_v26 = vld [vmem:[#allocation4 + $0x32c] sm:$0xf0]  ;;  %v9075_v41 = vld [vmem:[#allocation4 + $0x5e8] sm:$0xf] }
 0x41b   : > { %v2321_v19 = vmax.f32 %v2004_v53, 0.0  ;;  %4871 = vmatpush.bf16.msra.mxu3 %v8796_v63  ;;  %v8699_v63 = vld [vmem:[#allocation4 + $0x300] sm:$0xf]  ;;  %v1930_v8 = vadd.f32 %v12004_v18, %v11990_v40 }
 0x41d   : > { %v2534_v62 = vpack.c.bf16 %v2321_v19, %v2320_v1  ;;  %v10001_v1 = vld [vmem:[#allocation4 + $0x30c] sm:$0xf0] }
 0x41f   : > { %v2704_v20 = vunpack.c.l.bf16 %v2534_v62  ;;  %v2705_v30 = vunpack.c.h.bf16 %v2534_v62  ;;  %4872 = vmatpush.bf16.msra.mxu3 %v8780_v61  ;;  %v8700_v61 = vor.u32 %v10001_v1, %v8699_v63  ;;  %v9059_v1 = vld [vmem:[#allocation4 + $0x5c8] sm:$0xf] }
 0x420   : > { %v2005_v7 = vpop.f32.mrf.mxu3 }
 0x421   : > { %v2969_v33 = vmax.f32 %v2968_v48, %v2704_v20  ;;  %v2990_v38 = vmax.f32 %v2989_v22, %v2705_v30  ;;  %v2006_v25 = vadd.f32 %v2005_v7, %v12011_v56  ;;  %v1922_v22 = vadd.f32 %v11950_v55, %v11990_v40 }
 0x422   : > { %v12119_v19 = vpop.f32.mrf.mxu2  ;;  %v1925_v30 = vadd.f32 %v11966_v59, %v11990_v40 }
 0x423   : > { %v2329_v13 = vmax.f32 %v2006_v25, 0.0  ;;  %4873 = vmatpush.bf16.msra.mxu3 %v8764_v54  ;;  %v2344_v20 = vmax.f32 %v1922_v22, 0.0 }
 0x424   : > { %v2352_v25 = vmax.f32 %v1925_v30, 0.0 }
 0x425   : > { %v2538_v16 = vpack.c.bf16 %v2329_v13, %v2328_v44  ;;  %2047 = vmatmul.bf16.gmra.mxu3 %v11348_v0  ;;  %v8715_v0 = vld [vmem:[#allocation4 + $0x320] sm:$0xf] }
 0x426   : > { %v8716_v23 = vor.u32 %v10005_v26, %v8715_v0 }
 0x427   : > { %v2712_v32 = vunpack.c.l.bf16 %v2538_v16  ;;  %v2713_v52 = vunpack.c.h.bf16 %v2538_v16  ;;  %4874 = vmatpush.bf16.msra.mxu3 %v8748_v50 }
 0x428   : > { %v2008_v28 = vpop.f32.mrf.mxu3 }
 0x429   : > { %v2970_v49 = vmax.f32 %v2969_v33, %v2712_v32  ;;  %v2991_v11 = vmax.f32 %v2990_v38, %v2713_v52  ;;  %v2009_v4 = vadd.f32 %v2008_v28, %v12011_v56  ;;  %v10094_v33 = vld [vmem:[#allocation4 + $0x5f4] sm:$0xf0]  ;;  %v12136_v28 = vpack.c.b16 %v12033_v10, %v12033_v10 }
 0x42a   : > { %v9076_v38 = vor.u32 %v10094_v33, %v9075_v41  ;;  %v12126_v54 = vpop.f32.mrf.mxu2  ;;  %v1932_v10 = vadd.f32 %v12015_v15, %v11990_v40 }
 0x42b   : > { %v2337_v57 = vmax.f32 %v2009_v4, 0.0  ;;  %4875 = vmatpush.bf16.msra.mxu3 %v8732_v27  ;;  %v2368_v4 = vmax.f32 %v1930_v8, 0.0  ;;  %v1940_v8 = vadd.f32 %v12056_v21, %v11990_v40 }
 0x42c   : > { %5104 = vmatpush.bf16.msrb.mxu1 %v9076_v38  ;;  %v2376_v18 = vmax.f32 %v1932_v10, 0.0 }
 0x42d   : > { %v2542_v46 = vpack.c.bf16 %v2337_v57, %v2336_v45 }
 0x42f   : > { %v2720_v58 = vunpack.c.l.bf16 %v2542_v46  ;;  %v2721_v48 = vunpack.c.h.bf16 %v2542_v46  ;;  %4876 = vmatpush.bf16.msra.mxu3 %v8716_v23  ;;  %v13839_v46 = vld [vmem:[#allocation54_spill] sm:$0xff] }
 0x430   : > { %v2010_v53 = vpop.f32.mrf.mxu3  ;;  %v12151_v23 = vpack.c.b16 %v13839_v46, %v13839_v46 }
 0x431   : > { %v2971_v5 = vmax.f32 %v2970_v49, %v2720_v58  ;;  %v2992_v39 = vmax.f32 %v2991_v11, %v2721_v48  ;;  %v2011_v62 = vadd.f32 %v2010_v53, %v12011_v56  ;;  %v1935_v48 = vadd.f32 %v12027_v34, %v11990_v40 }
 0x432   : > { %v12138_v3 = vpop.f32.mrf.mxu2 }
 0x433   : > { %v2345_v36 = vmax.f32 %v2011_v62, 0.0  ;;  %4877 = vmatpush.bf16.msra.mxu3 %v8700_v61  ;;  %v2384_v61 = vmax.f32 %v1935_v48, 0.0 }
 0x435   : > { %2052 = vmatmul.bf16.gmra.mxu3 %v11370_v14  ;;  %v2546_v7 = vpack.c.bf16 %v2345_v36, %v2344_v20 }
 0x437   : > { %v2728_v44 = vunpack.c.l.bf16 %v2546_v7  ;;  %v2729_v13 = vunpack.c.h.bf16 %v2546_v7 }
 0x438   : > { %v2013_v55 = vpop.f32.mrf.mxu3 }
 0x439   : > { %v2014_v2 = vadd.f32 %v2013_v55, %v12011_v56  ;;  %v2972_v16 = vmax.f32 %v2971_v5, %v2728_v44  ;;  %v2993_v14 = vmax.f32 %v2992_v39, %v2729_v13  ;;  %v10090_v5 = vld [vmem:[#allocation4 + $0x5d4] sm:$0xf0]  ;;  %v1937_v44 = vadd.f32 %v12043_v51, %v11990_v40 }
 0x43a   : > { %v12144_v57 = vpop.f32.mrf.mxu2  ;;  %v9060_v15 = vor.u32 %v10090_v5, %v9059_v1 }
 0x43b   : > { %v2353_v31 = vmax.f32 %v2014_v2, 0.0 }
 0x43c   : > { %5105 = vmatpush.bf16.msrb.mxu1 %v9060_v15 }
 0x43d   : > { %v2550_v43 = vpack.c.bf16 %v2353_v31, %v2352_v25 }
 0x43f   : > { %v2736_v50 = vunpack.c.l.bf16 %v2550_v43  ;;  %v2737_v12 = vunpack.c.h.bf16 %v2550_v43 }
 0x440   : > { %v12128_v59 = vpop.f32.mrf.mxu3 }
 0x441   : > { %v12130_v32 = vmax.f32 %v2972_v16, %v2736_v50  ;;  %v12132_v52 = vmax.f32 %v2993_v14, %v2737_v12  ;;  %v2392_v12 = vmax.f32 %v1937_v44, 0.0 }
 0x442   : > { %v12156_v63 = vpop.f32.mrf.mxu2 }
 0x445   : > { %4852 = vmatmul.bf16.vlgmr.msrb.gmra.mxu3 %v12136_v28 }
 0x448   : > { %v2018_v49 = vpop.f32.mrf.mxu3 }
 0x449   : > { %v2019_v11 = vadd.f32 %v2018_v49, %v12011_v56 }
 0x44b   : > { %v2369_v27 = vmax.f32 %v2019_v11, 0.0 }
 0x44d   : > { %v2558_v45 = vpack.c.bf16 %v2369_v27, %v2368_v4 }
 0x44f   : > { %v2752_v7 = vunpack.c.l.bf16 %v2558_v45  ;;  %v2753_v55 = vunpack.c.h.bf16 %v2558_v45  ;;  %v2400_v45 = vmax.f32 %v1940_v8, 0.0 }
 0x450   : > { %v2020_v0 = vpop.f32.mrf.mxu3 }
 0x451   : > { %v2021_v26 = vadd.f32 %v2020_v0, %v12011_v56 }
 0x453   : > { %v2377_v58 = vmax.f32 %v2021_v26, 0.0 }
 0x455   : > { %4878 = vmatmul.bf16.vlgmr.msra.gmra.mxu3 %v12151_v23  ;;  %v2562_v22 = vpack.c.bf16 %v2377_v58, %v2376_v18 }
 0x457   : > { %v2760_v36 = vunpack.c.l.bf16 %v2562_v22  ;;  %v2761_v20 = vunpack.c.h.bf16 %v2562_v22 }
 0x458   : > { %v2023_v53 = vpop.f32.mrf.mxu3 }
 0x459   : > { %v2024_v39 = vadd.f32 %v2023_v53, %v12011_v56  ;;  %v3128_v34 = vmax.f32 %v2752_v7, %v2760_v36  ;;  %v3149_v41 = vmax.f32 %v2753_v55, %v2761_v20  ;;  %v1942_v53 = vadd.f32 %v12070_v24, %v11990_v40 }
 0x45a   : > { %v1945_v36 = vadd.f32 %v12081_v29, %v11990_v40  ;;  %v1947_v29 = vadd.f32 %v12088_v17, %v11990_v40  ;;  %v8923_v17 = vld [vmem:[#allocation4 + $0x4c0] sm:$0xf] }
 0x45b   : > { %v12159_v62 = vpop.f32.mrf.mxu0  ;;  %v2385_v30 = vmax.f32 %v2024_v39, 0.0 }
 0x45c   : > { %v2416_v24 = vmax.f32 %v1945_v36, 0.0 }
 0x45d   : > { %v2566_v2 = vpack.c.bf16 %v2385_v30, %v2384_v61  ;;  %v2408_v61 = vmax.f32 %v1942_v53, 0.0  ;;  %v9051_v53 = vld [vmem:[#allocation4 + $0x5c0] sm:$0xf] }
 0x45f   : > { %v2768_v33 = vunpack.c.l.bf16 %v2566_v2  ;;  %v2769_v38 = vunpack.c.h.bf16 %v2566_v2  ;;  %v9043_v2 = vld [vmem:[#allocation4 + $0x5a8] sm:$0xf] }
 0x460   : > { %v2025_v25 = vpop.f32.mrf.mxu3 }
 0x461   : > { %v2026_v13 = vadd.f32 %v2025_v25, %v12011_v56  ;;  %v12164_v31 = vpop.f32.mrf.mxu2  ;;  %v3129_v43 = vmax.f32 %v3128_v34, %v2768_v33  ;;  %v3150_v16 = vmax.f32 %v3149_v41, %v2769_v38  ;;  %v10086_v34 = vld [vmem:[#allocation4 + $0x5b4] sm:$0xf0] }
 0x462   : > { %v9044_v41 = vor.u32 %v10086_v34, %v9043_v2  ;;  %v8907_v2 = vld [vmem:[#allocation4 + $0x4a0] sm:$0xf]  ;;  %v10053_v34 = vld [vmem:[#allocation4 + $0x4ac] sm:$0xf0] }
 0x463   : > { %v2393_v14 = vmax.f32 %v2026_v13, 0.0  ;;  %v5050_v50 = vpop.f32.mrf.mxu0 }
 0x464   : > { %5106 = vmatpush.bf16.msrb.mxu1 %v9044_v41  ;;  %v9035_v41 = vld [vmem:[#allocation4 + $0x5a0] sm:$0xf] }
 0x465   : > { %v2570_v49 = vpack.c.bf16 %v2393_v14, %v2392_v12 }
 0x467   : > { %v2776_v0 = vunpack.c.l.bf16 %v2570_v49  ;;  %v2777_v51 = vunpack.c.h.bf16 %v2570_v49 }
 0x468   : > { %v2028_v11 = vpop.f32.mrf.mxu3 }
 0x469   : > { %v2029_v4 = vadd.f32 %v2028_v11, %v12011_v56  ;;  %v4842_v27 = vpop.f32.mrf.mxu2  ;;  %v3130_v46 = vmax.f32 %v3129_v43, %v2776_v0  ;;  %v3151_v58 = vmax.f32 %v3150_v16, %v2777_v51  ;;  %v8939_v11 = vld [vmem:[#allocation4 + $0x4e0] sm:$0xf]  ;;  %v10093_v51 = vld [vmem:[#allocation4 + $0x5ec] sm:$0xf0] }
 0x46a   : > { %v9067_v27 = vld [vmem:[#allocation4 + $0x5e0] sm:$0xf] }
 0x46b   : > { %v2401_v26 = vmax.f32 %v2029_v4, 0.0  ;;  %v10061_v4 = vld [vmem:[#allocation4 + $0x4ec] sm:$0xf0] }
 0x46c   : > { %v8940_v0 = vor.u32 %v10061_v4, %v8939_v11  ;;  %v10049_v11 = vld [vmem:[#allocation4 + $0x48c] sm:$0xf0]  ;;  %v9019_v4 = vld [vmem:[#allocation4 + $0x580] sm:$0xf] }
 0x46d   : > { %v2574_v10 = vpack.c.bf16 %v2401_v26, %v2400_v45  ;;  %v8947_v26 = vld [vmem:[#allocation4 + $0x4e8] sm:$0xf] }
 0x46e   : > { %4883 = vmatpush.bf16.msra.mxu2 %v8940_v0 }
 0x46f   : > { %v2784_v18 = vunpack.c.l.bf16 %v2574_v10  ;;  %v2785_v48 = vunpack.c.h.bf16 %v2574_v10  ;;  %v2424_v10 = vmax.f32 %v1947_v29, 0.0  ;;  %v1952_v29 = vadd.f32 %v12106_v37, %v11990_v40 }
 0x470   : > { %v2030_v22 = vpop.f32.mrf.mxu3 }
 0x471   : > { %v3131_v1 = vmax.f32 %v3130_v46, %v2784_v18  ;;  %v3152_v21 = vmax.f32 %v3151_v58, %v2785_v48  ;;  %v2031_v5 = vadd.f32 %v2030_v22, %v12011_v56  ;;  %v12172_v39 = vpop.f32.mrf.mxu2  ;;  %v9068_v46 = vor.u32 %v10093_v51, %v9067_v27  ;;  %v10062_v58 = vld [vmem:[#allocation4 + $0x4f4] sm:$0xf0]  ;;  %v10057_v22 = vld [vmem:[#allocation4 + $0x4cc] sm:$0xf0] }
 0x472   : > { %v8948_v18 = vor.u32 %v10062_v58, %v8947_v26  ;;  %v10081_v26 = vld [vmem:[#allocation4 + $0x58c] sm:$0xf0] }
 0x473   : > { %v2409_v15 = vmax.f32 %v2031_v5, 0.0  ;;  %4896 = vmatpush.bf16.msrb.mxu3 %v9068_v46  ;;  %v10089_v5 = vld [vmem:[#allocation4 + $0x5cc] sm:$0xf0]  ;;  %v10050_v46 = vld [vmem:[#allocation4 + $0x494] sm:$0xf0] }
 0x474   : > { %5091 = vmatpush.bf16.msra.mxu0 %v8948_v18  ;;  %v9020_v18 = vor.u32 %v10081_v26, %v9019_v4  ;;  %v10074_v4 = vld [vmem:[#allocation4 + $0x554] sm:$0xf0]  ;;  %v10037_v26 = vld [vmem:[#allocation4 + $0x42c] sm:$0xf0] }
 0x475   : > { %v2578_v20 = vpack.c.bf16 %v2409_v15, %v2408_v61  ;;  %v8931_v15 = vld [vmem:[#allocation4 + $0x4c8] sm:$0xf]  ;;  %v10058_v61 = vld [vmem:[#allocation4 + $0x4d4] sm:$0xf0] }
 0x477   : > { %v2792_v33 = vunpack.c.l.bf16 %v2578_v20  ;;  %v2793_v38 = vunpack.c.h.bf16 %v2578_v20  ;;  %v9052_v20 = vor.u32 %v10089_v5, %v9051_v53  ;;  %v9003_v5 = vld [vmem:[#allocation4 + $0x560] sm:$0xf] }
 0x478   : > { %v2033_v30 = vpop.f32.mrf.mxu3 }
 0x479   : > { %v2034_v7 = vadd.f32 %v2033_v30, %v12011_v56  ;;  %v4868_v55 = vpop.f32.mrf.mxu2  ;;  %v3132_v13 = vmax.f32 %v3131_v1, %v2792_v33  ;;  %v3153_v43 = vmax.f32 %v3152_v21, %v2793_v38  ;;  %v1950_v1 = vadd.f32 %v12094_v47, %v11990_v40  ;;  %4897 = vmatpush.bf16.msrb.mxu3 %v9052_v20  ;;  %v10077_v20 = vld [vmem:[#allocation4 + $0x56c] sm:$0xf0] }
 0x47a   : > { %v8924_v21 = vor.u32 %v10057_v22, %v8923_v17  ;;  %v8932_v30 = vor.u32 %v10058_v61, %v8931_v15  ;;  %v8908_v47 = vor.u32 %v10053_v34, %v8907_v2  ;;  %v9027_v17 = vld [vmem:[#allocation4 + $0x588] sm:$0xf]  ;;  %v10082_v22 = vld [vmem:[#allocation4 + $0x594] sm:$0xf0]  ;;  %v2440_v15 = vmax.f32 %v1952_v29, 0.0 }
 0x47b   : > { %v2417_v25 = vmax.f32 %v2034_v7, 0.0  ;;  %v9011_v2 = vld [vmem:[#allocation4 + $0x568] sm:$0xf]  ;;  %v10078_v34 = vld [vmem:[#allocation4 + $0x574] sm:$0xf0] }
 0x47c   : > { %4884 = vmatpush.bf16.msra.mxu2 %v8924_v21  ;;  %5092 = vmatpush.bf16.msra.mxu0 %v8932_v30  ;;  %v10045_v21 = vld [vmem:[#allocation4 + $0x46c] sm:$0xf0]  ;;  %v8883_v30 = vld [vmem:[#allocation4 + $0x468] sm:$0xf] }
 0x47d   : > { %v2582_v44 = vpack.c.bf16 %v2417_v25, %v2416_v24  ;;  %v2432_v24 = vmax.f32 %v1950_v1, 0.0  ;;  %v10085_v25 = vld [vmem:[#allocation4 + $0x5ac] sm:$0xf0]  ;;  %v8875_v1 = vld [vmem:[#allocation4 + $0x460] sm:$0xf] }
 0x47f   : > { %v2800_v16 = vunpack.c.l.bf16 %v2582_v44  ;;  %v2801_v14 = vunpack.c.h.bf16 %v2582_v44  ;;  %v8915_v44 = vld [vmem:[#allocation4 + $0x4a8] sm:$0xf] }
 0x480   : > { %v2035_v50 = vpop.f32.mrf.mxu3  ;;  %4885 = vmatpush.bf16.msra.mxu2 %v8908_v47  ;;  %v10041_v47 = vld [vmem:[#allocation4 + $0x44c] sm:$0xf0] }
 0x481   : > { %v3133_v12 = vmax.f32 %v3132_v13, %v2800_v16  ;;  %v3154_v8 = vmax.f32 %v3153_v43, %v2801_v14  ;;  %v2036_v49 = vadd.f32 %v2035_v50, %v12011_v56  ;;  %v9036_v13 = vor.u32 %v10085_v25, %v9035_v41  ;;  %v10054_v43 = vld [vmem:[#allocation4 + $0x4b4] sm:$0xf0]  ;;  %v8987_v25 = vld [vmem:[#allocation4 + $0x540] sm:$0xf] }
 0x482   : > { %v8916_v14 = vor.u32 %v10054_v43, %v8915_v44  ;;  %v1955_v44 = vadd.f32 %v12114_v6, %v11990_v40  ;;  %v10073_v43 = vld [vmem:[#allocation4 + $0x54c] sm:$0xf0]  ;;  %v8971_v6 = vld [vmem:[#allocation4 + $0x520] sm:$0xf] }
 0x483   : > { %v2425_v45 = vmax.f32 %v2036_v49, 0.0  ;;  %4898 = vmatpush.bf16.msrb.mxu3 %v9036_v13  ;;  %v8891_v49 = vld [vmem:[#allocation4 + $0x480] sm:$0xf] }
 0x484   : > { %5093 = vmatpush.bf16.msra.mxu0 %v8916_v14  ;;  %v8892_v51 = vor.u32 %v10049_v11, %v8891_v49  ;;  %v10042_v14 = vld [vmem:[#allocation4 + $0x454] sm:$0xf0]  ;;  %v8995_v11 = vld [vmem:[#allocation4 + $0x548] sm:$0xf] }
 0x485   : > { %v2586_v48 = vpack.c.bf16 %v2425_v45, %v2424_v10  ;;  %v8899_v10 = vld [vmem:[#allocation4 + $0x488] sm:$0xf] }
 0x486   : > { %4886 = vmatpush.bf16.msra.mxu2 %v8892_v51  ;;  %v8843_v51 = vld [vmem:[#allocation4 + $0x420] sm:$0xf] }
 0x487   : > { %v2808_v55 = vunpack.c.l.bf16 %v2586_v48  ;;  %v2809_v33 = vunpack.c.h.bf16 %v2586_v48  ;;  %v8900_v48 = vor.u32 %v10050_v46, %v8899_v10  ;;  %4899 = vmatpush.bf16.msrb.mxu3 %v9020_v18  ;;  %v2448_v10 = vmax.f32 %v1955_v44, 0.0 }
 0x488   : > { %v2038_v36 = vpop.f32.mrf.mxu3  ;;  %v8844_v18 = vor.u32 %v10037_v26, %v8843_v51 }
 0x489   : > { %v2039_v7 = vadd.f32 %v2038_v36, %v12011_v56  ;;  %v3134_v50 = vmax.f32 %v3133_v12, %v2808_v55  ;;  %v3155_v27 = vmax.f32 %v3154_v8, %v2809_v33  ;;  %v9028_v8 = vor.u32 %v10082_v22, %v9027_v17  ;;  %5094 = vmatpush.bf16.msra.mxu0 %v8900_v48  ;;  %v10046_v55 = vld [vmem:[#allocation4 + $0x474] sm:$0xf0]  ;;  %v10069_v48 = vld [vmem:[#allocation4 + $0x52c] sm:$0xf0]  ;;  %v8851_v17 = vld [vmem:[#allocation4 + $0x428] sm:$0xf] }
 0x48a   : > { %v8876_v36 = vor.u32 %v10045_v21, %v8875_v1  ;;  %v8884_v41 = vor.u32 %v10046_v55, %v8883_v30  ;;  %v8972_v22 = vor.u32 %v10069_v48, %v8971_v6  ;;  %v10070_v1 = vld [vmem:[#allocation4 + $0x534] sm:$0xf0]  ;;  %v10033_v30 = vld [vmem:[#allocation4 + $0x40c] sm:$0xf0]  ;;  %v9307_v48 = vld [vmem:[#allocation4 + $0x7c0] sm:$0xf] }
 0x48b   : > { %v2433_v38 = vmax.f32 %v2039_v7, 0.0  ;;  %5107 = vmatpush.bf16.msrb.mxu1 %v9028_v8  ;;  %v9004_v7 = vor.u32 %v10077_v20, %v9003_v5  ;;  %v8979_v8 = vld [vmem:[#allocation4 + $0x528] sm:$0xf]  ;;  %v8827_v20 = vld [vmem:[#allocation4 + $0x400] sm:$0xf] }
 0x48c   : > { %4887 = vmatpush.bf16.msra.mxu2 %v8876_v36 }
 0x48d   : > { %v2590_v16 = vpack.c.bf16 %v2433_v38, %v2432_v24  ;;  %v9012_v24 = vor.u32 %v10078_v34, %v9011_v2  ;;  %4900 = vmatpush.bf16.msrb.mxu3 %v9004_v7  ;;  %v8859_v38 = vld [vmem:[#allocation4 + $0x440] sm:$0xf]  ;;  %5095 = vmatpush.bf16.msra.mxu0 %v8884_v41  ;;  %v8828_v41 = vor.u32 %v10033_v30, %v8827_v20 }
 0x48e   : > { %v8860_v13 = vor.u32 %v10041_v47, %v8859_v38  ;;  %v8955_v7 = vld [vmem:[#allocation4 + $0x500] sm:$0xf]  ;;  %v10125_v38 = vld [vmem:[#allocation4 + $0x6ec] sm:$0xf0] }
 0x48f   : > { %v2816_v45 = vunpack.c.l.bf16 %v2590_v16  ;;  %v2817_v0 = vunpack.c.h.bf16 %v2590_v16  ;;  %5108 = vmatpush.bf16.msrb.mxu1 %v9012_v24  ;;  %v8867_v16 = vld [vmem:[#allocation4 + $0x448] sm:$0xf]  ;;  %v10065_v24 = vld [vmem:[#allocation4 + $0x50c] sm:$0xf0] }
 0x490   : > { %v2040_v58 = vpop.f32.mrf.mxu3  ;;  %v8868_v49 = vor.u32 %v10042_v14, %v8867_v16  ;;  %4888 = vmatpush.bf16.msra.mxu2 %v8860_v13  ;;  %v10157_v13 = vld [vmem:[#allocation4 + $0x7ec] sm:$0xf0] }
 0x491   : > { %v12185_v53 = vmax.f32 %v3134_v50, %v2816_v45  ;;  %v12187_v37 = vmax.f32 %v3155_v27, %v2817_v0  ;;  %v2041_v12 = vadd.f32 %v2040_v58, %v12011_v56  ;;  %v8988_v50 = vor.u32 %v10073_v43, %v8987_v25 }
 0x492   : > { %v8996_v45 = vor.u32 %v10074_v4, %v8995_v11  ;;  %5096 = vmatpush.bf16.msra.mxu0 %v8868_v49  ;;  %v8956_v25 = vor.u32 %v10065_v24, %v8955_v7  ;;  %v10066_v49 = vld [vmem:[#allocation4 + $0x514] sm:$0xf0]  ;;  %v9163_v7 = vld [vmem:[#allocation4 + $0x6a0] sm:$0xf]  ;;  %v10149_v24 = vld [vmem:[#allocation4 + $0x7ac] sm:$0xf0] }
 0x493   : > { %v2441_v61 = vmax.f32 %v2041_v12, 0.0  ;;  %4901 = vmatpush.bf16.msrb.mxu3 %v8988_v50  ;;  %v10038_v12 = vld [vmem:[#allocation4 + $0x434] sm:$0xf0]  ;;  %v8963_v50 = vld [vmem:[#allocation4 + $0x508] sm:$0xf] }
 0x494   : > { %5109 = vmatpush.bf16.msrb.mxu1 %v8996_v45  ;;  %4889 = vmatpush.bf16.msra.mxu2 %v8844_v18  ;;  %v8852_v5 = vor.u32 %v10038_v12, %v8851_v17  ;;  %v8964_v4 = vor.u32 %v10066_v49, %v8963_v50  ;;  %v8437_v45 = vld [vmem:[#allocation4 + $0xf8] sm:$0xf0]  ;;  %v10121_v18 = vld [vmem:[#allocation4 + $0x6cc] sm:$0xf0] }
 0x495   : > { %v2594_v33 = vpack.c.bf16 %v2441_v61, %v2440_v15  ;;  %v8980_v15 = vor.u32 %v10070_v1, %v8979_v8  ;;  %v1957_v61 = vadd.f32 %v12119_v19, %v11990_v40  ;;  %v9323_v19 = vld [vmem:[#allocation4 + $0x7e0] sm:$0xf]  ;;  %v10153_v17 = vld [vmem:[#allocation4 + $0x7cc] sm:$0xf0]  ;;  %v9928_v8 = vld [vmem:[#allocation4 + $0xcc] sm:$0xf] }
 0x496   : > { %5097 = vmatpush.bf16.msra.mxu0 %v8852_v5  ;;  %v9324_v14 = vor.u32 %v10157_v13, %v9323_v19  ;;  %v9308_v12 = vor.u32 %v10153_v17, %v9307_v48  ;;  %v8421_v1 = vld [vmem:[#allocation4 + $0xd8] sm:$0xf0]  ;;  %v1960_v5 = vadd.f32 %v12126_v54, %v11990_v40  ;;  %v1962_v48 = vadd.f32 %v12138_v3, %v11990_v40 }
 0x497   : > { %v2824_v0 = vunpack.c.l.bf16 %v2594_v33  ;;  %v2825_v46 = vunpack.c.h.bf16 %v2594_v33  ;;  %4902 = vmatpush.bf16.msrb.mxu3 %v8972_v22  ;;  %v9195_v33 = vld [vmem:[#allocation4 + $0x6e0] sm:$0xf]  ;;  %v2456_v51 = vmax.f32 %v1957_v61, 0.0  ;;  %v8549_v61 = vld [vmem:[#allocation4 + $0x1d8] sm:$0xf0] }
 0x498   : > { %v2043_v29 = vpop.f32.mrf.mxu3  ;;  %5110 = vmatpush.bf16.msrb.mxu1 %v8980_v15  ;;  %v9196_v44 = vor.u32 %v10125_v38, %v9195_v33  ;;  %4890 = vmatpush.bf16.msra.mxu2 %v8828_v41  ;;  %v8424_v15 = vor.u32 %v9928_v8, %v8421_v1  ;;  %v9924_v33 = vld [vmem:[#allocation4 + $0xac] sm:$0xf]  ;;  %v8405_v38 = vld [vmem:[#allocation4 + $0xb8] sm:$0xf0]  ;;  %v2464_v13 = vmax.f32 %v1960_v5, 0.0 }
 0x499   : > { %v2044_v27 = vadd.f32 %v2043_v29, %v12011_v56  ;;  %v3136_v36 = vmax.f32 %v12185_v53, %v2824_v0  ;;  %v3157_v55 = vmax.f32 %v12187_v37, %v2825_v46  ;;  %v8835_v53 = vld [vmem:[#allocation4 + $0x408] sm:$0xf]  ;;  %v10034_v29 = vld [vmem:[#allocation4 + $0x414] sm:$0xf0]  ;;  %v9964_v0 = vld [vmem:[#allocation4 + $0x1ec] sm:$0xf] }
 0x49a   : > { %v8836_v11 = vor.u32 %v10034_v29, %v8835_v53  ;;  %v9179_v46 = vld [vmem:[#allocation4 + $0x6c0] sm:$0xf]  ;;  %v8408_v53 = vor.u32 %v9924_v33, %v8405_v38  ;;  %v8373_v3 = vld [vmem:[#allocation4 + $0x78] sm:$0xf0]  ;;  %v1965_v33 = vadd.f32 %v12144_v57, %v11990_v40 }
 0x49b   : > { %v2449_v58 = vmax.f32 %v2044_v27, 0.0  ;;  %4903 = vmatpush.bf16.msrb.mxu3 %v8956_v25  ;;  %v9932_v27 = vld [vmem:[#allocation4 + $0xec] sm:$0xf]  ;;  %v9180_v22 = vor.u32 %v10121_v18, %v9179_v46  ;;  %v9131_v5 = vld [vmem:[#allocation4 + $0x660] sm:$0xf] }
 0x49c   : > { %4909 = vmatpush.bf16.msrb.mxu2 %v9196_v44  ;;  %v8440_v6 = vor.u32 %v9932_v27, %v8437_v45  ;;  %5098 = vmatpush.bf16.msra.mxu0 %v8836_v11  ;;  %v9956_v25 = vld [vmem:[#allocation4 + $0x1ac] sm:$0xf]  ;;  %v8533_v44 = vld [vmem:[#allocation4 + $0x1b8] sm:$0xf0]  ;;  %v9147_v11 = vld [vmem:[#allocation4 + $0x680] sm:$0xf] }
 0x49d   : > { %v2598_v21 = vpack.c.bf16 %v2449_v58, %v2448_v10  ;;  %v8565_v10 = vld [vmem:[#allocation4 + $0x1f8] sm:$0xf0]  ;;  %5111 = vmatpush.bf16.msrb.mxu1 %v8964_v4  ;;  %v10113_v4 = vld [vmem:[#allocation4 + $0x68c] sm:$0xf0]  ;;  %v9275_v45 = vld [vmem:[#allocation4 + $0x780] sm:$0xf] }
 0x49e   : > { %v8568_v58 = vor.u32 %v9964_v0, %v8565_v10  ;;  %v9148_v27 = vor.u32 %v10113_v4, %v9147_v11  ;;  %v10145_v0 = vld [vmem:[#allocation4 + $0x78c] sm:$0xf0]  ;;  %v8389_v10 = vld [vmem:[#allocation4 + $0x98] sm:$0xf0]  ;;  %v9952_v46 = vld [vmem:[#allocation4 + $0x18c] sm:$0xf] }
 0x49f   : > { %v2832_v2 = vunpack.c.l.bf16 %v2598_v21  ;;  %v2833_v34 = vunpack.c.h.bf16 %v2598_v21  ;;  %4922 = vmatpush.bf16.msra.mxu3 %v9324_v14  ;;  %v9960_v21 = vld [vmem:[#allocation4 + $0x1cc] sm:$0xf]  ;;  %v8485_v57 = vld [vmem:[#allocation4 + $0x158] sm:$0xf0]  ;;  %v2480_v4 = vmax.f32 %v1965_v33, 0.0 }
 0x4a0   : > { %v2045_v47 = vpop.f32.mrf.mxu3  ;;  %5143 = vmatpush.bf16.msrb.mxu0 %v8440_v6  ;;  %4910 = vmatpush.bf16.msrb.mxu2 %v9180_v22  ;;  %v8552_v30 = vor.u32 %v9960_v21, %v8549_v61  ;;  %v9276_v6 = vor.u32 %v10145_v0, %v9275_v45  ;;  %v9259_v61 = vld [vmem:[#allocation4 + $0x760] sm:$0xf]  ;;  %v9944_v11 = vld [vmem:[#allocation4 + $0x14c] sm:$0xf]  ;;  %v8325_v33 = vld [vmem:[#allocation4 + $0x18] sm:$0xf0] }
 0x4a1   : > { %v12197_v43 = vmax.f32 %v3136_v36, %v2832_v2  ;;  %v12199_v16 = vmax.f32 %v3157_v55, %v2833_v34  ;;  %v2046_v37 = vadd.f32 %v2045_v47, %v12011_v56  ;;  %5156 = vmatpush.bf16.msra.mxu1 %v8568_v58  ;;  %v2016_v36 = vadd.f32 %v12128_v59, %v12011_v56  ;;  %v10117_v55 = vld [vmem:[#allocation4 + $0x6ac] sm:$0xf0]  ;;  %v9291_v2 = vld [vmem:[#allocation4 + $0x7a0] sm:$0xf]  ;;  %v13840_v59 = vld [vmem:[#allocation33_spill] sm:$0xff] }
 0x4a2   : > { %v9164_v41 = vor.u32 %v10117_v55, %v9163_v7  ;;  %v9292_v47 = vor.u32 %v10149_v24, %v9291_v2  ;;  %v1927_v19 = vadd.f32 %v13840_v59, %v11990_v40  ;;  %v8517_v58 = vld [vmem:[#allocation4 + $0x198] sm:$0xf0]  ;;  %v10141_v7 = vld [vmem:[#allocation4 + $0x76c] sm:$0xf0]  ;;  %v9916_v55 = vld [vmem:[#allocation4 + $0x6c] sm:$0xf]  ;;  %v8488_v0 = vor.u32 %v9944_v11, %v8485_v57 }
 0x4a3   : > { %v2457_v26 = vmax.f32 %v2046_v37, 0.0  ;;  %4923 = vmatpush.bf16.msra.mxu3 %v9308_v12  ;;  %v8536_v37 = vor.u32 %v9956_v25, %v8533_v44  ;;  %v2361_v14 = vmax.f32 %v2016_v36, 0.0  ;;  %v8520_v22 = vor.u32 %v9952_v46, %v8517_v58  ;;  %v8501_v24 = vld [vmem:[#allocation4 + $0x178] sm:$0xf0]  ;;  %v9115_v44 = vld [vmem:[#allocation4 + $0x640] sm:$0xf] }
 0x4a4   : > { %5144 = vmatpush.bf16.msrb.mxu0 %v8424_v15  ;;  %4911 = vmatpush.bf16.msrb.mxu2 %v9164_v41  ;;  %v2360_v18 = vmax.f32 %v1927_v19, 0.0  ;;  %v10109_v15 = vld [vmem:[#allocation4 + $0x66c] sm:$0xf0]  ;;  %v9948_v41 = vld [vmem:[#allocation4 + $0x16c] sm:$0xf]  ;;  %v8376_v38 = vor.u32 %v9916_v55, %v8373_v3 }
 0x4a5   : > { %v2602_v20 = vpack.c.bf16 %v2457_v26, %v2456_v51  ;;  %5157 = vmatpush.bf16.msra.mxu1 %v8552_v30  ;;  %v9920_v51 = vld [vmem:[#allocation4 + $0x8c] sm:$0xf]  ;;  %v9132_v30 = vor.u32 %v10109_v15, %v9131_v5  ;;  %v10105_v59 = vld [vmem:[#allocation4 + $0x64c] sm:$0xf0]  ;;  %v9083_v5 = vld [vmem:[#allocation4 + $0x600] sm:$0xf] }
 0x4a6   : > { %v8392_v17 = vor.u32 %v9920_v51, %v8389_v10  ;;  %v2554_v36 = vpack.c.bf16 %v2361_v14, %v2360_v18  ;;  %v9912_v14 = vld [vmem:[#allocation4 + $0x4c] sm:$0xf]  ;;  %v9099_v51 = vld [vmem:[#allocation4 + $0x620] sm:$0xf]  ;;  %v10133_v18 = vld [vmem:[#allocation4 + $0x72c] sm:$0xf0] }
 0x4a7   : > { %v2840_v29 = vunpack.c.l.bf16 %v2602_v20  ;;  %v2841_v50 = vunpack.c.h.bf16 %v2602_v20  ;;  %4924 = vmatpush.bf16.msra.mxu3 %v9292_v47  ;;  %v2472_v47 = vmax.f32 %v1962_v48, 0.0  ;;  %v9908_v48 = vld [vmem:[#allocation4 + $0x2c] sm:$0xf] }
 0x4a8   : > { %v2048_v34 = vpop.f32.mrf.mxu3  ;;  %5145 = vmatpush.bf16.msrb.mxu0 %v8408_v53  ;;  %4912 = vmatpush.bf16.msrb.mxu2 %v9148_v27  ;;  %v2744_v19 = vunpack.c.l.bf16 %v2554_v36  ;;  %v9243_v53 = vld [vmem:[#allocation4 + $0x740] sm:$0xf] }
 0x4a9   : > { %v2049_v54 = vadd.f32 %v2048_v34, %v12011_v56  ;;  %5158 = vmatpush.bf16.msra.mxu1 %v8536_v37  ;;  %v3138_v12 = vmax.f32 %v12197_v43, %v2840_v29  ;;  %v3159_v8 = vmax.f32 %v12199_v16, %v2841_v50  ;;  %v9260_v16 = vor.u32 %v10141_v7, %v9259_v61  ;;  %v10137_v37 = vld [vmem:[#allocation4 + $0x74c] sm:$0xf0] }
 0x4aa   : > { %v2745_v29 = vunpack.c.h.bf16 %v2554_v36  ;;  %v9244_v50 = vor.u32 %v10137_v37, %v9243_v53  ;;  %v2974_v10 = vmax.f32 %v12130_v32, %v2744_v19  ;;  %v9211_v32 = vld [vmem:[#allocation4 + $0x700] sm:$0xf] }
 0x4ab   : > { %v2465_v49 = vmax.f32 %v2049_v54, 0.0  ;;  %4925 = vmatpush.bf16.msra.mxu3 %v9276_v6  ;;  %v8504_v54 = vor.u32 %v9948_v41, %v8501_v24  ;;  %v9227_v6 = vld [vmem:[#allocation4 + $0x720] sm:$0xf]  ;;  %v9904_v24 = vld [vmem:[#allocation4 + $0xc] sm:$0xf] }
 0x4ac   : > { %5146 = vmatpush.bf16.msrb.mxu0 %v8392_v17  ;;  %4913 = vmatpush.bf16.msrb.mxu2 %v9132_v30  ;;  %v8341_v17 = vld [vmem:[#allocation4 + $0x38] sm:$0xf0]  ;;  %v10129_v30 = vld [vmem:[#allocation4 + $0x70c] sm:$0xf0] }
 0x4ad   : > { %v2606_v26 = vpack.c.bf16 %v2465_v49, %v2464_v13  ;;  %5159 = vmatpush.bf16.msra.mxu1 %v8520_v22  ;;  %v9116_v13 = vor.u32 %v10105_v59, %v9115_v44  ;;  %v8357_v49 = vld [vmem:[#allocation4 + $0x58] sm:$0xf0]  ;;  %v2995_v22 = vmax.f32 %v12132_v52, %v2745_v29  ;;  %v8344_v61 = vor.u32 %v9908_v48, %v8341_v17 }
 0x4ae   : > { %v8360_v45 = vor.u32 %v9912_v14, %v8357_v49  ;;  %v9212_v52 = vor.u32 %v10129_v30, %v9211_v32  ;;  %v8453_v44 = vld [vmem:[#allocation4 + $0x118] sm:$0xf0] }
 0x4af   : > { %v2848_v1 = vunpack.c.l.bf16 %v2606_v26  ;;  %v2849_v21 = vunpack.c.h.bf16 %v2606_v26  ;;  %4926 = vmatpush.bf16.msra.mxu3 %v9260_v16  ;;  %v10101_v26 = vld [vmem:[#allocation4 + $0x62c] sm:$0xf0]  ;;  %v2996_v16 = vrot.slane %v2995_v22, 4 }
 0x4b0   : > { %v2050_v20 = vpop.f32.mrf.mxu3  ;;  %5147 = vmatpush.bf16.msrb.mxu0 %v8376_v38  ;;  %4914 = vmatpush.bf16.msrb.mxu2 %v9116_v13  ;;  %v9100_v58 = vor.u32 %v10101_v26, %v9099_v51  ;;  %v1967_v38 = vadd.f32 %v12156_v63, %v11990_v40  ;;  %v12231_v63 = vld [vmem:[%s13670_s9] sm:$0xf] }
 0x4b1   : > { %v12213_v2 = vmax.f32 %v3138_v12, %v2848_v1  ;;  %v12215_v34 = vmax.f32 %v3159_v8, %v2849_v21  ;;  %v2051_v43 = vadd.f32 %v2050_v20, %v12011_v56  ;;  %5160 = vmatpush.bf16.msra.mxu1 %v8504_v54  ;;  %v9228_v8 = vor.u32 %v10133_v18, %v9227_v6  ;;  %v9940_v1 = vld [vmem:[#allocation4 + $0x12c] sm:$0xf]  ;;  %v8469_v21 = vld [vmem:[#allocation4 + $0x138] sm:$0xf0]  ;;  %v10097_v20 = vld [vmem:[#allocation4 + $0x60c] sm:$0xf0] }
 0x4b2   : > { %v8472_v36 = vor.u32 %v9940_v1, %v8469_v21  ;;  %v9084_v3 = vor.u32 %v10097_v20, %v9083_v5  ;;  %v2997_v29 = vmax.f32 %v2995_v22, %v2996_v16 }
 0x4b3   : > { %v2473_v25 = vmax.f32 %v2051_v43, 0.0  ;;  %4927 = vmatpush.bf16.msra.mxu3 %v9244_v50  ;;  %v2975_v43 = vrot.slane %v2974_v10, 4 }
 0x4b4   : > { %5148 = vmatpush.bf16.msrb.mxu0 %v8360_v45  ;;  %4915 = vmatpush.bf16.msrb.mxu2 %v9100_v58 }
 0x4b5   : > { %v2610_v27 = vpack.c.bf16 %v2473_v25, %v2472_v47  ;;  %5161 = vmatpush.bf16.msra.mxu1 %v8488_v0  ;;  %v8328_v47 = vor.u32 %v9904_v24, %v8325_v33  ;;  %v9936_v25 = vld [vmem:[#allocation4 + $0x10c] sm:$0xf]  ;;  %v2976_v37 = vmax.f32 %v2974_v10, %v2975_v43 }
 0x4b6   : > { %v8456_v53 = vor.u32 %v9936_v25, %v8453_v44 }
 0x4b7   : > { %v2856_v15 = vunpack.c.l.bf16 %v2610_v27  ;;  %v2857_v7 = vunpack.c.h.bf16 %v2610_v27  ;;  %4928 = vmatpush.bf16.msra.mxu3 %v9228_v8  ;;  %v2977_v57 = vrot.slane %v2976_v37, 2 }
 0x4b8   : > { %v2053_v46 = vpop.f32.mrf.mxu3  ;;  %5149 = vmatpush.bf16.msrb.mxu0 %v8344_v61  ;;  %4916 = vmatpush.bf16.msrb.mxu2 %v9084_v3 }
 0x4b9   : > { %v2054_v12 = vadd.f32 %v2053_v46, %v12011_v56  ;;  %v3140_v54 = vmax.f32 %v12213_v2, %v2856_v15  ;;  %5162 = vmatpush.bf16.msra.mxu1 %v8472_v36  ;;  %v3161_v59 = vmax.f32 %v12215_v34, %v2857_v7  ;;  %v2488_v2 = vmax.f32 %v1967_v38, 0.0  ;;  %v8429_v38 = vld [vmem:[#allocation4 + $0xf0] sm:$0xf0] }
 0x4ba   : > { %v3486_v34 = vperm.slane %v12231_v63, 0  ;;  %v2978_v26 = vmax.f32 %v2976_v37, %v2977_v57  ;;  %v10092_v37 = vld [vmem:[#allocation4 + $0x5ec] sm:$0xf]  ;;  %v9959_v57 = vld [vmem:[#allocation4 + $0x1c4] sm:$0xf] }
 0x4bb   : > { %v2481_v55 = vmax.f32 %v2054_v12, 0.0  ;;  %4929 = vmatpush.bf16.msra.mxu3 %v9212_v52 }
 0x4bc   : > { %5150 = vmatpush.bf16.msrb.mxu0 %v8328_v47  ;;  %v4841_v45 = vadd.f32 %v12164_v31, %v3486_v34  ;;  %v2979_v17 = vrot.slane %v2978_v26, 1  ;;  %v8557_v47 = vld [vmem:[#allocation4 + $0x1f0] sm:$0xf0] }
 0x4bd   : > { %v2614_v41 = vpack.c.bf16 %v2481_v55, %v2480_v4  ;;  %5163 = vmatpush.bf16.msra.mxu1 %v8456_v53  ;;  %v2998_v4 = vrot.slane %v2997_v29, 2  ;;  %v8949_v53 = vld [vmem:[#allocation4 + $0x4f8] sm:$0xf0] }
 0x4be   : > { %v2980_v5 = vmax.f32 %v2978_v26, %v2979_v17  ;;  %v10088_v26 = vld [vmem:[#allocation4 + $0x5cc] sm:$0xf]  ;;  %v8525_v17 = vld [vmem:[#allocation4 + $0x1b0] sm:$0xf0] }
 0x4bf   : > { %v2864_v19 = vunpack.c.l.bf16 %v2614_v41  ;;  %v2865_v13 = vunpack.c.h.bf16 %v2614_v41  ;;  %v2999_v6 = vmax.f32 %v2997_v29, %v2998_v4  ;;  %v9931_v41 = vld [vmem:[#allocation4 + $0xe4] sm:$0xf]  ;;  %v8541_v4 = vld [vmem:[#allocation4 + $0x1d0] sm:$0xf0] }
 0x4c0   : > { %v2055_v14 = vpop.f32.mrf.mxu3  ;;  %v3216_v30 = vpack.c.bf16 %v2980_v5, %v2980_v5  ;;  %v9045_v5 = vld [vmem:[#allocation4 + $0x5b8] sm:$0xf0] }
 0x4c1   : > { %v3141_v50 = vmax.f32 %v3140_v54, %v2864_v19  ;;  %v3162_v49 = vmax.f32 %v3161_v59, %v2865_v13  ;;  %v2056_v40 = vadd.f32 %v2055_v14, %v12011_v56  ;;  %v3000_v22 = vrot.slane %v2999_v6, 1  ;;  %v9963_v54 = vld [vmem:[#allocation4 + $0x1e4] sm:$0xf]  ;;  %v10060_v13 = vld [vmem:[#allocation4 + $0x4ec] sm:$0xf] }
 0x4c2   : > { %v3514_v24 = vunpack.c.l.b16 %v3216_v30  ;;  %v9077_v14 = vld [vmem:[#allocation4 + $0x5f8] sm:$0xf0] }
 0x4c3   : > { %v2489_v11 = vmax.f32 %v2056_v40, 0.0  ;;  %v3001_v61 = vmax.f32 %v2999_v6, %v3000_v22  ;;  %v9927_v40 = vld [vmem:[#allocation4 + $0xc4] sm:$0xf] }
 0x4c5   : > { %v2618_v27 = vpack.c.bf16 %v2489_v11, %v2488_v2  ;;  %v3217_v7 = vpack.c.bf16 %v3001_v61, %v3001_v61  ;;  %v8413_v11 = vld [vmem:[#allocation4 + $0xd0] sm:$0xf0] }
 0x4c6   : > { %v8416_v6 = vor.u32 %v9927_v40, %v8413_v11  ;;  %v9943_v40 = vld [vmem:[#allocation4 + $0x144] sm:$0xf]  ;;  %v8477_v11 = vld [vmem:[#allocation4 + $0x150] sm:$0xf0] }
 0x4c7   : > { %v2872_v0 = vunpack.c.l.bf16 %v2618_v27  ;;  %v2873_v51 = vunpack.c.h.bf16 %v2618_v27  ;;  %v3515_v25 = vunpack.c.l.b16 %v3217_v7  ;;  %v8952_v27 = vor.u32 %v10060_v13, %v8949_v53  ;;  %v10076_v13 = vld [vmem:[#allocation4 + $0x56c] sm:$0xf]  ;;  %v9013_v53 = vld [vmem:[#allocation4 + $0x578] sm:$0xf0] }
 0x4c8   : > { %v4853_v56 = vpop.f32.mrf.mxu3 }
 0x4c9   : > { %v3142_v10 = vmax.f32 %v3141_v50, %v2872_v0  ;;  %v3163_v46 = vmax.f32 %v3162_v49, %v2873_v51  ;;  %v4854_v58 = vadd.f32 %v4853_v56, %v4841_v45  ;;  %v8560_v49 = vor.u32 %v9963_v54, %v8557_v47  ;;  %v10056_v0 = vld [vmem:[#allocation4 + $0x4cc] sm:$0xf]  ;;  %v8933_v51 = vld [vmem:[#allocation4 + $0x4d8] sm:$0xf0]  ;;  %v8493_v54 = vld [vmem:[#allocation4 + $0x170] sm:$0xf0] }
 0x4ca   : > { %v9080_v45 = vor.u32 %v10092_v37, %v9077_v14  ;;  %v9061_v56 = vld [vmem:[#allocation4 + $0x5d8] sm:$0xf0]  ;;  %v8936_v22 = vor.u32 %v10056_v0, %v8933_v51  ;;  %v10072_v0 = vld [vmem:[#allocation4 + $0x54c] sm:$0xf] }
 0x4cb   : > { %v3143_v18 = vrot.slane %v3142_v10, 4  ;;  %v3164_v48 = vrot.slane %v3163_v46, 4  ;;  %v4867_v16 = vadd.f32 %v12172_v39, %v4854_v58  ;;  %v8432_v39 = vor.u32 %v9931_v41, %v8429_v38  ;;  %v9947_v38 = vld [vmem:[#allocation4 + $0x164] sm:$0xf] }
 0x4cc   : > { %v8496_v14 = vor.u32 %v9947_v38, %v8493_v54  ;;  %v10173_v38 = vld [vmem:[%s13668_s7 + $0x6c] sm:$0xf0]  ;;  %v10171_v54 = vld [vmem:[%s13668_s7 + $0x64] sm:$0xf] }
 0x4cd   : > { %v3144_v12 = vmax.f32 %v3142_v10, %v3143_v18  ;;  %v3165_v8 = vmax.f32 %v3163_v46, %v3164_v48  ;;  %v8544_v10 = vor.u32 %v9959_v57, %v8541_v4  ;;  %v9923_v46 = vld [vmem:[#allocation4 + $0xa4] sm:$0xf]  ;;  %v8397_v18 = vld [vmem:[#allocation4 + $0xb0] sm:$0xf0]  ;;  %v9016_v4 = vor.u32 %v10076_v13, %v9013_v53 }
 0x4ce   : > { %v9955_v48 = vld [vmem:[#allocation4 + $0x1a4] sm:$0xf]  ;;  %v8669_v13 = vld [vmem:[#allocation4 + $0x2d0] sm:$0xf0] }
 0x4cf   : > { %v3145_v1 = vrot.slane %v3144_v12, 2  ;;  %v3166_v21 = vrot.slane %v3165_v8, 2  ;;  %v8528_v61 = vor.u32 %v9955_v48, %v8525_v17  ;;  %v8853_v48 = vld [vmem:[#allocation4 + $0x438] sm:$0xf0]  ;;  %v10068_v17 = vld [vmem:[#allocation4 + $0x52c] sm:$0xf] }
 0x4d0   : > { %v4855_v15 = vpop.f32.mrf.mxu3  ;;  %v10023_v53 = vld [vmem:[#allocation4 + $0x3c4] sm:$0xf] }
 0x4d1   : > { %v3146_v31 = vmax.f32 %v3144_v12, %v3145_v1  ;;  %v3167_v36 = vmax.f32 %v3165_v8, %v3166_v21  ;;  %v9064_v12 = vor.u32 %v10088_v26, %v9061_v56  ;;  %v10052_v8 = vld [vmem:[#allocation4 + $0x4ac] sm:$0xf]  ;;  %v8917_v1 = vld [vmem:[#allocation4 + $0x4b8] sm:$0xf0]  ;;  %v8400_v15 = vor.u32 %v9923_v46, %v8397_v18  ;;  %v9907_v26 = vld [vmem:[#allocation4 + $0x24] sm:$0xf] }
 0x4d2   : > { %v10084_v21 = vld [vmem:[#allocation4 + $0x5ac] sm:$0xf]  ;;  %v8920_v30 = vor.u32 %v10052_v8, %v8917_v1  ;;  %v8333_v56 = vld [vmem:[#allocation4 + $0x30] sm:$0xf0]  ;;  %v9903_v1 = vld [vmem:[#allocation4 + $0x4] sm:$0xf] }
 0x4d3   : > { %v3147_v20 = vrot.slane %v3146_v31, 1  ;;  %v3168_v32 = vrot.slane %v3167_v36, 1  ;;  %v9048_v7 = vor.u32 %v10084_v21, %v9045_v5  ;;  %v10036_v18 = vld [vmem:[#allocation4 + $0x42c] sm:$0xf]  ;;  %v8317_v21 = vld [vmem:[#allocation4 + $0x10] sm:$0xf0] }
 0x4d4   : > { %v9935_v5 = vld [vmem:[#allocation4 + $0x104] sm:$0xf] }
 0x4d5   : > { %v3148_v55 = vmax.f32 %v3146_v31, %v3147_v20  ;;  %v3169_v3 = vmax.f32 %v3167_v36, %v3168_v32  ;;  %v9919_v31 = vld [vmem:[#allocation4 + $0x84] sm:$0xf]  ;;  %v8381_v36 = vld [vmem:[#allocation4 + $0x90] sm:$0xf0] }
 0x4d6   : > { %v9951_v20 = vld [vmem:[#allocation4 + $0x184] sm:$0xf]  ;;  %v8509_v32 = vld [vmem:[#allocation4 + $0x190] sm:$0xf0] }
 0x4d7   : > { %v3224_v52 = vpack.c.bf16 %v3148_v55, %v3148_v55  ;;  %v3225_v43 = vpack.c.bf16 %v3169_v3, %v3169_v3  ;;  %v10048_v55 = vld [vmem:[#allocation4 + $0x48c] sm:$0xf]  ;;  %v8901_v3 = vld [vmem:[#allocation4 + $0x498] sm:$0xf0]  ;;  %v8512_v41 = vor.u32 %v9951_v20, %v8509_v32  ;;  %v10027_v32 = vld [vmem:[#allocation4 + $0x3e4] sm:$0xf] }
 0x4d8   : > { %v4879_v33 = vpop.f32.mrf.mxu3  ;;  %v8904_v47 = vor.u32 %v10048_v55, %v8901_v3  ;;  %v8837_v55 = vld [vmem:[#allocation4 + $0x418] sm:$0xf0]  ;;  %v10064_v3 = vld [vmem:[#allocation4 + $0x50c] sm:$0xf] }
 0x4d9   : > { %v3522_v44 = vunpack.c.l.b16 %v3224_v52  ;;  %v3523_v59 = vunpack.c.l.b16 %v3225_v43  ;;  %v12236_v19 = vadd.f32 %v4879_v33, %v4867_v16  ;;  %v10080_v52 = vld [vmem:[#allocation4 + $0x58c] sm:$0xf]  ;;  %v9029_v43 = vld [vmem:[#allocation4 + $0x598] sm:$0xf0]  ;;  %v8384_v16 = vor.u32 %v9919_v31, %v8381_v36  ;;  %v8365_v33 = vld [vmem:[#allocation4 + $0x70] sm:$0xf0] }
 0x4da   : > { %v8685_v31 = vld [vmem:[#allocation4 + $0x2f0] sm:$0xf0]  ;;  %v8856_v36 = vor.u32 %v10036_v18, %v8853_v48  ;;  %v9983_v18 = vld [vmem:[#allocation4 + $0x284] sm:$0xf] }
 0x4db   : > { %v3531_v29 = vsel %vm3526_vm3, %v3522_v44, %v3514_v24  ;;  %v3532_v50 = vsel %vm3526_vm3, %v3523_v59, %v3515_v25  ;;  %v9915_v24 = vld [vmem:[#allocation4 + $0x64] sm:$0xf]  ;;  %v9032_v25 = vor.u32 %v10080_v52, %v9029_v43  ;;  %v10044_v44 = vld [vmem:[#allocation4 + $0x46c] sm:$0xf]  ;;  %v8885_v59 = vld [vmem:[#allocation4 + $0x478] sm:$0xf0]  ;;  %v8320_v43 = vor.u32 %v9903_v1, %v8317_v21 }
 0x4dc   : > { %v12240_v2 = vpack.c.b16 %v3531_v29, %v3531_v29  ;;  %v12242_v34 = vpack.c.b16 %v3532_v50, %v3532_v50  ;;  %v8368_v37 = vor.u32 %v9915_v24, %v8365_v33  ;;  %v9911_v29 = vld [vmem:[#allocation4 + $0x44] sm:$0xf]  ;;  %v12250_v50 = vpack.c.b16 %v12101_v35, %v12101_v35  ;;  %v8997_v35 = vld [vmem:[#allocation4 + $0x558] sm:$0xf0]  ;;  %v8637_v48 = vld [vmem:[#allocation4 + $0x290] sm:$0xf0] }
 0x4dd   : > { %v8888_v57 = vor.u32 %v10044_v44, %v8885_v59  ;;  %v8965_v52 = vld [vmem:[#allocation4 + $0x518] sm:$0xf0]  ;;  %v9991_v59 = vld [vmem:[#allocation4 + $0x2c4] sm:$0xf]  ;;  %v9339_v1 = vld [vmem:[%s13668_s7] sm:$0xf] }
 0x4de   : > { %4891 = vmatmul.bf16.vlgmr.msra.gmra.mxu2 %v12240_v2  ;;  %4904 = vmatmul.bf16.vlgmr.msrb.gmra.mxu3 %v12242_v34  ;;  %v8968_v44 = vor.u32 %v10064_v3, %v8965_v52  ;;  %v10161_v21 = vld [vmem:[%s13668_s7 + $0xc] sm:$0xf0] }
 0x4df   : > { %4935 = vmatpush.bf16.msra.mxu2 %v8432_v39  ;;  %4948 = vmatpush.bf16.msrb.mxu3 %v8560_v49  ;;  %v12254_v39 = vpack.c.b16 %v12104_v60, %v12104_v60  ;;  %v8349_v49 = vld [vmem:[#allocation4 + $0x50] sm:$0xf0]  ;;  %v8480_v60 = vor.u32 %v9943_v40, %v8477_v11  ;;  %v10169_v40 = vld [vmem:[%s13668_s7 + $0x4c] sm:$0xf0]  ;;  %v10167_v11 = vld [vmem:[%s13668_s7 + $0x44] sm:$0xf] }
 0x4e0   : > { %5099 = vmatmul.bf16.vlgmr.msra.gmra.mxu0 %v12240_v2  ;;  %5112 = vmatmul.bf16.vlgmr.msrb.gmra.mxu1 %v12242_v34  ;;  %v4881_v58 = vpop.f32.mrf.mxu3  ;;  %v8352_v51 = vor.u32 %v9911_v29, %v8349_v49  ;;  %v9371_v49 = vld [vmem:[%s13668_s7 + $0x40] sm:$0xf] }
 0x4e1   : > { %5195 = vmatpush.bf16.msra.mxu0 %v8952_v27  ;;  %5208 = vmatpush.bf16.msrb.mxu1 %v9080_v45  ;;  %v10040_v27 = vld [vmem:[#allocation4 + $0x44c] sm:$0xf]  ;;  %v8869_v45 = vld [vmem:[#allocation4 + $0x458] sm:$0xf0]  ;;  %v9000_v58 = vor.u32 %v10072_v0, %v8997_v35  ;;  %v8653_v0 = vld [vmem:[#allocation4 + $0x2b0] sm:$0xf0] }
 0x4e2   : > { %v8872_v46 = vor.u32 %v10040_v27, %v8869_v45  ;;  %v9987_v45 = vld [vmem:[#allocation4 + $0x2a4] sm:$0xf] }
 0x4e3   : > { %4936 = vmatpush.bf16.msra.mxu2 %v8416_v6  ;;  %4949 = vmatpush.bf16.msrb.mxu3 %v8544_v10  ;;  %v9939_v6 = vld [vmem:[#allocation4 + $0x124] sm:$0xf]  ;;  %v8461_v10 = vld [vmem:[#allocation4 + $0x130] sm:$0xf0] }
 0x4e4   : > { %v8464_v8 = vor.u32 %v9939_v6, %v8461_v10  ;;  %v10019_v35 = vld [vmem:[#allocation4 + $0x3a4] sm:$0xf]  ;;  %v9357_v10 = vld [vmem:[%s13668_s7 + $0x30] sm:$0xf0] }
 0x4e5   : > { %5196 = vmatpush.bf16.msra.mxu0 %v8936_v22  ;;  %5209 = vmatpush.bf16.msrb.mxu1 %v9064_v12  ;;  %v8981_v22 = vld [vmem:[#allocation4 + $0x538] sm:$0xf0]  ;;  %v8336_v12 = vor.u32 %v9907_v26, %v8333_v56  ;;  %v9355_v56 = vld [vmem:[%s13668_s7 + $0x20] sm:$0xf]  ;;  %v10163_v6 = vld [vmem:[%s13668_s7 + $0x24] sm:$0xf] }
 0x4e6   : > { %v8984_v20 = vor.u32 %v10068_v17, %v8981_v22  ;;  %v10015_v17 = vld [vmem:[#allocation4 + $0x384] sm:$0xf]  ;;  %v8765_v22 = vld [vmem:[#allocation4 + $0x390] sm:$0xf0] }
 0x4e7   : > { %4937 = vmatpush.bf16.msra.mxu2 %v8400_v15  ;;  %4950 = vmatpush.bf16.msrb.mxu3 %v8528_v61  ;;  %v8445_v15 = vld [vmem:[#allocation4 + $0x110] sm:$0xf0]  ;;  %v9995_v61 = vld [vmem:[#allocation4 + $0x2e4] sm:$0xf] }
 0x4e8   : > { %v8688_v24 = vor.u32 %v9995_v61, %v8685_v31  ;;  %v8640_v61 = vor.u32 %v9983_v18, %v8637_v48  ;;  %v8768_v31 = vor.u32 %v10015_v17, %v8765_v22  ;;  %v9037_v18 = vld [vmem:[#allocation4 + $0x5b0] sm:$0xf0]  ;;  %v10047_v22 = vld [vmem:[#allocation4 + $0x484] sm:$0xf] }
 0x4e9   : > { %5197 = vmatpush.bf16.msra.mxu0 %v8920_v30  ;;  %5210 = vmatpush.bf16.msrb.mxu1 %v9048_v7  ;;  %v8813_v30 = vld [vmem:[#allocation4 + $0x3f0] sm:$0xf0]  ;;  %v10032_v7 = vld [vmem:[#allocation4 + $0x40c] sm:$0xf] }
 0x4ea   : > { %v8816_v33 = vor.u32 %v10027_v32, %v8813_v30  ;;  %v10011_v32 = vld [vmem:[#allocation4 + $0x364] sm:$0xf]  ;;  %v8749_v30 = vld [vmem:[#allocation4 + $0x370] sm:$0xf0] }
 0x4eb   : > { %4938 = vmatpush.bf16.msra.mxu2 %v8384_v16  ;;  %4951 = vmatpush.bf16.msrb.mxu3 %v8512_v41  ;;  %v8448_v16 = vor.u32 %v9935_v5, %v8445_v15  ;;  %v9387_v41 = vld [vmem:[%s13668_s7 + $0x60] sm:$0xf]  ;;  %v10159_v5 = vld [vmem:[%s13668_s7 + $0x4] sm:$0xf]  ;;  %v9341_v15 = vld [vmem:[%s13668_s7 + $0x10] sm:$0xf0]  ;;  %v8752_v52 = vor.u32 %v10011_v32, %v8749_v30 }
 0x4ed   : > { %5198 = vmatpush.bf16.msra.mxu0 %v8904_v47  ;;  %5211 = vmatpush.bf16.msrb.mxu1 %v9032_v25  ;;  %v9389_v47 = vld [vmem:[%s13668_s7 + $0x70] sm:$0xf0]  ;;  %v8840_v25 = vor.u32 %v10032_v7, %v8837_v55  ;;  %v9340_v7 = vor.u32 %v10161_v21, %v9339_v1  ;;  %v9344_v55 = vor.u32 %v10159_v5, %v9341_v15  ;;  %v13842_v21 = vld [vmem:[#allocation13_spill] sm:$0xff] }
 0x4ee   : > { %4917 = vmatmul.bf16.vlgmr.msrb.gmra.mxu2 %v12250_v50  ;;  %4930 = vmatmul.bf16.vlgmr.msra.gmra.mxu3 %v12254_v39  ;;  %v9392_v29 = vor.u32 %v10171_v54, %v9389_v47  ;;  %v9971_v54 = vld [vmem:[#allocation4 + $0x224] sm:$0xf]  ;;  %v8589_v47 = vld [vmem:[#allocation4 + $0x230] sm:$0xf0] }
 0x4ef   : > { %4939 = vmatpush.bf16.msra.mxu2 %v8368_v37  ;;  %4952 = vmatpush.bf16.msrb.mxu3 %v8496_v14  ;;  %v8797_v37 = vld [vmem:[#allocation4 + $0x3d0] sm:$0xf0]  ;;  %v9388_v14 = vor.u32 %v10173_v38, %v9387_v41  ;;  %v10007_v41 = vld [vmem:[#allocation4 + $0x344] sm:$0xf] }
 0x4f0   : > { %5151 = vmatmul.bf16.vlgmr.msrb.gmra.mxu0 %v12035_v42  ;;  %5164 = vmatmul.bf16.vlgmr.msra.gmra.mxu1 %v12136_v28  ;;  %v8800_v27 = vor.u32 %v10023_v53, %v8797_v37  ;;  %v9967_v37 = vld [vmem:[#allocation4 + $0x204] sm:$0xf]  ;;  %v9021_v1 = vld [vmem:[#allocation4 + $0x590] sm:$0xf0] }
 0x4f1   : > { %5199 = vmatpush.bf16.msra.mxu0 %v8888_v57  ;;  %5212 = vmatpush.bf16.msrb.mxu1 %v9016_v4  ;;  %v9373_v57 = vld [vmem:[%s13668_s7 + $0x50] sm:$0xf0]  ;;  %v8672_v4 = vor.u32 %v9991_v59, %v8669_v13  ;;  %v13841_v59 = vld [vmem:[#allocation12_spill] sm:$0xff]  ;;  %v8592_v13 = vor.u32 %v9971_v54, %v8589_v47 }
 0x4f2   : > { %v9376_v26 = vor.u32 %v10167_v11, %v9373_v57  ;;  %v8941_v11 = vld [vmem:[#allocation4 + $0x4f0] sm:$0xf0]  ;;  %v10091_v57 = vld [vmem:[#allocation4 + $0x5e4] sm:$0xf] }
 0x4f3   : > { %4940 = vmatpush.bf16.msra.mxu2 %v8352_v51  ;;  %4953 = vmatpush.bf16.msrb.mxu3 %v8480_v60  ;;  %v8781_v51 = vld [vmem:[#allocation4 + $0x3b0] sm:$0xf0]  ;;  %v9372_v60 = vor.u32 %v10169_v40, %v9371_v49  ;;  %v10059_v40 = vld [vmem:[#allocation4 + $0x4e4] sm:$0xf] }
 0x4f4   : > { %v8701_v49 = vld [vmem:[#allocation4 + $0x310] sm:$0xf0] }
 0x4f5   : > { %5200 = vmatpush.bf16.msra.mxu0 %v8872_v46  ;;  %5213 = vmatpush.bf16.msrb.mxu1 %v9000_v58  ;;  %v8656_v46 = vor.u32 %v9987_v45, %v8653_v0  ;;  %v8784_v58 = vor.u32 %v10019_v35, %v8781_v51  ;;  %v8944_v0 = vor.u32 %v10059_v40, %v8941_v11  ;;  %v10055_v51 = vld [vmem:[#allocation4 + $0x4c4] sm:$0xf]  ;;  %v9325_v40 = vld [vmem:[#allocation4 + $0x7f0] sm:$0xf0] }
 0x4f7   : > { %4941 = vmatpush.bf16.msra.mxu2 %v8336_v12  ;;  %4954 = vmatpush.bf16.msrb.mxu3 %v8464_v8  ;;  %v9360_v8 = vor.u32 %v10163_v6, %v9357_v10  ;;  %v10051_v10 = vld [vmem:[#allocation4 + $0x4a4] sm:$0xf] }
 0x4f9   : > { %5201 = vmatpush.bf16.msra.mxu0 %v8856_v36  ;;  %5214 = vmatpush.bf16.msrb.mxu1 %v8984_v20  ;;  %v9979_v36 = vld [vmem:[#allocation4 + $0x264] sm:$0xf]  ;;  %v8621_v20 = vld [vmem:[#allocation4 + $0x270] sm:$0xf0] }
 0x4fa   : > { %v8624_v3 = vor.u32 %v9979_v36, %v8621_v20  ;;  %v10075_v36 = vld [vmem:[#allocation4 + $0x564] sm:$0xf]  ;;  %v9005_v20 = vld [vmem:[#allocation4 + $0x570] sm:$0xf0] }
 0x4fb   : > { %4942 = vmatpush.bf16.msra.mxu2 %v8320_v43  ;;  %4955 = vmatpush.bf16.msrb.mxu3 %v8448_v16  ;;  %v9975_v43 = vld [vmem:[#allocation4 + $0x244] sm:$0xf]  ;;  %v8605_v16 = vld [vmem:[#allocation4 + $0x250] sm:$0xf0]  ;;  %v9008_v30 = vor.u32 %v10075_v36, %v9005_v20 }
 0x4fc   : > { %v10103_v36 = vld [vmem:[#allocation4 + $0x644] sm:$0xf]  ;;  %v9117_v20 = vld [vmem:[#allocation4 + $0x650] sm:$0xf0] }
 0x4fd   : > { %5202 = vmatpush.bf16.msra.mxu0 %v8840_v25  ;;  %5215 = vmatpush.bf16.msrb.mxu1 %v8968_v44  ;;  %v10003_v25 = vld [vmem:[#allocation4 + $0x324] sm:$0xf]  ;;  %v8717_v44 = vld [vmem:[#allocation4 + $0x330] sm:$0xf0] }
 0x4fe   : > { %4943 = vmatmul.bf16.vlgmr.msra.gmra.mxu2 %v12035_v42  ;;  %4956 = vmatmul.bf16.vlgmr.msrb.gmra.mxu3 %v12136_v28  ;;  %v10165_v42 = vld [vmem:[%s13668_s7 + $0x2c] sm:$0xf0]  ;;  %v8720_v53 = vor.u32 %v10003_v25, %v8717_v44  ;;  %v10031_v25 = vld [vmem:[#allocation4 + $0x404] sm:$0xf]  ;;  %v8829_v44 = vld [vmem:[#allocation4 + $0x410] sm:$0xf0] }
 0x4ff   : > { %4961 = vmatpush.bf16.msrb.mxu2 %v8688_v24  ;;  %4974 = vmatpush.bf16.msra.mxu3 %v8816_v33  ;;  %v9356_v12 = vor.u32 %v10165_v42, %v9355_v56  ;;  %v8733_v24 = vld [vmem:[#allocation4 + $0x350] sm:$0xf0]  ;;  %v8608_v33 = vor.u32 %v9975_v43, %v8605_v16  ;;  %v8832_v11 = vor.u32 %v10031_v25, %v8829_v44  ;;  %v8563_v25 = vld [vmem:[#allocation4 + $0x1e8] sm:$0xf]  ;;  %v9966_v44 = vld [vmem:[#allocation4 + $0x1f4] sm:$0xf0] }
 0x500   : > { %5203 = vmatmul.bf16.vlgmr.msra.gmra.mxu0 %v12240_v2  ;;  %5216 = vmatmul.bf16.vlgmr.msrb.gmra.mxu1 %v12242_v34  ;;  %v8736_v38 = vor.u32 %v10007_v41, %v8733_v24  ;;  %v9053_v56 = vld [vmem:[#allocation4 + $0x5d0] sm:$0xf0]  ;;  %v10035_v41 = vld [vmem:[#allocation4 + $0x424] sm:$0xf] }
 0x501   : > { %5347 = vmatpush.bf16.msrb.mxu0 %v9388_v14  ;;  %5436 = vmatpush.bf16.msra.mxu1 %v9392_v29  ;;  %v8573_v14 = vld [vmem:[#allocation4 + $0x210] sm:$0xf0]  ;;  %v9999_v29 = vld [vmem:[#allocation4 + $0x304] sm:$0xf] }
 0x502   : > { %v8704_v45 = vor.u32 %v9999_v29, %v8701_v49  ;;  %v8845_v24 = vld [vmem:[#allocation4 + $0x430] sm:$0xf0]  ;;  %v10155_v49 = vld [vmem:[#allocation4 + $0x7e4] sm:$0xf] }
 0x503   : > { %4962 = vmatpush.bf16.msrb.mxu2 %v8672_v4  ;;  %4975 = vmatpush.bf16.msra.mxu3 %v8800_v27  ;;  %v9069_v4 = vld [vmem:[#allocation4 + $0x5f0] sm:$0xf0]  ;;  %v8576_v27 = vor.u32 %v9967_v37, %v8573_v14  ;;  %v8848_v54 = vor.u32 %v10035_v41, %v8845_v24  ;;  %v10123_v37 = vld [vmem:[#allocation4 + $0x6e4] sm:$0xf] }
 0x504   : > { %v9072_v35 = vor.u32 %v10091_v57, %v9069_v4  ;;  %v13843_v14 = vld [vmem:[#allocation14_spill] sm:$0xff] }
 0x505   : > { %5348 = vmatpush.bf16.msrb.mxu0 %v9372_v60  ;;  %5437 = vmatpush.bf16.msra.mxu1 %v9376_v26  ;;  %v8925_v60 = vld [vmem:[#allocation4 + $0x4d0] sm:$0xf0]  ;;  %v10087_v26 = vld [vmem:[#allocation4 + $0x5c4] sm:$0xf] }
 0x506   : > { %v8928_v42 = vor.u32 %v10055_v51, %v8925_v60  ;;  %v9056_v6 = vor.u32 %v10087_v26, %v9053_v56  ;;  %v9197_v29 = vld [vmem:[#allocation4 + $0x6f0] sm:$0xf0]  ;;  %v10115_v56 = vld [vmem:[#allocation4 + $0x6a4] sm:$0xf] }
 0x507   : > { %4963 = vmatpush.bf16.msrb.mxu2 %v8656_v46  ;;  %4976 = vmatpush.bf16.msra.mxu3 %v8784_v58  ;;  %v8909_v46 = vld [vmem:[#allocation4 + $0x4b0] sm:$0xf0]  ;;  %v10083_v58 = vld [vmem:[#allocation4 + $0x5a4] sm:$0xf]  ;;  %v9200_v4 = vor.u32 %v10123_v37, %v9197_v29 }
 0x508   : > { %v8912_v48 = vor.u32 %v10051_v10, %v8909_v46  ;;  %v9040_v17 = vor.u32 %v10083_v58, %v9037_v18  ;;  %v9309_v51 = vld [vmem:[#allocation4 + $0x7d0] sm:$0xf0]  ;;  %v10111_v18 = vld [vmem:[#allocation4 + $0x684] sm:$0xf] }
 0x509   : > { %5349 = vmatpush.bf16.msrb.mxu0 %v9356_v12  ;;  %5438 = vmatpush.bf16.msra.mxu1 %v9360_v8  ;;  %v8893_v12 = vld [vmem:[#allocation4 + $0x490] sm:$0xf0]  ;;  %v10079_v8 = vld [vmem:[#allocation4 + $0x584] sm:$0xf] }
 0x50a   : > { %v8896_v5 = vor.u32 %v10047_v22, %v8893_v12  ;;  %v9024_v15 = vor.u32 %v10079_v8, %v9021_v1  ;;  %v9293_v10 = vld [vmem:[#allocation4 + $0x7b0] sm:$0xf0]  ;;  %v10107_v1 = vld [vmem:[#allocation4 + $0x664] sm:$0xf] }
 0x50b   : > { %4964 = vmatpush.bf16.msrb.mxu2 %v8640_v61  ;;  %4977 = vmatpush.bf16.msra.mxu3 %v8768_v31  ;;  %v10043_v61 = vld [vmem:[#allocation4 + $0x464] sm:$0xf]  ;;  %v8877_v31 = vld [vmem:[#allocation4 + $0x470] sm:$0xf0] }
 0x50c   : > { %v8880_v32 = vor.u32 %v10043_v61, %v8877_v31  ;;  %v9277_v22 = vld [vmem:[#allocation4 + $0x790] sm:$0xf0] }
 0x50d   : > { %5350 = vmatpush.bf16.msrb.mxu0 %v9340_v7  ;;  %5439 = vmatpush.bf16.msra.mxu1 %v9344_v55  ;;  %v10039_v7 = vld [vmem:[#allocation4 + $0x444] sm:$0xf]  ;;  %v8861_v55 = vld [vmem:[#allocation4 + $0x450] sm:$0xf0] }
 0x50e   : > { %v8864_v43 = vor.u32 %v10039_v7, %v8861_v55  ;;  %v9120_v7 = vor.u32 %v10103_v36, %v9117_v20  ;;  %v13846_v36 = vld [vmem:[#allocation17_spill] sm:$0xff] }
 0x50f   : > { %4965 = vmatpush.bf16.msrb.mxu2 %v8624_v3  ;;  %4978 = vmatpush.bf16.msra.mxu3 %v8752_v52  ;;  %v10071_v3 = vld [vmem:[#allocation4 + $0x544] sm:$0xf]  ;;  %v8989_v52 = vld [vmem:[#allocation4 + $0x550] sm:$0xf0] }
 0x510   : > { %9401 = vmatmul.msk.bf16.vlgmr.msrb.gmra.mxu0 %vm936_vm2, %v13841_v59  ;;  %9417 = vmatmul.msk.bf16.vlgmr.msra.gmra.mxu1 %vm936_vm2, %v13841_v59  ;;  %v8992_v16 = vor.u32 %v10071_v3, %v8989_v52  ;;  %v10099_v3 = vld [vmem:[#allocation4 + $0x624] sm:$0xf]  ;;  %v9101_v52 = vld [vmem:[#allocation4 + $0x630] sm:$0xf0] }
 0x511   : > { %v9104_v41 = vor.u32 %v10099_v3, %v9101_v52 }
 0x513   : > { %4966 = vmatpush.bf16.msrb.mxu2 %v8608_v33  ;;  %4979 = vmatpush.bf16.msra.mxu3 %v8736_v38  ;;  %v10067_v33 = vld [vmem:[#allocation4 + $0x524] sm:$0xf]  ;;  %v8973_v38 = vld [vmem:[#allocation4 + $0x530] sm:$0xf0] }
 0x514   : > { %v8976_v47 = vor.u32 %v10067_v33, %v8973_v38  ;;  %v10095_v33 = vld [vmem:[#allocation4 + $0x604] sm:$0xf]  ;;  %v9085_v38 = vld [vmem:[#allocation4 + $0x610] sm:$0xf0] }
 0x515   : > { %v9088_v37 = vor.u32 %v10095_v33, %v9085_v38  ;;  %v9942_v38 = vld [vmem:[#allocation4 + $0x134] sm:$0xf0] }
 0x517   : > { %4967 = vmatpush.bf16.msrb.mxu2 %v8592_v13  ;;  %4980 = vmatpush.bf16.msra.mxu3 %v8720_v53  ;;  %v10063_v13 = vld [vmem:[#allocation4 + $0x504] sm:$0xf]  ;;  %v8957_v53 = vld [vmem:[#allocation4 + $0x510] sm:$0xf0] }
 0x518   : > { %v8960_v57 = vor.u32 %v10063_v13, %v8957_v53  ;;  %v8691_v13 = vld [vmem:[#allocation4 + $0x2e8] sm:$0xf]  ;;  %v9998_v53 = vld [vmem:[#allocation4 + $0x2f4] sm:$0xf0] }
 0x51b   : > { %4968 = vmatpush.bf16.msrb.mxu2 %v8576_v27  ;;  %4981 = vmatpush.bf16.msra.mxu3 %v8704_v45  ;;  %v9328_v27 = vor.u32 %v10155_v49, %v9325_v40  ;;  %v10119_v45 = vld [vmem:[#allocation4 + $0x6c4] sm:$0xf]  ;;  %v8564_v40 = vor.u32 %v9966_v44, %v8563_v25  ;;  %v9523_v25 = vld [vmem:[#allocation6 + $0x70] sm:$0xf]  ;;  %v10190_v44 = vld [vmem:[#allocation6 + $0x74] sm:$0xf0] }
 0x51c   : > { %v13845_v49 = vld [vmem:[#allocation16_spill] sm:$0xff] }
 0x51e   : > { %4969 = vmatmul.bf16.vlgmr.msrb.gmra.mxu2 %v12060_v9  ;;  %4982 = vmatmul.bf16.vlgmr.msra.gmra.mxu3 %v12151_v23 }
 0x51f   : > { %4987 = vmatpush.bf16.msra.mxu2 %v8944_v0  ;;  %5000 = vmatpush.bf16.msrb.mxu3 %v9072_v35  ;;  %v9181_v0 = vld [vmem:[#allocation4 + $0x6d0] sm:$0xf0]  ;;  %v10151_v35 = vld [vmem:[#allocation4 + $0x7c4] sm:$0xf] }
 0x520   : > { %9402 = vmatmul.msk.bf16.gmra.mxu0 %vm936_vm2, %v13842_v21  ;;  %9418 = vmatmul.msk.bf16.gmra.mxu1 %vm936_vm2, %v13842_v21  ;;  %v9184_v60 = vor.u32 %v10119_v45, %v9181_v0  ;;  %v9312_v26 = vor.u32 %v10151_v35, %v9309_v51  ;;  %v9994_v45 = vld [vmem:[#allocation4 + $0x2d4] sm:$0xf0]  ;;  %v8531_v51 = vld [vmem:[#allocation4 + $0x1a8] sm:$0xf] }
 0x523   : > { %4988 = vmatpush.bf16.msra.mxu2 %v8928_v42  ;;  %5001 = vmatpush.bf16.msrb.mxu3 %v9056_v6  ;;  %v9165_v42 = vld [vmem:[#allocation4 + $0x6b0] sm:$0xf0]  ;;  %v10147_v6 = vld [vmem:[#allocation4 + $0x7a4] sm:$0xf] }
 0x524   : > { %v9168_v46 = vor.u32 %v10115_v56, %v9165_v42  ;;  %v9296_v58 = vor.u32 %v10147_v6, %v9293_v10  ;;  %v9990_v56 = vld [vmem:[#allocation4 + $0x2b4] sm:$0xf0]  ;;  %v8515_v10 = vld [vmem:[#allocation4 + $0x188] sm:$0xf] }
 0x527   : > { %4989 = vmatpush.bf16.msra.mxu2 %v8912_v48  ;;  %5002 = vmatpush.bf16.msrb.mxu3 %v9040_v17  ;;  %v9149_v48 = vld [vmem:[#allocation4 + $0x690] sm:$0xf0]  ;;  %v10143_v17 = vld [vmem:[#allocation4 + $0x784] sm:$0xf] }
 0x528   : > { %v9152_v12 = vor.u32 %v10111_v18, %v9149_v48  ;;  %v9280_v8 = vor.u32 %v10143_v17, %v9277_v22  ;;  %v9986_v18 = vld [vmem:[#allocation4 + $0x294] sm:$0xf0]  ;;  %v8499_v22 = vld [vmem:[#allocation4 + $0x168] sm:$0xf] }
 0x52b   : > { %4990 = vmatpush.bf16.msra.mxu2 %v8896_v5  ;;  %5003 = vmatpush.bf16.msrb.mxu3 %v9024_v15  ;;  %v13844_v5 = vld [vmem:[#allocation15_spill] sm:$0xff]  ;;  %v9261_v15 = vld [vmem:[#allocation4 + $0x770] sm:$0xf0] }
 0x52f   : > { %4991 = vmatpush.bf16.msra.mxu2 %v8880_v32  ;;  %5004 = vmatpush.bf16.msrb.mxu3 %v9008_v30  ;;  %v10135_v32 = vld [vmem:[#allocation4 + $0x744] sm:$0xf]  ;;  %v9245_v30 = vld [vmem:[#allocation4 + $0x750] sm:$0xf0] }
 0x530   : > { %9403 = vmatmul.msk.bf16.gmra.mxu0 %vm936_vm2, %v13843_v14  ;;  %9419 = vmatmul.msk.bf16.gmra.mxu1 %vm936_vm2, %v13843_v14  ;;  %v9248_v55 = vor.u32 %v10135_v32, %v9245_v30  ;;  %v9946_v30 = vld [vmem:[#allocation4 + $0x154] sm:$0xf0] }
 0x533   : > { %4992 = vmatpush.bf16.msra.mxu2 %v8864_v43  ;;  %5005 = vmatpush.bf16.msrb.mxu3 %v8992_v16  ;;  %v10131_v43 = vld [vmem:[#allocation4 + $0x724] sm:$0xf]  ;;  %v9229_v16 = vld [vmem:[#allocation4 + $0x730] sm:$0xf0] }
 0x534   : > { %v9232_v24 = vor.u32 %v10131_v43, %v9229_v16 }
 0x537   : > { %4993 = vmatpush.bf16.msra.mxu2 %v8848_v54  ;;  %5006 = vmatpush.bf16.msrb.mxu3 %v8976_v47  ;;  %v10127_v54 = vld [vmem:[#allocation4 + $0x704] sm:$0xf]  ;;  %v9213_v47 = vld [vmem:[#allocation4 + $0x710] sm:$0xf0] }
 0x538   : > { %v9216_v29 = vor.u32 %v10127_v54, %v9213_v47  ;;  %v8595_v54 = vld [vmem:[#allocation4 + $0x228] sm:$0xf]  ;;  %v9974_v47 = vld [vmem:[#allocation4 + $0x234] sm:$0xf0] }
 0x53b   : > { %4994 = vmatpush.bf16.msra.mxu2 %v8832_v11  ;;  %5007 = vmatpush.bf16.msrb.mxu3 %v8960_v57  ;;  %v8692_v11 = vor.u32 %v9998_v53, %v8691_v13  ;;  %v8547_v57 = vld [vmem:[#allocation4 + $0x1c8] sm:$0xf]  ;;  %v9524_v13 = vor.u32 %v10190_v44, %v9523_v25 }
 0x53d   : > { %6444 = vmatpush.bf16.msra.mxu0 %v9524_v13 }
 0x53e   : > { %4995 = vmatmul.bf16.vlgmr.msra.gmra.mxu2 %v12240_v2  ;;  %5008 = vmatmul.bf16.vlgmr.msrb.gmra.mxu3 %v12242_v34  ;;  %v9133_v2 = vld [vmem:[#allocation4 + $0x670] sm:$0xf0]  ;;  %v10139_v34 = vld [vmem:[#allocation4 + $0x764] sm:$0xf] }
 0x53f   : > { %5013 = vmatpush.bf16.msrb.mxu2 %v9200_v4  ;;  %5026 = vmatpush.bf16.msra.mxu3 %v9328_v27  ;;  %v9136_v61 = vor.u32 %v10107_v1, %v9133_v2  ;;  %v9264_v31 = vor.u32 %v10139_v34, %v9261_v15  ;;  %v9962_v4 = vld [vmem:[#allocation4 + $0x1d4] sm:$0xf0]  ;;  %v8675_v27 = vld [vmem:[#allocation4 + $0x2c8] sm:$0xf] }
 0x540   : > { %9404 = vmatmul.msk.bf16.gmra.mxu0 %vm936_vm2, %v13844_v5  ;;  %9420 = vmatmul.msk.bf16.gmra.mxu1 %vm936_vm2, %v13844_v5  ;;  %v8548_v0 = vor.u32 %v9962_v4, %v8547_v57  ;;  %v8676_v35 = vor.u32 %v9994_v45, %v8675_v27  ;;  %v9950_v1 = vld [vmem:[#allocation4 + $0x174] sm:$0xf0]  ;;  %v8627_v2 = vld [vmem:[#allocation4 + $0x268] sm:$0xf] }
 0x541   : > { %v9982_v34 = vld [vmem:[#allocation4 + $0x274] sm:$0xf0]  ;;  %v8500_v15 = vor.u32 %v9950_v1, %v8499_v22  ;;  %v8579_v4 = vld [vmem:[#allocation4 + $0x208] sm:$0xf] }
 0x542   : > { %v9938_v57 = vld [vmem:[#allocation4 + $0x114] sm:$0xf0]  ;;  %v8819_v45 = vld [vmem:[#allocation4 + $0x3e8] sm:$0xf] }
 0x543   : > { %5014 = vmatpush.bf16.msrb.mxu2 %v9184_v60  ;;  %5027 = vmatpush.bf16.msra.mxu3 %v9312_v26  ;;  %v9958_v60 = vld [vmem:[#allocation4 + $0x1b4] sm:$0xf0]  ;;  %v8659_v26 = vld [vmem:[#allocation4 + $0x2a8] sm:$0xf] }
 0x544   : > { %v8532_v42 = vor.u32 %v9958_v60, %v8531_v51  ;;  %v8660_v6 = vor.u32 %v9990_v56, %v8659_v26  ;;  %v9970_v27 = vld [vmem:[#allocation4 + $0x214] sm:$0xf0]  ;;  %v9203_v60 = vld [vmem:[#allocation4 + $0x6e8] sm:$0xf] }
 0x545   : > { %v10030_v51 = vld [vmem:[#allocation4 + $0x3f4] sm:$0xf0]  ;;  %v9187_v22 = vld [vmem:[#allocation4 + $0x6c8] sm:$0xf] }
 0x546   : > { %v10126_v26 = vld [vmem:[#allocation4 + $0x6f4] sm:$0xf0] }
 0x547   : > { %5015 = vmatpush.bf16.msrb.mxu2 %v9168_v46  ;;  %5028 = vmatpush.bf16.msra.mxu3 %v9296_v58  ;;  %v9954_v46 = vld [vmem:[#allocation4 + $0x194] sm:$0xf0]  ;;  %v8643_v58 = vld [vmem:[#allocation4 + $0x288] sm:$0xf] }
 0x548   : > { %v8516_v48 = vor.u32 %v9954_v46, %v8515_v10  ;;  %v8644_v17 = vor.u32 %v9986_v18, %v8643_v58  ;;  %v8820_v58 = vor.u32 %v10030_v51, %v8819_v45  ;;  %v9204_v18 = vor.u32 %v10126_v26, %v9203_v60  ;;  %v10122_v1 = vld [vmem:[#allocation4 + $0x6d4] sm:$0xf0]  ;;  %v9123_v51 = vld [vmem:[#allocation4 + $0x648] sm:$0xf] }
 0x549   : > { %v10106_v60 = vld [vmem:[#allocation4 + $0x654] sm:$0xf0] }
 0x54a   : > { %v13848_v26 = vld [vmem:[#allocation19_spill] sm:$0xff] }
 0x54b   : > { %5016 = vmatpush.bf16.msrb.mxu2 %v9152_v12  ;;  %5029 = vmatpush.bf16.msra.mxu3 %v9280_v8 }
 0x54f   : > { %5017 = vmatpush.bf16.msrb.mxu2 %v9136_v61  ;;  %5030 = vmatpush.bf16.msra.mxu3 %v9264_v31  ;;  %v8628_v61 = vor.u32 %v9982_v34, %v8627_v2  ;;  %v8483_v31 = vld [vmem:[#allocation4 + $0x148] sm:$0xf]  ;;  %v13847_v34 = vld [vmem:[#allocation18_spill] sm:$0xff] }
 0x550   : > { %9405 = vmatmul.msk.bf16.gmra.mxu0 %vm936_vm2, %v13845_v49  ;;  %9421 = vmatmul.msk.bf16.gmra.mxu1 %vm936_vm2, %v13845_v49  ;;  %v8484_v43 = vor.u32 %v9946_v30, %v8483_v31  ;;  %v8787_v30 = vld [vmem:[#allocation4 + $0x3a8] sm:$0xf] }
 0x553   : > { %5018 = vmatpush.bf16.msrb.mxu2 %v9120_v7  ;;  %5031 = vmatpush.bf16.msra.mxu3 %v9248_v55  ;;  %v8611_v7 = vld [vmem:[#allocation4 + $0x248] sm:$0xf]  ;;  %v9978_v55 = vld [vmem:[#allocation4 + $0x254] sm:$0xf0] }
 0x554   : > { %v8612_v16 = vor.u32 %v9978_v55, %v8611_v7  ;;  %v10022_v7 = vld [vmem:[#allocation4 + $0x3b4] sm:$0xf0]  ;;  %v9171_v55 = vld [vmem:[#allocation4 + $0x6a8] sm:$0xf] }
 0x557   : > { %5019 = vmatpush.bf16.msrb.mxu2 %v9104_v41  ;;  %5032 = vmatpush.bf16.msra.mxu3 %v9232_v24  ;;  %v8467_v41 = vld [vmem:[#allocation4 + $0x128] sm:$0xf] }
 0x558   : > { %v8468_v53 = vor.u32 %v9942_v38, %v8467_v41  ;;  %v8771_v38 = vld [vmem:[#allocation4 + $0x388] sm:$0xf] }
 0x55b   : > { %5020 = vmatpush.bf16.msrb.mxu2 %v9088_v37  ;;  %5033 = vmatpush.bf16.msra.mxu3 %v9216_v29  ;;  %v8596_v37 = vor.u32 %v9974_v47, %v8595_v54  ;;  %v8451_v29 = vld [vmem:[#allocation4 + $0x108] sm:$0xf]  ;;  %v10114_v47 = vld [vmem:[#allocation4 + $0x694] sm:$0xf0] }
 0x55c   : > { %v9155_v54 = vld [vmem:[#allocation4 + $0x688] sm:$0xf] }
 0x55d   : > { %v12338_v12 = vpop.f32.mrf.mxu0  ;;  %v12340_v8 = vpop.f32.mrf.mxu1  ;;  %v9156_v13 = vor.u32 %v10114_v47, %v9155_v54 }
 0x55e   : > { %5021 = vmatmul.bf16.vlgmr.msrb.gmra.mxu2 %v12250_v50  ;;  %5034 = vmatmul.bf16.vlgmr.msra.gmra.mxu3 %v12254_v39 }
 0x55f   : > { %5052 = vmatpush.bf16.msrb.mxu3 %v8564_v40  ;;  %5065 = vmatpush.bf16.msra.mxu2 %v8692_v11 }
 0x560   : > { %9406 = vmatmul.msk.bf16.gmra.mxu0 %vm936_vm2, %v13846_v36  ;;  %9422 = vmatmul.msk.bf16.gmra.mxu1 %vm936_vm2, %v13846_v36 }
 0x561   : > { %v4892_v20 = vpop.f32.mrf.mxu2  ;;  %v4905_v32 = vpop.f32.mrf.mxu3 }
 0x562   : > { %v4893_v3 = vadd.f32 %v4892_v20, %v12236_v19  ;;  %v3489_v19 = vperm.slane %v12231_v63, 3 }
 0x563   : > { %5053 = vmatpush.bf16.msrb.mxu3 %v8548_v0  ;;  %5066 = vmatpush.bf16.msra.mxu2 %v8676_v35  ;;  %v9587_v0 = vld [vmem:[#allocation6 + $0xf0] sm:$0xf]  ;;  %v10206_v35 = vld [vmem:[#allocation6 + $0xf4] sm:$0xf0] }
 0x564   : > { %v4906_v52 = vadd.f32 %v4905_v32, %v4893_v3  ;;  %v9588_v56 = vor.u32 %v10206_v35, %v9587_v0  ;;  %v9188_v32 = vor.u32 %v10122_v1, %v9187_v22  ;;  %v10118_v3 = vld [vmem:[#allocation4 + $0x6b4] sm:$0xf0]  ;;  %v8739_v0 = vld [vmem:[#allocation4 + $0x348] sm:$0xf] }
 0x565   : > { %v5102_v24 = vpop.f32.mrf.mxu0  ;;  %v5115_v33 = vpop.f32.mrf.mxu1  ;;  %v10010_v35 = vld [vmem:[#allocation4 + $0x354] sm:$0xf0] }
 0x566   : > { %6533 = vmatpush.bf16.msrb.mxu1 %v9588_v56  ;;  %v8788_v24 = vor.u32 %v10022_v7, %v8787_v30  ;;  %v9172_v33 = vor.u32 %v10118_v3, %v9171_v55  ;;  %v10098_v30 = vld [vmem:[#allocation4 + $0x614] sm:$0xf0]  ;;  %v9331_v7 = vld [vmem:[#allocation4 + $0x7e8] sm:$0xf]  ;;  %v9515_v3 = vld [vmem:[#allocation6 + $0x60] sm:$0xf] }
 0x567   : > { %5054 = vmatpush.bf16.msrb.mxu3 %v8532_v42  ;;  %5067 = vmatpush.bf16.msra.mxu2 %v8660_v6  ;;  %v8452_v42 = vor.u32 %v9938_v57, %v8451_v29  ;;  %v8580_v6 = vor.u32 %v9970_v27, %v8579_v4  ;;  %v10110_v29 = vld [vmem:[#allocation4 + $0x674] sm:$0xf0]  ;;  %v12365_v27 = vld [vmem:[%s13670_s9] sm:$0xf] }
 0x568   : > { %v3487_v45 = vperm.slane %v12365_v27, 1  ;;  %v10158_v55 = vld [vmem:[#allocation4 + $0x7f4] sm:$0xf0] }
 0x569   : > { %v4894_v40 = vpop.f32.mrf.mxu2  ;;  %v4907_v11 = vpop.f32.mrf.mxu3 }
 0x56b   : > { %5055 = vmatpush.bf16.msrb.mxu3 %v8516_v48  ;;  %5068 = vmatpush.bf16.msra.mxu2 %v8644_v17  ;;  %v8803_v48 = vld [vmem:[#allocation4 + $0x3c8] sm:$0xf]  ;;  %v10026_v17 = vld [vmem:[#allocation4 + $0x3d4] sm:$0xf0] }
 0x56c   : > { %v8804_v20 = vor.u32 %v10026_v17, %v8803_v48  ;;  %v10102_v48 = vld [vmem:[#allocation4 + $0x634] sm:$0xf0] }
 0x56d   : > { %v5152_v10 = vpop.f32.mrf.mxu0  ;;  %v5165_v63 = vpop.f32.mrf.mxu1 }
 0x56e   : > { %v5153_v46 = vadd.f32 %v5152_v10, %v3489_v19  ;;  %v9139_v19 = vld [vmem:[#allocation4 + $0x668] sm:$0xf]  ;;  %v8740_v10 = vor.u32 %v10010_v35, %v8739_v0 }
 0x56f   : > { %5056 = vmatpush.bf16.msrb.mxu3 %v8500_v15  ;;  %5069 = vmatpush.bf16.msra.mxu2 %v8628_v61  ;;  %v9140_v4 = vor.u32 %v10110_v29, %v9139_v19  ;;  %v10154_v19 = vld [vmem:[#allocation4 + $0x7d4] sm:$0xf0]  ;;  %v9992_v29 = vld [vmem:[#allocation4 + $0x2cc] sm:$0xf] }
 0x570   : > { %v12348_v2 = vadd.f32 %v5165_v63, %v5153_v46  ;;  %9407 = vmatmul.msk.bf16.gmra.mxu0 %vm936_vm2, %v13847_v34  ;;  %9423 = vmatmul.msk.bf16.gmra.mxu1 %vm936_vm2, %v13847_v34  ;;  %v9124_v63 = vor.u32 %v10106_v60, %v9123_v51  ;;  %v8723_v46 = vld [vmem:[#allocation4 + $0x328] sm:$0xf]  ;;  %v10150_v60 = vld [vmem:[#allocation4 + $0x7b4] sm:$0xf0] }
 0x571   : > { %v4918_v15 = vpop.f32.mrf.mxu2  ;;  %v4931_v61 = vpop.f32.mrf.mxu3  ;;  %v9299_v51 = vld [vmem:[#allocation4 + $0x7a8] sm:$0xf] }
 0x572   : > { %v4919_v31 = vadd.f32 %v4918_v15, %v4906_v52  ;;  %v10018_v52 = vld [vmem:[#allocation4 + $0x394] sm:$0xf0]  ;;  %v8707_v15 = vld [vmem:[#allocation4 + $0x308] sm:$0xf] }
 0x573   : > { %5057 = vmatpush.bf16.msrb.mxu3 %v8484_v43  ;;  %5070 = vmatpush.bf16.msra.mxu2 %v8612_v16 }
 0x574   : > { %v12356_v43 = vadd.f32 %v4931_v61, %v4919_v31  ;;  %v10002_v61 = vld [vmem:[#allocation4 + $0x314] sm:$0xf0]  ;;  %v9091_v31 = vld [vmem:[#allocation4 + $0x608] sm:$0xf] }
 0x575   : > { %v5154_v16 = vpop.f32.mrf.mxu0  ;;  %v5167_v41 = vpop.f32.mrf.mxu1 }
 0x576   : > { %v10188_v16 = vld [vmem:[#allocation6 + $0x64] sm:$0xf0]  ;;  %v9579_v41 = vld [vmem:[#allocation6 + $0xe0] sm:$0xf] }
 0x577   : > { %5058 = vmatpush.bf16.msrb.mxu3 %v8468_v53  ;;  %5071 = vmatpush.bf16.msra.mxu2 %v8596_v37  ;;  %v8755_v53 = vld [vmem:[#allocation4 + $0x368] sm:$0xf]  ;;  %v10014_v37 = vld [vmem:[#allocation4 + $0x374] sm:$0xf0] }
 0x578   : > { %v8756_v57 = vor.u32 %v10014_v37, %v8755_v53  ;;  %v9315_v37 = vld [vmem:[#allocation4 + $0x7c8] sm:$0xf] }
 0x579   : > { %v4920_v25 = vpop.f32.mrf.mxu2  ;;  %v4933_v44 = vpop.f32.mrf.mxu3  ;;  %v9316_v0 = vor.u32 %v10154_v19, %v9315_v37  ;;  %v8597_v37 = vld [vmem:[#allocation4 + $0x238] sm:$0xf0] }
 0x57a   : > { %v8708_v44 = vor.u32 %v10002_v61, %v8707_v15 }
 0x57b   : > { %5059 = vmatpush.bf16.msrb.mxu3 %v8452_v42  ;;  %5072 = vmatpush.bf16.msra.mxu2 %v8580_v6 }
 0x57d   : > { %v12358_v40 = vpop.f32.mrf.mxu0  ;;  %v12360_v11 = vpop.f32.mrf.mxu1 }
 0x57e   : > { %5060 = vmatmul.bf16.vlgmr.msrb.gmra.mxu3 %v12136_v28  ;;  %5073 = vmatmul.bf16.vlgmr.msra.gmra.mxu2 %v12060_v9  ;;  %v8772_v28 = vor.u32 %v10018_v52, %v8771_v38  ;;  %v9516_v38 = vor.u32 %v10188_v16, %v9515_v3  ;;  %v10204_v52 = vld [vmem:[#allocation6 + $0xe4] sm:$0xf0]  ;;  %v10138_v16 = vld [vmem:[#allocation4 + $0x754] sm:$0xf0] }
 0x57f   : > { %5078 = vmatpush.bf16.msra.mxu3 %v8820_v58  ;;  %5117 = vmatpush.bf16.msrb.mxu2 %v9204_v18  ;;  %v10006_v58 = vld [vmem:[#allocation4 + $0x334] sm:$0xf0]  ;;  %v9107_v18 = vld [vmem:[#allocation4 + $0x628] sm:$0xf]  ;;  %v9580_v25 = vor.u32 %v10204_v52, %v9579_v41  ;;  %v9976_v41 = vld [vmem:[#allocation4 + $0x24c] sm:$0xf] }
 0x580   : > { %9408 = vmatmul.msk.bf16.gmra.mxu0 %vm936_vm2, %v13848_v26  ;;  %9424 = vmatmul.msk.bf16.gmra.mxu1 %vm936_vm2, %v13848_v26  ;;  %v9251_v3 = vld [vmem:[#allocation4 + $0x748] sm:$0xf] }
 0x581   : > { %v4944_v56 = vpop.f32.mrf.mxu2  ;;  %v4957_v42 = vpop.f32.mrf.mxu3  ;;  %6445 = vmatpush.bf16.msra.mxu0 %v9516_v38  ;;  %6534 = vmatpush.bf16.msrb.mxu1 %v9580_v25 }
 0x582   : > { %v4945_v6 = vadd.f32 %v4944_v56, %v3487_v45  ;;  %v9988_v56 = vld [vmem:[#allocation4 + $0x2ac] sm:$0xf] }
 0x583   : > { %5079 = vmatpush.bf16.msra.mxu3 %v8804_v20  ;;  %5118 = vmatpush.bf16.msrb.mxu2 %v9188_v32  ;;  %v8724_v20 = vor.u32 %v10006_v58, %v8723_v46  ;;  %v9108_v32 = vor.u32 %v10102_v48, %v9107_v18  ;;  %v9283_v46 = vld [vmem:[#allocation4 + $0x788] sm:$0xf]  ;;  %v10146_v58 = vld [vmem:[#allocation4 + $0x794] sm:$0xf0]  ;;  %v9984_v18 = vld [vmem:[#allocation4 + $0x28c] sm:$0xf] }
 0x584   : > { %v12372_v17 = vadd.f32 %v4957_v42, %v4945_v6  ;;  %v8661_v42 = vld [vmem:[#allocation4 + $0x2b8] sm:$0xf0]  ;;  %v13849_v6 = vld [vmem:[#allocation20_spill] sm:$0xff]  ;;  %v9284_v15 = vor.u32 %v10146_v58, %v9283_v46  ;;  %v10124_v46 = vld [vmem:[#allocation4 + $0x6ec] sm:$0xf] }
 0x585   : > { %v5206_v22 = vpop.f32.mrf.mxu0  ;;  %v5219_v1 = vpop.f32.mrf.mxu1  ;;  %v8645_v48 = vld [vmem:[#allocation4 + $0x298] sm:$0xf0] }
 0x586   : > { %v8648_v61 = vor.u32 %v9984_v18, %v8645_v48  ;;  %v9205_v58 = vld [vmem:[#allocation4 + $0x6f8] sm:$0xf0] }
 0x587   : > { %5080 = vmatpush.bf16.msra.mxu3 %v8788_v24  ;;  %5119 = vmatpush.bf16.msrb.mxu2 %v9172_v33  ;;  %v9996_v24 = vld [vmem:[#allocation4 + $0x2ec] sm:$0xf]  ;;  %v8693_v33 = vld [vmem:[#allocation4 + $0x2f8] sm:$0xf0] }
 0x588   : > { %v8696_v53 = vor.u32 %v9996_v24, %v8693_v33  ;;  %v8613_v24 = vld [vmem:[#allocation4 + $0x258] sm:$0xf0] }
 0x589   : > { %v4946_v54 = vpop.f32.mrf.mxu2  ;;  %v4959_v47 = vpop.f32.mrf.mxu3  ;;  %v8616_v25 = vor.u32 %v9976_v41, %v8613_v24  ;;  %v9571_v24 = vld [vmem:[#allocation6 + $0xd0] sm:$0xf] }
 0x58a   : > { %v9252_v47 = vor.u32 %v10138_v16, %v9251_v3  ;;  %v10186_v3 = vld [vmem:[#allocation6 + $0x54] sm:$0xf0]  ;;  %v9189_v16 = vld [vmem:[#allocation4 + $0x6d8] sm:$0xf0] }
 0x58b   : > { %5081 = vmatpush.bf16.msra.mxu3 %v8772_v28  ;;  %5120 = vmatpush.bf16.msrb.mxu2 %v9156_v13  ;;  %v9092_v28 = vor.u32 %v10098_v30, %v9091_v31  ;;  %v9332_v13 = vor.u32 %v10158_v55, %v9331_v7  ;;  %v9267_v31 = vld [vmem:[#allocation4 + $0x768] sm:$0xf]  ;;  %v8629_v30 = vld [vmem:[#allocation4 + $0x278] sm:$0xf0] }
 0x58d   : > { %v12376_v45 = vpop.f32.mrf.mxu1 }
 0x58f   : > { %5082 = vmatpush.bf16.msra.mxu3 %v8756_v57  ;;  %5121 = vmatpush.bf16.msrb.mxu2 %v9140_v4  ;;  %v8677_v57 = vld [vmem:[#allocation4 + $0x2d8] sm:$0xf0]  ;;  %v12374_v4 = vpop.f32.mrf.mxu0 }
 0x590   : > { %v8680_v35 = vor.u32 %v9992_v29, %v8677_v57  ;;  %9409 = vmatmul.msk.bf16.gmra.mxu0 %vm936_vm2, %v13849_v6  ;;  %9425 = vmatmul.msk.bf16.gmra.mxu1 %vm936_vm2, %v13849_v6  ;;  %v13850_v29 = vld [vmem:[#allocation22_spill] sm:$0xff] }
 0x593   : > { %5083 = vmatpush.bf16.msra.mxu3 %v8740_v10  ;;  %5122 = vmatpush.bf16.msrb.mxu2 %v9124_v63  ;;  %v9300_v10 = vor.u32 %v10150_v60, %v9299_v51  ;;  %v8664_v63 = vor.u32 %v9988_v56, %v8661_v42  ;;  %v10130_v51 = vld [vmem:[#allocation4 + $0x714] sm:$0xf0]  ;;  %v9968_v60 = vld [vmem:[#allocation4 + $0x20c] sm:$0xf]  ;;  %v8581_v56 = vld [vmem:[#allocation4 + $0x218] sm:$0xf0] }
 0x595   : > { %v12386_v1 = vpop.f32.mrf.mxu1 }
 0x597   : > { %5084 = vmatpush.bf16.msra.mxu3 %v8724_v20  ;;  %5123 = vmatpush.bf16.msrb.mxu2 %v9108_v32  ;;  %v12384_v22 = vpop.f32.mrf.mxu0  ;;  %v10142_v20 = vld [vmem:[#allocation4 + $0x774] sm:$0xf0]  ;;  %v9980_v32 = vld [vmem:[#allocation4 + $0x26c] sm:$0xf] }
 0x598   : > { %v9268_v7 = vor.u32 %v10142_v20, %v9267_v31  ;;  %v8632_v55 = vor.u32 %v9980_v32, %v8629_v30  ;;  %v10024_v31 = vld [vmem:[#allocation4 + $0x3cc] sm:$0xf]  ;;  %v8805_v20 = vld [vmem:[#allocation4 + $0x3d8] sm:$0xf0]  ;;  %v9208_v30 = vor.u32 %v10124_v46, %v9205_v58 }
 0x59b   : > { %5085 = vmatpush.bf16.msra.mxu3 %v8708_v44  ;;  %5124 = vmatpush.bf16.msrb.mxu2 %v9092_v28  ;;  %v9235_v44 = vld [vmem:[#allocation4 + $0x728] sm:$0xf] }
 0x59d   : > { %v12390_v38 = vpop.f32.mrf.mxu1 }
 0x59e   : > { %5086 = vmatmul.bf16.vlgmr.msra.gmra.mxu3 %v12151_v23  ;;  %5125 = vmatmul.bf16.vlgmr.msrb.gmra.mxu2 %v12250_v50 }
 0x59f   : > { %5130 = vmatpush.bf16.msrb.mxu3 %v9332_v13  ;;  %5169 = vmatpush.bf16.msra.mxu2 %v8696_v53  ;;  %v12388_v33 = vpop.f32.mrf.mxu0  ;;  %v10134_v13 = vld [vmem:[#allocation4 + $0x734] sm:$0xf0]  ;;  %v9972_v53 = vld [vmem:[#allocation4 + $0x22c] sm:$0xf] }
 0x5a0   : > { %9410 = vmatmul.msk.bf16.gmra.mxu0 %vm936_vm2, %v13850_v29  ;;  %9426 = vmatmul.msk.bf16.gmra.mxu1 %vm936_vm2, %v13850_v29  ;;  %v9236_v57 = vor.u32 %v10134_v13, %v9235_v44  ;;  %v10020_v44 = vld [vmem:[#allocation4 + $0x3ac] sm:$0xf] }
 0x5a1   : > { %v4970_v52 = vpop.f32.mrf.mxu2  ;;  %v4983_v54 = vpop.f32.mrf.mxu3 }
 0x5a2   : > { %v4971_v28 = vadd.f32 %v4970_v52, %v12372_v17  ;;  %v10028_v17 = vld [vmem:[#allocation4 + $0x3ec] sm:$0xf]  ;;  %v10202_v52 = vld [vmem:[#allocation6 + $0xd4] sm:$0xf0] }
 0x5a3   : > { %5131 = vmatpush.bf16.msrb.mxu3 %v9316_v0  ;;  %5170 = vmatpush.bf16.msra.mxu2 %v8680_v35  ;;  %v8600_v0 = vor.u32 %v9972_v53, %v8597_v37  ;;  %v9219_v35 = vld [vmem:[#allocation4 + $0x708] sm:$0xf]  ;;  %v8789_v53 = vld [vmem:[#allocation4 + $0x3b8] sm:$0xf0]  ;;  %v10116_v37 = vld [vmem:[#allocation4 + $0x6ac] sm:$0xf] }
 0x5a4   : > { %v12393_v19 = vadd.f32 %v4983_v54, %v4971_v28  ;;  %v9572_v54 = vor.u32 %v10202_v52, %v9571_v24 }
 0x5a6   : > { %6535 = vmatpush.bf16.msrb.mxu1 %v9572_v54  ;;  %v10004_v54 = vld [vmem:[#allocation4 + $0x32c] sm:$0xf] }
 0x5a7   : > { %5132 = vmatpush.bf16.msrb.mxu3 %v9300_v10  ;;  %5171 = vmatpush.bf16.msra.mxu2 %v8664_v63  ;;  %v12399_v42 = vpop.f32.mrf.mxu0  ;;  %v12401_v10 = vpop.f32.mrf.mxu1  ;;  %v8821_v63 = vld [vmem:[#allocation4 + $0x3f8] sm:$0xf0] }
 0x5a8   : > { %v8824_v32 = vor.u32 %v10028_v17, %v8821_v63  ;;  %v9157_v17 = vld [vmem:[#allocation4 + $0x698] sm:$0xf0]  ;;  %v13851_v63 = vld [vmem:[#allocation25_spill] sm:$0xff] }
 0x5a9   : > { %v4972_v18 = vpop.f32.mrf.mxu2  ;;  %v4985_v48 = vpop.f32.mrf.mxu3 }
 0x5aa   : > { %v10012_v18 = vld [vmem:[#allocation4 + $0x36c] sm:$0xf] }
 0x5ab   : > { %5133 = vmatpush.bf16.msrb.mxu3 %v9284_v15  ;;  %5172 = vmatpush.bf16.msra.mxu2 %v8648_v61  ;;  %v9220_v15 = vor.u32 %v10130_v51, %v9219_v35  ;;  %v8584_v61 = vor.u32 %v9968_v60, %v8581_v56  ;;  %v10016_v51 = vld [vmem:[#allocation4 + $0x38c] sm:$0xf]  ;;  %v8773_v60 = vld [vmem:[#allocation4 + $0x398] sm:$0xf0] }
 0x5ac   : > { %v10112_v56 = vld [vmem:[#allocation4 + $0x68c] sm:$0xf]  ;;  %v8776_v46 = vor.u32 %v10016_v51, %v8773_v60 }
 0x5ad   : > { %v9160_v58 = vor.u32 %v10112_v56, %v9157_v17  ;;  %v10000_v60 = vld [vmem:[#allocation4 + $0x30c] sm:$0xf]  ;;  %v8709_v56 = vld [vmem:[#allocation4 + $0x318] sm:$0xf0] }
 0x5ae   : > { %v10096_v17 = vld [vmem:[#allocation4 + $0x60c] sm:$0xf] }
 0x5af   : > { %5134 = vmatpush.bf16.msrb.mxu3 %v9268_v7  ;;  %5173 = vmatpush.bf16.msra.mxu2 %v8632_v55  ;;  %v10120_v7 = vld [vmem:[#allocation4 + $0x6cc] sm:$0xf]  ;;  %v9507_v55 = vld [vmem:[#allocation6 + $0x50] sm:$0xf]  ;;  %v12403_v28 = vpop.f32.mrf.mxu0  ;;  %v12405_v13 = vpop.f32.mrf.mxu1 }
 0x5b0   : > { %v9508_v41 = vor.u32 %v10186_v3, %v9507_v55  ;;  %9411 = vmatmul.msk.bf16.gmra.mxu0 %vm936_vm2, %v13851_v63  ;;  %9427 = vmatmul.msk.bf16.gmra.mxu1 %vm936_vm2, %v13851_v63  ;;  %v10104_v55 = vld [vmem:[#allocation4 + $0x64c] sm:$0xf]  ;;  %v9125_v3 = vld [vmem:[#allocation4 + $0x658] sm:$0xf0] }
 0x5b1   : > { %v9128_v52 = vor.u32 %v10104_v55, %v9125_v3 }
 0x5b2   : > { %6446 = vmatpush.bf16.msra.mxu0 %v9508_v41 }
 0x5b3   : > { %5135 = vmatpush.bf16.msrb.mxu3 %v9252_v47  ;;  %5174 = vmatpush.bf16.msra.mxu2 %v8616_v25  ;;  %v8808_v47 = vor.u32 %v10024_v31, %v8805_v20  ;;  %v9192_v25 = vor.u32 %v10120_v7, %v9189_v16  ;;  %v9141_v31 = vld [vmem:[#allocation4 + $0x678] sm:$0xf0] }
 0x5b4   : > { %v8741_v7 = vld [vmem:[#allocation4 + $0x358] sm:$0xf0] }
 0x5b7   : > { %5136 = vmatpush.bf16.msrb.mxu3 %v9236_v57  ;;  %5175 = vmatpush.bf16.msra.mxu2 %v8600_v0  ;;  %v9173_v57 = vld [vmem:[#allocation4 + $0x6b8] sm:$0xf0]  ;;  %v8792_v0 = vor.u32 %v10020_v44, %v8789_v53  ;;  %v12415_v48 = vpop.f32.mrf.mxu1 }
 0x5b8   : > { %v9176_v35 = vor.u32 %v10116_v37, %v9173_v57  ;;  %v8725_v53 = vld [vmem:[#allocation4 + $0x338] sm:$0xf0]  ;;  %v10100_v37 = vld [vmem:[#allocation4 + $0x62c] sm:$0xf] }
 0x5b9   : > { %v9109_v57 = vld [vmem:[#allocation4 + $0x638] sm:$0xf0] }
 0x5ba   : > { %v9112_v51 = vor.u32 %v10100_v37, %v9109_v57  ;;  %v9563_v37 = vld [vmem:[#allocation6 + $0xc0] sm:$0xf] }
 0x5bb   : > { %5137 = vmatpush.bf16.msrb.mxu3 %v9220_v15  ;;  %5176 = vmatpush.bf16.msra.mxu2 %v8584_v61  ;;  %v8757_v15 = vld [vmem:[#allocation4 + $0x378] sm:$0xf0]  ;;  %v10108_v61 = vld [vmem:[#allocation4 + $0x66c] sm:$0xf] }
 0x5bc   : > { %v8760_v20 = vor.u32 %v10012_v18, %v8757_v15  ;;  %v13852_v18 = vld [vmem:[#allocation28_spill] sm:$0xff]  ;;  %v9395_v15 = vld [vmem:[%s13668_s7 + $0x68] sm:$0xf] }
 0x5be   : > { %5138 = vmatmul.bf16.vlgmr.msrb.gmra.mxu3 %v12254_v39  ;;  %5177 = vmatmul.bf16.vlgmr.msra.gmra.mxu2 %v12060_v9  ;;  %v12413_v9 = vpop.f32.mrf.mxu0 }
 0x5bf   : > { %5182 = vmatpush.bf16.msra.mxu3 %v8824_v32  ;;  %5221 = vmatpush.bf16.msrb.mxu2 %v9208_v30  ;;  %v9144_v32 = vor.u32 %v10108_v61, %v9141_v31  ;;  %v10008_v30 = vld [vmem:[#allocation4 + $0x34c] sm:$0xf]  ;;  %v12420_v44 = vpop.f32.mrf.mxu1  ;;  %v10174_v61 = vld [vmem:[%s13668_s7 + $0x74] sm:$0xf0] }
 0x5c0   : > { %v8744_v24 = vor.u32 %v10008_v30, %v8741_v7  ;;  %9412 = vmatmul.msk.bf16.gmra.mxu0 %vm936_vm2, %v13852_v18  ;;  %9428 = vmatmul.msk.bf16.gmra.mxu1 %vm936_vm2, %v13852_v18 }
 0x5c1   : > { %v4996_v16 = vpop.f32.mrf.mxu2  ;;  %v5009_v41 = vpop.f32.mrf.mxu3 }
 0x5c3   : > { %5183 = vmatpush.bf16.msra.mxu3 %v8808_v47  ;;  %5222 = vmatpush.bf16.msrb.mxu2 %v9192_v25  ;;  %v4997_v47 = vadd.f32 %v4996_v16, %v12393_v19  ;;  %v9333_v19 = vld [vmem:[#allocation4 + $0x7f8] sm:$0xf0]  ;;  %v9396_v16 = vor.u32 %v10174_v61, %v9395_v15 }
 0x5c6   : > { %v12418_v25 = vpop.f32.mrf.mxu0 }
 0x5c7   : > { %5184 = vmatpush.bf16.msra.mxu3 %v8792_v0  ;;  %5223 = vmatpush.bf16.msrb.mxu2 %v9176_v35  ;;  %v12422_v0 = vadd.f32 %v5009_v41, %v4997_v47  ;;  %v8728_v35 = vor.u32 %v10004_v54, %v8725_v53  ;;  %v12436_v55 = vpop.f32.mrf.mxu1  ;;  %v10152_v41 = vld [vmem:[#allocation4 + $0x7cc] sm:$0xf]  ;;  %v10170_v54 = vld [vmem:[%s13668_s7 + $0x54] sm:$0xf0]  ;;  %v9499_v47 = vld [vmem:[#allocation6 + $0x40] sm:$0xf] }
 0x5c8   : > { %v10184_v53 = vld [vmem:[#allocation6 + $0x44] sm:$0xf0] }
 0x5c9   : > { %v4998_v31 = vpop.f32.mrf.mxu2 }
 0x5cb   : > { %5185 = vmatpush.bf16.msra.mxu3 %v8776_v46  ;;  %5224 = vmatpush.bf16.msrb.mxu2 %v9160_v58  ;;  %v9093_v46 = vld [vmem:[#allocation4 + $0x618] sm:$0xf0]  ;;  %v10156_v58 = vld [vmem:[#allocation4 + $0x7ec] sm:$0xf] }
 0x5cc   : > { %v9096_v30 = vor.u32 %v10096_v17, %v9093_v46  ;;  %v9336_v3 = vor.u32 %v10156_v58, %v9333_v19  ;;  %v9301_v17 = vld [vmem:[#allocation4 + $0x7b8] sm:$0xf0]  ;;  %v9363_v46 = vld [vmem:[%s13668_s7 + $0x28] sm:$0xf]  ;;  %v10166_v58 = vld [vmem:[%s13668_s7 + $0x34] sm:$0xf0] }
 0x5ce   : > { %v12434_v7 = vpop.f32.mrf.mxu0 }
 0x5cf   : > { %5186 = vmatpush.bf16.msra.mxu3 %v8760_v20  ;;  %5225 = vmatpush.bf16.msrb.mxu2 %v9144_v32  ;;  %v5011_v20 = vpop.f32.mrf.mxu3  ;;  %v8712_v32 = vor.u32 %v10000_v60, %v8709_v56  ;;  %v9500_v60 = vor.u32 %v10184_v53, %v9499_v47  ;;  %v10200_v56 = vld [vmem:[#allocation6 + $0xc4] sm:$0xf0]  ;;  %v12454_v61 = vpop.f32.mrf.mxu1 }
 0x5d0   : > { %v9564_v19 = vor.u32 %v10200_v56, %v9563_v37  ;;  %v9364_v20 = vor.u32 %v10166_v58, %v9363_v46  ;;  %v10136_v37 = vld [vmem:[#allocation4 + $0x74c] sm:$0xf] }
 0x5d1   : > { %6447 = vmatpush.bf16.msra.mxu0 %v9500_v60 }
 0x5d2   : > { %6536 = vmatpush.bf16.msrb.mxu1 %v9564_v19  ;;  %v10132_v19 = vld [vmem:[#allocation4 + $0x72c] sm:$0xf] }
 0x5d3   : > { %5187 = vmatpush.bf16.msra.mxu3 %v8744_v24  ;;  %5226 = vmatpush.bf16.msrb.mxu2 %v9128_v52  ;;  %v9317_v24 = vld [vmem:[#allocation4 + $0x7d8] sm:$0xf0]  ;;  %v9379_v52 = vld [vmem:[%s13668_s7 + $0x48] sm:$0xf] }
 0x5d4   : > { %v9320_v57 = vor.u32 %v10152_v41, %v9317_v24  ;;  %v13853_v41 = vld [vmem:[#allocation31_spill] sm:$0xff]  ;;  %v10140_v24 = vld [vmem:[#allocation4 + $0x76c] sm:$0xf] }
 0x5d5   : > { %9413 = vmatmul.msk.bf16.gmra.mxu0 %vm936_vm2, %v13853_v41  ;;  %9429 = vmatmul.msk.bf16.gmra.mxu1 %vm936_vm2, %v13853_v41 }
 0x5d6   : > { %v12452_v15 = vpop.f32.mrf.mxu0 }
 0x5d7   : > { %5188 = vmatpush.bf16.msra.mxu3 %v8728_v35  ;;  %5227 = vmatpush.bf16.msrb.mxu2 %v9112_v51  ;;  %v9380_v35 = vor.u32 %v10170_v54, %v9379_v52  ;;  %v10148_v51 = vld [vmem:[#allocation4 + $0x7ac] sm:$0xf]  ;;  %v9269_v52 = vld [vmem:[#allocation4 + $0x778] sm:$0xf0]  ;;  %v12468_v47 = vpop.f32.mrf.mxu1 }
 0x5d8   : > { %v9304_v31 = vor.u32 %v10148_v51, %v9301_v17  ;;  %v9272_v53 = vor.u32 %v10140_v24, %v9269_v52  ;;  %v10222_v51 = vld [vmem:[#allocation6 + $0x174] sm:$0xf0]  ;;  %v9397_v24 = vld [vmem:[%s13668_s7 + $0x78] sm:$0xf0] }
 0x5db   : > { %5189 = vmatpush.bf16.msra.mxu3 %v8712_v32  ;;  %5228 = vmatpush.bf16.msrb.mxu2 %v9096_v30  ;;  %v10144_v32 = vld [vmem:[#allocation4 + $0x78c] sm:$0xf]  ;;  %v9285_v30 = vld [vmem:[#allocation4 + $0x798] sm:$0xf0] }
 0x5de   : > { %5190 = vmatmul.bf16.vlgmr.msra.gmra.mxu3 %v12151_v23  ;;  %5229 = vmatmul.bf16.vlgmr.msrb.gmra.mxu2 %v12250_v50  ;;  %v10162_v23 = vld [vmem:[%s13668_s7 + $0x14] sm:$0xf0]  ;;  %v9288_v50 = vor.u32 %v10144_v32, %v9285_v30  ;;  %v12466_v54 = vpop.f32.mrf.mxu0 }
 0x5df   : > { %5234 = vmatpush.bf16.msrb.mxu3 %v9336_v3  ;;  %5525 = vmatpush.bf16.msra.mxu2 %v9396_v16  ;;  %v9347_v3 = vld [vmem:[%s13668_s7 + $0x8] sm:$0xf] }
 0x5e0   : > { %v9348_v16 = vor.u32 %v10162_v23, %v9347_v3  ;;  %v12475_v23 = vpop.f32.mrf.mxu1 }
 0x5e1   : > { %v5022_v56 = vpop.f32.mrf.mxu2  ;;  %v5035_v17 = vpop.f32.mrf.mxu3 }
 0x5e2   : > { %v5023_v58 = vadd.f32 %v5022_v56, %v12422_v0  ;;  %v10172_v0 = vld [vmem:[%s13668_s7 + $0x6c] sm:$0xf] }
 0x5e3   : > { %5235 = vmatpush.bf16.msrb.mxu3 %v9320_v57  ;;  %5526 = vmatpush.bf16.msra.mxu2 %v9380_v35  ;;  %v9253_v57 = vld [vmem:[#allocation4 + $0x758] sm:$0xf0]  ;;  %v9651_v35 = vld [vmem:[#allocation6 + $0x170] sm:$0xf]  ;;  %v10168_v56 = vld [vmem:[%s13668_s7 + $0x4c] sm:$0xf] }
 0x5e4   : > { %v9652_v60 = vor.u32 %v10222_v51, %v9651_v35  ;;  %v9256_v46 = vor.u32 %v10136_v37, %v9253_v57  ;;  %v13854_v51 = vld [vmem:[#allocation23_spill] sm:$0xff] }
 0x5e5   : > { %9414 = vmatmul.msk.bf16.gmra.mxu0 %vm936_vm2, %v13854_v51  ;;  %9430 = vmatmul.msk.bf16.gmra.mxu1 %vm936_vm2, %v13854_v51 }
 0x5e6   : > { %v12473_v3 = vpop.f32.mrf.mxu0 }
 0x5e7   : > { %5236 = vmatpush.bf16.msrb.mxu3 %v9304_v31  ;;  %5527 = vmatpush.bf16.msra.mxu2 %v9364_v20  ;;  %v9237_v31 = vld [vmem:[#allocation4 + $0x738] sm:$0xf0]  ;;  %v5036_v20 = vadd.f32 %v5035_v17, %v5023_v58 }
 0x5e8   : > { %v9240_v32 = vor.u32 %v10132_v19, %v9237_v31  ;;  %v10164_v19 = vld [vmem:[%s13668_s7 + $0x2c] sm:$0xf]  ;;  %v9365_v31 = vld [vmem:[%s13668_s7 + $0x38] sm:$0xf0] }
 0x5e9   : > { %v5703_v30 = vrot.slane %v5036_v20, 7  ;;  %v5024_v37 = vpop.f32.mrf.mxu2  ;;  %v5037_v57 = vpop.f32.mrf.mxu3  ;;  %v9491_v20 = vld [vmem:[#allocation6 + $0x30] sm:$0xf] }
 0x5ea   : > { %v10160_v37 = vld [vmem:[%s13668_s7 + $0xc] sm:$0xf]  ;;  %v9715_v57 = vld [vmem:[#allocation6 + $0x1f0] sm:$0xf] }
 0x5eb   : > { %5237 = vmatpush.bf16.msrb.mxu3 %v9288_v50  ;;  %5528 = vmatpush.bf16.msra.mxu2 %v9348_v16  ;;  %v10128_v50 = vld [vmem:[#allocation4 + $0x70c] sm:$0xf]  ;;  %v9221_v16 = vld [vmem:[#allocation4 + $0x718] sm:$0xf0]  ;;  %v12484_v52 = vsel %vm5706_vm4, %v12356_v43, %v5703_v30 }
 0x5ec   : > { %v9224_v35 = vor.u32 %v10128_v50, %v9221_v16  ;;  %v10198_v16 = vld [vmem:[#allocation6 + $0xb4] sm:$0xf0] }
 0x5ee   : > { %9433 = vmatmul.msk.bf16.vlgmr.msra.gmra.mxu2 %vm936_vm2, %v13841_v59  ;;  %v12500_v17 = vpop.f32.mrf.mxu0 }
 0x5ef   : > { %5238 = vmatpush.bf16.msrb.mxu3 %v9272_v53  ;;  %6622 = vmatpush.bf16.msrb.mxu2 %v9652_v60  ;;  %v12488_v53 = vsel %vm3526_vm3, %v12356_v43, %v5703_v30  ;;  %v9400_v60 = vor.u32 %v10172_v0, %v9397_v24  ;;  %v9381_v43 = vld [vmem:[%s13668_s7 + $0x58] sm:$0xf0]  ;;  %v9555_v30 = vld [vmem:[#allocation6 + $0xb0] sm:$0xf]  ;;  %v9368_v0 = vor.u32 %v10164_v19, %v9365_v31  ;;  %v3488_v19 = vperm.slane %v12365_v27, 2 }
 0x5f0   : > { %v9384_v58 = vor.u32 %v10168_v56, %v9381_v43  ;;  %v9556_v24 = vor.u32 %v10198_v16, %v9555_v30  ;;  %v13856_v31 = vld [vmem:[#allocation26_spill] sm:$0xff] }
 0x5f2   : > { %6537 = vmatpush.bf16.msrb.mxu1 %v9556_v24  ;;  %v9643_v24 = vld [vmem:[#allocation6 + $0x160] sm:$0xf] }
 0x5f3   : > { %5239 = vmatpush.bf16.msrb.mxu3 %v9256_v46  ;;  %v12502_v46 = vpop.f32.mrf.mxu1 }
 0x5f5   : > { %9415 = vmatmul.msk.bf16.gmra.mxu0 %vm936_vm2, %v13856_v31  ;;  %9431 = vmatmul.msk.bf16.gmra.mxu1 %vm936_vm2, %v13856_v31 }
 0x5f7   : > { %5240 = vmatpush.bf16.msrb.mxu3 %v9240_v32  ;;  %v10182_v32 = vld [vmem:[#allocation6 + $0x34] sm:$0xf0] }
 0x5f8   : > { %v9492_v50 = vor.u32 %v10182_v32, %v9491_v20  ;;  %v5049_v20 = vadd.f32 %v12159_v62, %v3488_v19 }
 0x5fa   : > { %6448 = vmatpush.bf16.msra.mxu0 %v9492_v50 }
 0x5fb   : > { %5241 = vmatpush.bf16.msrb.mxu3 %v9224_v35  ;;  %v10238_v35 = vld [vmem:[#allocation6 + $0x1f4] sm:$0xf0]  ;;  %v12521_v56 = vpop.f32.mrf.mxu1 }
 0x5fc   : > { %13855 = vst [vmem:[#allocation21_spill] sm:$0xff] %v12521_v56 }
 0x5fe   : > { %5242 = vmatmul.bf16.vlgmr.msrb.gmra.mxu3 %v12254_v39  ;;  %9434 = vmatmul.msk.bf16.gmra.mxu2 %vm936_vm2, %v13842_v21  ;;  %v9349_v39 = vld [vmem:[%s13668_s7 + $0x18] sm:$0xf0] }
 0x5ff   : > { %5614 = vmatpush.bf16.msra.mxu3 %v9400_v60  ;;  %v12519_v60 = vpop.f32.mrf.mxu0  ;;  %v9352_v43 = vor.u32 %v10160_v37, %v9349_v39  ;;  %v10220_v37 = vld [vmem:[#allocation6 + $0x164] sm:$0xf0]  ;;  %v9707_v39 = vld [vmem:[#allocation6 + $0x1e0] sm:$0xf] }
 0x601   : > { %v5061_v50 = vpop.f32.mrf.mxu3  ;;  %v5074_v16 = vpop.f32.mrf.mxu2 }
 0x603   : > { %5615 = vmatpush.bf16.msra.mxu3 %v9384_v58  ;;  %v9716_v58 = vor.u32 %v10238_v35, %v9715_v57  ;;  %v12531_v30 = vpop.f32.mrf.mxu1  ;;  %v9644_v57 = vor.u32 %v10220_v37, %v9643_v24  ;;  %v10236_v35 = vld [vmem:[#allocation6 + $0x1e4] sm:$0xf0]  ;;  %v9547_v37 = vld [vmem:[#allocation6 + $0xa0] sm:$0xf] }
 0x604   : > { %13858 = vst [vmem:[#allocation35_spill] sm:$0xff] %v12531_v30  ;;  %v9708_v62 = vor.u32 %v10236_v35, %v9707_v39  ;;  %v10180_v24 = vld [vmem:[#allocation6 + $0x24] sm:$0xf0] }
 0x605   : > { %6623 = vmatpush.bf16.msrb.mxu2 %v9644_v57  ;;  %v10196_v57 = vld [vmem:[#allocation6 + $0xa4] sm:$0xf0] }
 0x606   : > { %v9548_v35 = vor.u32 %v10196_v57, %v9547_v37  ;;  %v10234_v57 = vld [vmem:[#allocation6 + $0x1d4] sm:$0xf0] }
 0x607   : > { %5616 = vmatpush.bf16.msra.mxu3 %v9368_v0  ;;  %v12529_v32 = vpop.f32.mrf.mxu0  ;;  %v5062_v0 = vadd.f32 %v5061_v50, %v5049_v20  ;;  %v13861_v50 = vld [vmem:[#allocation29_spill] sm:$0xff] }
 0x608   : > { %13857 = vst [vmem:[#allocation34_spill] sm:$0xff] %v12529_v32  ;;  %9416 = vmatmul.msk.bf16.gmra.mxu0 %vm936_vm2, %v13861_v50  ;;  %9432 = vmatmul.msk.bf16.gmra.mxu1 %vm936_vm2, %v13861_v50 }
 0x609   : > { %v5075_v27 = vadd.f32 %v5074_v16, %v5062_v0  ;;  %v5063_v19 = vpop.f32.mrf.mxu3  ;;  %v5076_v20 = vpop.f32.mrf.mxu2  ;;  %v9483_v0 = vld [vmem:[#allocation6 + $0x20] sm:$0xf]  ;;  %6538 = vmatpush.bf16.msrb.mxu1 %v9548_v35 }
 0x60a   : > { %v9484_v39 = vor.u32 %v10180_v24, %v9483_v0  ;;  %v9635_v0 = vld [vmem:[#allocation6 + $0x150] sm:$0xf]  ;;  %v10218_v24 = vld [vmem:[#allocation6 + $0x154] sm:$0xf0] }
 0x60b   : > { %5617 = vmatpush.bf16.msra.mxu3 %v9352_v43  ;;  %v9636_v37 = vor.u32 %v10218_v24, %v9635_v0 }
 0x60c   : > { %6449 = vmatpush.bf16.msra.mxu0 %v9484_v39  ;;  %v9699_v39 = vld [vmem:[#allocation6 + $0x1d0] sm:$0xf] }
 0x60d   : > { %6624 = vmatpush.bf16.msrb.mxu2 %v9636_v37  ;;  %v10194_v37 = vld [vmem:[#allocation6 + $0x94] sm:$0xf0] }
 0x60e   : > { %9449 = vmatmul.msk.bf16.vlgmr.msra.gmra.mxu3 %vm936_vm2, %v13841_v59  ;;  %9435 = vmatmul.msk.bf16.gmra.mxu2 %vm936_vm2, %v13843_v14 }
 0x60f   : > { %6711 = vmatpush.bf16.msrb.mxu3 %v9716_v58  ;;  %v12537_v43 = vpop.f32.mrf.mxu0  ;;  %v12539_v58 = vpop.f32.mrf.mxu1 }
 0x610   : > { %13859 = vst [vmem:[#allocation24_spill] sm:$0xff] %v12537_v43 }
 0x611   : > { %13860 = vst [vmem:[#allocation36_spill] sm:$0xff] %v12539_v58 }
 0x613   : > { %6712 = vmatpush.bf16.msrb.mxu3 %v9708_v62 }
 0x617   : > { %v12545_v59 = vpop.f32.mrf.mxu0  ;;  %v12547_v16 = vpop.f32.mrf.mxu1 }
 0x618   : > { %13862 = vst [vmem:[#allocation37_spill] sm:$0xff] %v12545_v59 }
 0x619   : > { %13863 = vst [vmem:[#allocation27_spill] sm:$0xff] %v12547_v16 }
 0x61e   : > { %9450 = vmatmul.msk.bf16.gmra.mxu3 %vm936_vm2, %v13842_v21  ;;  %9436 = vmatmul.msk.bf16.gmra.mxu2 %vm936_vm2, %v13844_v5 }
 0x61f   : > { %v12553_v62 = vpop.f32.mrf.mxu0  ;;  %v12555_v19 = vpop.f32.mrf.mxu1 }
 0x620   : > { %13864 = vst [vmem:[#allocation38_spill] sm:$0xff] %v12553_v62 }
 0x621   : > { %13865 = vst [vmem:[#allocation41_spill] sm:$0xff] %v12555_v19  ;;  %v5087_v20 = vpop.f32.mrf.mxu3  ;;  %v5126_v16 = vpop.f32.mrf.mxu2  ;;  %v9700_v19 = vor.u32 %v10234_v57, %v9699_v39 }
 0x622   : > { %v5088_v58 = vadd.f32 %v5087_v20, %v5075_v27 }
 0x623   : > { %6713 = vmatpush.bf16.msrb.mxu3 %v9700_v19 }
 0x624   : > { %v5101_v21 = vadd.f32 %v12338_v12, %v5088_v58 }
 0x626   : > { %v5114_v35 = vadd.f32 %v12340_v8, %v5101_v21  ;;  %v9475_v8 = vld [vmem:[#allocation6 + $0x10] sm:$0xf] }
 0x627   : > { %v12558_v59 = vpop.f32.mrf.mxu0  ;;  %v12560_v43 = vpop.f32.mrf.mxu1  ;;  %v9539_v21 = vld [vmem:[#allocation6 + $0x90] sm:$0xf] }
 0x628   : > { %13866 = vst [vmem:[#allocation30_spill] sm:$0xff] %v12558_v59  ;;  %v12565_v62 = vadd.f32 %v5126_v16, %v5114_v35  ;;  %v10178_v16 = vld [vmem:[#allocation6 + $0x14] sm:$0xf0]  ;;  %v9540_v39 = vor.u32 %v10194_v37, %v9539_v21  ;;  %v10232_v21 = vld [vmem:[#allocation6 + $0x1c4] sm:$0xf0] }
 0x629   : > { %13867 = vst [vmem:[#allocation43_spill] sm:$0xff] %v12560_v43  ;;  %v5089_v12 = vpop.f32.mrf.mxu3  ;;  %v5128_v27 = vpop.f32.mrf.mxu2  ;;  %v9476_v24 = vor.u32 %v10178_v16, %v9475_v8  ;;  %v9691_v16 = vld [vmem:[#allocation6 + $0x1c0] sm:$0xf] }
 0x62a   : > { %6539 = vmatpush.bf16.msrb.mxu1 %v9540_v39  ;;  %v9692_v39 = vor.u32 %v10232_v21, %v9691_v16  ;;  %v9675_v59 = vld [vmem:[#allocation6 + $0x1a0] sm:$0xf] }
 0x62b   : > { %6450 = vmatpush.bf16.msra.mxu0 %v9476_v24 }
 0x62c   : > { %6714 = vmatpush.bf16.msrb.mxu3 %v9692_v39 }
 0x62e   : > { %9451 = vmatmul.msk.bf16.gmra.mxu3 %vm936_vm2, %v13843_v14  ;;  %9437 = vmatmul.msk.bf16.gmra.mxu2 %vm936_vm2, %v13845_v49 }
 0x62f   : > { %v12569_v58 = vpop.f32.mrf.mxu0  ;;  %v12571_v20 = vpop.f32.mrf.mxu1 }
 0x630   : > { %13868 = vst [vmem:[#allocation45_spill] sm:$0xff] %v12569_v58  ;;  %v9611_v58 = vld [vmem:[#allocation6 + $0x120] sm:$0xf] }
 0x631   : > { %13869 = vst [vmem:[#allocation32_spill] sm:$0xff] %v12571_v20  ;;  %v10216_v20 = vld [vmem:[#allocation6 + $0x144] sm:$0xf0] }
 0x637   : > { %v12573_v14 = vpop.f32.mrf.mxu0  ;;  %v12575_v0 = vpop.f32.mrf.mxu1 }
 0x638   : > { %13870 = vst [vmem:[#allocation39_spill] sm:$0xff] %v12573_v14 }
 0x639   : > { %13871 = vst [vmem:[#allocation40_spill] sm:$0xff] %v12575_v0  ;;  %v9627_v0 = vld [vmem:[#allocation6 + $0x140] sm:$0xf] }
 0x63a   : > { %v9628_v8 = vor.u32 %v10216_v20, %v9627_v0  ;;  %v10176_v20 = vld [vmem:[#allocation6 + $0x4] sm:$0xf0]  ;;  %v9531_v0 = vld [vmem:[#allocation6 + $0x80] sm:$0xf] }
 0x63c   : > { %6625 = vmatpush.bf16.msrb.mxu2 %v9628_v8  ;;  %v10192_v8 = vld [vmem:[#allocation6 + $0x84] sm:$0xf0] }
 0x63d   : > { %v9532_v21 = vor.u32 %v10192_v8, %v9531_v0  ;;  %v9683_v0 = vld [vmem:[#allocation6 + $0x1b0] sm:$0xf]  ;;  %v10230_v8 = vld [vmem:[#allocation6 + $0x1b4] sm:$0xf0] }
 0x63e   : > { %9452 = vmatmul.msk.bf16.gmra.mxu3 %vm936_vm2, %v13844_v5  ;;  %9438 = vmatmul.msk.bf16.gmra.mxu2 %vm936_vm2, %v13846_v36 }
 0x63f   : > { %v12581_v19 = vpop.f32.mrf.mxu0  ;;  %v12583_v57 = vpop.f32.mrf.mxu1  ;;  %6540 = vmatpush.bf16.msrb.mxu1 %v9532_v21 }
 0x640   : > { %13872 = vst [vmem:[#allocation42_spill] sm:$0xff] %v12581_v19 }
 0x641   : > { %13873 = vst [vmem:[#allocation44_spill] sm:$0xff] %v12583_v57  ;;  %v5139_v35 = vpop.f32.mrf.mxu3  ;;  %v5178_v12 = vpop.f32.mrf.mxu2 }
 0x642   : > { %v5179_v21 = vadd.f32 %v5178_v12, %v12348_v2  ;;  %v5140_v2 = vadd.f32 %v5139_v35, %v12565_v62 }
 0x647   : > { %v12585_v27 = vpop.f32.mrf.mxu0  ;;  %v12587_v5 = vpop.f32.mrf.mxu1 }
 0x648   : > { %13874 = vst [vmem:[#allocation46_spill] sm:$0xff] %v12585_v27 }
 0x649   : > { %13875 = vst [vmem:[#allocation48_spill] sm:$0xff] %v12587_v5  ;;  %v5141_v24 = vpop.f32.mrf.mxu3  ;;  %v5180_v37 = vpop.f32.mrf.mxu2 }
 0x64e   : > { %9453 = vmatmul.msk.bf16.gmra.mxu3 %vm936_vm2, %v13845_v49  ;;  %9439 = vmatmul.msk.bf16.gmra.mxu2 %vm936_vm2, %v13847_v34  ;;  %v9467_v49 = vld [vmem:[#allocation6] sm:$0xf] }
 0x64f   : > { %v12593_v57 = vpop.f32.mrf.mxu0  ;;  %v12595_v27 = vpop.f32.mrf.mxu1  ;;  %v9468_v16 = vor.u32 %v10176_v20, %v9467_v49  ;;  %v9619_v49 = vld [vmem:[#allocation6 + $0x130] sm:$0xf]  ;;  %v10214_v20 = vld [vmem:[#allocation6 + $0x134] sm:$0xf0] }
 0x650   : > { %13876 = vst [vmem:[#allocation49_spill] sm:$0xff] %v12593_v57 }
 0x651   : > { %13877 = vst [vmem:[#allocation51_spill] sm:$0xff] %v12595_v27  ;;  %6451 = vmatpush.bf16.msra.mxu0 %v9468_v16  ;;  %v9620_v16 = vor.u32 %v10214_v20, %v9619_v49 }
 0x653   : > { %6626 = vmatpush.bf16.msrb.mxu2 %v9620_v16 }
 0x657   : > { %v12597_v5 = vpop.f32.mrf.mxu0  ;;  %v12599_v19 = vpop.f32.mrf.mxu1 }
 0x658   : > { %13878 = vst [vmem:[#allocation47_spill] sm:$0xff] %v12597_v5 }
 0x659   : > { %13879 = vst [vmem:[#allocation50_spill] sm:$0xff] %v12599_v19 }
 0x65e   : > { %9454 = vmatmul.msk.bf16.gmra.mxu3 %vm936_vm2, %v13846_v36  ;;  %9440 = vmatmul.msk.bf16.gmra.mxu2 %vm936_vm2, %v13848_v26 }
 0x65f   : > { %v12605_v39 = vpop.f32.mrf.mxu0  ;;  %v12607_v27 = vpop.f32.mrf.mxu1 }
 0x660   : > { %13880 = vst [vmem:[#allocation52_spill] sm:$0xff] %v12605_v39 }
 0x661   : > { %v5191_v24 = vpop.f32.mrf.mxu3  ;;  %v5230_v37 = vpop.f32.mrf.mxu2  ;;  %13881 = vst [vmem:[#allocation53_spill] sm:$0xff] %v12607_v27  ;;  %v9684_v27 = vor.u32 %v10230_v8, %v9683_v0  ;;  %v10205_v8 = vld [vmem:[#allocation6 + $0xf4] sm:$0xf] }
 0x663   : > { %6715 = vmatpush.bf16.msrb.mxu3 %v9684_v27  ;;  %v10189_v27 = vld [vmem:[#allocation6 + $0x74] sm:$0xf] }
 0x667   : > { %v12609_v36 = vpop.f32.mrf.mxu0  ;;  %v12611_v57 = vpop.f32.mrf.mxu1 }
 0x668   : > { %13882 = vst [vmem:[#allocation54_spill] sm:$0xff] %v12609_v36 }
 0x669   : > { %v5193_v19 = vpop.f32.mrf.mxu3  ;;  %v5232_v5 = vpop.f32.mrf.mxu2  ;;  %13883 = vst [vmem:[#allocation33_spill] sm:$0xff] %v12611_v57 }
 0x66a   : > { %v5192_v19 = vadd.f32 %v5191_v24, %v5179_v21  ;;  %v9525_v24 = vld [vmem:[#allocation6 + $0x78] sm:$0xf0] }
 0x66b   : > { %v9589_v21 = vld [vmem:[#allocation6 + $0xf8] sm:$0xf0] }
 0x66e   : > { %9455 = vmatmul.msk.bf16.gmra.mxu3 %vm936_vm2, %v13847_v34  ;;  %9441 = vmatmul.msk.bf16.gmra.mxu2 %vm936_vm2, %v13849_v6  ;;  %v5205_v34 = vadd.f32 %v12358_v40, %v5192_v19  ;;  %v9528_v40 = vor.u32 %v10189_v27, %v9525_v24 }
 0x66f   : > { %v12620_v57 = vpop.f32.mrf.mxu0  ;;  %v12622_v36 = vpop.f32.mrf.mxu1 }
 0x670   : > { %v5218_v39 = vadd.f32 %v12360_v11, %v5205_v34  ;;  %v5704_v11 = vrot.slane %v5140_v2, 6  ;;  %6800 = vmatpush.bf16.msrb.mxu0 %v9528_v40 }
 0x671   : > { %v12618_v5 = vpop.f32.mrf.mxu2 }
 0x672   : > { %v5231_v12 = vadd.f32 %v5230_v37, %v5218_v39 }
 0x677   : > { %v12628_v49 = vpop.f32.mrf.mxu0  ;;  %v12630_v20 = vpop.f32.mrf.mxu1 }
 0x679   : > { %v12626_v14 = vpop.f32.mrf.mxu2 }
 0x67e   : > { %9456 = vmatmul.msk.bf16.gmra.mxu3 %vm936_vm2, %v13848_v26  ;;  %9442 = vmatmul.msk.bf16.gmra.mxu2 %vm936_vm2, %v13850_v29  ;;  %v9592_v26 = vor.u32 %v10205_v8, %v9589_v21 }
 0x67f   : > { %v5422_v35 = vpop.f32.mrf.mxu0  ;;  %v5511_v37 = vpop.f32.mrf.mxu1 }
 0x680   : > { %6889 = vmatpush.bf16.msra.mxu1 %v9592_v26 }
 0x681   : > { %v5243_v0 = vpop.f32.mrf.mxu3  ;;  %v12637_v62 = vpop.f32.mrf.mxu2 }
 0x682   : > { %v5244_v16 = vadd.f32 %v5243_v0, %v5231_v12 }
 0x684   : > { %v5705_v19 = vrot.slane %v5244_v16, 5 }
 0x686   : > { %v5709_v39 = vsel %vm5708_vm5, %v5704_v11, %v5705_v19  ;;  %v5714_v34 = vsel %vm5713_vm6, %v5704_v11, %v5705_v19 }
 0x687   : > { %v5711_v27 = vsel %vm5710_vm7, %v12484_v52, %v5709_v39  ;;  %v5716_v2 = vsel %vm5715_vm8, %v12488_v53, %v5714_v34  ;;  %v12667_v34 = vpop.f32.mrf.mxu0 }
 0x688   : > { %v12641_v12 = vrot.slane %v5716_v2, 1  ;;  %v12643_v24 = vperm.slane %v5711_v27, 0  ;;  %v12645_v0 = vperm.slane %v5711_v27, 1  ;;  %v12669_v2 = vpop.f32.mrf.mxu1  ;;  %v12699_v32 = vperm.slane %v5711_v27, 2 }
 0x689   : > { %v5245_v40 = vpop.f32.mrf.mxu3  ;;  %v5537_v26 = vpop.f32.mrf.mxu2 }
 0x68a   : > { %13884 = vst [vmem:[#allocation12_spill] sm:$0xff] %v12641_v12  ;;  %v12648_v16 = vperm.slane %v12641_v12, 0  ;;  %v12651_v8 = vperm.slane %v12641_v12, 1  ;;  %v5734_v11 = vadd.f32 %v12643_v24, %v12374_v4  ;;  %v5738_v52 = vadd.f32 %v12643_v24, %v12384_v22 }
 0x68b   : > { %v5735_v53 = vadd.f32 %v12645_v0, %v12376_v45  ;;  %v5739_v39 = vadd.f32 %v12645_v0, %v12386_v1 }
 0x68c   : > { %v12660_v21 = vadd.f32 %v12648_v16, %v5422_v35  ;;  %v12663_v19 = vadd.f32 %v12651_v8, %v5511_v37  ;;  %v5862_v4 = vmax.f32 %v5734_v11, 0.0  ;;  %v5866_v40 = vmax.f32 %v5738_v52, 0.0  ;;  %v10212_v37 = vld [vmem:[#allocation6 + $0x124] sm:$0xf0] }
 0x68d   : > { %v5863_v22 = vmax.f32 %v5735_v53, 0.0  ;;  %v5867_v35 = vmax.f32 %v5739_v39, 0.0  ;;  %v10228_v11 = vld [vmem:[#allocation6 + $0x1a4] sm:$0xf0]  ;;  %v9612_v52 = vor.u32 %v10212_v37, %v9611_v58 }
 0x68e   : > { %9457 = vmatmul.msk.bf16.gmra.mxu3 %vm936_vm2, %v13849_v6  ;;  %v12673_v45 = vpack.c.bf16 %v5866_v40, %v5862_v4  ;;  %9443 = vmatmul.msk.bf16.gmra.mxu2 %vm936_vm2, %v13851_v63  ;;  %v9676_v12 = vor.u32 %v10228_v11, %v9675_v59  ;;  %v12681_v4 = vperm.slane %v5711_v27, 3  ;;  %v5746_v59 = vadd.f32 %v12643_v24, %v12399_v42 }
 0x68f   : > { %v12676_v43 = vpack.c.bf16 %v5867_v35, %v5863_v22  ;;  %6627 = vmatpush.bf16.msrb.mxu2 %v9612_v52  ;;  %v5427_v53 = vpop.f32.mrf.mxu0  ;;  %v5742_v35 = vadd.f32 %v12643_v24, %v12388_v33  ;;  %v5747_v11 = vadd.f32 %v12645_v0, %v12401_v10  ;;  %v9517_v10 = vld [vmem:[#allocation6 + $0x68] sm:$0xf0] }
 0x690   : > { %13885 = vst [vmem:[#allocation13_spill] sm:$0xff] %v12673_v45  ;;  %6452 = vmatmul.bf16.vlgmr.msra.gmra.mxu0 %v12673_v45  ;;  %6716 = vmatpush.bf16.msrb.mxu3 %v9676_v12  ;;  %v5516_v39 = vpop.f32.mrf.mxu1  ;;  %v12684_v40 = vadd.f32 %v12648_v16, %v5427_v53  ;;  %v5743_v12 = vadd.f32 %v12645_v0, %v12390_v38 }
 0x691   : > { %13886 = vst [vmem:[#allocation14_spill] sm:$0xff] %v12676_v43  ;;  %v5619_v1 = vpop.f32.mrf.mxu3  ;;  %6541 = vmatmul.bf16.vlgmr.msrb.gmra.mxu1 %v12676_v43  ;;  %v5540_v6 = vpop.f32.mrf.mxu2  ;;  %v12687_v22 = vadd.f32 %v12651_v8, %v5516_v39  ;;  %v5870_v53 = vmax.f32 %v5742_v35, 0.0  ;;  %v5874_v39 = vmax.f32 %v5746_v59, 0.0  ;;  %v5875_v56 = vmax.f32 %v5747_v11, 0.0 }
 0x692   : > { %v5737_v58 = vadd.f32 %v12681_v4, %v5619_v1  ;;  %v5871_v33 = vmax.f32 %v5743_v12, 0.0  ;;  %v10187_v1 = vld [vmem:[#allocation6 + $0x64] sm:$0xf] }
 0x693   : > { %v12705_v38 = vpack.c.bf16 %v5874_v39, %v5870_v53  ;;  %v9520_v35 = vor.u32 %v10187_v1, %v9517_v10  ;;  %v5752_v53 = vadd.f32 %v12699_v32, %v5540_v6  ;;  %v5750_v1 = vadd.f32 %v12643_v24, %v12403_v28 }
 0x694   : > { %v5865_v43 = vmax.f32 %v5737_v58, 0.0  ;;  %v12709_v59 = vpack.c.bf16 %v5875_v56, %v5871_v33  ;;  %v9581_v58 = vld [vmem:[#allocation6 + $0xe8] sm:$0xf0]  ;;  %v5740_v56 = vadd.f32 %v12699_v32, %v12626_v14  ;;  %v5754_v10 = vadd.f32 %v12643_v24, %v12413_v9 }
 0x695   : > { %6801 = vmatpush.bf16.msrb.mxu0 %v9520_v35  ;;  %v5751_v6 = vadd.f32 %v12645_v0, %v12405_v13  ;;  %v5878_v28 = vmax.f32 %v5750_v1, 0.0 }
 0x696   : > { %v5868_v33 = vmax.f32 %v5740_v56, 0.0 }
 0x699   : > { %v5621_v37 = vpop.f32.mrf.mxu3  ;;  %v5542_v30 = vpop.f32.mrf.mxu2 }
 0x69a   : > { %v5741_v52 = vadd.f32 %v12681_v4, %v5621_v37  ;;  %v5748_v37 = vadd.f32 %v12699_v32, %v5537_v26  ;;  %v5736_v26 = vadd.f32 %v12699_v32, %v12618_v5 }
 0x69c   : > { %v5869_v45 = vmax.f32 %v5741_v52, 0.0  ;;  %v5876_v12 = vmax.f32 %v5748_v37, 0.0  ;;  %v5864_v39 = vmax.f32 %v5736_v26, 0.0  ;;  %v5880_v37 = vmax.f32 %v5752_v53, 0.0 }
 0x69d   : > { %v5879_v53 = vmax.f32 %v5751_v6, 0.0 }
 0x69e   : > { %v12701_v42 = vpack.c.bf16 %v5869_v45, %v5865_v43  ;;  %9458 = vmatmul.msk.bf16.gmra.mxu3 %vm936_vm2, %v13850_v29  ;;  %9444 = vmatmul.msk.bf16.gmra.mxu2 %vm936_vm2, %v13852_v18  ;;  %v5744_v43 = vadd.f32 %v12699_v32, %v12637_v62  ;;  %v5756_v29 = vadd.f32 %v12699_v32, %v5542_v30  ;;  %v10203_v45 = vld [vmem:[#allocation6 + $0xe4] sm:$0xf] }
 0x69f   : > { %v9584_v52 = vor.u32 %v10203_v45, %v9581_v58  ;;  %v12727_v35 = vpack.c.bf16 %v5868_v33, %v5864_v39  ;;  %v5882_v58 = vmax.f32 %v5754_v10, 0.0  ;;  %v9603_v33 = vld [vmem:[#allocation6 + $0x110] sm:$0xf] }
 0x6a0   : > { %13887 = vst [vmem:[#allocation15_spill] sm:$0xff] %v12701_v42  ;;  %6457 = vmatmul.bf16.gmra.mxu0 %v12705_v38  ;;  %v5872_v62 = vmax.f32 %v5744_v43, 0.0  ;;  %v5884_v30 = vmax.f32 %v5756_v29, 0.0  ;;  %v5755_v43 = vadd.f32 %v12645_v0, %v12415_v48  ;;  %v9667_v10 = vld [vmem:[#allocation6 + $0x190] sm:$0xf] }
 0x6a1   : > { %v5624_v27 = vpop.f32.mrf.mxu3  ;;  %6546 = vmatmul.bf16.gmra.mxu1 %v12709_v59  ;;  %v5545_v11 = vpop.f32.mrf.mxu2  ;;  %13888 = vst [vmem:[#allocation16_spill] sm:$0xff] %v12727_v35 }
 0x6a2   : > { %6890 = vmatpush.bf16.msra.mxu1 %v9584_v52  ;;  %v5745_v5 = vadd.f32 %v12681_v4, %v5624_v27  ;;  %v12729_v14 = vpack.c.bf16 %v5876_v12, %v5872_v62  ;;  %v12736_v26 = vpack.c.bf16 %v5884_v30, %v5880_v37  ;;  %v5760_v12 = vadd.f32 %v12699_v32, %v5545_v11  ;;  %v10210_v30 = vld [vmem:[#allocation6 + $0x114] sm:$0xf0]  ;;  %v5429_v37 = vpop.f32.mrf.mxu0 }
 0x6a3   : > { %v5883_v39 = vmax.f32 %v5755_v43, 0.0  ;;  %v12744_v62 = vpack.c.bf16 %v5882_v58, %v5878_v28  ;;  %v9604_v1 = vor.u32 %v10210_v30, %v9603_v33  ;;  %v5518_v43 = vpop.f32.mrf.mxu1  ;;  %v5851_v28 = vadd.f32 %v12651_v8, %v12669_v2 }
 0x6a4   : > { %13889 = vst [vmem:[#allocation17_spill] sm:$0xff] %v12729_v14  ;;  %v5873_v9 = vmax.f32 %v5745_v5, 0.0  ;;  %v10226_v5 = vld [vmem:[#allocation6 + $0x194] sm:$0xf0]  ;;  %v5762_v2 = vadd.f32 %v12643_v24, %v12434_v7  ;;  %v5983_v33 = vmax.f32 %v12687_v22, 0.0  ;;  %v5842_v7 = vadd.f32 %v12648_v16, %v12628_v49 }
 0x6a5   : > { %13890 = vst [vmem:[#allocation18_spill] sm:$0xff] %v12736_v26  ;;  %v12747_v11 = vpack.c.bf16 %v5883_v39, %v5879_v53  ;;  %v9668_v6 = vor.u32 %v10226_v5, %v9667_v10  ;;  %6628 = vmatpush.bf16.msrb.mxu2 %v9604_v1  ;;  %v5979_v39 = vmax.f32 %v5851_v28, 0.0  ;;  %v5838_v10 = vadd.f32 %v12648_v16, %v12620_v57 }
 0x6a6   : > { %v5843_v57 = vadd.f32 %v12651_v8, %v12630_v20 }
 0x6a7   : > { %6717 = vmatpush.bf16.msrb.mxu3 %v9668_v6  ;;  %v5970_v6 = vmax.f32 %v5842_v7, 0.0 }
 0x6a9   : > { %v5626_v45 = vpop.f32.mrf.mxu3  ;;  %v5547_v56 = vpop.f32.mrf.mxu2 }
 0x6aa   : > { %v5749_v29 = vadd.f32 %v12681_v4, %v5626_v45  ;;  %v5764_v52 = vadd.f32 %v12699_v32, %v5547_v56  ;;  %v5888_v45 = vmax.f32 %v5760_v12, 0.0  ;;  %v5758_v56 = vadd.f32 %v12643_v24, %v12418_v25 }
 0x6ab   : > { %v5859_v12 = vadd.f32 %v12651_v8, %v5518_v43  ;;  %v5759_v25 = vadd.f32 %v12645_v0, %v12420_v44  ;;  %v5966_v44 = vmax.f32 %v5838_v10, 0.0 }
 0x6ac   : > { %v5877_v27 = vmax.f32 %v5749_v29, 0.0  ;;  %v5892_v48 = vmax.f32 %v5764_v52, 0.0  ;;  %v5850_v29 = vadd.f32 %v12648_v16, %v12667_v34  ;;  %v5974_v52 = vmax.f32 %v12660_v21, 0.0 }
 0x6ad   : > { %v5975_v34 = vmax.f32 %v12663_v19, 0.0  ;;  %v5886_v1 = vmax.f32 %v5758_v56, 0.0  ;;  %v5987_v21 = vmax.f32 %v5859_v12, 0.0  ;;  %v5763_v19 = vadd.f32 %v12645_v0, %v12436_v55 }
 0x6ae   : > { %9459 = vmatmul.msk.bf16.gmra.mxu3 %vm936_vm2, %v13851_v63  ;;  %v12742_v13 = vpack.c.bf16 %v5877_v27, %v5873_v9  ;;  %9445 = vmatmul.msk.bf16.gmra.mxu2 %vm936_vm2, %v13853_v41  ;;  %v12756_v58 = vpack.c.bf16 %v5892_v48, %v5888_v45  ;;  %v5858_v9 = vadd.f32 %v12648_v16, %v5429_v37  ;;  %v5978_v53 = vmax.f32 %v5850_v29, 0.0 }
 0x6af   : > { %v5982_v48 = vmax.f32 %v12684_v40, 0.0  ;;  %v5839_v40 = vadd.f32 %v12651_v8, %v12622_v36  ;;  %v5890_v45 = vmax.f32 %v5762_v2, 0.0  ;;  %v12784_v49 = vpack.c.bf16 %v5979_v39, %v5975_v34 }
 0x6b0   : > { %13891 = vst [vmem:[#allocation19_spill] sm:$0xff] %v12742_v13  ;;  %6462 = vmatmul.bf16.gmra.mxu0 %v12744_v62  ;;  %v5986_v30 = vmax.f32 %v5858_v9, 0.0  ;;  %v12782_v29 = vpack.c.bf16 %v5978_v53, %v5974_v52  ;;  %v5887_v9 = vmax.f32 %v5759_v25, 0.0  ;;  %v5891_v36 = vmax.f32 %v5763_v19, 0.0  ;;  %v10185_v53 = vld [vmem:[#allocation6 + $0x54] sm:$0xf] }
 0x6b1   : > { %v5629_v63 = vpop.f32.mrf.mxu3  ;;  %6551 = vmatmul.bf16.gmra.mxu1 %v12747_v11  ;;  %13892 = vst [vmem:[#allocation20_spill] sm:$0xff] %v12756_v58  ;;  %v5550_v27 = vpop.f32.mrf.mxu2  ;;  %v5967_v43 = vmax.f32 %v5839_v40, 0.0  ;;  %v5971_v12 = vmax.f32 %v5843_v57, 0.0  ;;  %v12790_v2 = vpack.c.bf16 %v5987_v21, %v5983_v33  ;;  %v12795_v52 = vpack.c.bf16 %v5890_v45, %v5886_v1  ;;  %v9509_v25 = vld [vmem:[#allocation6 + $0x58] sm:$0xf0] }
 0x6b2   : > { %v5753_v22 = vadd.f32 %v12681_v4, %v5629_v63  ;;  %13893 = vst [vmem:[#allocation22_spill] sm:$0xff] %v12784_v49  ;;  %v12786_v56 = vpack.c.bf16 %v5986_v30, %v5982_v48  ;;  %v12788_v63 = vpack.c.bf16 %v5970_v6, %v5966_v44  ;;  %v9512_v39 = vor.u32 %v10185_v53, %v9509_v25  ;;  %v10201_v21 = vld [vmem:[#allocation6 + $0xd4] sm:$0xf]  ;;  %v9659_v53 = vld [vmem:[#allocation6 + $0x180] sm:$0xf] }
 0x6b3   : > { %13895 = vst [vmem:[#allocation28_spill] sm:$0xff] %v12790_v2  ;;  %v12797_v34 = vpack.c.bf16 %v5971_v12, %v5967_v43  ;;  %v5768_v30 = vadd.f32 %v12699_v32, %v5550_v27  ;;  %v12803_v33 = vpack.c.bf16 %v5891_v36, %v5887_v9  ;;  %v5766_v27 = vadd.f32 %v12643_v24, %v12452_v15  ;;  %v9595_v12 = vld [vmem:[#allocation6 + $0x100] sm:$0xf] }
 0x6b4   : > { %13894 = vst [vmem:[#allocation25_spill] sm:$0xff] %v12788_v63  ;;  %v5881_v10 = vmax.f32 %v5753_v22, 0.0  ;;  %6802 = vmatpush.bf16.msrb.mxu0 %v9512_v39  ;;  %v5770_v22 = vadd.f32 %v12643_v24, %v12466_v54  ;;  %v5767_v44 = vadd.f32 %v12645_v0, %v12454_v61  ;;  %v5771_v6 = vadd.f32 %v12645_v0, %v12468_v47  ;;  %v10224_v47 = vld [vmem:[#allocation6 + $0x184] sm:$0xf0] }
 0x6b5   : > { %13896 = vst [vmem:[#allocation31_spill] sm:$0xff] %v12797_v34  ;;  %v5896_v40 = vmax.f32 %v5768_v30, 0.0  ;;  %v5894_v57 = vmax.f32 %v5766_v27, 0.0  ;;  %v9660_v30 = vor.u32 %v10224_v47, %v9659_v53  ;;  %v5778_v27 = vadd.f32 %v12643_v24, %v12500_v17 }
 0x6b6   : > { %v5898_v43 = vmax.f32 %v5770_v22, 0.0  ;;  %v5895_v9 = vmax.f32 %v5767_v44, 0.0  ;;  %v5899_v36 = vmax.f32 %v5771_v6, 0.0  ;;  %v5775_v44 = vadd.f32 %v12645_v0, %v12475_v23 }
 0x6b7   : > { %6718 = vmatpush.bf16.msrb.mxu3 %v9660_v30  ;;  %v5779_v6 = vadd.f32 %v12645_v0, %v12502_v46 }
 0x6b8   : > { %v12822_v54 = vpack.c.bf16 %v5898_v43, %v5894_v57  ;;  %v12825_v25 = vpack.c.bf16 %v5899_v36, %v5895_v9  ;;  %v5906_v43 = vmax.f32 %v5778_v27, 0.0  ;;  %v10183_v36 = vld [vmem:[#allocation6 + $0x44] sm:$0xf] }
 0x6b9   : > { %v5631_v5 = vpop.f32.mrf.mxu3  ;;  %v5552_v28 = vpop.f32.mrf.mxu2  ;;  %v5907_v9 = vmax.f32 %v5779_v6, 0.0  ;;  %v13904_v6 = vld [vmem:[#allocation35_spill] sm:$0xff] }
 0x6ba   : > { %v5757_v37 = vadd.f32 %v12681_v4, %v5631_v5  ;;  %v5772_v20 = vadd.f32 %v12699_v32, %v5552_v28  ;;  %v9573_v5 = vld [vmem:[#allocation6 + $0xd8] sm:$0xf0] }
 0x6bb   : > { %v9576_v7 = vor.u32 %v10201_v21, %v9573_v5 }
 0x6bc   : > { %v5885_v55 = vmax.f32 %v5757_v37, 0.0  ;;  %v5900_v1 = vmax.f32 %v5772_v20, 0.0 }
 0x6bd   : > { %6891 = vmatpush.bf16.msra.mxu1 %v9576_v7 }
 0x6be   : > { %9460 = vmatmul.msk.bf16.gmra.mxu3 %vm936_vm2, %v13852_v18  ;;  %v12799_v48 = vpack.c.bf16 %v5885_v55, %v5881_v10  ;;  %9446 = vmatmul.msk.bf16.gmra.mxu2 %vm936_vm2, %v13854_v51  ;;  %v12812_v37 = vpack.c.bf16 %v5900_v1, %v5896_v40  ;;  %v10208_v10 = vld [vmem:[#allocation6 + $0x104] sm:$0xf0]  ;;  %v5774_v40 = vadd.f32 %v12643_v24, %v12473_v3 }
 0x6bf   : > { %v9596_v20 = vor.u32 %v10208_v10, %v9595_v12 }
 0x6c0   : > { %13897 = vst [vmem:[#allocation23_spill] sm:$0xff] %v12799_v48  ;;  %6467 = vmatmul.bf16.gmra.mxu0 %v12795_v52 }
 0x6c1   : > { %v5634_v18 = vpop.f32.mrf.mxu3  ;;  %6556 = vmatmul.bf16.gmra.mxu1 %v12803_v33  ;;  %v5555_v19 = vpop.f32.mrf.mxu2  ;;  %13898 = vst [vmem:[#allocation26_spill] sm:$0xff] %v12812_v37  ;;  %6629 = vmatpush.bf16.msrb.mxu2 %v9596_v20  ;;  %v9565_v20 = vld [vmem:[#allocation6 + $0xc8] sm:$0xf0] }
 0x6c2   : > { %v5761_v15 = vadd.f32 %v12681_v4, %v5634_v18  ;;  %v5776_v1 = vadd.f32 %v12699_v32, %v5555_v19  ;;  %v5902_v19 = vmax.f32 %v5774_v40, 0.0 }
 0x6c4   : > { %v5889_v18 = vmax.f32 %v5761_v15, 0.0  ;;  %v5904_v22 = vmax.f32 %v5776_v1, 0.0  ;;  %v12847_v17 = vpack.c.bf16 %v5906_v43, %v5902_v19  ;;  %v9501_v15 = vld [vmem:[#allocation6 + $0x48] sm:$0xf0]  ;;  %v13902_v1 = vld [vmem:[#allocation34_spill] sm:$0xff]  ;;  %v5787_v19 = vadd.f32 %v12645_v0, %v13904_v6 }
 0x6c5   : > { %v9504_v23 = vor.u32 %v10183_v36, %v9501_v15  ;;  %v10221_v15 = vld [vmem:[#allocation6 + $0x174] sm:$0xf] }
 0x6c7   : > { %6803 = vmatpush.bf16.msrb.mxu0 %v9504_v23  ;;  %v9653_v23 = vld [vmem:[#allocation6 + $0x178] sm:$0xf0] }
 0x6c9   : > { %v5636_v45 = vpop.f32.mrf.mxu3  ;;  %v5557_v28 = vpop.f32.mrf.mxu2 }
 0x6ca   : > { %v5765_v55 = vadd.f32 %v12681_v4, %v5636_v45 }
 0x6cc   : > { %v5893_v61 = vmax.f32 %v5765_v55, 0.0 }
 0x6ce   : > { %9461 = vmatmul.msk.bf16.gmra.mxu3 %vm936_vm2, %v13853_v41  ;;  %9447 = vmatmul.msk.bf16.gmra.mxu2 %vm936_vm2, %v13856_v31  ;;  %v5780_v41 = vadd.f32 %v12699_v32, %v5557_v28  ;;  %v12832_v5 = vpack.c.bf16 %v5893_v61, %v5889_v18  ;;  %v5903_v28 = vmax.f32 %v5775_v44, 0.0 }
 0x6d0   : > { %6472 = vmatmul.bf16.gmra.mxu0 %v12822_v54  ;;  %13899 = vst [vmem:[#allocation29_spill] sm:$0xff] %v12832_v5  ;;  %v5908_v7 = vmax.f32 %v5780_v41, 0.0  ;;  %v12851_v46 = vpack.c.bf16 %v5907_v9, %v5903_v28  ;;  %v5782_v41 = vadd.f32 %v12643_v24, %v12519_v60 }
 0x6d1   : > { %v5639_v39 = vpop.f32.mrf.mxu3  ;;  %6561 = vmatmul.bf16.gmra.mxu1 %v12825_v25  ;;  %v5560_v21 = vpop.f32.mrf.mxu2 }
 0x6d2   : > { %v12842_v57 = vpack.c.bf16 %v5908_v7, %v5904_v22  ;;  %v5769_v12 = vadd.f32 %v12681_v4, %v5639_v39  ;;  %13901 = vst [vmem:[#allocation56_spill] sm:$0xff] %v12851_v46  ;;  %v5784_v39 = vadd.f32 %v12699_v32, %v5560_v21  ;;  %v5786_v7 = vadd.f32 %v12643_v24, %v13902_v1  ;;  %v13907_v1 = vld [vmem:[#allocation24_spill] sm:$0xff] }
 0x6d4   : > { %13900 = vst [vmem:[#allocation55_spill] sm:$0xff] %v12842_v57  ;;  %v5897_v30 = vmax.f32 %v5769_v12, 0.0  ;;  %v5912_v43 = vmax.f32 %v5784_v39, 0.0  ;;  %v5914_v28 = vmax.f32 %v5786_v7, 0.0  ;;  %v9656_v12 = vor.u32 %v10221_v15, %v9653_v23 }
 0x6d5   : > { %v5790_v7 = vadd.f32 %v12643_v24, %v13907_v1  ;;  %v9557_v1 = vld [vmem:[#allocation6 + $0xb8] sm:$0xf0] }
 0x6d6   : > { %6978 = vmatpush.bf16.msra.mxu2 %v9656_v12 }
 0x6d9   : > { %v5641_v45 = vpop.f32.mrf.mxu3  ;;  %v5562_v55 = vpop.f32.mrf.mxu2 }
 0x6da   : > { %v5773_v3 = vadd.f32 %v12681_v4, %v5641_v45  ;;  %v5788_v18 = vadd.f32 %v12699_v32, %v5562_v55  ;;  %v13903_v45 = vld [vmem:[#allocation21_spill] sm:$0xff]  ;;  %v5910_v55 = vmax.f32 %v5782_v41, 0.0 }
 0x6db   : > { %v5783_v44 = vadd.f32 %v12645_v0, %v13903_v45 }
 0x6dc   : > { %v5901_v61 = vmax.f32 %v5773_v3, 0.0  ;;  %v5916_v27 = vmax.f32 %v5788_v18, 0.0  ;;  %v5915_v3 = vmax.f32 %v5787_v19, 0.0  ;;  %v12872_v36 = vpack.c.bf16 %v5914_v28, %v5910_v55  ;;  %v13910_v55 = vld [vmem:[#allocation27_spill] sm:$0xff] }
 0x6dd   : > { %v5911_v9 = vmax.f32 %v5783_v44, 0.0  ;;  %v5795_v28 = vadd.f32 %v12645_v0, %v13910_v55  ;;  %v13917_v55 = vld [vmem:[#allocation30_spill] sm:$0xff] }
 0x6de   : > { %9462 = vmatmul.msk.bf16.gmra.mxu3 %vm936_vm2, %v13854_v51  ;;  %9448 = vmatmul.msk.bf16.gmra.mxu2 %vm936_vm2, %v13861_v50  ;;  %v10199_v51 = vld [vmem:[#allocation6 + $0xc4] sm:$0xf]  ;;  %v12862_v40 = vpack.c.bf16 %v5901_v61, %v5897_v30  ;;  %v12868_v60 = vpack.c.bf16 %v5916_v27, %v5912_v43  ;;  %13905 = vst [vmem:[#allocation34_spill] sm:$0xff] %v12872_v36  ;;  %v13908_v27 = vld [vmem:[#allocation37_spill] sm:$0xff] }
 0x6df   : > { %v9568_v47 = vor.u32 %v10199_v51, %v9565_v20  ;;  %v12875_v61 = vpack.c.bf16 %v5915_v3, %v5911_v9  ;;  %v10237_v20 = vld [vmem:[#allocation6 + $0x1f4] sm:$0xf]  ;;  %v5794_v45 = vadd.f32 %v12643_v24, %v13908_v27  ;;  %v5918_v3 = vmax.f32 %v5790_v7, 0.0 }
 0x6e0   : > { %6477 = vmatmul.bf16.gmra.mxu0 %v12847_v17  ;;  %v5923_v24 = vmax.f32 %v5795_v28, 0.0  ;;  %v5802_v28 = vadd.f32 %v12648_v16, %v13917_v55 }
 0x6e1   : > { %v5644_v10 = vpop.f32.mrf.mxu3  ;;  %6566 = vmatmul.bf16.gmra.mxu1 %v12851_v46  ;;  %v5565_v53 = vpop.f32.mrf.mxu2  ;;  %13906 = vst [vmem:[#allocation21_spill] sm:$0xff] %v12875_v61  ;;  %v5922_v15 = vmax.f32 %v5794_v45, 0.0  ;;  %v13915_v45 = vld [vmem:[#allocation12_spill] sm:$0xff] }
 0x6e2   : > { %6892 = vmatpush.bf16.msra.mxu1 %v9568_v47  ;;  %v9717_v47 = vld [vmem:[#allocation6 + $0x1f8] sm:$0xf0] }
 0x6e3   : > { %v9720_v18 = vor.u32 %v10237_v20, %v9717_v47 }
 0x6e5   : > { %7067 = vmatpush.bf16.msra.mxu3 %v9720_v18  ;;  %v9493_v18 = vld [vmem:[#allocation6 + $0x38] sm:$0xf0] }
 0x6e9   : > { %v5646_v22 = vpop.f32.mrf.mxu3  ;;  %v5567_v21 = vpop.f32.mrf.mxu2 }
 0x6ea   : > { %v5781_v30 = vadd.f32 %v12681_v4, %v5646_v22  ;;  %v5796_v6 = vadd.f32 %v12699_v32, %v5567_v21  ;;  %v13909_v22 = vld [vmem:[#allocation36_spill] sm:$0xff]  ;;  %v12895_v21 = vpack.c.bf16 %v5922_v15, %v5918_v3 }
 0x6eb   : > { %v5791_v43 = vadd.f32 %v12645_v0, %v13909_v22  ;;  %v13916_v22 = vld [vmem:[#allocation38_spill] sm:$0xff]  ;;  %v6118_v3 = vld [vmem:[%s13672_s11] sm:$0x3] }
 0x6ec   : > { %v5909_v41 = vmax.f32 %v5781_v30, 0.0  ;;  %v5924_v23 = vmax.f32 %v5796_v6, 0.0  ;;  %13912 = vst [vmem:[#allocation24_spill] sm:$0xff] %v12895_v21 }
 0x6ed   : > { %v5919_v20 = vmax.f32 %v5791_v43, 0.0  ;;  %v5798_v43 = vadd.f32 %v12648_v16, %v13916_v22 }
 0x6ee   : > { %9463 = vmatmul.msk.bf16.gmra.mxu3 %vm936_vm2, %v13856_v31  ;;  %6630 = vmatmul.bf16.vlgmr.msrb.gmra.mxu2 %v12727_v35  ;;  %v5777_v31 = vadd.f32 %v12681_v4, %v5644_v10  ;;  %v5792_v10 = vadd.f32 %v12699_v32, %v5565_v53  ;;  %v10181_v53 = vld [vmem:[#allocation6 + $0x34] sm:$0xf]  ;;  %v9637_v35 = vld [vmem:[#allocation6 + $0x158] sm:$0xf0] }
 0x6ef   : > { %v12900_v0 = vpack.c.bf16 %v5923_v24, %v5919_v20  ;;  %v13919_v24 = vld [vmem:[#allocation43_spill] sm:$0xff] }
 0x6f0   : > { %6482 = vmatmul.bf16.gmra.mxu0 %v12872_v36  ;;  %v5905_v44 = vmax.f32 %v5777_v31, 0.0  ;;  %v5920_v47 = vmax.f32 %v5792_v10, 0.0  ;;  %v9496_v31 = vor.u32 %v10181_v53, %v9493_v18  ;;  %v12922_v18 = vperm.slane %v6118_v3, 0 }
 0x6f1   : > { %v5649_v51 = vpop.f32.mrf.mxu3  ;;  %6571 = vmatmul.bf16.gmra.mxu1 %v12875_v61  ;;  %v5570_v39 = vpop.f32.mrf.mxu2  ;;  %13914 = vst [vmem:[#allocation36_spill] sm:$0xff] %v12900_v0 }
 0x6f2   : > { %v12891_v9 = vpack.c.bf16 %v5909_v41, %v5905_v44  ;;  %v12897_v30 = vpack.c.bf16 %v5924_v23, %v5920_v47  ;;  %v10197_v41 = vld [vmem:[#allocation6 + $0xb4] sm:$0xf]  ;;  %6804 = vmatpush.bf16.msrb.mxu0 %v9496_v31  ;;  %v12906_v44 = vperm.slane %v13915_v45, 2  ;;  %v5785_v6 = vadd.f32 %v12681_v4, %v5649_v51  ;;  %v13918_v23 = vld [vmem:[#allocation41_spill] sm:$0xff] }
 0x6f3   : > { %v5799_v20 = vadd.f32 %v12651_v8, %v13918_v23  ;;  %v5803_v51 = vadd.f32 %v12651_v8, %v13919_v24  ;;  %v5926_v31 = vmax.f32 %v5798_v43, 0.0 }
 0x6f4   : > { %13911 = vst [vmem:[#allocation35_spill] sm:$0xff] %v12891_v9  ;;  %v5800_v47 = vadd.f32 %v12906_v44, %v5570_v39  ;;  %v5913_v53 = vmax.f32 %v5785_v6, 0.0  ;;  %v10219_v39 = vld [vmem:[#allocation6 + $0x164] sm:$0xf]  ;;  %v9645_v6 = vld [vmem:[#allocation6 + $0x168] sm:$0xf0] }
 0x6f5   : > { %13913 = vst [vmem:[#allocation37_spill] sm:$0xff] %v12897_v30  ;;  %v5931_v22 = vmax.f32 %v5803_v51, 0.0  ;;  %v9709_v51 = vld [vmem:[#allocation6 + $0x1e8] sm:$0xf0] }
 0x6f9   : > { %v5651_v19 = vpop.f32.mrf.mxu3  ;;  %v5572_v12 = vpop.f32.mrf.mxu2 }
 0x6fa   : > { %v5789_v27 = vadd.f32 %v12681_v4, %v5651_v19  ;;  %v5804_v10 = vadd.f32 %v12906_v44, %v5572_v12 }
 0x6fc   : > { %v5917_v15 = vmax.f32 %v5789_v27, 0.0  ;;  %v5932_v12 = vmax.f32 %v5804_v10, 0.0  ;;  %v5928_v27 = vmax.f32 %v5800_v47, 0.0 }
 0x6fe   : > { %9464 = vmatmul.msk.bf16.gmra.mxu3 %vm936_vm2, %v13861_v50  ;;  %6635 = vmatmul.bf16.gmra.mxu2 %v12729_v14  ;;  %v9560_v50 = vor.u32 %v10197_v41, %v9557_v1  ;;  %v5930_v41 = vmax.f32 %v5802_v28, 0.0  ;;  %v12924_v55 = vpack.c.bf16 %v5917_v15, %v5913_v53  ;;  %v9648_v14 = vor.u32 %v10219_v39, %v9645_v6 }
 0x6ff   : > { %v12930_v43 = vpack.c.bf16 %v5932_v12, %v5928_v27  ;;  %v13924_v27 = vld [vmem:[#allocation39_spill] sm:$0xff] }
 0x700   : > { %6487 = vmatmul.bf16.gmra.mxu0 %v12895_v21  ;;  %6893 = vmatpush.bf16.msra.mxu1 %v9560_v50  ;;  %v5927_v50 = vmax.f32 %v5799_v20, 0.0  ;;  %v12928_v24 = vpack.c.bf16 %v5930_v41, %v5926_v31  ;;  %v10235_v20 = vld [vmem:[#allocation6 + $0x1e4] sm:$0xf] }
 0x701   : > { %v5654_v32 = vpop.f32.mrf.mxu3  ;;  %6576 = vmatmul.bf16.gmra.mxu1 %v12900_v0  ;;  %v5575_v7 = vpop.f32.mrf.mxu2  ;;  %13921 = vst [vmem:[#allocation12_spill] sm:$0xff] %v12930_v43  ;;  %6979 = vmatpush.bf16.msra.mxu2 %v9648_v14 }
 0x702   : > { %13920 = vst [vmem:[#allocation27_spill] sm:$0xff] %v12928_v24  ;;  %v12935_v10 = vpack.c.bf16 %v5931_v22, %v5927_v50  ;;  %v5793_v41 = vadd.f32 %v12681_v4, %v5654_v32  ;;  %v13923_v50 = vld [vmem:[#allocation45_spill] sm:$0xff]  ;;  %v5808_v32 = vadd.f32 %v12906_v44, %v5575_v7 }
 0x703   : > { %v5806_v22 = vadd.f32 %v12648_v16, %v13923_v50 }
 0x704   : > { %13922 = vst [vmem:[#allocation38_spill] sm:$0xff] %v12935_v10 }
 0x705   : > { %v5934_v50 = vmax.f32 %v5806_v22, 0.0 }
 0x709   : > { %v5656_v19 = vpop.f32.mrf.mxu3  ;;  %v5577_v1 = vpop.f32.mrf.mxu2 }
 0x70a   : > { %v5797_v53 = vadd.f32 %v12681_v4, %v5656_v19  ;;  %v5812_v14 = vadd.f32 %v12906_v44, %v5577_v1 }
 0x70c   : > { %v5925_v6 = vmax.f32 %v5797_v53, 0.0  ;;  %v5936_v53 = vmax.f32 %v5808_v32, 0.0 }
 0x70d   : > { %v6453_v0 = vpop.f32.mrf.mxu0 }
 0x70e   : > { %6719 = vmatmul.bf16.vlgmr.msrb.gmra.mxu3 %v12701_v42  ;;  %v6454_v23 = vadd.f32 %v6453_v0, %v12922_v18  ;;  %v6542_v3 = vpop.f32.mrf.mxu1  ;;  %6640 = vmatmul.bf16.gmra.mxu2 %v12736_v26  ;;  %v9712_v0 = vor.u32 %v10235_v20, %v9709_v51  ;;  %v13925_v51 = vld [vmem:[#allocation32_spill] sm:$0xff]  ;;  %v5940_v26 = vmax.f32 %v5812_v14, 0.0  ;;  %v9485_v14 = vld [vmem:[#allocation6 + $0x28] sm:$0xf0] }
 0x70f   : > { %v5807_v19 = vadd.f32 %v12651_v8, %v13925_v51 }
 0x710   : > { %v12932_v28 = vadd.f32 %v6542_v3, %v6454_v23  ;;  %6492 = vmatmul.bf16.gmra.mxu0 %v12928_v24  ;;  %7068 = vmatpush.bf16.msra.mxu3 %v9712_v0  ;;  %v5810_v23 = vadd.f32 %v12648_v16, %v13924_v27  ;;  %v13926_v0 = vld [vmem:[#allocation40_spill] sm:$0xff]  ;;  %v12960_v21 = vpack.c.bf16 %v5940_v26, %v5936_v53  ;;  %v9549_v26 = vld [vmem:[#allocation6 + $0xa8] sm:$0xf0]  ;;  %v13930_v53 = vld [vmem:[#allocation42_spill] sm:$0xff] }
 0x711   : > { %v5659_v15 = vpop.f32.mrf.mxu3  ;;  %6581 = vmatmul.bf16.gmra.mxu1 %v12935_v10  ;;  %v5580_v47 = vpop.f32.mrf.mxu2  ;;  %v5811_v4 = vadd.f32 %v12651_v8, %v13926_v0  ;;  %v5935_v24 = vmax.f32 %v5807_v19, 0.0  ;;  %v12969_v19 = vperm.slane %v13915_v45, 3  ;;  %v13931_v45 = vld [vmem:[#allocation46_spill] sm:$0xff] }
 0x712   : > { %v5938_v10 = vmax.f32 %v5810_v23, 0.0  ;;  %13928 = vst [vmem:[#allocation41_spill] sm:$0xff] %v12960_v21  ;;  %v10179_v23 = vld [vmem:[#allocation6 + $0x24] sm:$0xf] }
 0x713   : > { %v5939_v1 = vmax.f32 %v5811_v4, 0.0 }
 0x714   : > { %v12958_v51 = vpack.c.bf16 %v5938_v10, %v5934_v50  ;;  %v10195_v10 = vld [vmem:[#allocation6 + $0xa4] sm:$0xf]  ;;  %v5801_v50 = vadd.f32 %v12969_v19, %v5659_v15 }
 0x715   : > { %v6455_v31 = vpop.f32.mrf.mxu0  ;;  %v9552_v32 = vor.u32 %v10195_v10, %v9549_v26 }
 0x716   : > { %v6456_v12 = vadd.f32 %v6455_v31, %v12922_v18  ;;  %v6544_v39 = vpop.f32.mrf.mxu1  ;;  %v5921_v31 = vmax.f32 %v5793_v41, 0.0  ;;  %13927 = vst [vmem:[#allocation30_spill] sm:$0xff] %v12958_v51  ;;  %v12965_v41 = vpack.c.bf16 %v5939_v1, %v5935_v24 }
 0x717   : > { %6894 = vmatpush.bf16.msra.mxu1 %v9552_v32  ;;  %v13933_v32 = vld [vmem:[#allocation48_spill] sm:$0xff] }
 0x718   : > { %v12947_v3 = vadd.f32 %v6544_v39, %v6456_v12  ;;  %v12954_v42 = vpack.c.bf16 %v5925_v6, %v5921_v31  ;;  %13929 = vst [vmem:[#allocation43_spill] sm:$0xff] %v12965_v41  ;;  %v9488_v6 = vor.u32 %v10179_v23, %v9485_v14  ;;  %v5819_v15 = vadd.f32 %v12651_v8, %v13933_v32  ;;  %v10217_v32 = vld [vmem:[#allocation6 + $0x154] sm:$0xf] }
 0x719   : > { %v5661_v20 = vpop.f32.mrf.mxu3  ;;  %v5582_v27 = vpop.f32.mrf.mxu2 }
 0x71a   : > { %6805 = vmatpush.bf16.msrb.mxu0 %v9488_v6  ;;  %v5805_v31 = vadd.f32 %v12969_v19, %v5661_v20  ;;  %v13932_v20 = vld [vmem:[#allocation44_spill] sm:$0xff] }
 0x71b   : > { %v5815_v26 = vadd.f32 %v12651_v8, %v13932_v20 }
 0x71c   : > { %v5933_v14 = vmax.f32 %v5805_v31, 0.0 }
 0x71d   : > { %v6458_v12 = vpop.f32.mrf.mxu0 }
 0x71e   : > { %6724 = vmatmul.bf16.gmra.mxu3 %v12742_v13  ;;  %v6459_v39 = vadd.f32 %v6458_v12, %v12922_v18  ;;  %v6547_v0 = vpop.f32.mrf.mxu1  ;;  %6645 = vmatmul.bf16.gmra.mxu2 %v12756_v58  ;;  %v5814_v12 = vadd.f32 %v12648_v16, %v13930_v53  ;;  %v5943_v13 = vmax.f32 %v5815_v26, 0.0  ;;  %v9701_v26 = vld [vmem:[#allocation6 + $0x1d8] sm:$0xf0] }
 0x720   : > { %v12962_v7 = vadd.f32 %v6547_v0, %v6459_v39  ;;  %6497 = vmatmul.bf16.gmra.mxu0 %v12958_v51  ;;  %v5818_v39 = vadd.f32 %v12648_v16, %v13931_v45  ;;  %v5820_v0 = vadd.f32 %v12906_v44, %v5582_v27  ;;  %v5942_v53 = vmax.f32 %v5814_v12, 0.0 }
 0x721   : > { %v5664_v22 = vpop.f32.mrf.mxu3  ;;  %6586 = vmatmul.bf16.gmra.mxu1 %v12965_v41  ;;  %v5585_v4 = vpop.f32.mrf.mxu2  ;;  %v5929_v41 = vmax.f32 %v5801_v50, 0.0  ;;  %v5947_v27 = vmax.f32 %v5819_v15, 0.0  ;;  %v9640_v50 = vor.u32 %v10217_v32, %v9637_v35 }
 0x722   : > { %v5946_v58 = vmax.f32 %v5818_v39, 0.0  ;;  %v5948_v51 = vmax.f32 %v5820_v0, 0.0 }
 0x723   : > { %v12987_v61 = vpack.c.bf16 %v5933_v14, %v5929_v41  ;;  %v12998_v41 = vpack.c.bf16 %v5947_v27, %v5943_v13  ;;  %v10233_v14 = vld [vmem:[#allocation6 + $0x1d4] sm:$0xf]  ;;  %6980 = vmatpush.bf16.msra.mxu2 %v9640_v50  ;;  %v13938_v13 = vld [vmem:[#allocation49_spill] sm:$0xff] }
 0x724   : > { %v12991_v20 = vpack.c.bf16 %v5946_v58, %v5942_v53  ;;  %v9704_v58 = vor.u32 %v10233_v14, %v9701_v26  ;;  %v5822_v27 = vadd.f32 %v12648_v16, %v13938_v13  ;;  %v13940_v26 = vld [vmem:[#allocation51_spill] sm:$0xff] }
 0x725   : > { %v6460_v24 = vpop.f32.mrf.mxu0  ;;  %13934 = vst [vmem:[#allocation45_spill] sm:$0xff] %v12987_v61 }
 0x726   : > { %v6461_v1 = vadd.f32 %v6460_v24, %v12922_v18  ;;  %v6549_v23 = vpop.f32.mrf.mxu1  ;;  %v5816_v24 = vadd.f32 %v12906_v44, %v5580_v47  ;;  %13935 = vst [vmem:[#allocation39_spill] sm:$0xff] %v12991_v20  ;;  %7069 = vmatpush.bf16.msra.mxu3 %v9704_v58  ;;  %v13941_v58 = vld [vmem:[#allocation50_spill] sm:$0xff]  ;;  %v5950_v13 = vmax.f32 %v5822_v27, 0.0 }
 0x727   : > { %13937 = vst [vmem:[#allocation40_spill] sm:$0xff] %v12998_v41 }
 0x728   : > { %v12980_v6 = vadd.f32 %v6549_v23, %v6461_v1  ;;  %v5944_v31 = vmax.f32 %v5816_v24, 0.0  ;;  %v5809_v24 = vadd.f32 %v12969_v19, %v5664_v22  ;;  %v5827_v22 = vadd.f32 %v12651_v8, %v13941_v58 }
 0x729   : > { %v5666_v10 = vpop.f32.mrf.mxu3  ;;  %v5587_v45 = vpop.f32.mrf.mxu2 }
 0x72a   : > { %v12993_v12 = vpack.c.bf16 %v5948_v51, %v5944_v31  ;;  %v5813_v35 = vadd.f32 %v12969_v19, %v5666_v10  ;;  %v13939_v31 = vld [vmem:[#allocation47_spill] sm:$0xff]  ;;  %v5823_v10 = vadd.f32 %v12651_v8, %v13940_v26 }
 0x72c   : > { %13936 = vst [vmem:[#allocation32_spill] sm:$0xff] %v12993_v12 }
 0x72d   : > { %v6463_v1 = vpop.f32.mrf.mxu0 }
 0x72e   : > { %6729 = vmatmul.bf16.gmra.mxu3 %v12799_v48  ;;  %v6464_v23 = vadd.f32 %v6463_v1, %v12922_v18  ;;  %v6552_v47 = vpop.f32.mrf.mxu1  ;;  %6650 = vmatmul.bf16.gmra.mxu2 %v12812_v37  ;;  %v5826_v1 = vadd.f32 %v12648_v16, %v13939_v31  ;;  %v5951_v48 = vmax.f32 %v5823_v10, 0.0 }
 0x730   : > { %v12995_v39 = vadd.f32 %v6552_v47, %v6464_v23  ;;  %6502 = vmatmul.bf16.gmra.mxu0 %v12991_v20  ;;  %v5828_v23 = vadd.f32 %v12906_v44, %v5587_v45  ;;  %v5941_v47 = vmax.f32 %v5813_v35, 0.0  ;;  %v5954_v37 = vmax.f32 %v5826_v1, 0.0  ;;  %v9477_v1 = vld [vmem:[#allocation6 + $0x18] sm:$0xf0] }
 0x731   : > { %v5669_v0 = vpop.f32.mrf.mxu3  ;;  %6591 = vmatmul.bf16.gmra.mxu1 %v12998_v41  ;;  %v5590_v15 = vpop.f32.mrf.mxu2  ;;  %v5937_v41 = vmax.f32 %v5809_v24, 0.0  ;;  %v5955_v45 = vmax.f32 %v5827_v22, 0.0 }
 0x732   : > { %v5956_v20 = vmax.f32 %v5828_v23, 0.0  ;;  %v13021_v26 = vpack.c.bf16 %v5954_v37, %v5950_v13  ;;  %v9541_v37 = vld [vmem:[#allocation6 + $0x98] sm:$0xf0] }
 0x733   : > { %v13017_v36 = vpack.c.bf16 %v5941_v47, %v5937_v41  ;;  %v13028_v24 = vpack.c.bf16 %v5955_v45, %v5951_v48  ;;  %v10177_v41 = vld [vmem:[#allocation6 + $0x14] sm:$0xf]  ;;  %v5817_v48 = vadd.f32 %v12969_v19, %v5669_v0  ;;  %v13944_v45 = vld [vmem:[#allocation52_spill] sm:$0xff] }
 0x734   : > { %13942 = vst [vmem:[#allocation42_spill] sm:$0xff] %v13021_v26  ;;  %v9480_v23 = vor.u32 %v10177_v41, %v9477_v1  ;;  %v10193_v47 = vld [vmem:[#allocation6 + $0x94] sm:$0xf] }
 0x735   : > { %v6465_v51 = vpop.f32.mrf.mxu0  ;;  %13943 = vst [vmem:[#allocation46_spill] sm:$0xff] %v13028_v24 }
 0x736   : > { %v6466_v53 = vadd.f32 %v6465_v51, %v12922_v18  ;;  %v6554_v32 = vpop.f32.mrf.mxu1  ;;  %v5824_v51 = vadd.f32 %v12906_v44, %v5585_v4  ;;  %6806 = vmatpush.bf16.msrb.mxu0 %v9480_v23 }
 0x738   : > { %v13010_v50 = vadd.f32 %v6554_v32, %v6466_v53  ;;  %v5952_v35 = vmax.f32 %v5824_v51, 0.0 }
 0x739   : > { %v5671_v14 = vpop.f32.mrf.mxu3  ;;  %v5592_v31 = vpop.f32.mrf.mxu2 }
 0x73a   : > { %v13023_v46 = vpack.c.bf16 %v5956_v20, %v5952_v35  ;;  %v9544_v20 = vor.u32 %v10193_v47, %v9541_v37  ;;  %v5821_v22 = vadd.f32 %v12969_v19, %v5671_v14  ;;  %v5830_v35 = vadd.f32 %v12648_v16, %v13944_v45  ;;  %v13946_v14 = vld [vmem:[#allocation53_spill] sm:$0xff] }
 0x73b   : > { %v5831_v37 = vadd.f32 %v12651_v8, %v13946_v14 }
 0x73c   : > { %6895 = vmatpush.bf16.msra.mxu1 %v9544_v20  ;;  %v5949_v1 = vmax.f32 %v5821_v22, 0.0  ;;  %v13947_v20 = vld [vmem:[#allocation33_spill] sm:$0xff]  ;;  %v5958_v45 = vmax.f32 %v5830_v35, 0.0 }
 0x73d   : > { %v6468_v53 = vpop.f32.mrf.mxu0  ;;  %v5835_v0 = vadd.f32 %v12651_v8, %v13947_v20  ;;  %v10215_v8 = vld [vmem:[#allocation6 + $0x144] sm:$0xf]  ;;  %v9629_v20 = vld [vmem:[#allocation6 + $0x148] sm:$0xf0] }
 0x73e   : > { %6734 = vmatmul.bf16.gmra.mxu3 %v12832_v5  ;;  %v6469_v32 = vadd.f32 %v6468_v53, %v12922_v18  ;;  %v6557_v58 = vpop.f32.mrf.mxu1  ;;  %6655 = vmatmul.bf16.gmra.mxu2 %v12842_v57  ;;  %v13945_v53 = vld [vmem:[#allocation54_spill] sm:$0xff] }
 0x740   : > { %v13025_v4 = vadd.f32 %v6557_v58, %v6469_v32  ;;  %6507 = vmatmul.bf16.gmra.mxu0 %v13021_v26  ;;  %v5834_v32 = vadd.f32 %v12648_v16, %v13945_v53  ;;  %v5836_v58 = vadd.f32 %v12906_v44, %v5592_v31  ;;  %v5959_v53 = vmax.f32 %v5831_v37, 0.0  ;;  %v9693_v37 = vld [vmem:[#allocation6 + $0x1c8] sm:$0xf0] }
 0x741   : > { %v5674_v27 = vpop.f32.mrf.mxu3  ;;  %6596 = vmatmul.bf16.gmra.mxu1 %v13028_v24  ;;  %v5595_v10 = vpop.f32.mrf.mxu2  ;;  %v5945_v24 = vmax.f32 %v5817_v48, 0.0  ;;  %v5963_v31 = vmax.f32 %v5835_v0, 0.0  ;;  %v9632_v48 = vor.u32 %v10215_v8, %v9629_v20 }
 0x742   : > { %v5962_v57 = vmax.f32 %v5834_v32, 0.0  ;;  %v5964_v26 = vmax.f32 %v5836_v58, 0.0  ;;  %v5840_v20 = vadd.f32 %v12906_v44, %v5595_v10  ;;  %v10175_v10 = vld [vmem:[#allocation6 + $0x4] sm:$0xf] }
 0x743   : > { %v13047_v5 = vpack.c.bf16 %v5949_v1, %v5945_v24  ;;  %v13058_v24 = vpack.c.bf16 %v5963_v31, %v5959_v53  ;;  %v10231_v1 = vld [vmem:[#allocation6 + $0x1c4] sm:$0xf]  ;;  %6981 = vmatpush.bf16.msra.mxu2 %v9632_v48 }
 0x744   : > { %v13051_v14 = vpack.c.bf16 %v5962_v57, %v5958_v45  ;;  %v9696_v57 = vor.u32 %v10231_v1, %v9693_v37  ;;  %v5825_v45 = vadd.f32 %v12969_v19, %v5674_v27 }
 0x745   : > { %v6470_v51 = vpop.f32.mrf.mxu0  ;;  %13948 = vst [vmem:[#allocation44_spill] sm:$0xff] %v13058_v24 }
 0x746   : > { %v6471_v13 = vadd.f32 %v6470_v51, %v12922_v18  ;;  %v6559_v41 = vpop.f32.mrf.mxu1  ;;  %v5832_v51 = vadd.f32 %v12906_v44, %v5590_v15  ;;  %7070 = vmatpush.bf16.msra.mxu3 %v9696_v57 }
 0x748   : > { %v13040_v23 = vadd.f32 %v6559_v41, %v6471_v13  ;;  %v5960_v22 = vmax.f32 %v5832_v51, 0.0 }
 0x749   : > { %v5676_v47 = vpop.f32.mrf.mxu3  ;;  %v5597_v16 = vpop.f32.mrf.mxu2 }
 0x74a   : > { %v13053_v35 = vpack.c.bf16 %v5964_v26, %v5960_v22  ;;  %v5829_v26 = vadd.f32 %v12969_v19, %v5676_v47  ;;  %v5844_v53 = vadd.f32 %v12906_v44, %v5597_v16  ;;  %v5968_v47 = vmax.f32 %v5840_v20, 0.0 }
 0x74c   : > { %v5972_v48 = vmax.f32 %v5844_v53, 0.0 }
 0x74d   : > { %v6473_v13 = vpop.f32.mrf.mxu0 }
 0x74e   : > { %6739 = vmatmul.bf16.gmra.mxu3 %v12862_v40  ;;  %v6474_v41 = vadd.f32 %v6473_v13, %v12922_v18  ;;  %v6562_v15 = vpop.f32.mrf.mxu1  ;;  %6660 = vmatmul.bf16.gmra.mxu2 %v12868_v60  ;;  %v5957_v13 = vmax.f32 %v5829_v26, 0.0  ;;  %v13073_v16 = vpack.c.bf16 %v5972_v48, %v5968_v47 }
 0x750   : > { %v13055_v32 = vadd.f32 %v6562_v15, %v6474_v41  ;;  %6512 = vmatmul.bf16.gmra.mxu0 %v13051_v14  ;;  %v5953_v15 = vmax.f32 %v5825_v45, 0.0  ;;  %v9469_v45 = vld [vmem:[#allocation6 + $0x8] sm:$0xf0] }
 0x751   : > { %v5679_v58 = vpop.f32.mrf.mxu3  ;;  %6601 = vmatmul.bf16.gmra.mxu1 %v13058_v24  ;;  %v5600_v0 = vpop.f32.mrf.mxu2  ;;  %v9472_v53 = vor.u32 %v10175_v10, %v9469_v45 }
 0x752   : > { %v13069_v37 = vpack.c.bf16 %v5957_v13, %v5953_v15  ;;  %v9533_v13 = vld [vmem:[#allocation6 + $0x88] sm:$0xf0] }
 0x753   : > { %6807 = vmatpush.bf16.msrb.mxu0 %v9472_v53 }
 0x755   : > { %v6475_v51 = vpop.f32.mrf.mxu0 }
 0x756   : > { %v6476_v22 = vadd.f32 %v6475_v51, %v12922_v18  ;;  %v6564_v31 = vpop.f32.mrf.mxu1 }
 0x758   : > { %v13066_v41 = vadd.f32 %v6564_v31, %v6476_v22  ;;  %v10191_v31 = vld [vmem:[#allocation6 + $0x84] sm:$0xf] }
 0x759   : > { %v5681_v8 = vpop.f32.mrf.mxu3  ;;  %v5602_v1 = vpop.f32.mrf.mxu2  ;;  %v9536_v15 = vor.u32 %v10191_v31, %v9533_v13  ;;  %v10213_v13 = vld [vmem:[#allocation6 + $0x134] sm:$0xf] }
 0x75a   : > { %v5837_v48 = vadd.f32 %v12969_v19, %v5681_v8  ;;  %v9621_v8 = vld [vmem:[#allocation6 + $0x138] sm:$0xf0] }
 0x75b   : > { %6896 = vmatpush.bf16.msra.mxu1 %v9536_v15 }
 0x75d   : > { %v6478_v57 = vpop.f32.mrf.mxu0 }
 0x75e   : > { %6744 = vmatmul.bf16.gmra.mxu3 %v12891_v9  ;;  %v6479_v27 = vadd.f32 %v6478_v57, %v12922_v18  ;;  %v6567_v51 = vpop.f32.mrf.mxu1  ;;  %6665 = vmatmul.bf16.gmra.mxu2 %v12897_v30  ;;  %v5833_v57 = vadd.f32 %v12969_v19, %v5679_v58 }
 0x760   : > { %v13075_v26 = vadd.f32 %v6567_v51, %v6479_v27  ;;  %6517 = vmatmul.bf16.gmra.mxu0 %v12788_v63  ;;  %v5852_v51 = vadd.f32 %v12906_v44, %v5602_v1  ;;  %v5965_v63 = vmax.f32 %v5837_v48, 0.0  ;;  %v5961_v9 = vmax.f32 %v5833_v57, 0.0 }
 0x761   : > { %v5684_v22 = vpop.f32.mrf.mxu3  ;;  %6606 = vmatmul.bf16.gmra.mxu1 %v12797_v34  ;;  %v5605_v20 = vpop.f32.mrf.mxu2  ;;  %v5848_v34 = vadd.f32 %v12906_v44, %v5600_v0 }
 0x762   : > { %v5980_v53 = vmax.f32 %v5852_v51, 0.0  ;;  %v13087_v24 = vpack.c.bf16 %v5965_v63, %v5961_v9  ;;  %v10229_v63 = vld [vmem:[#allocation6 + $0x1b4] sm:$0xf]  ;;  %v9685_v9 = vld [vmem:[#allocation6 + $0x1b8] sm:$0xf0] }
 0x763   : > { %v5976_v15 = vmax.f32 %v5848_v34, 0.0  ;;  %v9688_v34 = vor.u32 %v10229_v63, %v9685_v9  ;;  %v5856_v9 = vadd.f32 %v12906_v44, %v5605_v20 }
 0x765   : > { %v6480_v47 = vpop.f32.mrf.mxu0  ;;  %7071 = vmatpush.bf16.msra.mxu3 %v9688_v34 }
 0x766   : > { %v6481_v27 = vadd.f32 %v6480_v47, %v12922_v18  ;;  %v6569_v30 = vpop.f32.mrf.mxu1  ;;  %v9624_v47 = vor.u32 %v10213_v13, %v9621_v8  ;;  %v5841_v8 = vadd.f32 %v12969_v19, %v5684_v22 }
 0x768   : > { %v13084_v10 = vadd.f32 %v6569_v30, %v6481_v27  ;;  %6982 = vmatpush.bf16.msra.mxu2 %v9624_v47  ;;  %v13091_v30 = vpack.c.bf16 %v5980_v53, %v5976_v15 }
 0x769   : > { %v5686_v45 = vpop.f32.mrf.mxu3  ;;  %v5607_v31 = vpop.f32.mrf.mxu2 }
 0x76a   : > { %v5845_v51 = vadd.f32 %v12969_v19, %v5686_v45 }
 0x76d   : > { %v6483_v58 = vpop.f32.mrf.mxu0 }
 0x76e   : > { %6749 = vmatmul.bf16.gmra.mxu3 %v12924_v55  ;;  %v6484_v1 = vadd.f32 %v6483_v58, %v12922_v18  ;;  %v6572_v48 = vpop.f32.mrf.mxu1  ;;  %6670 = vmatmul.bf16.gmra.mxu2 %v12930_v43  ;;  %v5860_v58 = vadd.f32 %v12906_v44, %v5607_v31 }
 0x770   : > { %v13093_v27 = vadd.f32 %v6572_v48, %v6484_v1  ;;  %6522 = vmatmul.bf16.gmra.mxu0 %v12782_v29  ;;  %v5973_v1 = vmax.f32 %v5845_v51, 0.0  ;;  %v5988_v34 = vmax.f32 %v5860_v58, 0.0 }
 0x771   : > { %v5689_v0 = vpop.f32.mrf.mxu3  ;;  %6611 = vmatmul.bf16.gmra.mxu1 %v12784_v49  ;;  %v6631_v57 = vpop.f32.mrf.mxu2  ;;  %v5969_v49 = vmax.f32 %v5841_v8, 0.0 }
 0x772   : > { %v6632_v13 = vadd.f32 %v6631_v57, %v12932_v28  ;;  %v5984_v57 = vmax.f32 %v5856_v9, 0.0 }
 0x773   : > { %v13107_v28 = vpack.c.bf16 %v5973_v1, %v5969_v49  ;;  %v10246_v49 = vld [vmem:[%s13949_s16 + $0x38] sm:$0xff] }
 0x774   : > { %v13111_v51 = vpack.c.bf16 %v5988_v34, %v5984_v57  ;;  %7384 = vmatpush.bf16.msra.mxu0 %v10246_v49 }
 0x775   : > { %v6485_v53 = vpop.f32.mrf.mxu0 }
 0x776   : > { %v6486_v15 = vadd.f32 %v6485_v53, %v12922_v18  ;;  %v6574_v47 = vpop.f32.mrf.mxu1 }
 0x778   : > { %v13103_v48 = vadd.f32 %v6574_v47, %v6486_v15  ;;  %v5849_v47 = vadd.f32 %v12969_v19, %v5689_v0 }
 0x779   : > { %v5691_v63 = vpop.f32.mrf.mxu3  ;;  %v6633_v43 = vpop.f32.mrf.mxu2 }
 0x77a   : > { %v6634_v45 = vadd.f32 %v6633_v43, %v12947_v3  ;;  %v10254_v43 = vld [vmem:[%s13949_s16 + $0x78] sm:$0xff]  ;;  %v5853_v20 = vadd.f32 %v12969_v19, %v5691_v63 }
 0x77b   : > { %7473 = vmatpush.bf16.msrb.mxu1 %v10254_v43 }
 0x77c   : > { %v5981_v34 = vmax.f32 %v5853_v20, 0.0 }
 0x77d   : > { %v6488_v22 = vpop.f32.mrf.mxu0 }
 0x77e   : > { %6754 = vmatmul.bf16.gmra.mxu3 %v12954_v42  ;;  %v6489_v31 = vadd.f32 %v6488_v22, %v12922_v18  ;;  %v6577_v53 = vpop.f32.mrf.mxu1  ;;  %6675 = vmatmul.bf16.gmra.mxu2 %v12960_v21  ;;  %v9613_v21 = vld [vmem:[#allocation6 + $0x128] sm:$0xf0] }
 0x780   : > { %v13113_v15 = vadd.f32 %v6577_v53, %v6489_v31  ;;  %6527 = vmatmul.bf16.gmra.mxu0 %v12786_v56  ;;  %v5977_v31 = vmax.f32 %v5849_v47, 0.0 }
 0x781   : > { %v5694_v44 = vpop.f32.mrf.mxu3  ;;  %6616 = vmatmul.bf16.gmra.mxu1 %v12790_v2  ;;  %v6636_v3 = vpop.f32.mrf.mxu2  ;;  %v10211_v2 = vld [vmem:[#allocation6 + $0x124] sm:$0xf] }
 0x782   : > { %v6637_v8 = vadd.f32 %v6636_v3, %v12962_v7  ;;  %v13131_v63 = vpack.c.bf16 %v5981_v34, %v5977_v31  ;;  %v9616_v43 = vor.u32 %v10211_v2, %v9613_v21  ;;  %v13951_v31 = vld [vmem:[#allocation14_spill] sm:$0xff] }
 0x784   : > { %6983 = vmatpush.bf16.msra.mxu2 %v9616_v43  ;;  %v5857_v43 = vadd.f32 %v12969_v19, %v5694_v44 }
 0x785   : > { %v6490_v58 = vpop.f32.mrf.mxu0 }
 0x786   : > { %v6491_v1 = vadd.f32 %v6490_v58, %v12922_v18  ;;  %v6579_v9 = vpop.f32.mrf.mxu1  ;;  %v13950_v58 = vld [vmem:[#allocation13_spill] sm:$0xff] }
 0x788   : > { %v13128_v57 = vadd.f32 %v6579_v9, %v6491_v1  ;;  %v9677_v1 = vld [vmem:[#allocation6 + $0x1a8] sm:$0xf0] }
 0x789   : > { %v5696_v22 = vpop.f32.mrf.mxu3  ;;  %v6638_v53 = vpop.f32.mrf.mxu2 }
 0x78a   : > { %v6639_v49 = vadd.f32 %v6638_v53, %v12980_v6  ;;  %v10227_v6 = vld [vmem:[#allocation6 + $0x1a4] sm:$0xf]  ;;  %v5861_v2 = vadd.f32 %v12969_v19, %v5696_v22 }
 0x78b   : > { %v9680_v34 = vor.u32 %v10227_v6, %v9677_v1 }
 0x78d   : > { %v6493_v7 = vpop.f32.mrf.mxu0  ;;  %7072 = vmatpush.bf16.msra.mxu3 %v9680_v34 }
 0x78e   : > { %6759 = vmatmul.bf16.gmra.mxu3 %v12987_v61  ;;  %v6494_v0 = vadd.f32 %v6493_v7, %v12922_v18  ;;  %v6582_v3 = vpop.f32.mrf.mxu1  ;;  %6680 = vmatmul.bf16.gmra.mxu2 %v12993_v12 }
 0x790   : > { %v13135_v20 = vadd.f32 %v6582_v3, %v6494_v0  ;;  %6808 = vmatmul.bf16.vlgmr.msrb.gmra.mxu0 %v13950_v58  ;;  %v5989_v58 = vmax.f32 %v5861_v2, 0.0 }
 0x791   : > { %v6720_v47 = vpop.f32.mrf.mxu3  ;;  %6897 = vmatmul.bf16.vlgmr.msra.gmra.mxu1 %v13951_v31  ;;  %v6641_v53 = vpop.f32.mrf.mxu2 }
 0x792   : > { %v6721_v9 = vadd.f32 %v6720_v47, %v6632_v13  ;;  %v6642_v21 = vadd.f32 %v6641_v53, %v12995_v39  ;;  %v5985_v47 = vmax.f32 %v5857_v43, 0.0 }
 0x794   : > { %v7156_v6 = vmax.f32 %v6721_v9, 0.0  ;;  %v13147_v22 = vpack.c.bf16 %v5989_v58, %v5985_v47  ;;  %v10253_v9 = vld [vmem:[%s13949_s16 + $0x70] sm:$0xff] }
 0x795   : > { %v6495_v7 = vpop.f32.mrf.mxu0  ;;  %7474 = vmatpush.bf16.msrb.mxu1 %v10253_v9 }
 0x796   : > { %v6496_v0 = vadd.f32 %v6495_v7, %v12922_v18  ;;  %v6584_v3 = vpop.f32.mrf.mxu1 }
 0x798   : > { %v13144_v12 = vadd.f32 %v6584_v3, %v6496_v0 }
 0x799   : > { %v6722_v61 = vpop.f32.mrf.mxu3  ;;  %v6643_v31 = vpop.f32.mrf.mxu2 }
 0x79a   : > { %v6723_v13 = vadd.f32 %v6722_v61, %v6634_v45  ;;  %v6644_v34 = vadd.f32 %v6643_v31, %v13010_v50  ;;  %v10245_v50 = vld [vmem:[%s13949_s16 + $0x30] sm:$0xff] }
 0x79b   : > { %7385 = vmatpush.bf16.msra.mxu0 %v10245_v50  ;;  %v9669_v50 = vld [vmem:[#allocation6 + $0x198] sm:$0xf0] }
 0x79c   : > { %v7158_v1 = vmax.f32 %v6723_v13, 0.0 }
 0x79d   : > { %v6498_v53 = vpop.f32.mrf.mxu0 }
 0x79e   : > { %v13149_v39 = vpack.c.bf16 %v7158_v1, %v7156_v6  ;;  %6764 = vmatmul.bf16.gmra.mxu3 %v13017_v36  ;;  %v6499_v19 = vadd.f32 %v6498_v53, %v12922_v18  ;;  %v6587_v44 = vpop.f32.mrf.mxu1  ;;  %6685 = vmatmul.bf16.gmra.mxu2 %v13023_v46  ;;  %v10209_v6 = vld [vmem:[#allocation6 + $0x114] sm:$0xf]  ;;  %v9605_v1 = vld [vmem:[#allocation6 + $0x118] sm:$0xf0] }
 0x79f   : > { %v9608_v53 = vor.u32 %v10209_v6, %v9605_v1 }
 0x7a0   : > { %v13153_v2 = vadd.f32 %v6587_v44, %v6499_v19  ;;  %6813 = vmatmul.bf16.gmra.mxu0 %v12705_v38 }
 0x7a1   : > { %v6725_v61 = vpop.f32.mrf.mxu3  ;;  %6902 = vmatmul.bf16.gmra.mxu1 %v12709_v59  ;;  %v6646_v7 = vpop.f32.mrf.mxu2  ;;  %6984 = vmatpush.bf16.msra.mxu2 %v9608_v53 }
 0x7a2   : > { %v6726_v45 = vadd.f32 %v6725_v61, %v6637_v8  ;;  %v6647_v43 = vadd.f32 %v6646_v7, %v13025_v4  ;;  %v10225_v61 = vld [vmem:[#allocation6 + $0x194] sm:$0xf] }
 0x7a3   : > { %v9672_v9 = vor.u32 %v10225_v61, %v9669_v50 }
 0x7a5   : > { %v6500_v38 = vpop.f32.mrf.mxu0  ;;  %7073 = vmatpush.bf16.msra.mxu3 %v9672_v9 }
 0x7a6   : > { %v6501_v0 = vadd.f32 %v6500_v38, %v12922_v18  ;;  %v6589_v3 = vpop.f32.mrf.mxu1 }
 0x7a8   : > { %v13166_v58 = vadd.f32 %v6589_v3, %v6501_v0 }
 0x7a9   : > { %v6727_v13 = vpop.f32.mrf.mxu3  ;;  %v6648_v8 = vpop.f32.mrf.mxu2 }
 0x7aa   : > { %v6728_v47 = vadd.f32 %v6727_v13, %v6639_v49  ;;  %v6649_v59 = vadd.f32 %v6648_v8, %v13040_v23 }
 0x7ac   : > { %v7162_v8 = vmax.f32 %v6728_v47, 0.0 }
 0x7ad   : > { %v6503_v31 = vpop.f32.mrf.mxu0 }
 0x7ae   : > { %6769 = vmatmul.bf16.gmra.mxu3 %v13047_v5  ;;  %v6504_v4 = vadd.f32 %v6503_v31, %v12922_v18  ;;  %v6592_v19 = vpop.f32.mrf.mxu1  ;;  %6690 = vmatmul.bf16.gmra.mxu2 %v13053_v35  ;;  %v7160_v31 = vmax.f32 %v6726_v45, 0.0  ;;  %v10252_v45 = vld [vmem:[%s13949_s16 + $0x68] sm:$0xff] }
 0x7af   : > { %7475 = vmatpush.bf16.msrb.mxu1 %v10252_v45 }
 0x7b0   : > { %v13171_v44 = vadd.f32 %v6592_v19, %v6504_v4  ;;  %6818 = vmatmul.bf16.gmra.mxu0 %v12744_v62  ;;  %v13181_v4 = vpack.c.bf16 %v7162_v8, %v7160_v31  ;;  %v10207_v31 = vld [vmem:[#allocation6 + $0x104] sm:$0xf] }
 0x7b1   : > { %v6730_v49 = vpop.f32.mrf.mxu3  ;;  %6907 = vmatmul.bf16.gmra.mxu1 %v12747_v11  ;;  %v6651_v7 = vpop.f32.mrf.mxu2 }
 0x7b2   : > { %v6731_v23 = vadd.f32 %v6730_v49, %v6642_v21  ;;  %v6652_v38 = vadd.f32 %v6651_v7, %v13055_v32 }
 0x7b4   : > { %v7164_v8 = vmax.f32 %v6731_v23, 0.0  ;;  %v9661_v23 = vld [vmem:[#allocation6 + $0x188] sm:$0xf0] }
 0x7b5   : > { %v6505_v0 = vpop.f32.mrf.mxu0 }
 0x7b6   : > { %v6506_v3 = vadd.f32 %v6505_v0, %v12922_v18  ;;  %v6594_v13 = vpop.f32.mrf.mxu1 }
 0x7b8   : > { %v13178_v6 = vadd.f32 %v6594_v13, %v6506_v3 }
 0x7b9   : > { %v6732_v62 = vpop.f32.mrf.mxu3  ;;  %v6653_v53 = vpop.f32.mrf.mxu2 }
 0x7ba   : > { %v6733_v1 = vadd.f32 %v6732_v62, %v6644_v34  ;;  %v6654_v21 = vadd.f32 %v6653_v53, %v13066_v41  ;;  %v10244_v34 = vld [vmem:[%s13949_s16 + $0x28] sm:$0xff] }
 0x7bb   : > { %7386 = vmatpush.bf16.msra.mxu0 %v10244_v34  ;;  %v9597_v53 = vld [vmem:[#allocation6 + $0x108] sm:$0xf0] }
 0x7bc   : > { %v7166_v0 = vmax.f32 %v6733_v1, 0.0 }
 0x7bd   : > { %v6508_v11 = vpop.f32.mrf.mxu0 }
 0x7be   : > { %6774 = vmatmul.bf16.gmra.mxu3 %v13069_v37  ;;  %v6509_v32 = vadd.f32 %v6508_v11, %v12922_v18  ;;  %v6597_v19 = vpop.f32.mrf.mxu1  ;;  %6695 = vmatmul.bf16.gmra.mxu2 %v13073_v16  ;;  %v13201_v11 = vpack.c.bf16 %v7166_v0, %v7164_v8 }
 0x7c0   : > { %v13185_v49 = vadd.f32 %v6597_v19, %v6509_v32  ;;  %6823 = vmatmul.bf16.gmra.mxu0 %v12795_v52 }
 0x7c1   : > { %v6735_v47 = vpop.f32.mrf.mxu3  ;;  %6912 = vmatmul.bf16.gmra.mxu1 %v12803_v33  ;;  %v6656_v61 = vpop.f32.mrf.mxu2 }
 0x7c2   : > { %v6736_v41 = vadd.f32 %v6735_v47, %v6647_v43  ;;  %v6657_v50 = vadd.f32 %v6656_v61, %v13075_v26  ;;  %v9600_v26 = vor.u32 %v10207_v31, %v9597_v53 }
 0x7c4   : > { %6985 = vmatpush.bf16.msra.mxu2 %v9600_v26  ;;  %v7168_v31 = vmax.f32 %v6736_v41, 0.0  ;;  %v13952_v41 = vld [vmem:[#allocation56_spill] sm:$0xff] }
 0x7c5   : > { %v6510_v52 = vpop.f32.mrf.mxu0 }
 0x7c6   : > { %v6511_v9 = vadd.f32 %v6510_v52, %v12922_v18  ;;  %v6599_v7 = vpop.f32.mrf.mxu1 }
 0x7c8   : > { %v13198_v3 = vadd.f32 %v6599_v7, %v6511_v9 }
 0x7c9   : > { %v6737_v13 = vpop.f32.mrf.mxu3  ;;  %v6658_v33 = vpop.f32.mrf.mxu2 }
 0x7ca   : > { %v6738_v43 = vadd.f32 %v6737_v13, %v6649_v59  ;;  %v6659_v62 = vadd.f32 %v6658_v33, %v13084_v10  ;;  %v10223_v10 = vld [vmem:[#allocation6 + $0x184] sm:$0xf] }
 0x7cb   : > { %v9664_v45 = vor.u32 %v10223_v10, %v9661_v23 }
 0x7cc   : > { %v7170_v13 = vmax.f32 %v6738_v43, 0.0 }
 0x7cd   : > { %v6513_v32 = vpop.f32.mrf.mxu0  ;;  %7074 = vmatpush.bf16.msra.mxu3 %v9664_v45 }
 0x7ce   : > { %6779 = vmatmul.bf16.gmra.mxu3 %v13087_v24  ;;  %v6514_v19 = vadd.f32 %v6513_v32, %v12922_v18  ;;  %v6602_v47 = vpop.f32.mrf.mxu1  ;;  %6700 = vmatmul.bf16.gmra.mxu2 %v13091_v30  ;;  %v13215_v32 = vpack.c.bf16 %v7170_v13, %v7168_v31 }
 0x7d0   : > { %v13205_v1 = vadd.f32 %v6602_v47, %v6514_v19  ;;  %6828 = vmatmul.bf16.gmra.mxu0 %v12822_v54  ;;  %v10251_v47 = vld [vmem:[%s13949_s16 + $0x60] sm:$0xff] }
 0x7d1   : > { %v6740_v59 = vpop.f32.mrf.mxu3  ;;  %6917 = vmatmul.bf16.gmra.mxu1 %v12825_v25  ;;  %v6661_v61 = vpop.f32.mrf.mxu2 }
 0x7d2   : > { %v6741_v34 = vadd.f32 %v6740_v59, %v6652_v38  ;;  %v6662_v52 = vadd.f32 %v6661_v61, %v13093_v27  ;;  %7476 = vmatpush.bf16.msrb.mxu1 %v10251_v47 }
 0x7d5   : > { %v6515_v9 = vpop.f32.mrf.mxu0 }
 0x7d6   : > { %v6516_v7 = vadd.f32 %v6515_v9, %v12922_v18  ;;  %v6604_v0 = vpop.f32.mrf.mxu1 }
 0x7d8   : > { %v13212_v8 = vadd.f32 %v6604_v0, %v6516_v7  ;;  %v7172_v0 = vmax.f32 %v6741_v34, 0.0  ;;  %v13955_v34 = vld [vmem:[#allocation21_spill] sm:$0xff] }
 0x7d9   : > { %v6742_v54 = vpop.f32.mrf.mxu3  ;;  %v6663_v53 = vpop.f32.mrf.mxu2 }
 0x7da   : > { %v6743_v33 = vadd.f32 %v6742_v54, %v6654_v21  ;;  %v6664_v38 = vadd.f32 %v6663_v53, %v13103_v48  ;;  %v10243_v21 = vld [vmem:[%s13949_s16 + $0x20] sm:$0xff] }
 0x7db   : > { %7387 = vmatpush.bf16.msra.mxu0 %v10243_v21 }
 0x7dc   : > { %v7174_v61 = vmax.f32 %v6743_v33, 0.0 }
 0x7dd   : > { %v6518_v25 = vpop.f32.mrf.mxu0 }
 0x7de   : > { %6784 = vmatmul.bf16.gmra.mxu3 %v13107_v28  ;;  %v6519_v27 = vadd.f32 %v6518_v25, %v12922_v18  ;;  %v6607_v26 = vpop.f32.mrf.mxu1  ;;  %6705 = vmatmul.bf16.gmra.mxu2 %v13111_v51  ;;  %v13235_v31 = vpack.c.bf16 %v7174_v61, %v7172_v0 }
 0x7e0   : > { %v13219_v19 = vadd.f32 %v6607_v26, %v6519_v27  ;;  %6833 = vmatmul.bf16.gmra.mxu0 %v12847_v17  ;;  %v13953_v26 = vld [vmem:[#allocation34_spill] sm:$0xff] }
 0x7e1   : > { %v6745_v43 = vpop.f32.mrf.mxu3  ;;  %6922 = vmatmul.bf16.gmra.mxu1 %v13952_v41  ;;  %v6666_v59 = vpop.f32.mrf.mxu2 }
 0x7e2   : > { %v6746_v48 = vadd.f32 %v6745_v43, %v6657_v50  ;;  %v6667_v10 = vadd.f32 %v6666_v59, %v13113_v15  ;;  %v13954_v43 = vld [vmem:[#allocation16_spill] sm:$0xff] }
 0x7e5   : > { %v6520_v17 = vpop.f32.mrf.mxu0 }
 0x7e6   : > { %v6521_v23 = vadd.f32 %v6520_v17, %v12922_v18  ;;  %v6609_v45 = vpop.f32.mrf.mxu1 }
 0x7e8   : > { %v13232_v9 = vadd.f32 %v6609_v45, %v6521_v23 }
 0x7e9   : > { %v6747_v7 = vpop.f32.mrf.mxu3  ;;  %v6668_v13 = vpop.f32.mrf.mxu2 }
 0x7ea   : > { %v6748_v50 = vadd.f32 %v6747_v7, %v6659_v62  ;;  %v6669_v54 = vadd.f32 %v6668_v13, %v13128_v57  ;;  %v7176_v7 = vmax.f32 %v6746_v48, 0.0  ;;  %v13958_v48 = vld [vmem:[#allocation36_spill] sm:$0xff] }
 0x7ec   : > { %v7178_v17 = vmax.f32 %v6748_v50, 0.0 }
 0x7ed   : > { %v6523_v53 = vpop.f32.mrf.mxu0 }
 0x7ee   : > { %6789 = vmatmul.bf16.gmra.mxu3 %v13131_v63  ;;  %v6524_v15 = vadd.f32 %v6523_v53, %v12922_v18  ;;  %v6612_v25 = vpop.f32.mrf.mxu1  ;;  %6986 = vmatmul.bf16.vlgmr.msra.gmra.mxu2 %v13954_v43  ;;  %v13249_v53 = vpack.c.bf16 %v7178_v17, %v7176_v7  ;;  %v10250_v43 = vld [vmem:[%s13949_s16 + $0x58] sm:$0xff] }
 0x7ef   : > { %7477 = vmatpush.bf16.msrb.mxu1 %v10250_v43 }
 0x7f0   : > { %v13239_v27 = vadd.f32 %v6612_v25, %v6524_v15  ;;  %6838 = vmatmul.bf16.gmra.mxu0 %v13953_v26  ;;  %v13956_v26 = vld [vmem:[#allocation24_spill] sm:$0xff] }
 0x7f1   : > { %v6750_v33 = vpop.f32.mrf.mxu3  ;;  %6927 = vmatmul.bf16.gmra.mxu1 %v13955_v34  ;;  %v6671_v21 = vpop.f32.mrf.mxu2 }
 0x7f2   : > { %v6751_v62 = vadd.f32 %v6750_v33, %v6662_v52  ;;  %v6672_v57 = vadd.f32 %v6671_v21, %v13135_v20  ;;  %v13957_v33 = vld [vmem:[#allocation17_spill] sm:$0xff] }
 0x7f5   : > { %v6525_v41 = vpop.f32.mrf.mxu0 }
 0x7f6   : > { %v6526_v47 = vadd.f32 %v6525_v41, %v12922_v18  ;;  %v6614_v59 = vpop.f32.mrf.mxu1 }
 0x7f8   : > { %v13246_v23 = vadd.f32 %v6614_v59, %v6526_v47 }
 0x7f9   : > { %v6752_v45 = vpop.f32.mrf.mxu3  ;;  %v6673_v0 = vpop.f32.mrf.mxu2 }
 0x7fa   : > { %v6753_v61 = vadd.f32 %v6752_v45, %v6664_v38  ;;  %v6674_v13 = vadd.f32 %v6673_v0, %v13144_v12  ;;  %v10242_v38 = vld [vmem:[%s13949_s16 + $0x18] sm:$0xff]  ;;  %v7180_v0 = vmax.f32 %v6751_v62, 0.0 }
 0x7fb   : > { %7388 = vmatpush.bf16.msra.mxu0 %v10242_v38 }
 0x7fc   : > { %v7182_v17 = vmax.f32 %v6753_v61, 0.0 }
 0x7fd   : > { %v6528_v52 = vpop.f32.mrf.mxu0 }
 0x7fe   : > { %6794 = vmatmul.bf16.gmra.mxu3 %v13147_v22  ;;  %v6529_v20 = vadd.f32 %v6528_v52, %v12922_v18  ;;  %v6617_v15 = vpop.f32.mrf.mxu1  ;;  %6991 = vmatmul.bf16.gmra.mxu2 %v13957_v33  ;;  %v10441_v52 = vld [vmem:[%s13672_s11] sm:$0x3] }
 0x800   : > { %v13253_v25 = vadd.f32 %v6617_v15, %v6529_v20  ;;  %6843 = vmatmul.bf16.gmra.mxu0 %v13956_v26  ;;  %v13271_v20 = vperm.slane %v10441_v52, 1  ;;  %v13274_v26 = vpack.c.bf16 %v7182_v17, %v7180_v0 }
 0x801   : > { %v6755_v50 = vpop.f32.mrf.mxu3  ;;  %6932 = vmatmul.bf16.gmra.mxu1 %v13958_v48  ;;  %v6676_v34 = vpop.f32.mrf.mxu2  ;;  %v13961_v48 = vld [vmem:[#allocation18_spill] sm:$0xff] }
 0x802   : > { %v6756_v12 = vadd.f32 %v6755_v50, %v6667_v10  ;;  %v6677_v21 = vadd.f32 %v6676_v34, %v13153_v2  ;;  %v13962_v34 = vld [vmem:[#allocation38_spill] sm:$0xff] }
 0x805   : > { %v6530_v41 = vpop.f32.mrf.mxu0 }
 0x806   : > { %v6531_v47 = vadd.f32 %v6530_v41, %v12922_v18  ;;  %v6619_v59 = vpop.f32.mrf.mxu1  ;;  %v13959_v18 = vld [vmem:[#allocation15_spill] sm:$0xff] }
 0x808   : > { %v13266_v45 = vadd.f32 %v6619_v59, %v6531_v47 }
 0x809   : > { %v6757_v7 = vpop.f32.mrf.mxu3  ;;  %v6678_v15 = vpop.f32.mrf.mxu2 }
 0x80a   : > { %v6758_v10 = vadd.f32 %v6757_v7, %v6669_v54  ;;  %v6679_v2 = vadd.f32 %v6678_v15, %v13166_v58  ;;  %v13960_v54 = vld [vmem:[#allocation27_spill] sm:$0xff] }
 0x80c   : > { %v7186_v7 = vmax.f32 %v6758_v10, 0.0 }
 0x80d   : > { %v6809_v50 = vpop.f32.mrf.mxu0 }
 0x80e   : > { %7075 = vmatmul.bf16.vlgmr.msra.gmra.mxu3 %v13959_v18  ;;  %v6810_v61 = vadd.f32 %v6809_v50, %v13271_v20  ;;  %v6898_v33 = vpop.f32.mrf.mxu1  ;;  %6996 = vmatmul.bf16.gmra.mxu2 %v13961_v48  ;;  %v7184_v50 = vmax.f32 %v6756_v12, 0.0  ;;  %v13965_v12 = vld [vmem:[#allocation20_spill] sm:$0xff] }
 0x810   : > { %v13278_v38 = vadd.f32 %v6898_v33, %v6810_v61  ;;  %6848 = vmatmul.bf16.gmra.mxu0 %v13960_v54  ;;  %v13288_v33 = vld [vmem:[#allocation7 + $0x38] sm:$0xff] }
 0x811   : > { %v6760_v62 = vpop.f32.mrf.mxu3  ;;  %6937 = vmatmul.bf16.gmra.mxu1 %v13962_v34  ;;  %v6681_v41 = vpop.f32.mrf.mxu2  ;;  %10371 = vmatpush.bf16.msrb.mxu2 %v13288_v33  ;;  %v13964_v34 = vld [vmem:[#allocation30_spill] sm:$0xff] }
 0x812   : > { %v6761_v43 = vadd.f32 %v6760_v62, %v6672_v57  ;;  %v6682_v58 = vadd.f32 %v6681_v41, %v13171_v44  ;;  %v13290_v57 = vpack.c.bf16 %v7186_v7, %v7184_v50  ;;  %v13963_v62 = vld [vmem:[#allocation19_spill] sm:$0xff] }
 0x815   : > { %v6811_v47 = vpop.f32.mrf.mxu0 }
 0x816   : > { %v6812_v59 = vadd.f32 %v6811_v47, %v13271_v20  ;;  %v6900_v17 = vpop.f32.mrf.mxu1  ;;  %v13966_v47 = vld [vmem:[#allocation43_spill] sm:$0xff] }
 0x818   : > { %v13285_v0 = vadd.f32 %v6900_v17, %v6812_v59  ;;  %v10249_v59 = vld [vmem:[%s13949_s16 + $0x50] sm:$0xff] }
 0x819   : > { %v6762_v52 = vpop.f32.mrf.mxu3  ;;  %v6683_v18 = vpop.f32.mrf.mxu2  ;;  %7478 = vmatpush.bf16.msrb.mxu1 %v10249_v59 }
 0x81a   : > { %v6763_v15 = vadd.f32 %v6762_v52, %v6674_v13  ;;  %v6684_v61 = vadd.f32 %v6683_v18, %v13178_v6  ;;  %v10241_v6 = vld [vmem:[%s13949_s16 + $0x10] sm:$0xff] }
 0x81b   : > { %7389 = vmatpush.bf16.msra.mxu0 %v10241_v6 }
 0x81d   : > { %v6814_v54 = vpop.f32.mrf.mxu0 }
 0x81e   : > { %7080 = vmatmul.bf16.gmra.mxu3 %v13963_v62  ;;  %v6815_v44 = vadd.f32 %v6814_v54, %v13271_v20  ;;  %v6903_v10 = vpop.f32.mrf.mxu1  ;;  %7001 = vmatmul.bf16.gmra.mxu2 %v13965_v12  ;;  %v7190_v54 = vmax.f32 %v6763_v15, 0.0 }
 0x820   : > { %v13295_v48 = vadd.f32 %v6903_v10, %v6815_v44  ;;  %6853 = vmatmul.bf16.gmra.mxu0 %v13964_v34  ;;  %v7188_v10 = vmax.f32 %v6761_v43, 0.0  ;;  %v13971_v43 = vld [vmem:[#allocation40_spill] sm:$0xff] }
 0x821   : > { %v6765_v13 = vpop.f32.mrf.mxu3  ;;  %6942 = vmatmul.bf16.gmra.mxu1 %v13966_v47  ;;  %v6686_v17 = vpop.f32.mrf.mxu2  ;;  %v13968_v47 = vld [vmem:[#allocation23_spill] sm:$0xff] }
 0x822   : > { %v6766_v41 = vadd.f32 %v6765_v13, %v6677_v21  ;;  %v6687_v7 = vadd.f32 %v6686_v17, %v13185_v49  ;;  %v13311_v12 = vpack.c.bf16 %v7190_v54, %v7188_v10 }
 0x824   : > { %13967 = vst [vmem:[#allocation48_spill] sm:$0xff] %v13311_v12 }
 0x825   : > { %v6816_v52 = vpop.f32.mrf.mxu0 }
 0x826   : > { %v6817_v50 = vadd.f32 %v6816_v52, %v13271_v20  ;;  %v6905_v18 = vpop.f32.mrf.mxu1  ;;  %v13969_v52 = vld [vmem:[#allocation39_spill] sm:$0xff] }
 0x828   : > { %v13308_v62 = vadd.f32 %v6905_v18, %v6817_v50  ;;  %v13970_v50 = vld [vmem:[#allocation26_spill] sm:$0xff] }
 0x829   : > { %v6767_v44 = vpop.f32.mrf.mxu3  ;;  %v6688_v34 = vpop.f32.mrf.mxu2 }
 0x82a   : > { %v6768_v21 = vadd.f32 %v6767_v44, %v6679_v2  ;;  %v6689_v13 = vadd.f32 %v6688_v34, %v13198_v3 }
 0x82c   : > { %v7194_v34 = vmax.f32 %v6768_v21, 0.0 }
 0x82d   : > { %v6819_v6 = vpop.f32.mrf.mxu0 }
 0x82e   : > { %7085 = vmatmul.bf16.gmra.mxu3 %v13968_v47  ;;  %v6820_v49 = vadd.f32 %v6819_v6, %v13271_v20  ;;  %v6908_v59 = vpop.f32.mrf.mxu1  ;;  %7006 = vmatmul.bf16.gmra.mxu2 %v13970_v50  ;;  %v13325_v50 = vld [vmem:[#allocation7 + $0x30] sm:$0xff] }
 0x82f   : > { %10372 = vmatpush.bf16.msrb.mxu2 %v13325_v50 }
 0x830   : > { %v13315_v17 = vadd.f32 %v6908_v59, %v6820_v49  ;;  %6858 = vmatmul.bf16.gmra.mxu0 %v13969_v52  ;;  %v7192_v59 = vmax.f32 %v6766_v41, 0.0  ;;  %v13975_v41 = vld [vmem:[#allocation55_spill] sm:$0xff] }
 0x831   : > { %v6770_v15 = vpop.f32.mrf.mxu3  ;;  %6947 = vmatmul.bf16.gmra.mxu1 %v13971_v43  ;;  %v6691_v18 = vpop.f32.mrf.mxu2  ;;  %v13973_v43 = vld [vmem:[#allocation29_spill] sm:$0xff] }
 0x832   : > { %v6771_v2 = vadd.f32 %v6770_v15, %v6682_v58  ;;  %v6692_v3 = vadd.f32 %v6691_v18, %v13205_v1  ;;  %v13327_v58 = vpack.c.bf16 %v7194_v34, %v7192_v59  ;;  %v10248_v34 = vld [vmem:[%s13949_s16 + $0x48] sm:$0xff] }
 0x833   : > { %7479 = vmatpush.bf16.msrb.mxu1 %v10248_v34 }
 0x834   : > { %13972 = vst [vmem:[#allocation49_spill] sm:$0xff] %v13327_v58 }
 0x835   : > { %v6821_v54 = vpop.f32.mrf.mxu0 }
 0x836   : > { %v6822_v44 = vadd.f32 %v6821_v54, %v13271_v20  ;;  %v6910_v10 = vpop.f32.mrf.mxu1  ;;  %v13974_v54 = vld [vmem:[#allocation42_spill] sm:$0xff] }
 0x838   : > { %v13322_v6 = vadd.f32 %v6910_v10, %v6822_v44  ;;  %v13976_v10 = vld [vmem:[#allocation46_spill] sm:$0xff] }
 0x839   : > { %v6772_v47 = vpop.f32.mrf.mxu3  ;;  %v6693_v52 = vpop.f32.mrf.mxu2 }
 0x83a   : > { %v6773_v49 = vadd.f32 %v6772_v47, %v6684_v61  ;;  %v6694_v12 = vadd.f32 %v6693_v52, %v13212_v8  ;;  %v10240_v8 = vld [vmem:[%s13949_s16 + $0x8] sm:$0xff] }
 0x83b   : > { %7390 = vmatpush.bf16.msra.mxu0 %v10240_v8 }
 0x83d   : > { %v6824_v15 = vpop.f32.mrf.mxu0 }
 0x83e   : > { %7090 = vmatmul.bf16.gmra.mxu3 %v13973_v43  ;;  %v6825_v1 = vadd.f32 %v6824_v15, %v13271_v20  ;;  %v6913_v21 = vpop.f32.mrf.mxu1  ;;  %7011 = vmatmul.bf16.gmra.mxu2 %v13975_v41 }
 0x840   : > { %v13332_v18 = vadd.f32 %v6913_v21, %v6825_v1  ;;  %6863 = vmatmul.bf16.gmra.mxu0 %v13974_v54  ;;  %v7198_v1 = vmax.f32 %v6773_v49, 0.0 }
 0x841   : > { %v6775_v61 = vpop.f32.mrf.mxu3  ;;  %6952 = vmatmul.bf16.gmra.mxu1 %v13976_v10  ;;  %v6696_v47 = vpop.f32.mrf.mxu2 }
 0x842   : > { %v6776_v44 = vadd.f32 %v6775_v61, %v6687_v7  ;;  %v6697_v59 = vadd.f32 %v6696_v47, %v13219_v19  ;;  %v7196_v61 = vmax.f32 %v6771_v2, 0.0  ;;  %v13978_v2 = vld [vmem:[#allocation44_spill] sm:$0xff] }
 0x844   : > { %v13348_v10 = vpack.c.bf16 %v7198_v1, %v7196_v61 }
 0x845   : > { %v6826_v52 = vpop.f32.mrf.mxu0 }
 0x846   : > { %v6827_v15 = vadd.f32 %v6826_v52, %v13271_v20  ;;  %v6915_v43 = vpop.f32.mrf.mxu1  ;;  %13977 = vst [vmem:[#allocation47_spill] sm:$0xff] %v13348_v10 }
 0x848   : > { %v13345_v21 = vadd.f32 %v6915_v43, %v6827_v15 }
 0x849   : > { %v6777_v54 = vpop.f32.mrf.mxu3  ;;  %v6698_v41 = vpop.f32.mrf.mxu2 }
 0x84a   : > { %v6778_v7 = vadd.f32 %v6777_v54, %v6689_v13  ;;  %v6699_v8 = vadd.f32 %v6698_v41, %v13232_v9  ;;  %v7200_v54 = vmax.f32 %v6776_v44, 0.0  ;;  %v10260_v41 = vld [vmem:[#allocation7 + $0x28] sm:$0xff] }
 0x84b   : > { %10373 = vmatpush.bf16.msrb.mxu2 %v10260_v41 }
 0x84d   : > { %v6829_v58 = vpop.f32.mrf.mxu0 }
 0x84e   : > { %7095 = vmatmul.bf16.gmra.mxu3 %v12862_v40  ;;  %v6830_v19 = vadd.f32 %v6829_v58, %v13271_v20  ;;  %v6918_v34 = vpop.f32.mrf.mxu1  ;;  %7016 = vmatmul.bf16.gmra.mxu2 %v12868_v60  ;;  %v7202_v40 = vmax.f32 %v6778_v7, 0.0 }
 0x850   : > { %v13352_v47 = vadd.f32 %v6918_v34, %v6830_v19  ;;  %6868 = vmatmul.bf16.gmra.mxu0 %v13051_v14  ;;  %v13363_v19 = vpack.c.bf16 %v7202_v40, %v7200_v54  ;;  %v10247_v40 = vld [vmem:[%s13949_s16 + $0x40] sm:$0xff] }
 0x851   : > { %v6780_v49 = vpop.f32.mrf.mxu3  ;;  %6957 = vmatmul.bf16.gmra.mxu1 %v13978_v2  ;;  %v6701_v52 = vpop.f32.mrf.mxu2  ;;  %v13981_v2 = vld [vmem:[#allocation25_spill] sm:$0xff] }
 0x852   : > { %v6781_v13 = vadd.f32 %v6780_v49, %v6692_v3  ;;  %v6702_v9 = vadd.f32 %v6701_v52, %v13239_v27  ;;  %13979 = vst [vmem:[#allocation51_spill] sm:$0xff] %v13363_v19  ;;  %v13980_v3 = vld [vmem:[#allocation35_spill] sm:$0xff]  ;;  %7480 = vmatpush.bf16.msrb.mxu1 %v10247_v40 }
 0x853   : > { %v13983_v52 = vld [vmem:[#allocation31_spill] sm:$0xff] }
 0x854   : > { %v10258_v19 = vld [vmem:[#allocation7 + $0x18] sm:$0xff] }
 0x855   : > { %v13358_v15 = vpop.f32.mrf.mxu0 }
 0x856   : > { %v13360_v43 = vpop.f32.mrf.mxu1  ;;  %7678 = vmatpush.bf16.msra.mxu1 %v13288_v33 }
 0x859   : > { %v6782_v58 = vpop.f32.mrf.mxu3  ;;  %v6703_v61 = vpop.f32.mrf.mxu2 }
 0x85a   : > { %v6783_v1 = vadd.f32 %v6782_v58, %v6694_v12  ;;  %v6704_v14 = vadd.f32 %v6703_v61, %v13246_v23  ;;  %v13982_v12 = vld [vmem:[#allocation37_spill] sm:$0xff]  ;;  %v10239_v23 = vld [vmem:[%s13949_s16] sm:$0xff]  ;;  %7679 = vmatpush.bf16.msra.mxu1 %v13325_v50 }
 0x85b   : > { %7391 = vmatpush.bf16.msra.mxu0 %v10239_v23 }
 0x85d   : > { %v6834_v60 = vpop.f32.mrf.mxu0 }
 0x85e   : > { %7100 = vmatmul.bf16.gmra.mxu3 %v13980_v3  ;;  %v6835_v34 = vadd.f32 %v6834_v60, %v13271_v20  ;;  %v6923_v27 = vpop.f32.mrf.mxu1  ;;  %7021 = vmatmul.bf16.gmra.mxu2 %v13982_v12  ;;  %v7206_v3 = vmax.f32 %v6783_v1, 0.0  ;;  %v13985_v1 = vld [vmem:[#allocation12_spill] sm:$0xff] }
 0x85f   : > { %7680 = vmatpush.bf16.msra.mxu1 %v10260_v41 }
 0x860   : > { %v13367_v49 = vadd.f32 %v6923_v27, %v6835_v34  ;;  %6873 = vmatmul.bf16.gmra.mxu0 %v13981_v2  ;;  %v7204_v27 = vmax.f32 %v6781_v13, 0.0  ;;  %v13986_v13 = vld [vmem:[#allocation22_spill] sm:$0xff] }
 0x861   : > { %v6785_v7 = vpop.f32.mrf.mxu3  ;;  %6962 = vmatmul.bf16.gmra.mxu1 %v13983_v52  ;;  %v6706_v58 = vpop.f32.mrf.mxu2 }
 0x862   : > { %v6786_v44 = vadd.f32 %v6785_v7, %v6697_v59  ;;  %v6707_v54 = vadd.f32 %v6706_v58, %v13253_v25  ;;  %v13386_v12 = vpack.c.bf16 %v7206_v3, %v7204_v27 }
 0x864   : > { %13984 = vst [vmem:[#allocation50_spill] sm:$0xff] %v13386_v12 }
 0x865   : > { %v13379_v61 = vpop.f32.mrf.mxu0 }
 0x866   : > { %v13382_v60 = vpop.f32.mrf.mxu1 }
 0x869   : > { %v6787_v34 = vpop.f32.mrf.mxu3  ;;  %v6708_v2 = vpop.f32.mrf.mxu2 }
 0x86a   : > { %v6788_v59 = vadd.f32 %v6787_v34, %v6699_v8  ;;  %v6709_v7 = vadd.f32 %v6708_v2, %v13266_v45  ;;  %v7208_v34 = vmax.f32 %v6786_v44, 0.0  ;;  %v13989_v44 = vld [vmem:[#allocation28_spill] sm:$0xff] }
 0x86d   : > { %v6839_v23 = vpop.f32.mrf.mxu0 }
 0x86e   : > { %7105 = vmatmul.bf16.gmra.mxu3 %v12924_v55  ;;  %v6840_v25 = vadd.f32 %v6839_v23, %v13271_v20  ;;  %v6928_v33 = vpop.f32.mrf.mxu1  ;;  %7026 = vmatmul.bf16.gmra.mxu2 %v13985_v1  ;;  %v7210_v55 = vmax.f32 %v6788_v59, 0.0 }
 0x870   : > { %v13390_v52 = vadd.f32 %v6928_v33, %v6840_v25  ;;  %6878 = vmatmul.bf16.gmra.mxu0 %v12782_v29  ;;  %v13399_v2 = vpack.c.bf16 %v7210_v55, %v7208_v34  ;;  %v10259_v29 = vld [vmem:[#allocation7 + $0x20] sm:$0xff] }
 0x871   : > { %v6790_v8 = vpop.f32.mrf.mxu3  ;;  %6967 = vmatmul.bf16.gmra.mxu1 %v13986_v13  ;;  %v6987_v45 = vpop.f32.mrf.mxu2  ;;  %10374 = vmatpush.bf16.msrb.mxu2 %v10259_v29 }
 0x872   : > { %v6791_v50 = vadd.f32 %v6790_v8, %v6702_v9  ;;  %13987 = vst [vmem:[#allocation52_spill] sm:$0xff] %v13399_v2  ;;  %7681 = vmatpush.bf16.msra.mxu1 %v10259_v29  ;;  %v13988_v8 = vld [vmem:[#allocation41_spill] sm:$0xff] }
 0x875   : > { %v13395_v40 = vpop.f32.mrf.mxu0  ;;  %10375 = vmatpush.bf16.msrb.mxu2 %v10258_v19 }
 0x876   : > { %v13397_v58 = vpop.f32.mrf.mxu1  ;;  %7682 = vmatpush.bf16.msra.mxu1 %v10258_v19 }
 0x879   : > { %v6792_v41 = vpop.f32.mrf.mxu3  ;;  %v6989_v27 = vpop.f32.mrf.mxu2 }
 0x87a   : > { %v6793_v3 = vadd.f32 %v6792_v41, %v6704_v14 }
 0x87c   : > { %v7214_v55 = vmax.f32 %v6793_v3, 0.0 }
 0x87d   : > { %v6844_v23 = vpop.f32.mrf.mxu0 }
 0x87e   : > { %7110 = vmatmul.bf16.gmra.mxu3 %v12954_v42  ;;  %v6845_v9 = vadd.f32 %v6844_v23, %v13271_v20  ;;  %v6933_v25 = vpop.f32.mrf.mxu1  ;;  %7031 = vmatmul.bf16.gmra.mxu2 %v13988_v8  ;;  %v7212_v23 = vmax.f32 %v6791_v50, 0.0 }
 0x880   : > { %v13403_v33 = vadd.f32 %v6933_v25, %v6845_v9  ;;  %6883 = vmatmul.bf16.gmra.mxu0 %v12786_v56  ;;  %v13412_v9 = vpack.c.bf16 %v7214_v55, %v7212_v23  ;;  %v13991_v56 = vld [vmem:[#allocation45_spill] sm:$0xff]  ;;  %v6990_v55 = vadd.f32 %v6989_v27, %v13285_v0 }
 0x881   : > { %v6795_v59 = vpop.f32.mrf.mxu3  ;;  %6972 = vmatmul.bf16.gmra.mxu1 %v13989_v44  ;;  %v6992_v1 = vpop.f32.mrf.mxu2  ;;  %v13993_v44 = vld [vmem:[#allocation32_spill] sm:$0xff] }
 0x882   : > { %v6796_v14 = vadd.f32 %v6795_v59, %v6707_v54  ;;  %13990 = vst [vmem:[#allocation54_spill] sm:$0xff] %v13412_v9 }
 0x885   : > { %v13408_v13 = vpop.f32.mrf.mxu0 }
 0x886   : > { %v13410_v42 = vpop.f32.mrf.mxu1 }
 0x889   : > { %v6797_v41 = vpop.f32.mrf.mxu3  ;;  %v6994_v29 = vpop.f32.mrf.mxu2 }
 0x88a   : > { %v6798_v34 = vadd.f32 %v6797_v41, %v6709_v7  ;;  %v6988_v7 = vadd.f32 %v6987_v45, %v13278_v38 }
 0x88d   : > { %v6849_v25 = vpop.f32.mrf.mxu0 }
 0x88e   : > { %7115 = vmatmul.bf16.gmra.mxu3 %v13991_v56  ;;  %v6850_v8 = vadd.f32 %v6849_v25, %v13271_v20  ;;  %v6938_v54 = vpop.f32.mrf.mxu1  ;;  %7036 = vmatmul.bf16.gmra.mxu2 %v13993_v44  ;;  %v7218_v56 = vmax.f32 %v6798_v34, 0.0 }
 0x890   : > { %v13416_v59 = vadd.f32 %v6938_v54, %v6850_v8  ;;  %7392 = vmatmul.bf16.vlgmr.msra.gmra.mxu0 %v13149_v39  ;;  %v7216_v8 = vmax.f32 %v6796_v14, 0.0  ;;  %v6993_v14 = vadd.f32 %v6992_v1, %v13295_v48 }
 0x891   : > { %v7076_v2 = vpop.f32.mrf.mxu3  ;;  %v6997_v3 = vpop.f32.mrf.mxu2 }
 0x892   : > { %13992 = vst [vmem:[#allocation53_spill] sm:$0xff] %v13416_v59  ;;  %v7077_v41 = vadd.f32 %v7076_v2, %v6988_v7  ;;  %v13426_v44 = vpack.c.bf16 %v7218_v56, %v7216_v8 }
 0x894   : > { %v7157_v54 = vmax.f32 %v7077_v41, 0.0 }
 0x895   : > { %v13421_v50 = vpop.f32.mrf.mxu0 }
 0x896   : > { %v13424_v23 = vpop.f32.mrf.mxu1 }
 0x899   : > { %v7078_v25 = vpop.f32.mrf.mxu3  ;;  %v6999_v39 = vpop.f32.mrf.mxu2 }
 0x89a   : > { %v7079_v9 = vadd.f32 %v7078_v25, %v6990_v55  ;;  %v7000_v8 = vadd.f32 %v6999_v39, %v13322_v6 }
 0x89c   : > { %v7159_v12 = vmax.f32 %v7079_v9, 0.0 }
 0x89d   : > { %v6854_v59 = vpop.f32.mrf.mxu0 }
 0x89e   : > { %v7221_v10 = vpack.c.bf16 %v7159_v12, %v7157_v54  ;;  %7120 = vmatmul.bf16.gmra.mxu3 %v13017_v36  ;;  %v6855_v38 = vadd.f32 %v6854_v59, %v13271_v20  ;;  %v6943_v0 = vpop.f32.mrf.mxu1  ;;  %7041 = vmatmul.bf16.gmra.mxu2 %v13023_v46  ;;  %v6995_v36 = vadd.f32 %v6994_v29, %v13308_v62 }
 0x89f   : > { %v6998_v29 = vadd.f32 %v6997_v3, %v13315_v17 }
 0x8a0   : > { %7481 = vmatmul.bf16.vlgmr.msrb.gmra.mxu1 %v7221_v10  ;;  %v13430_v45 = vadd.f32 %v6943_v0, %v6855_v38  ;;  %7397 = vmatmul.bf16.gmra.mxu0 %v13181_v4 }
 0x8a1   : > { %v7081_v27 = vpop.f32.mrf.mxu3  ;;  %v7002_v2 = vpop.f32.mrf.mxu2 }
 0x8a2   : > { %v7082_v34 = vadd.f32 %v7081_v27, %v6993_v14 }
 0x8a4   : > { %v7161_v10 = vmax.f32 %v7082_v34, 0.0 }
 0x8a5   : > { %v13435_v12 = vpop.f32.mrf.mxu0 }
 0x8a6   : > { %v13438_v9 = vpop.f32.mrf.mxu1 }
 0x8a9   : > { %v7083_v19 = vpop.f32.mrf.mxu3  ;;  %v7004_v55 = vpop.f32.mrf.mxu2 }
 0x8aa   : > { %v7084_v59 = vadd.f32 %v7083_v19, %v6995_v36 }
 0x8ac   : > { %v7163_v7 = vmax.f32 %v7084_v59, 0.0  ;;  %v7003_v59 = vadd.f32 %v7002_v2, %v13332_v18  ;;  %v6832_v2 = vadd.f32 %v13358_v15, %v13271_v20  ;;  %v10256_v15 = vld [vmem:[#allocation7 + $0x8] sm:$0xff] }
 0x8ad   : > { %v6859_v41 = vpop.f32.mrf.mxu0 }
 0x8ae   : > { %7125 = vmatmul.bf16.gmra.mxu3 %v13047_v5  ;;  %v7223_v46 = vpack.c.bf16 %v7163_v7, %v7161_v10  ;;  %v6860_v4 = vadd.f32 %v6859_v41, %v13271_v20  ;;  %v6948_v56 = vpop.f32.mrf.mxu1  ;;  %7046 = vmatmul.bf16.gmra.mxu2 %v13053_v35 }
 0x8b0   : > { %7486 = vmatmul.bf16.gmra.mxu1 %v7223_v46  ;;  %v13442_v48 = vadd.f32 %v6948_v56, %v6860_v4  ;;  %7402 = vmatmul.bf16.gmra.mxu0 %v13201_v11  ;;  %v10257_v11 = vld [vmem:[#allocation7 + $0x10] sm:$0xff] }
 0x8b1   : > { %v7086_v62 = vpop.f32.mrf.mxu3  ;;  %v7007_v1 = vpop.f32.mrf.mxu2  ;;  %10376 = vmatpush.bf16.msrb.mxu2 %v10257_v11  ;;  %7683 = vmatpush.bf16.msra.mxu1 %v10257_v11 }
 0x8b2   : > { %v7087_v5 = vadd.f32 %v7086_v62, %v6998_v29 }
 0x8b4   : > { %v7165_v27 = vmax.f32 %v7087_v5, 0.0 }
 0x8b5   : > { %v13447_v25 = vpop.f32.mrf.mxu0  ;;  %10377 = vmatpush.bf16.msrb.mxu2 %v10256_v15  ;;  %7684 = vmatpush.bf16.msra.mxu1 %v10256_v15 }
 0x8b6   : > { %v13450_v54 = vpop.f32.mrf.mxu1 }
 0x8b9   : > { %v7088_v38 = vpop.f32.mrf.mxu3  ;;  %v7009_v36 = vpop.f32.mrf.mxu2 }
 0x8ba   : > { %v7089_v0 = vadd.f32 %v7088_v38, %v7000_v8  ;;  %v6921_v38 = vadd.f32 %v13360_v43, %v6832_v2 }
 0x8bc   : > { %v7167_v14 = vmax.f32 %v7089_v0, 0.0 }
 0x8bd   : > { %v6864_v34 = vpop.f32.mrf.mxu0 }
 0x8be   : > { %7130 = vmatmul.bf16.gmra.mxu3 %v13069_v37  ;;  %v7225_v35 = vpack.c.bf16 %v7167_v14, %v7165_v27  ;;  %v6865_v19 = vadd.f32 %v6864_v34, %v13271_v20  ;;  %v6953_v17 = vpop.f32.mrf.mxu1  ;;  %7051 = vmatmul.bf16.gmra.mxu2 %v13073_v16  ;;  %v7005_v37 = vadd.f32 %v7004_v55, %v13345_v21 }
 0x8bf   : > { %v7010_v27 = vadd.f32 %v7009_v36, %v6921_v38  ;;  %v6837_v36 = vadd.f32 %v13379_v61, %v13271_v20 }
 0x8c0   : > { %7491 = vmatmul.bf16.gmra.mxu1 %v7225_v35  ;;  %v13454_v3 = vadd.f32 %v6953_v17, %v6865_v19  ;;  %7407 = vmatmul.bf16.gmra.mxu0 %v13215_v32 }
 0x8c1   : > { %v7091_v6 = vpop.f32.mrf.mxu3  ;;  %v7012_v39 = vpop.f32.mrf.mxu2 }
 0x8c2   : > { %v7092_v7 = vadd.f32 %v7091_v6, %v7003_v59 }
 0x8c4   : > { %v7169_v56 = vmax.f32 %v7092_v7, 0.0  ;;  %v7013_v7 = vadd.f32 %v7012_v39, %v13367_v49 }
 0x8c5   : > { %v13459_v10 = vpop.f32.mrf.mxu0 }
 0x8c6   : > { %v13462_v41 = vpop.f32.mrf.mxu1 }
 0x8c9   : > { %v7093_v46 = vpop.f32.mrf.mxu3  ;;  %v7014_v29 = vpop.f32.mrf.mxu2 }
 0x8ca   : > { %v7094_v4 = vadd.f32 %v7093_v46, %v7005_v37 }
 0x8cc   : > { %v7171_v62 = vmax.f32 %v7094_v4, 0.0 }
 0x8cd   : > { %v6869_v32 = vpop.f32.mrf.mxu0 }
 0x8ce   : > { %7135 = vmatmul.bf16.gmra.mxu3 %v13087_v24  ;;  %v7227_v16 = vpack.c.bf16 %v7171_v62, %v7169_v56  ;;  %v6870_v8 = vadd.f32 %v6869_v32, %v13271_v20  ;;  %v6958_v5 = vpop.f32.mrf.mxu1  ;;  %7056 = vmatmul.bf16.gmra.mxu2 %v13091_v30  ;;  %v7008_v24 = vadd.f32 %v7007_v1, %v13352_v47 }
 0x8d0   : > { %7496 = vmatmul.bf16.gmra.mxu1 %v7227_v16  ;;  %v13466_v18 = vadd.f32 %v6958_v5, %v6870_v8  ;;  %7412 = vmatmul.bf16.gmra.mxu0 %v13235_v31 }
 0x8d1   : > { %v7096_v21 = vpop.f32.mrf.mxu3  ;;  %v7017_v55 = vpop.f32.mrf.mxu2 }
 0x8d2   : > { %v7097_v14 = vadd.f32 %v7096_v21, %v7008_v24  ;;  %v7018_v24 = vadd.f32 %v7017_v55, %v13390_v52 }
 0x8d4   : > { %v7173_v31 = vmax.f32 %v7097_v14, 0.0 }
 0x8d5   : > { %v13474_v0 = vpop.f32.mrf.mxu0 }
 0x8d6   : > { %v13476_v34 = vpop.f32.mrf.mxu1 }
 0x8d9   : > { %v7098_v35 = vpop.f32.mrf.mxu3  ;;  %v7019_v30 = vpop.f32.mrf.mxu2 }
 0x8da   : > { %v7099_v11 = vadd.f32 %v7098_v35, %v7010_v27 }
 0x8dc   : > { %v7175_v19 = vmax.f32 %v7099_v11, 0.0 }
 0x8dd   : > { %v6874_v6 = vpop.f32.mrf.mxu0 }
 0x8de   : > { %v7229_v17 = vpack.c.bf16 %v7175_v19, %v7173_v31  ;;  %7140 = vmatmul.bf16.gmra.mxu3 %v13107_v28  ;;  %v6875_v43 = vadd.f32 %v6874_v6, %v13271_v20  ;;  %v6963_v59 = vpop.f32.mrf.mxu1  ;;  %7061 = vmatmul.bf16.gmra.mxu2 %v13111_v51  ;;  %v6926_v28 = vadd.f32 %v13382_v60, %v6837_v36 }
 0x8e0   : > { %7501 = vmatmul.bf16.gmra.mxu1 %v7229_v17  ;;  %v13480_v47 = vadd.f32 %v6963_v59, %v6875_v43  ;;  %7417 = vmatmul.bf16.gmra.mxu0 %v13249_v53  ;;  %v7015_v4 = vadd.f32 %v7014_v29, %v6926_v28  ;;  %v6842_v29 = vadd.f32 %v13395_v40, %v13271_v20  ;;  %v10255_v40 = vld [vmem:[#allocation7] sm:$0xff] }
 0x8e1   : > { %v7101_v1 = vpop.f32.mrf.mxu3  ;;  %v7022_v37 = vpop.f32.mrf.mxu2  ;;  %10378 = vmatpush.bf16.msrb.mxu2 %v10255_v40  ;;  %7685 = vmatpush.bf16.msra.mxu1 %v10255_v40 }
 0x8e2   : > { %v7102_v56 = vadd.f32 %v7101_v1, %v7013_v7  ;;  %v6931_v38 = vadd.f32 %v13397_v58, %v6842_v29  ;;  %v13526_v29 = vld [vmem:[%s13996_s27] ss:$0 sm:$0xff] }
 0x8e4   : > { %v7177_v16 = vmax.f32 %v7102_v56, 0.0 }
 0x8e5   : > { %v13488_v46 = vpop.f32.mrf.mxu0 }
 0x8e6   : > { %v13490_v62 = vpop.f32.mrf.mxu1 }
 0x8e9   : > { %v7103_v32 = vpop.f32.mrf.mxu3  ;;  %v7024_v8 = vpop.f32.mrf.mxu2 }
 0x8ea   : > { %v7104_v53 = vadd.f32 %v7103_v32, %v7015_v4 }
 0x8ec   : > { %v7179_v51 = vmax.f32 %v7104_v53, 0.0 }
 0x8ed   : > { %v6879_v21 = vpop.f32.mrf.mxu0 }
 0x8ee   : > { %v7231_v5 = vpack.c.bf16 %v7179_v51, %v7177_v16  ;;  %7145 = vmatmul.bf16.gmra.mxu3 %v13131_v63  ;;  %v6880_v61 = vadd.f32 %v6879_v21, %v13271_v20  ;;  %v6968_v60 = vpop.f32.mrf.mxu1  ;;  %v7020_v63 = vadd.f32 %v7019_v30, %v6931_v38  ;;  %v6847_v30 = vadd.f32 %v13408_v13, %v13271_v20 }
 0x8f0   : > { %7506 = vmatmul.bf16.gmra.mxu1 %v7231_v5  ;;  %v13494_v49 = vadd.f32 %v6968_v60, %v6880_v61  ;;  %7422 = vmatmul.bf16.gmra.mxu0 %v13274_v26  ;;  %v6936_v1 = vadd.f32 %v13410_v42, %v6847_v30  ;;  %v13994_v5 = vld [vmem:[#allocation48_spill] sm:$0xff]  ;;  %v6852_v42 = vadd.f32 %v13421_v50, %v13271_v20 }
 0x8f1   : > { %v7106_v39 = vpop.f32.mrf.mxu3  ;;  %v7027_v2 = vpop.f32.mrf.mxu2 }
 0x8f2   : > { %v7107_v14 = vadd.f32 %v7106_v39, %v7018_v24  ;;  %v7025_v28 = vadd.f32 %v7024_v8, %v6936_v1 }
 0x8f4   : > { %v7181_v19 = vmax.f32 %v7107_v14, 0.0 }
 0x8f5   : > { %v13501_v27 = vpop.f32.mrf.mxu0 }
 0x8f6   : > { %v13503_v35 = vpop.f32.mrf.mxu1 }
 0x8f9   : > { %v7108_v11 = vpop.f32.mrf.mxu3  ;;  %v7029_v26 = vpop.f32.mrf.mxu2 }
 0x8fa   : > { %v7109_v31 = vadd.f32 %v7108_v11, %v7020_v63 }
 0x8fc   : > { %v7183_v17 = vmax.f32 %v7109_v31, 0.0 }
 0x8fd   : > { %v6884_v15 = vpop.f32.mrf.mxu0 }
 0x8fe   : > { %v7233_v6 = vpack.c.bf16 %v7183_v17, %v7181_v19  ;;  %7150 = vmatmul.bf16.gmra.mxu3 %v13147_v22  ;;  %v6885_v58 = vadd.f32 %v6884_v15, %v13271_v20  ;;  %v6973_v43 = vpop.f32.mrf.mxu1  ;;  %v7023_v22 = vadd.f32 %v7022_v37, %v13403_v33  ;;  %v6941_v33 = vadd.f32 %v13424_v23, %v6852_v42  ;;  %v13995_v37 = vld [vmem:[#allocation53_spill] sm:$0xff] }
 0x8ff   : > { %v7028_v8 = vadd.f32 %v7027_v2, %v13995_v37  ;;  %v6857_v15 = vadd.f32 %v13435_v12, %v13271_v20 }
 0x900   : > { %7511 = vmatmul.bf16.gmra.mxu1 %v7233_v6  ;;  %v13507_v52 = vadd.f32 %v6973_v43, %v6885_v58  ;;  %7427 = vmatmul.bf16.gmra.mxu0 %v13290_v57  ;;  %v7030_v39 = vadd.f32 %v7029_v26, %v6941_v33  ;;  %v13997_v6 = vld [vmem:[#allocation49_spill] sm:$0xff] }
 0x901   : > { %v7111_v55 = vpop.f32.mrf.mxu3  ;;  %v7032_v59 = vpop.f32.mrf.mxu2  ;;  %v6946_v43 = vadd.f32 %v13438_v9, %v6857_v15  ;;  %v13998_v9 = vld [vmem:[#allocation47_spill] sm:$0xff] }
 0x902   : > { %v7112_v7 = vadd.f32 %v7111_v55, %v7023_v22  ;;  %v7033_v55 = vadd.f32 %v7032_v59, %v13430_v45  ;;  %v6862_v59 = vadd.f32 %v13447_v25, %v13271_v20 }
 0x904   : > { %v7185_v32 = vmax.f32 %v7112_v7, 0.0 }
 0x905   : > { %v13514_v36 = vpop.f32.mrf.mxu0 }
 0x906   : > { %v13519_v21 = vpop.f32.mrf.mxu1 }
 0x909   : > { %v7113_v4 = vpop.f32.mrf.mxu3  ;;  %v7034_v16 = vpop.f32.mrf.mxu2 }
 0x90a   : > { %v7114_v56 = vadd.f32 %v7113_v4, %v7025_v28  ;;  %v7035_v22 = vadd.f32 %v7034_v16, %v6946_v43 }
 0x90c   : > { %v7187_v53 = vmax.f32 %v7114_v56, 0.0 }
 0x90d   : > { %v7393_v51 = vpop.f32.mrf.mxu0 }
 0x90e   : > { %v7235_v57 = vpack.c.bf16 %v7187_v53, %v7185_v32  ;;  %v7394_v14 = vadd.f32 %v13526_v29, %v7393_v51 }
 0x910   : > { %7516 = vmatmul.bf16.gmra.mxu1 %v7235_v57  ;;  %7432 = vmatmul.bf16.gmra.mxu0 %v13994_v5 }
 0x911   : > { %v7116_v13 = vpop.f32.mrf.mxu3  ;;  %v7037_v60 = vpop.f32.mrf.mxu2 }
 0x912   : > { %v7117_v38 = vadd.f32 %v7116_v13, %v7028_v8 }
 0x914   : > { %v7189_v50 = vmax.f32 %v7117_v38, 0.0  ;;  %v7038_v38 = vadd.f32 %v7037_v60, %v13442_v48  ;;  %v6867_v60 = vadd.f32 %v13459_v10, %v13271_v20 }
 0x915   : > { %v7395_v61 = vpop.f32.mrf.mxu0 }
 0x916   : > { %v7396_v40 = vadd.f32 %v13526_v29, %v7395_v61 }
 0x919   : > { %v7118_v24 = vpop.f32.mrf.mxu3  ;;  %v7039_v2 = vpop.f32.mrf.mxu2 }
 0x91a   : > { %v7119_v63 = vadd.f32 %v7118_v24, %v7030_v39  ;;  %v6951_v39 = vadd.f32 %v13450_v54, %v6862_v59  ;;  %v13999_v54 = vld [vmem:[#allocation51_spill] sm:$0xff] }
 0x91c   : > { %v7191_v11 = vmax.f32 %v7119_v63, 0.0 }
 0x91d   : > { %v7482_v31 = vpop.f32.mrf.mxu1  ;;  %v7398_v23 = vpop.f32.mrf.mxu0 }
 0x91e   : > { %v7237_v19 = vpack.c.bf16 %v7191_v11, %v7189_v50  ;;  %v7483_v17 = vadd.f32 %v7482_v31, %v7394_v14  ;;  %v7399_v16 = vadd.f32 %v13526_v29, %v7398_v23  ;;  %v7040_v14 = vadd.f32 %v7039_v2, %v6951_v39 }
 0x920   : > { %7521 = vmatmul.bf16.gmra.mxu1 %v7237_v19  ;;  %7437 = vmatmul.bf16.gmra.mxu0 %v13997_v6  ;;  %v7562_v28 = vmax.f32 %v7483_v17, 0.0 }
 0x921   : > { %v7121_v26 = vpop.f32.mrf.mxu3  ;;  %v7042_v57 = vpop.f32.mrf.mxu2 }
 0x922   : > { %v7122_v7 = vadd.f32 %v7121_v26, %v7033_v55 }
 0x924   : > { %v7193_v51 = vmax.f32 %v7122_v7, 0.0 }
 0x925   : > { %v7484_v58 = vpop.f32.mrf.mxu1  ;;  %v7400_v30 = vpop.f32.mrf.mxu0 }
 0x926   : > { %v7485_v1 = vadd.f32 %v7484_v58, %v7396_v40  ;;  %v7401_v33 = vadd.f32 %v13526_v29, %v7400_v30 }
 0x928   : > { %v7563_v4 = vmax.f32 %v7485_v1, 0.0  ;;  %v6956_v1 = vadd.f32 %v13462_v41, %v6867_v60  ;;  %v14000_v41 = vld [vmem:[#allocation50_spill] sm:$0xff] }
 0x929   : > { %v7123_v56 = vpop.f32.mrf.mxu3  ;;  %v7044_v8 = vpop.f32.mrf.mxu2 }
 0x92a   : > { %v13535_v32 = vpack.c.bf16 %v7563_v4, %v7562_v28  ;;  %v7124_v53 = vadd.f32 %v7123_v56, %v7035_v22  ;;  %v7043_v22 = vadd.f32 %v7042_v57, %v13454_v3  ;;  %v7045_v4 = vadd.f32 %v7044_v8, %v6956_v1 }
 0x92b   : > { %v6872_v57 = vadd.f32 %v13474_v0, %v13271_v20 }
 0x92c   : > { %v7195_v12 = vmax.f32 %v7124_v53, 0.0 }
 0x92d   : > { %v7487_v5 = vpop.f32.mrf.mxu1  ;;  %v7403_v42 = vpop.f32.mrf.mxu0 }
 0x92e   : > { %v7239_v13 = vpack.c.bf16 %v7195_v12, %v7193_v51  ;;  %v7488_v37 = vadd.f32 %v7487_v5, %v7399_v16  ;;  %v7404_v2 = vadd.f32 %v13526_v29, %v7403_v42 }
 0x930   : > { %7526 = vmatmul.bf16.gmra.mxu1 %v7239_v13  ;;  %7442 = vmatmul.bf16.gmra.mxu0 %v13998_v9  ;;  %v7564_v50 = vmax.f32 %v7488_v37, 0.0 }
 0x931   : > { %v7126_v45 = vpop.f32.mrf.mxu3  ;;  %v7047_v58 = vpop.f32.mrf.mxu2 }
 0x932   : > { %v7127_v11 = vadd.f32 %v7126_v45, %v7038_v38  ;;  %v6961_v38 = vadd.f32 %v13476_v34, %v6872_v57  ;;  %v14001_v34 = vld [vmem:[#allocation52_spill] sm:$0xff] }
 0x934   : > { %v7197_v6 = vmax.f32 %v7127_v11, 0.0 }
 0x935   : > { %v7489_v61 = vpop.f32.mrf.mxu1  ;;  %v7405_v24 = vpop.f32.mrf.mxu0 }
 0x936   : > { %v7490_v63 = vadd.f32 %v7489_v61, %v7401_v33  ;;  %v7406_v43 = vadd.f32 %v13526_v29, %v7405_v24  ;;  %v7048_v24 = vadd.f32 %v7047_v58, %v13466_v18  ;;  %v6877_v58 = vadd.f32 %v13488_v46, %v13271_v20 }
 0x938   : > { %v7565_v31 = vmax.f32 %v7490_v63, 0.0 }
 0x939   : > { %v7128_v19 = vpop.f32.mrf.mxu3  ;;  %v7049_v12 = vpop.f32.mrf.mxu2 }
 0x93a   : > { %v7595_v17 = vpack.c.bf16 %v7565_v31, %v7564_v50  ;;  %v7129_v25 = vadd.f32 %v7128_v19, %v7040_v14  ;;  %v7050_v50 = vadd.f32 %v7049_v12, %v6961_v38 }
 0x93c   : > { %v7199_v23 = vmax.f32 %v7129_v25, 0.0  ;;  %7691 = vmatmul.bf16.vlgmr.msrb.gmra.mxu2 %v7595_v17 }
 0x93d   : > { %v7492_v26 = vpop.f32.mrf.mxu1  ;;  %v7408_v40 = vpop.f32.mrf.mxu0 }
 0x93e   : > { %v7241_v15 = vpack.c.bf16 %v7199_v23, %v7197_v6  ;;  %v7493_v55 = vadd.f32 %v7492_v26, %v7404_v2  ;;  %v7409_v33 = vadd.f32 %v13526_v29, %v7408_v40 }
 0x940   : > { %7531 = vmatmul.bf16.gmra.mxu1 %v7241_v15  ;;  %7447 = vmatmul.bf16.gmra.mxu0 %v13999_v54  ;;  %v7566_v56 = vmax.f32 %v7493_v55, 0.0  ;;  %v6966_v55 = vadd.f32 %v13490_v62, %v6877_v58 }
 0x941   : > { %v7131_v48 = vpop.f32.mrf.mxu3  ;;  %v7052_v37 = vpop.f32.mrf.mxu2 }
 0x942   : > { %v7132_v53 = vadd.f32 %v7131_v48, %v7043_v22 }
 0x944   : > { %v7201_v9 = vmax.f32 %v7132_v53, 0.0 }
 0x945   : > { %v7494_v30 = vpop.f32.mrf.mxu1  ;;  %v7410_v28 = vpop.f32.mrf.mxu0 }
 0x946   : > { %v7495_v7 = vadd.f32 %v7494_v30, %v7406_v43  ;;  %v7411_v8 = vadd.f32 %v13526_v29, %v7410_v28  ;;  %v7053_v30 = vadd.f32 %v7052_v37, %v13480_v47 }
 0x948   : > { %v7567_v51 = vmax.f32 %v7495_v7, 0.0 }
 0x949   : > { %v7133_v5 = vpop.f32.mrf.mxu3  ;;  %v7054_v26 = vpop.f32.mrf.mxu2 }
 0x94a   : > { %v7134_v13 = vadd.f32 %v7133_v5, %v7045_v4  ;;  %v7596_v10 = vpack.c.bf16 %v7567_v51, %v7566_v56  ;;  %v7055_v7 = vadd.f32 %v7054_v26, %v6966_v55 }
 0x94c   : > { %v7203_v42 = vmax.f32 %v7134_v13, 0.0  ;;  %7696 = vmatmul.bf16.gmra.mxu2 %v7596_v10 }
 0x94d   : > { %v7497_v45 = vpop.f32.mrf.mxu1  ;;  %v7413_v16 = vpop.f32.mrf.mxu0 }
 0x94e   : > { %v7243_v59 = vpack.c.bf16 %v7203_v42, %v7201_v9  ;;  %v7498_v61 = vadd.f32 %v7497_v45, %v7409_v33  ;;  %v7414_v48 = vadd.f32 %v13526_v29, %v7413_v16  ;;  %v14002_v45 = vld [vmem:[#allocation54_spill] sm:$0xff] }
 0x950   : > { %7536 = vmatmul.bf16.gmra.mxu1 %v7243_v59  ;;  %7452 = vmatmul.bf16.gmra.mxu0 %v14000_v41  ;;  %v7568_v11 = vmax.f32 %v7498_v61, 0.0  ;;  %v6882_v59 = vadd.f32 %v13501_v27, %v13271_v20 }
 0x951   : > { %v7136_v3 = vpop.f32.mrf.mxu3  ;;  %v7057_v28 = vpop.f32.mrf.mxu2 }
 0x952   : > { %v7137_v31 = vadd.f32 %v7136_v3, %v7048_v24  ;;  %v6971_v33 = vadd.f32 %v13503_v35, %v6882_v59  ;;  %v7058_v37 = vadd.f32 %v7057_v28, %v13494_v49  ;;  %v6887_v35 = vadd.f32 %v13514_v36, %v13271_v20 }
 0x954   : > { %v7205_v6 = vmax.f32 %v7137_v31, 0.0 }
 0x955   : > { %v7499_v39 = vpop.f32.mrf.mxu1  ;;  %v7415_v63 = vpop.f32.mrf.mxu0 }
 0x956   : > { %v7500_v14 = vadd.f32 %v7499_v39, %v7411_v8  ;;  %v7416_v60 = vadd.f32 %v13526_v29, %v7415_v63 }
 0x958   : > { %v7569_v19 = vmax.f32 %v7500_v14, 0.0 }
 0x959   : > { %v7138_v17 = vpop.f32.mrf.mxu3  ;;  %v7059_v62 = vpop.f32.mrf.mxu2 }
 0x95a   : > { %v7139_v25 = vadd.f32 %v7138_v17, %v7050_v50  ;;  %v7597_v0 = vpack.c.bf16 %v7569_v19, %v7568_v11  ;;  %v7060_v39 = vadd.f32 %v7059_v62, %v6971_v33 }
 0x95c   : > { %v7207_v23 = vmax.f32 %v7139_v25, 0.0  ;;  %7701 = vmatmul.bf16.gmra.mxu2 %v7597_v0 }
 0x95d   : > { %v7502_v15 = vpop.f32.mrf.mxu1  ;;  %v7418_v54 = vpop.f32.mrf.mxu0 }
 0x95e   : > { %v7245_v40 = vpack.c.bf16 %v7207_v23, %v7205_v6  ;;  %v7503_v2 = vadd.f32 %v7502_v15, %v7414_v48  ;;  %v7419_v16 = vadd.f32 %v13526_v29, %v7418_v54  ;;  %v6976_v54 = vadd.f32 %v13519_v21, %v6887_v35 }
 0x960   : > { %7541 = vmatmul.bf16.gmra.mxu1 %v7245_v40  ;;  %7457 = vmatmul.bf16.gmra.mxu0 %v14001_v34  ;;  %v7570_v4 = vmax.f32 %v7503_v2, 0.0 }
 0x961   : > { %v7141_v18 = vpop.f32.mrf.mxu3  ;;  %v7062_v27 = vpop.f32.mrf.mxu2 }
 0x962   : > { %v7142_v56 = vadd.f32 %v7141_v18, %v7053_v30  ;;  %v7063_v34 = vadd.f32 %v7062_v27, %v13507_v52 }
 0x964   : > { %v7209_v5 = vmax.f32 %v7142_v56, 0.0 }
 0x965   : > { %v7504_v43 = vpop.f32.mrf.mxu1  ;;  %v7420_v1 = vpop.f32.mrf.mxu0 }
 0x966   : > { %v7505_v22 = vadd.f32 %v7504_v43, %v7416_v60  ;;  %v7421_v41 = vadd.f32 %v13526_v29, %v7420_v1 }
 0x968   : > { %v7571_v53 = vmax.f32 %v7505_v22, 0.0 }
 0x969   : > { %v7143_v51 = vpop.f32.mrf.mxu3  ;;  %v7064_v15 = vpop.f32.mrf.mxu2 }
 0x96a   : > { %v7144_v12 = vadd.f32 %v7143_v51, %v7055_v7  ;;  %v7598_v46 = vpack.c.bf16 %v7571_v53, %v7570_v4  ;;  %v7065_v48 = vadd.f32 %v7064_v15, %v6976_v54 }
 0x96c   : > { %v7211_v13 = vmax.f32 %v7144_v12, 0.0  ;;  %7706 = vmatmul.bf16.gmra.mxu2 %v7598_v46 }
 0x96d   : > { %v7507_v10 = vpop.f32.mrf.mxu1  ;;  %v7423_v42 = vpop.f32.mrf.mxu0 }
 0x96e   : > { %v7247_v9 = vpack.c.bf16 %v7211_v13, %v7209_v5  ;;  %v7508_v3 = vadd.f32 %v7507_v10, %v7419_v16  ;;  %v7424_v6 = vadd.f32 %v13526_v29, %v7423_v42 }
 0x970   : > { %7546 = vmatmul.bf16.gmra.mxu1 %v7247_v9  ;;  %7462 = vmatmul.bf16.gmra.mxu0 %v14002_v45  ;;  %v7572_v38 = vmax.f32 %v7508_v3, 0.0 }
 0x971   : > { %v7146_v47 = vpop.f32.mrf.mxu3 }
 0x972   : > { %v7147_v24 = vadd.f32 %v7146_v47, %v7058_v37 }
 0x974   : > { %v7213_v31 = vmax.f32 %v7147_v24, 0.0 }
 0x975   : > { %v7509_v57 = vpop.f32.mrf.mxu1  ;;  %v7425_v8 = vpop.f32.mrf.mxu0 }
 0x976   : > { %v7510_v61 = vadd.f32 %v7509_v57, %v7421_v41  ;;  %v7426_v23 = vadd.f32 %v13526_v29, %v7425_v8 }
 0x978   : > { %v7573_v63 = vmax.f32 %v7510_v61, 0.0 }
 0x979   : > { %v7148_v14 = vpop.f32.mrf.mxu3 }
 0x97a   : > { %v7599_v50 = vpack.c.bf16 %v7573_v63, %v7572_v38  ;;  %v7149_v11 = vadd.f32 %v7148_v14, %v7060_v39 }
 0x97c   : > { %v7215_v19 = vmax.f32 %v7149_v11, 0.0  ;;  %7711 = vmatmul.bf16.gmra.mxu2 %v7599_v50 }
 0x97d   : > { %v7512_v17 = vpop.f32.mrf.mxu1  ;;  %v7428_v0 = vpop.f32.mrf.mxu0 }
 0x97e   : > { %v7249_v25 = vpack.c.bf16 %v7215_v19, %v7213_v31  ;;  %v7513_v26 = vadd.f32 %v7512_v17, %v7424_v6  ;;  %v7429_v21 = vadd.f32 %v13526_v29, %v7428_v0  ;;  %v13591_v17 = vld [vmem:[%s14003_s26] ss:$0 sm:$0xff] }
 0x980   : > { %7551 = vmatmul.bf16.gmra.mxu1 %v7249_v25  ;;  %7467 = vmatmul.bf16.gmra.mxu0 %v13426_v44  ;;  %v7574_v60 = vmax.f32 %v7513_v26, 0.0 }
 0x981   : > { %v7151_v49 = vpop.f32.mrf.mxu3 }
 0x982   : > { %v7152_v44 = vadd.f32 %v7151_v49, %v7063_v34 }
 0x984   : > { %v7217_v36 = vmax.f32 %v7152_v44, 0.0 }
 0x985   : > { %v7514_v40 = vpop.f32.mrf.mxu1  ;;  %v7430_v18 = vpop.f32.mrf.mxu0 }
 0x986   : > { %v7515_v58 = vadd.f32 %v7514_v40, %v7426_v23  ;;  %v7431_v52 = vadd.f32 %v13526_v29, %v7430_v18 }
 0x988   : > { %v7575_v2 = vmax.f32 %v7515_v58, 0.0 }
 0x989   : > { %v7153_v43 = vpop.f32.mrf.mxu3 }
 0x98a   : > { %v7600_v55 = vpack.c.bf16 %v7575_v2, %v7574_v60  ;;  %v7154_v20 = vadd.f32 %v7153_v43, %v7065_v48 }
 0x98c   : > { %v7219_v30 = vmax.f32 %v7154_v20, 0.0  ;;  %7716 = vmatmul.bf16.gmra.mxu2 %v7600_v55 }
 0x98d   : > { %v7517_v1 = vpop.f32.mrf.mxu1  ;;  %v7433_v28 = vpop.f32.mrf.mxu0 }
 0x98e   : > { %v7251_v22 = vpack.c.bf16 %v7219_v30, %v7217_v36  ;;  %v7518_v7 = vadd.f32 %v7517_v1, %v7429_v21  ;;  %v7434_v10 = vadd.f32 %v13526_v29, %v7433_v28 }
 0x990   : > { %7556 = vmatmul.bf16.gmra.mxu1 %v7251_v22  ;;  %v7576_v51 = vmax.f32 %v7518_v7, 0.0 }
 0x995   : > { %v7519_v4 = vpop.f32.mrf.mxu1  ;;  %v7435_v56 = vpop.f32.mrf.mxu0 }
 0x996   : > { %v7520_v53 = vadd.f32 %v7519_v4, %v7431_v52  ;;  %v7436_v9 = vadd.f32 %v13526_v29, %v7435_v56 }
 0x998   : > { %v7577_v12 = vmax.f32 %v7520_v53, 0.0 }
 0x99a   : > { %v7601_v46 = vpack.c.bf16 %v7577_v12, %v7576_v51 }
 0x99c   : > { %7721 = vmatmul.bf16.gmra.mxu2 %v7601_v46 }
 0x99d   : > { %v7522_v5 = vpop.f32.mrf.mxu1  ;;  %v7438_v13 = vpop.f32.mrf.mxu0 }
 0x99e   : > { %v7523_v42 = vadd.f32 %v7522_v5, %v7434_v10  ;;  %v7439_v33 = vadd.f32 %v13526_v29, %v7438_v13 }
 0x9a0   : > { %7686 = vmatmul.bf16.vlgmr.msra.gmra.mxu1 %v13535_v32  ;;  %v7578_v59 = vmax.f32 %v7523_v42, 0.0 }
 0x9a5   : > { %v7524_v62 = vpop.f32.mrf.mxu1  ;;  %v7440_v45 = vpop.f32.mrf.mxu0 }
 0x9a6   : > { %v7525_v47 = vadd.f32 %v7524_v62, %v7436_v9  ;;  %v7441_v37 = vadd.f32 %v13526_v29, %v7440_v45 }
 0x9a8   : > { %v7579_v16 = vmax.f32 %v7525_v47, 0.0 }
 0x9aa   : > { %v7602_v41 = vpack.c.bf16 %v7579_v16, %v7578_v59 }
 0x9ac   : > { %7726 = vmatmul.bf16.gmra.mxu2 %v7602_v41 }
 0x9ad   : > { %v7527_v3 = vpop.f32.mrf.mxu1  ;;  %v7443_v57 = vpop.f32.mrf.mxu0 }
 0x9ae   : > { %v7528_v8 = vadd.f32 %v7527_v3, %v7439_v33  ;;  %v7444_v27 = vadd.f32 %v13526_v29, %v7443_v57 }
 0x9b0   : > { %v7580_v38 = vmax.f32 %v7528_v8, 0.0 }
 0x9b5   : > { %v7529_v32 = vpop.f32.mrf.mxu1  ;;  %v7445_v61 = vpop.f32.mrf.mxu0 }
 0x9b6   : > { %v7530_v39 = vadd.f32 %v7529_v32, %v7441_v37  ;;  %v7446_v31 = vadd.f32 %v13526_v29, %v7445_v61 }
 0x9b8   : > { %v7581_v24 = vmax.f32 %v7530_v39, 0.0 }
 0x9ba   : > { %v7603_v63 = vpack.c.bf16 %v7581_v24, %v7580_v38 }
 0x9bc   : > { %7731 = vmatmul.bf16.gmra.mxu2 %v7603_v63 }
 0x9bd   : > { %v7532_v14 = vpop.f32.mrf.mxu1  ;;  %v7448_v50 = vpop.f32.mrf.mxu0 }
 0x9be   : > { %v7533_v19 = vadd.f32 %v7532_v14, %v7444_v27  ;;  %v7449_v48 = vadd.f32 %v13526_v29, %v7448_v50 }
 0x9bf   : > { %v7692_v11 = vpop.f32.mrf.mxu2 }
 0x9c0   : > { %v7582_v6 = vmax.f32 %v7533_v19, 0.0  ;;  %v7693_v23 = vadd.f32 %v13591_v17, %v7692_v11 }
 0x9c5   : > { %v7534_v25 = vpop.f32.mrf.mxu1  ;;  %v7450_v0 = vpop.f32.mrf.mxu0 }
 0x9c6   : > { %v7535_v49 = vadd.f32 %v7534_v25, %v7446_v31  ;;  %v7451_v60 = vadd.f32 %v13526_v29, %v7450_v0 }
 0x9c7   : > { %v7694_v35 = vpop.f32.mrf.mxu2 }
 0x9c8   : > { %v7583_v26 = vmax.f32 %v7535_v49, 0.0  ;;  %v7695_v15 = vadd.f32 %v13591_v17, %v7694_v35 }
 0x9ca   : > { %v7604_v40 = vpack.c.bf16 %v7583_v26, %v7582_v6  ;;  %v10271_v54 = vpack.c.bf16 %v7695_v15, %v7693_v23 }
 0x9cc   : > { %10343 = vst [vmem:[%s13600_s28 + $0x8] sm:$0xff] %v10271_v54   ;;  %7736 = vmatmul.bf16.gmra.mxu2 %v7604_v40 }
 0x9cd   : > { %v7537_v34 = vpop.f32.mrf.mxu1  ;;  %v7453_v18 = vpop.f32.mrf.mxu0 }
 0x9ce   : > { %v7538_v44 = vadd.f32 %v7537_v34, %v7449_v48  ;;  %v7454_v56 = vadd.f32 %v13526_v29, %v7453_v18 }
 0x9cf   : > { %v7697_v58 = vpop.f32.mrf.mxu2 }
 0x9d0   : > { %v7584_v36 = vmax.f32 %v7538_v44, 0.0  ;;  %v7698_v30 = vadd.f32 %v13591_v17, %v7697_v58 }
 0x9d5   : > { %v7539_v2 = vpop.f32.mrf.mxu1  ;;  %v7455_v43 = vpop.f32.mrf.mxu0 }
 0x9d6   : > { %v7540_v55 = vadd.f32 %v7539_v2, %v7451_v60  ;;  %v7456_v53 = vadd.f32 %v13526_v29, %v7455_v43 }
 0x9d7   : > { %v7699_v20 = vpop.f32.mrf.mxu2 }
 0x9d8   : > { %v7585_v1 = vmax.f32 %v7540_v55, 0.0  ;;  %v7700_v22 = vadd.f32 %v13591_v17, %v7699_v20 }
 0x9da   : > { %v7605_v28 = vpack.c.bf16 %v7585_v1, %v7584_v36  ;;  %v10276_v21 = vpack.c.bf16 %v7700_v22, %v7698_v30 }
 0x9dc   : > { %10344 = vst [vmem:[%s13600_s28 + $0x10] sm:$0xff] %v10276_v21   ;;  %7741 = vmatmul.bf16.gmra.mxu2 %v7605_v28 }
 0x9dd   : > { %v7542_v52 = vpop.f32.mrf.mxu1  ;;  %v7458_v7 = vpop.f32.mrf.mxu0 }
 0x9de   : > { %v7543_v51 = vadd.f32 %v7542_v52, %v7454_v56  ;;  %v7459_v41 = vadd.f32 %v13526_v29, %v7458_v7 }
 0x9df   : > { %v7702_v4 = vpop.f32.mrf.mxu2 }
 0x9e0   : > { %v7586_v13 = vmax.f32 %v7543_v51, 0.0  ;;  %v7703_v10 = vadd.f32 %v13591_v17, %v7702_v4 }
 0x9e5   : > { %v7544_v12 = vpop.f32.mrf.mxu1  ;;  %v7460_v62 = vpop.f32.mrf.mxu0 }
 0x9e6   : > { %v7545_v46 = vadd.f32 %v7544_v12, %v7456_v53  ;;  %v7461_v57 = vadd.f32 %v13526_v29, %v7460_v62 }
 0x9e7   : > { %v7704_v5 = vpop.f32.mrf.mxu2 }
 0x9e8   : > { %v7587_v9 = vmax.f32 %v7545_v46, 0.0  ;;  %v7705_v42 = vadd.f32 %v13591_v17, %v7704_v5 }
 0x9ea   : > { %v7606_v45 = vpack.c.bf16 %v7587_v9, %v7586_v13  ;;  %v10281_v47 = vpack.c.bf16 %v7705_v42, %v7703_v10 }
 0x9ec   : > { %10345 = vst [vmem:[%s13600_s28 + $0x18] sm:$0xff] %v10281_v47   ;;  %7746 = vmatmul.bf16.gmra.mxu2 %v7606_v45 }
 0x9ed   : > { %v7547_v59 = vpop.f32.mrf.mxu1  ;;  %v7463_v3 = vpop.f32.mrf.mxu0 }
 0x9ee   : > { %v7548_v33 = vadd.f32 %v7547_v59, %v7459_v41  ;;  %v7464_v31 = vadd.f32 %v13526_v29, %v7463_v3 }
 0x9ef   : > { %v7707_v16 = vpop.f32.mrf.mxu2 }
 0x9f0   : > { %v7588_v61 = vmax.f32 %v7548_v33, 0.0  ;;  %v7708_v39 = vadd.f32 %v13591_v17, %v7707_v16 }
 0x9f5   : > { %v7549_v37 = vpop.f32.mrf.mxu1  ;;  %v7465_v50 = vpop.f32.mrf.mxu0 }
 0x9f6   : > { %v7550_v8 = vadd.f32 %v7549_v37, %v7461_v57  ;;  %v7466_v19 = vadd.f32 %v13526_v29, %v7465_v50 }
 0x9f7   : > { %v7709_v32 = vpop.f32.mrf.mxu2 }
 0x9f8   : > { %v7589_v38 = vmax.f32 %v7550_v8, 0.0  ;;  %v7710_v24 = vadd.f32 %v13591_v17, %v7709_v32 }
 0x9fa   : > { %v7607_v63 = vpack.c.bf16 %v7589_v38, %v7588_v61  ;;  %v10286_v14 = vpack.c.bf16 %v7710_v24, %v7708_v39 }
 0x9fc   : > { %10346 = vst [vmem:[%s13600_s28 + $0x20] sm:$0xff] %v10286_v14   ;;  %7751 = vmatmul.bf16.gmra.mxu2 %v7607_v63 }
 0x9fd   : > { %v7552_v11 = vpop.f32.mrf.mxu1  ;;  %v7468_v35 = vpop.f32.mrf.mxu0 }
 0x9fe   : > { %v7553_v25 = vadd.f32 %v7552_v11, %v7464_v31  ;;  %v7469_v60 = vadd.f32 %v13526_v29, %v7468_v35 }
 0x9ff   : > { %v7712_v27 = vpop.f32.mrf.mxu2 }
 0xa00   : > { %v7590_v23 = vmax.f32 %v7553_v25, 0.0  ;;  %v7713_v26 = vadd.f32 %v13591_v17, %v7712_v27 }
 0xa05   : > { %v7554_v0 = vpop.f32.mrf.mxu1  ;;  %v7470_v48 = vpop.f32.mrf.mxu0 }
 0xa06   : > { %v7555_v49 = vadd.f32 %v7554_v0, %v7466_v19  ;;  %v7471_v44 = vadd.f32 %v13526_v29, %v7470_v48 }
 0xa07   : > { %v7714_v6 = vpop.f32.mrf.mxu2 }
 0xa08   : > { %v7591_v15 = vmax.f32 %v7555_v49, 0.0  ;;  %v7715_v40 = vadd.f32 %v13591_v17, %v7714_v6 }
 0xa0a   : > { %v7608_v54 = vpack.c.bf16 %v7591_v15, %v7590_v23  ;;  %v10291_v34 = vpack.c.bf16 %v7715_v40, %v7713_v26 }
 0xa0c   : > { %10347 = vst [vmem:[%s13600_s28 + $0x28] sm:$0xff] %v10291_v34   ;;  %7756 = vmatmul.bf16.gmra.mxu2 %v7608_v54 }
 0xa0d   : > { %v7557_v18 = vpop.f32.mrf.mxu1 }
 0xa0e   : > { %v7558_v2 = vadd.f32 %v7557_v18, %v7469_v60 }
 0xa0f   : > { %v7717_v58 = vpop.f32.mrf.mxu2 }
 0xa10   : > { %v7592_v36 = vmax.f32 %v7558_v2, 0.0  ;;  %v7718_v30 = vadd.f32 %v13591_v17, %v7717_v58 }
 0xa15   : > { %v7559_v43 = vpop.f32.mrf.mxu1 }
 0xa16   : > { %v7560_v55 = vadd.f32 %v7559_v43, %v7471_v44 }
 0xa17   : > { %v7719_v20 = vpop.f32.mrf.mxu2 }
 0xa18   : > { %v7593_v1 = vmax.f32 %v7560_v55, 0.0  ;;  %v7720_v22 = vadd.f32 %v13591_v17, %v7719_v20 }
 0xa1a   : > { %v7609_v28 = vpack.c.bf16 %v7593_v1, %v7592_v36  ;;  %v10296_v21 = vpack.c.bf16 %v7720_v22, %v7718_v30 }
 0xa1c   : > { %10348 = vst [vmem:[%s13600_s28 + $0x30] sm:$0xff] %v10296_v21   ;;  %7761 = vmatmul.bf16.gmra.mxu2 %v7609_v28 }
 0xa1d   : > { %v7687_v52 = vpop.f32.mrf.mxu1 }
 0xa1e   : > { %v7688_v4 = vadd.f32 %v13591_v17, %v7687_v52 }
 0xa1f   : > { %v7722_v7 = vpop.f32.mrf.mxu2 }
 0xa20   : > { %v7723_v51 = vadd.f32 %v13591_v17, %v7722_v7 }
 0xa25   : > { %v7689_v29 = vpop.f32.mrf.mxu1 }
 0xa26   : > { %v7690_v56 = vadd.f32 %v13591_v17, %v7689_v29 }
 0xa27   : > { %v7724_v53 = vpop.f32.mrf.mxu2 }
 0xa28   : > { %v10266_v12 = vpack.c.bf16 %v7690_v56, %v7688_v4  ;;  %v7725_v46 = vadd.f32 %v13591_v17, %v7724_v53 }
 0xa2a   : > { %10267 = vst [vmem:[%s13600_s28] sm:$0xff] %v10266_v12   ;;  %v10301_v5 = vpack.c.bf16 %v7725_v46, %v7723_v51 }
 0xa2c   : > { %10349 = vst [vmem:[%s13600_s28 + $0x38] sm:$0xff] %v10301_v5  }
 0xa2f   : > { %v7727_v13 = vpop.f32.mrf.mxu2 }
 0xa30   : > { %v7728_v9 = vadd.f32 %v13591_v17, %v7727_v13 }
 0xa37   : > { %v7729_v10 = vpop.f32.mrf.mxu2 }
 0xa38   : > { %v7730_v42 = vadd.f32 %v13591_v17, %v7729_v10 }
 0xa3a   : > { %v10306_v62 = vpack.c.bf16 %v7730_v42, %v7728_v9 }
 0xa3c   : > { %10350 = vst [vmem:[%s13600_s28 + $0x40] sm:$0xff] %v10306_v62  }
 0xa3f   : > { %v7732_v45 = vpop.f32.mrf.mxu2 }
 0xa40   : > { %v7733_v59 = vadd.f32 %v13591_v17, %v7732_v45 }
 0xa47   : > { %v7734_v47 = vpop.f32.mrf.mxu2 }
 0xa48   : > { %v7735_v16 = vadd.f32 %v13591_v17, %v7734_v47 }
 0xa4a   : > { %v10311_v41 = vpack.c.bf16 %v7735_v16, %v7733_v59 }
 0xa4c   : > { %10351 = vst [vmem:[%s13600_s28 + $0x48] sm:$0xff] %v10311_v41  }
 0xa4f   : > { %v7737_v3 = vpop.f32.mrf.mxu2 }
 0xa50   : > { %v7738_v33 = vadd.f32 %v13591_v17, %v7737_v3 }
 0xa57   : > { %v7739_v57 = vpop.f32.mrf.mxu2 }
 0xa58   : > { %v7740_v37 = vadd.f32 %v13591_v17, %v7739_v57 }
 0xa5a   : > { %v10316_v8 = vpack.c.bf16 %v7740_v37, %v7738_v33 }
 0xa5c   : > { %10352 = vst [vmem:[%s13600_s28 + $0x50] sm:$0xff] %v10316_v8  }
 0xa5f   : > { %v7742_v32 = vpop.f32.mrf.mxu2 }
 0xa60   : > { %v7743_v39 = vadd.f32 %v13591_v17, %v7742_v32 }
 0xa67   : > { %v7744_v61 = vpop.f32.mrf.mxu2 }
 0xa68   : > { %v7745_v38 = vadd.f32 %v13591_v17, %v7744_v61 }
 0xa6a   : > { %v10321_v24 = vpack.c.bf16 %v7745_v38, %v7743_v39 }
 0xa6c   : > { %10353 = vst [vmem:[%s13600_s28 + $0x58] sm:$0xff] %v10321_v24  }
 0xa6f   : > { %v7747_v63 = vpop.f32.mrf.mxu2 }
 0xa70   : > { %v7748_v50 = vadd.f32 %v13591_v17, %v7747_v63 }
 0xa77   : > { %v7749_v14 = vpop.f32.mrf.mxu2 }
 0xa78   : > { %v7750_v11 = vadd.f32 %v13591_v17, %v7749_v14 }
 0xa7a   : > { %v10326_v27 = vpack.c.bf16 %v7750_v11, %v7748_v50 }
 0xa7c   : > { %10354 = vst [vmem:[%s13600_s28 + $0x60] sm:$0xff] %v10326_v27  }
 0xa7f   : > { %v7752_v31 = vpop.f32.mrf.mxu2 }
 0xa80   : > { %v7753_v25 = vadd.f32 %v13591_v17, %v7752_v31 }
 0xa87   : > { %v7754_v19 = vpop.f32.mrf.mxu2 }
 0xa88   : > { %v7755_v0 = vadd.f32 %v13591_v17, %v7754_v19 }
 0xa8a   : > { %v10331_v49 = vpack.c.bf16 %v7755_v0, %v7753_v25 }
 0xa8c   : > { %10355 = vst [vmem:[%s13600_s28 + $0x68] sm:$0xff] %v10331_v49  }
 0xa8f   : > { %v7757_v35 = vpop.f32.mrf.mxu2 }
 0xa90   : > { %v7758_v23 = vadd.f32 %v13591_v17, %v7757_v35 }
 0xa97   : > { %v7759_v6 = vpop.f32.mrf.mxu2 }
 0xa98   : > { %v7760_v26 = vadd.f32 %v13591_v17, %v7759_v6 }
 0xa9a   : > { %v10336_v15 = vpack.c.bf16 %v7760_v26, %v7758_v23 }
 0xa9c   : > { %10356 = vst [vmem:[%s13600_s28 + $0x70] sm:$0xff] %v10336_v15  }
 0xa9f   : > { %v7762_v40 = vpop.f32.mrf.mxu2 }
 0xaa0   : > { %v7763_v34 = vadd.f32 %v13591_v17, %v7762_v40 }
 0xaa7   : > { %v7764_v54 = vpop.f32.mrf.mxu2 }
 0xaa8   : > { %v7765_v18 = vadd.f32 %v13591_v17, %v7764_v54 }
 0xaaa   : > { %v10341_v58 = vpack.c.bf16 %v7765_v18, %v7763_v34 }
 0xaac   : > { %10357 = vst [vmem:[%s13600_s28 + $0x78] sm:$0xff] %v10341_v58  }
 0xaad PF: > { %s29_s21 = sadd.s32 1, %s10580_s21  }
 0xaae   : > { %p26_p7 = scmp.ge.s32.totalorder %s29_s21, 4  }
 0xab0   :  { %28 = sbr.rel (!%p26_p7) target bundleno = 11 (0xb), region = 131 }
 0xab5   :  { %7853 = vsyncpa [#allocation3], 1 }
 0xab6   :  { %7855 = vsyncpa [#allocation3 + $0x1], 1 }
 0xab7   :  { %7856 = vsyncpa [#allocation5], 1 }
 0xab8   :  { %7857 = vsyncpa [#allocation8], 1 }

</bundles_post_ra>
